<compile_context>
chip_gen: v7x
topology: tpu7x:2x2x1
jax: 0.10.0
libtpu: 0.0.40
codegen_flags: <defaults>
</compile_context>

<pallas_src>
import jax
import jax.numpy as jnp
from jax.experimental import pallas as pl
from jax.experimental.pallas import tpu as pltpu

# ----- small synthetic hyper-parameters (the "param" module) -----
VOCAB = 32    # param.vocabSize
E = 16        # param.e   (embedding size)
D = 16        # param.d   (hidden size)
N_MELS = 8    # param.n_mels
B = 2         # batch
N_TEXT = 16   # text length N
T_MEL = 16    # mel frames T/r


# ----------------------- stack (layer) descriptions -----------------------
# layer = (kind, cin, cout, ksize, dilation, act)
#   kind "cv": plain conv (+ optional relu / sigmoid)
#   kind "hc": highway conv (conv -> 2*cout channels, gate blend w/ residual)

TEXT_ENC_SPECS = (
    [("cv", E, 2 * D, 1, 1, "relu"),
     ("cv", 2 * D, 2 * D, 1, 1, None)]
    + [("hc", 2 * D, 2 * D, 3, dl, None) for dl in (1, 3, 9, 27)] * 2   # HcTwice1/2
    + [("hc", 2 * D, 2 * D, 3, 1, None)] * 2                            # Hc3
    + [("hc", 2 * D, 2 * D, 1, 1, None)] * 2                            # Hc4
)

AUDIO_ENC_SPECS = (
    [("cv", N_MELS, D, 1, 1, "relu"),
     ("cv", D, D, 1, 1, "relu"),
     ("cv", D, D, 1, 1, None)]
    + [("hc", D, D, 3, dl, None) for dl in (1, 3, 9, 27)] * 2           # HcTwice1/2
    + [("hc", D, D, 3, 3, None)] * 2                                    # Hc3
)

AUDIO_DEC_SPECS = (
    [("cv", 2 * D, D, 1, 1, None)]                                      # Conv1st
    + [("hc", D, D, 3, dl, None) for dl in (1, 3, 9, 27)]               # Hc1
    + [("hc", D, D, 3, 1, None)] * 2                                    # Hc2
    + [("cv", D, D, 1, 1, "relu")] * 3                                  # ConvThrice
    + [("cv", D, N_MELS, 1, 1, "sigmoid")]                              # ConvLast
)

LT = len(TEXT_ENC_SPECS)
LA = len(AUDIO_ENC_SPECS)
LD = len(AUDIO_DEC_SPECS)
NLAYERS = LT + LA + LD


def _pads(K, dil, pad_mode):
    total = (K - 1) * dil
    lo = total // 2 if pad_mode == "SAME" else total   # causal: all on the left
    return lo, total - lo


def _max_pads(specs, pad_mode):
    lo = hi = 0
    for (_, _, _, K, dil, _) in specs:
        l, h = _pads(K, dil, pad_mode)
        lo, hi = max(lo, l), max(hi, h)
    return lo, hi


PADL_T, PADR_T = _max_pads(TEXT_ENC_SPECS, "SAME")        # 27, 27
PADL_A, _ = _max_pads(AUDIO_ENC_SPECS, "causal")          # 54
PADL_D, _ = _max_pads(AUDIO_DEC_SPECS, "causal")          # 54
CMAX_T = 2 * D
CMAX_A = D
CMAX_D = 2 * D
TP_T = PADL_T + N_TEXT + PADR_T
TP_A = PADL_A + T_MEL
TP_D = PADL_D + T_MEL


# --------------------------- in-kernel conv stack ---------------------------

def _run_stack(buf, layers, padl, Tlen, pad_mode, out_ref=None):
    """Run a conv/highway stack on the padded VMEM activation `buf`.

    layers : list of (spec, w_ref, b_ref) with w_ref (K, co, cin) bf16 and
             b_ref (co, 1) f32.  The live window is buf[:, padl:padl+Tlen);
             padding columns are assumed zero.  If out_ref is given, the LAST
             layer's result is stored to out_ref[0] instead of the buffer.
    """
    L = len(layers)
    for li, (spec, w_ref, b_ref) in enumerate(layers):
        kind, cin, cout, K, dil, act = spec
        lo, _ = _pads(K, dil, pad_mode)
        # per-tap (co, cin) MXU dots accumulated in f32 (no im2col concat copy)
        acc = None
        for k in range(K):
            start = padl - lo + k * dil
            xs = buf[0:cin, start:start + Tlen].astype(jnp.bfloat16)
            part = jnp.dot(w_ref[k], xs, preferred_element_type=jnp.float32)
            acc = part if acc is None else acc + part
        acc = acc + b_ref[...]
        if kind == "cv":
            if act == "relu":
                acc = jnp.maximum(acc, 0.0)
            elif act == "sigmoid":
                acc = jax.nn.sigmoid(acc)
            res = acc
        else:
            # highway: sig(H1)*H2 + (1-sig(H1))*x  ==  x + g*(H2 - x)
            g = jax.nn.sigmoid(acc[:cout, :])
            x0 = buf[0:cout, padl:padl + Tlen]
            res = x0 + g * (acc[cout:, :] - x0)
        if li == L - 1 and out_ref is not None:
            out_ref[0] = res
        else:
            buf[0:cout, padl:padl + Tlen] = res


# ------------------------------ fused kernel ------------------------------

def _t2m_kernel(*refs):
    text_ref, mel_ref, emb_ref = refs[:3]
    wr = refs[3:3 + 2 * NLAYERS]
    coarse_ref, a_ref, m_ref = refs[3 + 2 * NLAYERS:6 + 2 * NLAYERS]
    tbuf, abuf, dbuf = refs[6 + 2 * NLAYERS:]

    def pack(off, specs):
        return [(specs[i], wr[off + 2 * i], wr[off + 2 * i + 1])
                for i in range(len(specs))]

    text_layers = pack(0, TEXT_ENC_SPECS)
    aenc_layers = pack(2 * LT, AUDIO_ENC_SPECS)
    adec_layers = pack(2 * (LT + LA), AUDIO_DEC_SPECS)

    N, T = N_TEXT, T_MEL

    # Zero ONLY the padding columns (the live windows are always rewritten
    # before being read).  Done every grid step, unconditionally — with a
    # "parallel" batch axis each TensorCore has its own scratch, so a
    # program_id==0-only init would leave the other core's pads garbage.
    tbuf[:, 0:PADL_T] = jnp.zeros((CMAX_T, PADL_T), jnp.float32)
    tbuf[:, PADL_T + N:] = jnp.zeros((CMAX_T, PADR_T), jnp.float32)
    abuf[:, 0:PADL_A] = jnp.zeros((CMAX_A, PADL_A), jnp.float32)
    dbuf[:, 0:PADL_D] = jnp.zeros((CMAX_D, PADL_D), jnp.float32)

    # ---- TextEnc ----
    # embedding lookup fused as a one-hot MXU matmul (no XLA gather/transpose)
    ids = text_ref[0]                                             # (1, N) int32
    onehot = (jax.lax.broadcasted_iota(jnp.int32, (VOCAB, N), 0) == ids
              ).astype(jnp.float32)                               # (VOCAB, N)
    tbuf[0:E, PADL_T:PADL_T + N] = jnp.dot(
        emb_ref[...], onehot, preferred_element_type=jnp.float32)  # (E, N)
    _run_stack(tbuf, text_layers, PADL_T, N, "SAME")

    # ---- AudioEnc ----
    # first layer (k=1, cin=n_mels) contracts directly against the (T, n_mels)
    # mel block — the torch .transpose(1, 2) never materializes.
    _, w0_ref, b0_ref = aenc_layers[0]
    mel = mel_ref[0].astype(jnp.bfloat16)                         # (T, n_mels)
    q0 = jax.lax.dot_general(w0_ref[0], mel, (((1,), (1,)), ((), ())),
                             preferred_element_type=jnp.float32) + b0_ref[...]
    abuf[0:D, PADL_A:PADL_A + T] = jnp.maximum(q0, 0.0)           # ReLU (layer 0)
    _run_stack(abuf, aenc_layers[1:], PADL_A, T, "causal")

    # ---- Attention ----
    kt = tbuf[0:D, PADL_T:PADL_T + N]        # K  (d, N)  = first d channels
    vt = tbuf[D:2 * D, PADL_T:PADL_T + N]    # V  (d, N)
    qq = abuf[0:D, PADL_A:PADL_A + T]        # Q  (d, T)
    # K^T built with a trans_b MXU matmul against a *scaled* identity: folds
    # the 1/sqrt(d) softmax scale in for free and avoids a transposed-LHS dot.
    ir = jax.lax.broadcasted_iota(jnp.int32, (N, N), 0)
    ic = jax.lax.broadcasted_iota(jnp.int32, (N, N), 1)
    scaled_eye = jnp.where(ir == ic, jnp.float32(1.0 / D ** 0.5), jnp.float32(0.0))
    kt_t = jax.lax.dot_general(scaled_eye, kt, (((1,), (1,)), ((), ())),
                               preferred_element_type=jnp.float32)  # (N, d) = K^T/sqrt(d)
    scores = jnp.dot(kt_t, qq, preferred_element_type=jnp.float32)  # (N, T)
    # softmax over N (axis 0) — matches torch.softmax(..., dim=1) on (B, N, T)
    mx = jnp.max(scores, axis=0, keepdims=True)
    e = jnp.exp(scores - mx)
    a = e * pl.reciprocal(jnp.sum(e, axis=0, keepdims=True), approx=True)
    a_ref[0] = a
    # argmax over N, first occurrence (computed on scores: same argmax as A)
    idx = jax.lax.broadcasted_iota(jnp.int32, (N, T), 0)
    m_ref[0] = jnp.min(jnp.where(scores >= mx, idx, N), axis=0, keepdims=True)
    # R_ = cat(R, Q): written straight into the decoder buffer's live window.
    dbuf[0:D, PADL_D:PADL_D + T] = jnp.dot(vt, a, preferred_element_type=jnp.float32)
    dbuf[D:2 * D, PADL_D:PADL_D + T] = qq

    # ---- AudioDec ---- (last layer stores straight to the output block)
    _run_stack(dbuf, adec_layers, PADL_D, T, "causal", out_ref=coarse_ref)


# ------------------------------ wrapper ------------------------------

def _const_spec(arr):
    nd = arr.ndim
    return pl.BlockSpec(arr.shape, lambda i, _n=nd: (0,) * _n)


def t2m_pallas_call(params, text, mel):
    Bn, N = text.shape
    T = mel.shape[1]
    assert N == N_TEXT and T == T_MEL and mel.shape[2] == N_MELS

    inputs = [text.reshape(Bn, 1, N), mel, params["embT"]]
    in_specs = [
        pl.BlockSpec((1, 1, N), lambda i: (i, 0, 0)),        # text ids
        pl.BlockSpec((1, T, N_MELS), lambda i: (i, 0, 0)),   # mel (B, T, n_mels)
        _const_spec(params["embT"]),                          # (E, VOCAB)
    ]
    for group in ("text_w", "aenc_w", "adec_w"):
        for (w, b) in params[group]:
            inputs.extend((w, b))
            in_specs.append(_const_spec(w))
            in_specs.append(_const_spec(b))

    coarse, A, maxAtt = pl.pallas_call(
        _t2m_kernel,
        out_shape=(
            jax.ShapeDtypeStruct((Bn, N_MELS, T), jnp.float32),
            jax.ShapeDtypeStruct((Bn, N, T), jnp.float32),
            jax.ShapeDtypeStruct((Bn, 1, T), jnp.int32),
        ),
        grid=(Bn,),
        in_specs=in_specs,
        out_specs=(
            pl.BlockSpec((1, N_MELS, T), lambda i: (i, 0, 0)),
            pl.BlockSpec((1, N, T), lambda i: (i, 0, 0)),
            pl.BlockSpec((1, 1, T), lambda i: (i, 0, 0)),
        ),
        scratch_shapes=[
            pltpu.VMEM((CMAX_T, TP_T), jnp.float32),   # TextEnc padded activation
            pltpu.VMEM((CMAX_A, TP_A), jnp.float32),   # AudioEnc padded activation
            pltpu.VMEM((CMAX_D, TP_D), jnp.float32),   # AudioDec padded activation
        ],
        compiler_params=pltpu.CompilerParams(
            dimension_semantics=("parallel",)),        # both TCs on v7x
    )(*inputs)
    return coarse, A, maxAtt[:, 0, :]


@jax.jit
def t2m_forward(params, text, mel):
    return t2m_pallas_call(params, text, mel)


# ----------------------------- parameters -----------------------------

class KeyGen:
    def __init__(self, key):
        self.key = key

    def __call__(self):
        self.key, sub = jax.random.split(self.key)
        return sub


def _init_conv(key, cout, cin, ksize):
    kw, kb = jax.random.split(key)
    bound = 1.0 / (cin * ksize) ** 0.5        # PyTorch Conv1d default init
    w = jax.random.uniform(kw, (cout, cin, ksize), jnp.float32, -bound, bound)
    b = jax.random.uniform(kb, (cout,), jnp.float32, -bound, bound)
    return w, b


def _init_stack_weights(kg, specs):
    ws = []
    for (kind, cin, cout, K, dil, act) in specs:
        co = cout if kind == "cv" else 2 * cout
        w, b = _init_conv(kg(), co, cin, K)
        # kernel-ready: per-tap slabs (K, co, cin) in bf16 (MXU-native, f32
        # accumulation), bias as an f32 (co, 1) column for broadcast add.
        w3 = jnp.transpose(w, (2, 0, 1)).astype(jnp.bfloat16)
        ws.append((w3, b.reshape(co, 1)))
    return ws


def init_params(kg):
    emb = jax.random.normal(kg(), (VOCAB, E), jnp.float32) * 0.1
    return {
        "embT": jnp.transpose(emb),                 # (E, VOCAB), kernel-ready
        "text_w": _init_stack_weights(kg, TEXT_ENC_SPECS),
        "aenc_w": _init_stack_weights(kg, AUDIO_ENC_SPECS),
        "adec_w": _init_stack_weights(kg, AUDIO_DEC_SPECS),
    }


# ----------------------------- main -----------------------------

if __name__ == "__main__":
    key = jax.random.PRNGKey(0)
    kp, kt_, km = jax.random.split(key, 3)
    kg = KeyGen(kp)
    params = init_params(kg)

    text = jax.random.randint(kt_, (B, N_TEXT), 0, VOCAB, dtype=jnp.int32)
    mel = jax.random.uniform(km, (B, T_MEL, N_MELS), dtype=jnp.float32)

    coarse, A, maxAtt = t2m_forward(params, text, mel)
    jax.block_until_ready((coarse, A, maxAtt))

    assert coarse.shape == (B, N_MELS, T_MEL)
    assert A.shape == (B, N_TEXT, T_MEL)
    assert maxAtt.shape == (B, T_MEL)
    # TODO(synk): maxAtt is int32 (PyTorch argmax returns int64).
    print("KERNEL_OK")
</pallas_src>

<mosaic_0001>
module attributes {stable_mosaic.version = 11 : i64} {
  func.func @_t2m_kernel(%arg0: i32, %arg1: memref<1x1x16xi32, #tpu.memory_space<vmem>>, %arg2: memref<1x16x8xf32, #tpu.memory_space<vmem>>, %arg3: memref<16x32xf32, #tpu.memory_space<vmem>>, %arg4: memref<1x32x16xbf16, #tpu.memory_space<vmem>>, %arg5: memref<32x1xf32, #tpu.memory_space<vmem>>, %arg6: memref<1x32x32xbf16, #tpu.memory_space<vmem>>, %arg7: memref<32x1xf32, #tpu.memory_space<vmem>>, %arg8: memref<3x64x32xbf16, #tpu.memory_space<vmem>>, %arg9: memref<64x1xf32, #tpu.memory_space<vmem>>, %arg10: memref<3x64x32xbf16, #tpu.memory_space<vmem>>, %arg11: memref<64x1xf32, #tpu.memory_space<vmem>>, %arg12: memref<3x64x32xbf16, #tpu.memory_space<vmem>>, %arg13: memref<64x1xf32, #tpu.memory_space<vmem>>, %arg14: memref<3x64x32xbf16, #tpu.memory_space<vmem>>, %arg15: memref<64x1xf32, #tpu.memory_space<vmem>>, %arg16: memref<3x64x32xbf16, #tpu.memory_space<vmem>>, %arg17: memref<64x1xf32, #tpu.memory_space<vmem>>, %arg18: memref<3x64x32xbf16, #tpu.memory_space<vmem>>, %arg19: memref<64x1xf32, #tpu.memory_space<vmem>>, %arg20: memref<3x64x32xbf16, #tpu.memory_space<vmem>>, %arg21: memref<64x1xf32, #tpu.memory_space<vmem>>, %arg22: memref<3x64x32xbf16, #tpu.memory_space<vmem>>, %arg23: memref<64x1xf32, #tpu.memory_space<vmem>>, %arg24: memref<3x64x32xbf16, #tpu.memory_space<vmem>>, %arg25: memref<64x1xf32, #tpu.memory_space<vmem>>, %arg26: memref<3x64x32xbf16, #tpu.memory_space<vmem>>, %arg27: memref<64x1xf32, #tpu.memory_space<vmem>>, %arg28: memref<1x64x32xbf16, #tpu.memory_space<vmem>>, %arg29: memref<64x1xf32, #tpu.memory_space<vmem>>, %arg30: memref<1x64x32xbf16, #tpu.memory_space<vmem>>, %arg31: memref<64x1xf32, #tpu.memory_space<vmem>>, %arg32: memref<1x16x8xbf16, #tpu.memory_space<vmem>>, %arg33: memref<16x1xf32, #tpu.memory_space<vmem>>, %arg34: memref<1x16x16xbf16, #tpu.memory_space<vmem>>, %arg35: memref<16x1xf32, #tpu.memory_space<vmem>>, %arg36: memref<1x16x16xbf16, #tpu.memory_space<vmem>>, %arg37: memref<16x1xf32, #tpu.memory_space<vmem>>, %arg38: memref<3x32x16xbf16, #tpu.memory_space<vmem>>, %arg39: memref<32x1xf32, #tpu.memory_space<vmem>>, %arg40: memref<3x32x16xbf16, #tpu.memory_space<vmem>>, %arg41: memref<32x1xf32, #tpu.memory_space<vmem>>, %arg42: memref<3x32x16xbf16, #tpu.memory_space<vmem>>, %arg43: memref<32x1xf32, #tpu.memory_space<vmem>>, %arg44: memref<3x32x16xbf16, #tpu.memory_space<vmem>>, %arg45: memref<32x1xf32, #tpu.memory_space<vmem>>, %arg46: memref<3x32x16xbf16, #tpu.memory_space<vmem>>, %arg47: memref<32x1xf32, #tpu.memory_space<vmem>>, %arg48: memref<3x32x16xbf16, #tpu.memory_space<vmem>>, %arg49: memref<32x1xf32, #tpu.memory_space<vmem>>, %arg50: memref<3x32x16xbf16, #tpu.memory_space<vmem>>, %arg51: memref<32x1xf32, #tpu.memory_space<vmem>>, %arg52: memref<3x32x16xbf16, #tpu.memory_space<vmem>>, %arg53: memref<32x1xf32, #tpu.memory_space<vmem>>, %arg54: memref<3x32x16xbf16, #tpu.memory_space<vmem>>, %arg55: memref<32x1xf32, #tpu.memory_space<vmem>>, %arg56: memref<3x32x16xbf16, #tpu.memory_space<vmem>>, %arg57: memref<32x1xf32, #tpu.memory_space<vmem>>, %arg58: memref<1x16x32xbf16, #tpu.memory_space<vmem>>, %arg59: memref<16x1xf32, #tpu.memory_space<vmem>>, %arg60: memref<3x32x16xbf16, #tpu.memory_space<vmem>>, %arg61: memref<32x1xf32, #tpu.memory_space<vmem>>, %arg62: memref<3x32x16xbf16, #tpu.memory_space<vmem>>, %arg63: memref<32x1xf32, #tpu.memory_space<vmem>>, %arg64: memref<3x32x16xbf16, #tpu.memory_space<vmem>>, %arg65: memref<32x1xf32, #tpu.memory_space<vmem>>, %arg66: memref<3x32x16xbf16, #tpu.memory_space<vmem>>, %arg67: memref<32x1xf32, #tpu.memory_space<vmem>>, %arg68: memref<3x32x16xbf16, #tpu.memory_space<vmem>>, %arg69: memref<32x1xf32, #tpu.memory_space<vmem>>, %arg70: memref<3x32x16xbf16, #tpu.memory_space<vmem>>, %arg71: memref<32x1xf32, #tpu.memory_space<vmem>>, %arg72: memref<1x16x16xbf16, #tpu.memory_space<vmem>>, %arg73: memref<16x1xf32, #tpu.memory_space<vmem>>, %arg74: memref<1x16x16xbf16, #tpu.memory_space<vmem>>, %arg75: memref<16x1xf32, #tpu.memory_space<vmem>>, %arg76: memref<1x16x16xbf16, #tpu.memory_space<vmem>>, %arg77: memref<16x1xf32, #tpu.memory_space<vmem>>, %arg78: memref<1x8x16xbf16, #tpu.memory_space<vmem>>, %arg79: memref<8x1xf32, #tpu.memory_space<vmem>>, %arg80: memref<1x8x16xf32, #tpu.memory_space<vmem>>, %arg81: memref<1x16x16xf32, #tpu.memory_space<vmem>>, %arg82: memref<1x1x16xi32, #tpu.memory_space<vmem>>, %arg83: memref<32x70xf32, #tpu.memory_space<vmem>>, %arg84: memref<16x70xf32, #tpu.memory_space<vmem>>, %arg85: memref<32x70xf32, #tpu.memory_space<vmem>>) attributes {dimension_semantics = [#tpu.dimension_semantics<parallel>], iteration_bounds = array<i64: 2>, scalar_prefetch = 0 : i64, scratch_operands = 3 : i64, tpu.core_type = #tpu.core_type<tc>, window_params = [{transform_indices = @transform_0, window_bounds = array<i64: 1, 1, 16>}, {transform_indices = @transform_1, window_bounds = array<i64: 1, 16, 8>}, {pipeline_mode = #tpu.pipeline_mode<synchronous>, transform_indices = @transform_2, window_bounds = array<i64: 16, 32>}, {pipeline_mode = #tpu.pipeline_mode<synchronous>, transform_indices = @transform_3, window_bounds = array<i64: 1, 32, 16>}, {pipeline_mode = #tpu.pipeline_mode<synchronous>, transform_indices = @transform_4, window_bounds = array<i64: 32, 1>}, {pipeline_mode = #tpu.pipeline_mode<synchronous>, transform_indices = @transform_5, window_bounds = array<i64: 1, 32, 32>}, {pipeline_mode = #tpu.pipeline_mode<synchronous>, transform_indices = @transform_6, window_bounds = array<i64: 32, 1>}, {pipeline_mode = #tpu.pipeline_mode<synchronous>, transform_indices = @transform_7, window_bounds = array<i64: 3, 64, 32>}, {pipeline_mode = #tpu.pipeline_mode<synchronous>, transform_indices = @transform_8, window_bounds = array<i64: 64, 1>}, {pipeline_mode = #tpu.pipeline_mode<synchronous>, transform_indices = @transform_9, window_bounds = array<i64: 3, 64, 32>}, {pipeline_mode = #tpu.pipeline_mode<synchronous>, transform_indices = @transform_10, window_bounds = array<i64: 64, 1>}, {pipeline_mode = #tpu.pipeline_mode<synchronous>, transform_indices = @transform_11, window_bounds = array<i64: 3, 64, 32>}, {pipeline_mode = #tpu.pipeline_mode<synchronous>, transform_indices = @transform_12, window_bounds = array<i64: 64, 1>}, {pipeline_mode = #tpu.pipeline_mode<synchronous>, transform_indices = @transform_13, window_bounds = array<i64: 3, 64, 32>}, {pipeline_mode = #tpu.pipeline_mode<synchronous>, transform_indices = @transform_14, window_bounds = array<i64: 64, 1>}, {pipeline_mode = #tpu.pipeline_mode<synchronous>, transform_indices = @transform_15, window_bounds = array<i64: 3, 64, 32>}, {pipeline_mode = #tpu.pipeline_mode<synchronous>, transform_indices = @transform_16, window_bounds = array<i64: 64, 1>}, {pipeline_mode = #tpu.pipeline_mode<synchronous>, transform_indices = @transform_17, window_bounds = array<i64: 3, 64, 32>}, {pipeline_mode = #tpu.pipeline_mode<synchronous>, transform_indices = @transform_18, window_bounds = array<i64: 64, 1>}, {pipeline_mode = #tpu.pipeline_mode<synchronous>, transform_indices = @transform_19, window_bounds = array<i64: 3, 64, 32>}, {pipeline_mode = #tpu.pipeline_mode<synchronous>, transform_indices = @transform_20, window_bounds = array<i64: 64, 1>}, {pipeline_mode = #tpu.pipeline_mode<synchronous>, transform_indices = @transform_21, window_bounds = array<i64: 3, 64, 32>}, {pipeline_mode = #tpu.pipeline_mode<synchronous>, transform_indices = @transform_22, window_bounds = array<i64: 64, 1>}, {pipeline_mode = #tpu.pipeline_mode<synchronous>, transform_indices = @transform_23, window_bounds = array<i64: 3, 64, 32>}, {pipeline_mode = #tpu.pipeline_mode<synchronous>, transform_indices = @transform_24, window_bounds = array<i64: 64, 1>}, {pipeline_mode = #tpu.pipeline_mode<synchronous>, transform_indices = @transform_25, window_bounds = array<i64: 3, 64, 32>}, {pipeline_mode = #tpu.pipeline_mode<synchronous>, transform_indices = @transform_26, window_bounds = array<i64: 64, 1>}, {pipeline_mode = #tpu.pipeline_mode<synchronous>, transform_indices = @transform_27, window_bounds = array<i64: 1, 64, 32>}, {pipeline_mode = #tpu.pipeline_mode<synchronous>, transform_indices = @transform_28, window_bounds = array<i64: 64, 1>}, {pipeline_mode = #tpu.pipeline_mode<synchronous>, transform_indices = @transform_29, window_bounds = array<i64: 1, 64, 32>}, {pipeline_mode = #tpu.pipeline_mode<synchronous>, transform_indices = @transform_30, window_bounds = array<i64: 64, 1>}, {pipeline_mode = #tpu.pipeline_mode<synchronous>, transform_indices = @transform_31, window_bounds = array<i64: 1, 16, 8>}, {pipeline_mode = #tpu.pipeline_mode<synchronous>, transform_indices = @transform_32, window_bounds = array<i64: 16, 1>}, {pipeline_mode = #tpu.pipeline_mode<synchronous>, transform_indices = @transform_33, window_bounds = array<i64: 1, 16, 16>}, {pipeline_mode = #tpu.pipeline_mode<synchronous>, transform_indices = @transform_34, window_bounds = array<i64: 16, 1>}, {pipeline_mode = #tpu.pipeline_mode<synchronous>, transform_indices = @transform_35, window_bounds = array<i64: 1, 16, 16>}, {pipeline_mode = #tpu.pipeline_mode<synchronous>, transform_indices = @transform_36, window_bounds = array<i64: 16, 1>}, {pipeline_mode = #tpu.pipeline_mode<synchronous>, transform_indices = @transform_37, window_bounds = array<i64: 3, 32, 16>}, {pipeline_mode = #tpu.pipeline_mode<synchronous>, transform_indices = @transform_38, window_bounds = array<i64: 32, 1>}, {pipeline_mode = #tpu.pipeline_mode<synchronous>, transform_indices = @transform_39, window_bounds = array<i64: 3, 32, 16>}, {pipeline_mode = #tpu.pipeline_mode<synchronous>, transform_indices = @transform_40, window_bounds = array<i64: 32, 1>}, {pipeline_mode = #tpu.pipeline_mode<synchronous>, transform_indices = @transform_41, window_bounds = array<i64: 3, 32, 16>}, {pipeline_mode = #tpu.pipeline_mode<synchronous>, transform_indices = @transform_42, window_bounds = array<i64: 32, 1>}, {pipeline_mode = #tpu.pipeline_mode<synchronous>, transform_indices = @transform_43, window_bounds = array<i64: 3, 32, 16>}, {pipeline_mode = #tpu.pipeline_mode<synchronous>, transform_indices = @transform_44, window_bounds = array<i64: 32, 1>}, {pipeline_mode = #tpu.pipeline_mode<synchronous>, transform_indices = @transform_45, window_bounds = array<i64: 3, 32, 16>}, {pipeline_mode = #tpu.pipeline_mode<synchronous>, transform_indices = @transform_46, window_bounds = array<i64: 32, 1>}, {pipeline_mode = #tpu.pipeline_mode<synchronous>, transform_indices = @transform_47, window_bounds = array<i64: 3, 32, 16>}, {pipeline_mode = #tpu.pipeline_mode<synchronous>, transform_indices = @transform_48, window_bounds = array<i64: 32, 1>}, {pipeline_mode = #tpu.pipeline_mode<synchronous>, transform_indices = @transform_49, window_bounds = array<i64: 3, 32, 16>}, {pipeline_mode = #tpu.pipeline_mode<synchronous>, transform_indices = @transform_50, window_bounds = array<i64: 32, 1>}, {pipeline_mode = #tpu.pipeline_mode<synchronous>, transform_indices = @transform_51, window_bounds = array<i64: 3, 32, 16>}, {pipeline_mode = #tpu.pipeline_mode<synchronous>, transform_indices = @transform_52, window_bounds = array<i64: 32, 1>}, {pipeline_mode = #tpu.pipeline_mode<synchronous>, transform_indices = @transform_53, window_bounds = array<i64: 3, 32, 16>}, {pipeline_mode = #tpu.pipeline_mode<synchronous>, transform_indices = @transform_54, window_bounds = array<i64: 32, 1>}, {pipeline_mode = #tpu.pipeline_mode<synchronous>, transform_indices = @transform_55, window_bounds = array<i64: 3, 32, 16>}, {pipeline_mode = #tpu.pipeline_mode<synchronous>, transform_indices = @transform_56, window_bounds = array<i64: 32, 1>}, {pipeline_mode = #tpu.pipeline_mode<synchronous>, transform_indices = @transform_57, window_bounds = array<i64: 1, 16, 32>}, {pipeline_mode = #tpu.pipeline_mode<synchronous>, transform_indices = @transform_58, window_bounds = array<i64: 16, 1>}, {pipeline_mode = #tpu.pipeline_mode<synchronous>, transform_indices = @transform_59, window_bounds = array<i64: 3, 32, 16>}, {pipeline_mode = #tpu.pipeline_mode<synchronous>, transform_indices = @transform_60, window_bounds = array<i64: 32, 1>}, {pipeline_mode = #tpu.pipeline_mode<synchronous>, transform_indices = @transform_61, window_bounds = array<i64: 3, 32, 16>}, {pipeline_mode = #tpu.pipeline_mode<synchronous>, transform_indices = @transform_62, window_bounds = array<i64: 32, 1>}, {pipeline_mode = #tpu.pipeline_mode<synchronous>, transform_indices = @transform_63, window_bounds = array<i64: 3, 32, 16>}, {pipeline_mode = #tpu.pipeline_mode<synchronous>, transform_indices = @transform_64, window_bounds = array<i64: 32, 1>}, {pipeline_mode = #tpu.pipeline_mode<synchronous>, transform_indices = @transform_65, window_bounds = array<i64: 3, 32, 16>}, {pipeline_mode = #tpu.pipeline_mode<synchronous>, transform_indices = @transform_66, window_bounds = array<i64: 32, 1>}, {pipeline_mode = #tpu.pipeline_mode<synchronous>, transform_indices = @transform_67, window_bounds = array<i64: 3, 32, 16>}, {pipeline_mode = #tpu.pipeline_mode<synchronous>, transform_indices = @transform_68, window_bounds = array<i64: 32, 1>}, {pipeline_mode = #tpu.pipeline_mode<synchronous>, transform_indices = @transform_69, window_bounds = array<i64: 3, 32, 16>}, {pipeline_mode = #tpu.pipeline_mode<synchronous>, transform_indices = @transform_70, window_bounds = array<i64: 32, 1>}, {pipeline_mode = #tpu.pipeline_mode<synchronous>, transform_indices = @transform_71, window_bounds = array<i64: 1, 16, 16>}, {pipeline_mode = #tpu.pipeline_mode<synchronous>, transform_indices = @transform_72, window_bounds = array<i64: 16, 1>}, {pipeline_mode = #tpu.pipeline_mode<synchronous>, transform_indices = @transform_73, window_bounds = array<i64: 1, 16, 16>}, {pipeline_mode = #tpu.pipeline_mode<synchronous>, transform_indices = @transform_74, window_bounds = array<i64: 16, 1>}, {pipeline_mode = #tpu.pipeline_mode<synchronous>, transform_indices = @transform_75, window_bounds = array<i64: 1, 16, 16>}, {pipeline_mode = #tpu.pipeline_mode<synchronous>, transform_indices = @transform_76, window_bounds = array<i64: 16, 1>}, {pipeline_mode = #tpu.pipeline_mode<synchronous>, transform_indices = @transform_77, window_bounds = array<i64: 1, 8, 16>}, {pipeline_mode = #tpu.pipeline_mode<synchronous>, transform_indices = @transform_78, window_bounds = array<i64: 8, 1>}, {transform_indices = @transform_79, window_bounds = array<i64: 1, 8, 16>}, {transform_indices = @transform_80, window_bounds = array<i64: 1, 16, 16>}, {transform_indices = @transform_81, window_bounds = array<i64: 1, 1, 16>}]} {
    %cst = arith.constant 0.000000e+00 : f32
    %0 = vector.broadcast %cst : f32 to vector<32x27xf32>
    %c0 = arith.constant 0 : index
    %c0_0 = arith.constant 0 : index
    %1 = vector.load %arg83[%c0, %c0_0] : memref<32x70xf32, #tpu.memory_space<vmem>>, vector<32x27xf32>
    tpu.vector_store %arg83[%c0, %c0_0], %0 {strides = array<i32>} : memref<32x70xf32, #tpu.memory_space<vmem>>, vector<32x27xf32>,
    %cst_1 = arith.constant 0.000000e+00 : f32
    %2 = vector.broadcast %cst_1 : f32 to vector<32x27xf32>
    %c0_2 = arith.constant 0 : index
    %c43 = arith.constant 43 : index
    %3 = vector.load %arg83[%c0_2, %c43] : memref<32x70xf32, #tpu.memory_space<vmem>>, vector<32x27xf32>
    tpu.vector_store %arg83[%c0_2, %c43], %2 {strides = array<i32>} : memref<32x70xf32, #tpu.memory_space<vmem>>, vector<32x27xf32>,
    %cst_3 = arith.constant 0.000000e+00 : f32
    %4 = vector.broadcast %cst_3 : f32 to vector<16x54xf32>
    %c0_4 = arith.constant 0 : index
    %c0_5 = arith.constant 0 : index
    %5 = vector.load %arg84[%c0_4, %c0_5] : memref<16x70xf32, #tpu.memory_space<vmem>>, vector<16x54xf32>
    tpu.vector_store %arg84[%c0_4, %c0_5], %4 {strides = array<i32>} : memref<16x70xf32, #tpu.memory_space<vmem>>, vector<16x54xf32>,
    %cst_6 = arith.constant 0.000000e+00 : f32
    %6 = vector.broadcast %cst_6 : f32 to vector<32x54xf32>
    %c0_7 = arith.constant 0 : index
    %c0_8 = arith.constant 0 : index
    %7 = vector.load %arg85[%c0_7, %c0_8] : memref<32x70xf32, #tpu.memory_space<vmem>>, vector<32x54xf32>
    tpu.vector_store %arg85[%c0_7, %c0_8], %6 {strides = array<i32>} : memref<32x70xf32, #tpu.memory_space<vmem>>, vector<32x54xf32>,
    %c0_9 = arith.constant 0 : index
    %c0_10 = arith.constant 0 : index
    %c0_11 = arith.constant 0 : index
    %8 = vector.load %arg1[%c0_9, %c0_10, %c0_11] : memref<1x1x16xi32, #tpu.memory_space<vmem>>, vector<1x1x16xi32>
    %9 = vector.shape_cast %8 : vector<1x1x16xi32> to vector<1x16xi32>
    %10 = tpu.iota {dimensions = array<i32: 0>} : vector<32x16xi32>
    %11 = vector.broadcast %9 : vector<1x16xi32> to vector<32x16xi32>
    %12 = arith.cmpi eq, %10, %11 : vector<32x16xi32>
    %13 = arith.extui %12 : vector<32x16xi1> to vector<32x16xi32>
    %14 = arith.sitofp %13 : vector<32x16xi32> to vector<32x16xf32>
    %c0_12 = arith.constant 0 : index
    %c0_13 = arith.constant 0 : index
    %15 = vector.load %arg3[%c0_12, %c0_13] : memref<16x32xf32, #tpu.memory_space<vmem>>, vector<16x32xf32>
    %cst_14 = arith.constant dense<0.000000e+00> : vector<16x16xf32>
    %16 = tpu.matmul %15, %14, %cst_14 {dimension_numbers = #tpu.dot_dimension_numbers<[1], [0], [0], [1], [0, 0, 1, 1], [], []>} : vector<16x32xf32>, vector<32x16xf32>, vector<16x16xf32> -> vector<16x16xf32>
    %c0_15 = arith.constant 0 : index
    %c27 = arith.constant 27 : index
    %17 = vector.load %arg83[%c0_15, %c27] : memref<32x70xf32, #tpu.memory_space<vmem>>, vector<16x16xf32>
    tpu.vector_store %arg83[%c0_15, %c27], %16 {strides = array<i32>} : memref<32x70xf32, #tpu.memory_space<vmem>>, vector<16x16xf32>,
    %c0_16 = arith.constant 0 : index
    %c27_17 = arith.constant 27 : index
    %18 = vector.load %arg83[%c0_16, %c27_17] : memref<32x70xf32, #tpu.memory_space<vmem>>, vector<16x16xf32>
    %19 = arith.truncf %18 : vector<16x16xf32> to vector<16x16xbf16>
    %c0_18 = arith.constant 0 : index
    %c0_19 = arith.constant 0 : index
    %c0_20 = arith.constant 0 : index
    %20 = vector.load %arg4[%c0_18, %c0_19, %c0_20] : memref<1x32x16xbf16, #tpu.memory_space<vmem>>, vector<1x32x16xbf16>
    %21 = vector.shape_cast %20 : vector<1x32x16xbf16> to vector<32x16xbf16>
    %cst_21 = arith.constant dense<0.000000e+00> : vector<32x16xf32>
    %22 = tpu.matmul %21, %19, %cst_21 {dimension_numbers = #tpu.dot_dimension_numbers<[1], [0], [0], [1], [0, 0, 1, 1], [], []>} : vector<32x16xbf16>, vector<16x16xbf16>, vector<32x16xf32> -> vector<32x16xf32>
    %c0_22 = arith.constant 0 : index
    %c0_23 = arith.constant 0 : index
    %23 = vector.load %arg5[%c0_22, %c0_23] : memref<32x1xf32, #tpu.memory_space<vmem>>, vector<32x1xf32>
    %24 = vector.broadcast %23 : vector<32x1xf32> to vector<32x16xf32>
    %25 = arith.addf %22, %24 : vector<32x16xf32>
    %cst_24 = arith.constant 0.000000e+00 : f32
    %26 = vector.broadcast %cst_24 : f32 to vector<32x16xf32>
    %27 = arith.maximumf %25, %26 : vector<32x16xf32>
    %c0_25 = arith.constant 0 : index
    %c27_26 = arith.constant 27 : index
    %28 = vector.load %arg83[%c0_25, %c27_26] : memref<32x70xf32, #tpu.memory_space<vmem>>, vector<32x16xf32>
    tpu.vector_store %arg83[%c0_25, %c27_26], %27 {strides = array<i32>} : memref<32x70xf32, #tpu.memory_space<vmem>>, vector<32x16xf32>,
    %c0_27 = arith.constant 0 : index
    %c27_28 = arith.constant 27 : index
    %29 = vector.load %arg83[%c0_27, %c27_28] : memref<32x70xf32, #tpu.memory_space<vmem>>, vector<32x16xf32>
    %30 = arith.truncf %29 : vector<32x16xf32> to vector<32x16xbf16>
    %c0_29 = arith.constant 0 : index
    %c0_30 = arith.constant 0 : index
    %c0_31 = arith.constant 0 : index
    %31 = vector.load %arg6[%c0_29, %c0_30, %c0_31] : memref<1x32x32xbf16, #tpu.memory_space<vmem>>, vector<1x32x32xbf16>
    %32 = vector.shape_cast %31 : vector<1x32x32xbf16> to vector<32x32xbf16>
    %cst_32 = arith.constant dense<0.000000e+00> : vector<32x16xf32>
    %33 = tpu.matmul %32, %30, %cst_32 {dimension_numbers = #tpu.dot_dimension_numbers<[1], [0], [0], [1], [0, 0, 1, 1], [], []>} : vector<32x32xbf16>, vector<32x16xbf16>, vector<32x16xf32> -> vector<32x16xf32>
    %c0_33 = arith.constant 0 : index
    %c0_34 = arith.constant 0 : index
    %34 = vector.load %arg7[%c0_33, %c0_34] : memref<32x1xf32, #tpu.memory_space<vmem>>, vector<32x1xf32>
    %35 = vector.broadcast %34 : vector<32x1xf32> to vector<32x16xf32>
    %36 = arith.addf %33, %35 : vector<32x16xf32>
    %c0_35 = arith.constant 0 : index
    %c27_36 = arith.constant 27 : index
    %37 = vector.load %arg83[%c0_35, %c27_36] : memref<32x70xf32, #tpu.memory_space<vmem>>, vector<32x16xf32>
    tpu.vector_store %arg83[%c0_35, %c27_36], %36 {strides = array<i32>} : memref<32x70xf32, #tpu.memory_space<vmem>>, vector<32x16xf32>,
    %c0_37 = arith.constant 0 : index
    %c26 = arith.constant 26 : index
    %38 = vector.load %arg83[%c0_37, %c26] : memref<32x70xf32, #tpu.memory_space<vmem>>, vector<32x16xf32>
    %39 = arith.truncf %38 : vector<32x16xf32> to vector<32x16xbf16>
    %c0_38 = arith.constant 0 : index
    %c0_39 = arith.constant 0 : index
    %c0_40 = arith.constant 0 : index
    %40 = vector.load %arg8[%c0_38, %c0_39, %c0_40] : memref<3x64x32xbf16, #tpu.memory_space<vmem>>, vector<1x64x32xbf16>
    %41 = vector.shape_cast %40 : vector<1x64x32xbf16> to vector<64x32xbf16>
    %cst_41 = arith.constant dense<0.000000e+00> : vector<64x16xf32>
    %42 = tpu.matmul %41, %39, %cst_41 {dimension_numbers = #tpu.dot_dimension_numbers<[1], [0], [0], [1], [0, 0, 1, 1], [], []>} : vector<64x32xbf16>, vector<32x16xbf16>, vector<64x16xf32> -> vector<64x16xf32>
    %c0_42 = arith.constant 0 : index
    %c27_43 = arith.constant 27 : index
    %43 = vector.load %arg83[%c0_42, %c27_43] : memref<32x70xf32, #tpu.memory_space<vmem>>, vector<32x16xf32>
    %44 = arith.truncf %43 : vector<32x16xf32> to vector<32x16xbf16>
    %c1 = arith.constant 1 : index
    %c0_44 = arith.constant 0 : index
    %c0_45 = arith.constant 0 : index
    %45 = vector.load %arg8[%c1, %c0_44, %c0_45] : memref<3x64x32xbf16, #tpu.memory_space<vmem>>, vector<1x64x32xbf16>
    %46 = vector.shape_cast %45 : vector<1x64x32xbf16> to vector<64x32xbf16>
    %cst_46 = arith.constant dense<0.000000e+00> : vector<64x16xf32>
    %47 = tpu.matmul %46, %44, %cst_46 {dimension_numbers = #tpu.dot_dimension_numbers<[1], [0], [0], [1], [0, 0, 1, 1], [], []>} : vector<64x32xbf16>, vector<32x16xbf16>, vector<64x16xf32> -> vector<64x16xf32>
    %48 = arith.addf %42, %47 : vector<64x16xf32>
    %c0_47 = arith.constant 0 : index
    %c28 = arith.constant 28 : index
    %49 = vector.load %arg83[%c0_47, %c28] : memref<32x70xf32, #tpu.memory_space<vmem>>, vector<32x16xf32>
    %50 = arith.truncf %49 : vector<32x16xf32> to vector<32x16xbf16>
    %c2 = arith.constant 2 : index
    %c0_48 = arith.constant 0 : index
    %c0_49 = arith.constant 0 : index
    %51 = vector.load %arg8[%c2, %c0_48, %c0_49] : memref<3x64x32xbf16, #tpu.memory_space<vmem>>, vector<1x64x32xbf16>
    %52 = vector.shape_cast %51 : vector<1x64x32xbf16> to vector<64x32xbf16>
    %cst_50 = arith.constant dense<0.000000e+00> : vector<64x16xf32>
    %53 = tpu.matmul %52, %50, %cst_50 {dimension_numbers = #tpu.dot_dimension_numbers<[1], [0], [0], [1], [0, 0, 1, 1], [], []>} : vector<64x32xbf16>, vector<32x16xbf16>, vector<64x16xf32> -> vector<64x16xf32>
    %54 = arith.addf %48, %53 : vector<64x16xf32>
    %c0_51 = arith.constant 0 : index
    %c0_52 = arith.constant 0 : index
    %55 = vector.load %arg9[%c0_51, %c0_52] : memref<64x1xf32, #tpu.memory_space<vmem>>, vector<64x1xf32>
    %56 = vector.broadcast %55 : vector<64x1xf32> to vector<64x16xf32>
    %57 = arith.addf %54, %56 : vector<64x16xf32>
    %58 = vector.extract_strided_slice %57 {offsets = [0, 0], sizes = [32, 16], strides = [1, 1]} : vector<64x16xf32> to vector<32x16xf32>
    %59 = arith.negf %58 : vector<32x16xf32>
    %60 = math.exp %59 : vector<32x16xf32>
    %cst_53 = arith.constant 1.000000e+00 : f32
    %61 = vector.broadcast %cst_53 : f32 to vector<32x16xf32>
    %62 = arith.addf %61, %60 : vector<32x16xf32>
    %63 = arith.divf %61, %62 : vector<32x16xf32>
    %c0_54 = arith.constant 0 : index
    %c27_55 = arith.constant 27 : index
    %64 = vector.load %arg83[%c0_54, %c27_55] : memref<32x70xf32, #tpu.memory_space<vmem>>, vector<32x16xf32>
    %65 = vector.extract_strided_slice %57 {offsets = [32, 0], sizes = [32, 16], strides = [1, 1]} : vector<64x16xf32> to vector<32x16xf32>
    %66 = arith.subf %65, %64 : vector<32x16xf32>
    %67 = arith.mulf %63, %66 : vector<32x16xf32>
    %68 = arith.addf %64, %67 : vector<32x16xf32>
    %c0_56 = arith.constant 0 : index
    %c27_57 = arith.constant 27 : index
    %69 = vector.load %arg83[%c0_56, %c27_57] : memref<32x70xf32, #tpu.memory_space<vmem>>, vector<32x16xf32>
    tpu.vector_store %arg83[%c0_56, %c27_57], %68 {strides = array<i32>} : memref<32x70xf32, #tpu.memory_space<vmem>>, vector<32x16xf32>,
    %c0_58 = arith.constant 0 : index
    %c24 = arith.constant 24 : index
    %70 = vector.load %arg83[%c0_58, %c24] : memref<32x70xf32, #tpu.memory_space<vmem>>, vector<32x16xf32>
    %71 = arith.truncf %70 : vector<32x16xf32> to vector<32x16xbf16>
    %c0_59 = arith.constant 0 : index
    %c0_60 = arith.constant 0 : index
    %c0_61 = arith.constant 0 : index
    %72 = vector.load %arg10[%c0_59, %c0_60, %c0_61] : memref<3x64x32xbf16, #tpu.memory_space<vmem>>, vector<1x64x32xbf16>
    %73 = vector.shape_cast %72 : vector<1x64x32xbf16> to vector<64x32xbf16>
    %cst_62 = arith.constant dense<0.000000e+00> : vector<64x16xf32>
    %74 = tpu.matmul %73, %71, %cst_62 {dimension_numbers = #tpu.dot_dimension_numbers<[1], [0], [0], [1], [0, 0, 1, 1], [], []>} : vector<64x32xbf16>, vector<32x16xbf16>, vector<64x16xf32> -> vector<64x16xf32>
    %c0_63 = arith.constant 0 : index
    %c27_64 = arith.constant 27 : index
    %75 = vector.load %arg83[%c0_63, %c27_64] : memref<32x70xf32, #tpu.memory_space<vmem>>, vector<32x16xf32>
    %76 = arith.truncf %75 : vector<32x16xf32> to vector<32x16xbf16>
    %c1_65 = arith.constant 1 : index
    %c0_66 = arith.constant 0 : index
    %c0_67 = arith.constant 0 : index
    %77 = vector.load %arg10[%c1_65, %c0_66, %c0_67] : memref<3x64x32xbf16, #tpu.memory_space<vmem>>, vector<1x64x32xbf16>
    %78 = vector.shape_cast %77 : vector<1x64x32xbf16> to vector<64x32xbf16>
    %cst_68 = arith.constant dense<0.000000e+00> : vector<64x16xf32>
    %79 = tpu.matmul %78, %76, %cst_68 {dimension_numbers = #tpu.dot_dimension_numbers<[1], [0], [0], [1], [0, 0, 1, 1], [], []>} : vector<64x32xbf16>, vector<32x16xbf16>, vector<64x16xf32> -> vector<64x16xf32>
    %80 = arith.addf %74, %79 : vector<64x16xf32>
    %c0_69 = arith.constant 0 : index
    %c30 = arith.constant 30 : index
    %81 = vector.load %arg83[%c0_69, %c30] : memref<32x70xf32, #tpu.memory_space<vmem>>, vector<32x16xf32>
    %82 = arith.truncf %81 : vector<32x16xf32> to vector<32x16xbf16>
    %c2_70 = arith.constant 2 : index
    %c0_71 = arith.constant 0 : index
    %c0_72 = arith.constant 0 : index
    %83 = vector.load %arg10[%c2_70, %c0_71, %c0_72] : memref<3x64x32xbf16, #tpu.memory_space<vmem>>, vector<1x64x32xbf16>
    %84 = vector.shape_cast %83 : vector<1x64x32xbf16> to vector<64x32xbf16>
    %cst_73 = arith.constant dense<0.000000e+00> : vector<64x16xf32>
    %85 = tpu.matmul %84, %82, %cst_73 {dimension_numbers = #tpu.dot_dimension_numbers<[1], [0], [0], [1], [0, 0, 1, 1], [], []>} : vector<64x32xbf16>, vector<32x16xbf16>, vector<64x16xf32> -> vector<64x16xf32>
    %86 = arith.addf %80, %85 : vector<64x16xf32>
    %c0_74 = arith.constant 0 : index
    %c0_75 = arith.constant 0 : index
    %87 = vector.load %arg11[%c0_74, %c0_75] : memref<64x1xf32, #tpu.memory_space<vmem>>, vector<64x1xf32>
    %88 = vector.broadcast %87 : vector<64x1xf32> to vector<64x16xf32>
    %89 = arith.addf %86, %88 : vector<64x16xf32>
    %90 = vector.extract_strided_slice %89 {offsets = [0, 0], sizes = [32, 16], strides = [1, 1]} : vector<64x16xf32> to vector<32x16xf32>
    %91 = arith.negf %90 : vector<32x16xf32>
    %92 = math.exp %91 : vector<32x16xf32>
    %cst_76 = arith.constant 1.000000e+00 : f32
    %93 = vector.broadcast %cst_76 : f32 to vector<32x16xf32>
    %94 = arith.addf %93, %92 : vector<32x16xf32>
    %95 = arith.divf %93, %94 : vector<32x16xf32>
    %c0_77 = arith.constant 0 : index
    %c27_78 = arith.constant 27 : index
    %96 = vector.load %arg83[%c0_77, %c27_78] : memref<32x70xf32, #tpu.memory_space<vmem>>, vector<32x16xf32>
    %97 = vector.extract_strided_slice %89 {offsets = [32, 0], sizes = [32, 16], strides = [1, 1]} : vector<64x16xf32> to vector<32x16xf32>
    %98 = arith.subf %97, %96 : vector<32x16xf32>
    %99 = arith.mulf %95, %98 : vector<32x16xf32>
    %100 = arith.addf %96, %99 : vector<32x16xf32>
    %c0_79 = arith.constant 0 : index
    %c27_80 = arith.constant 27 : index
    %101 = vector.load %arg83[%c0_79, %c27_80] : memref<32x70xf32, #tpu.memory_space<vmem>>, vector<32x16xf32>
    tpu.vector_store %arg83[%c0_79, %c27_80], %100 {strides = array<i32>} : memref<32x70xf32, #tpu.memory_space<vmem>>, vector<32x16xf32>,
    %c0_81 = arith.constant 0 : index
    %c18 = arith.constant 18 : index
    %102 = vector.load %arg83[%c0_81, %c18] : memref<32x70xf32, #tpu.memory_space<vmem>>, vector<32x16xf32>
    %103 = arith.truncf %102 : vector<32x16xf32> to vector<32x16xbf16>
    %c0_82 = arith.constant 0 : index
    %c0_83 = arith.constant 0 : index
    %c0_84 = arith.constant 0 : index
    %104 = vector.load %arg12[%c0_82, %c0_83, %c0_84] : memref<3x64x32xbf16, #tpu.memory_space<vmem>>, vector<1x64x32xbf16>
    %105 = vector.shape_cast %104 : vector<1x64x32xbf16> to vector<64x32xbf16>
    %cst_85 = arith.constant dense<0.000000e+00> : vector<64x16xf32>
    %106 = tpu.matmul %105, %103, %cst_85 {dimension_numbers = #tpu.dot_dimension_numbers<[1], [0], [0], [1], [0, 0, 1, 1], [], []>} : vector<64x32xbf16>, vector<32x16xbf16>, vector<64x16xf32> -> vector<64x16xf32>
    %c0_86 = arith.constant 0 : index
    %c27_87 = arith.constant 27 : index
    %107 = vector.load %arg83[%c0_86, %c27_87] : memref<32x70xf32, #tpu.memory_space<vmem>>, vector<32x16xf32>
    %108 = arith.truncf %107 : vector<32x16xf32> to vector<32x16xbf16>
    %c1_88 = arith.constant 1 : index
    %c0_89 = arith.constant 0 : index
    %c0_90 = arith.constant 0 : index
    %109 = vector.load %arg12[%c1_88, %c0_89, %c0_90] : memref<3x64x32xbf16, #tpu.memory_space<vmem>>, vector<1x64x32xbf16>
    %110 = vector.shape_cast %109 : vector<1x64x32xbf16> to vector<64x32xbf16>
    %cst_91 = arith.constant dense<0.000000e+00> : vector<64x16xf32>
    %111 = tpu.matmul %110, %108, %cst_91 {dimension_numbers = #tpu.dot_dimension_numbers<[1], [0], [0], [1], [0, 0, 1, 1], [], []>} : vector<64x32xbf16>, vector<32x16xbf16>, vector<64x16xf32> -> vector<64x16xf32>
    %112 = arith.addf %106, %111 : vector<64x16xf32>
    %c0_92 = arith.constant 0 : index
    %c36 = arith.constant 36 : index
    %113 = vector.load %arg83[%c0_92, %c36] : memref<32x70xf32, #tpu.memory_space<vmem>>, vector<32x16xf32>
    %114 = arith.truncf %113 : vector<32x16xf32> to vector<32x16xbf16>
    %c2_93 = arith.constant 2 : index
    %c0_94 = arith.constant 0 : index
    %c0_95 = arith.constant 0 : index
    %115 = vector.load %arg12[%c2_93, %c0_94, %c0_95] : memref<3x64x32xbf16, #tpu.memory_space<vmem>>, vector<1x64x32xbf16>
    %116 = vector.shape_cast %115 : vector<1x64x32xbf16> to vector<64x32xbf16>
    %cst_96 = arith.constant dense<0.000000e+00> : vector<64x16xf32>
    %117 = tpu.matmul %116, %114, %cst_96 {dimension_numbers = #tpu.dot_dimension_numbers<[1], [0], [0], [1], [0, 0, 1, 1], [], []>} : vector<64x32xbf16>, vector<32x16xbf16>, vector<64x16xf32> -> vector<64x16xf32>
    %118 = arith.addf %112, %117 : vector<64x16xf32>
    %c0_97 = arith.constant 0 : index
    %c0_98 = arith.constant 0 : index
    %119 = vector.load %arg13[%c0_97, %c0_98] : memref<64x1xf32, #tpu.memory_space<vmem>>, vector<64x1xf32>
    %120 = vector.broadcast %119 : vector<64x1xf32> to vector<64x16xf32>
    %121 = arith.addf %118, %120 : vector<64x16xf32>
    %122 = vector.extract_strided_slice %121 {offsets = [0, 0], sizes = [32, 16], strides = [1, 1]} : vector<64x16xf32> to vector<32x16xf32>
    %123 = arith.negf %122 : vector<32x16xf32>
    %124 = math.exp %123 : vector<32x16xf32>
    %cst_99 = arith.constant 1.000000e+00 : f32
    %125 = vector.broadcast %cst_99 : f32 to vector<32x16xf32>
    %126 = arith.addf %125, %124 : vector<32x16xf32>
    %127 = arith.divf %125, %126 : vector<32x16xf32>
    %c0_100 = arith.constant 0 : index
    %c27_101 = arith.constant 27 : index
    %128 = vector.load %arg83[%c0_100, %c27_101] : memref<32x70xf32, #tpu.memory_space<vmem>>, vector<32x16xf32>
    %129 = vector.extract_strided_slice %121 {offsets = [32, 0], sizes = [32, 16], strides = [1, 1]} : vector<64x16xf32> to vector<32x16xf32>
    %130 = arith.subf %129, %128 : vector<32x16xf32>
    %131 = arith.mulf %127, %130 : vector<32x16xf32>
    %132 = arith.addf %128, %131 : vector<32x16xf32>
    %c0_102 = arith.constant 0 : index
    %c27_103 = arith.constant 27 : index
    %133 = vector.load %arg83[%c0_102, %c27_103] : memref<32x70xf32, #tpu.memory_space<vmem>>, vector<32x16xf32>
    tpu.vector_store %arg83[%c0_102, %c27_103], %132 {strides = array<i32>} : memref<32x70xf32, #tpu.memory_space<vmem>>, vector<32x16xf32>,
    %c0_104 = arith.constant 0 : index
    %c0_105 = arith.constant 0 : index
    %134 = vector.load %arg83[%c0_104, %c0_105] : memref<32x70xf32, #tpu.memory_space<vmem>>, vector<32x16xf32>
    %135 = arith.truncf %134 : vector<32x16xf32> to vector<32x16xbf16>
    %c0_106 = arith.constant 0 : index
    %c0_107 = arith.constant 0 : index
    %c0_108 = arith.constant 0 : index
    %136 = vector.load %arg14[%c0_106, %c0_107, %c0_108] : memref<3x64x32xbf16, #tpu.memory_space<vmem>>, vector<1x64x32xbf16>
    %137 = vector.shape_cast %136 : vector<1x64x32xbf16> to vector<64x32xbf16>
    %cst_109 = arith.constant dense<0.000000e+00> : vector<64x16xf32>
    %138 = tpu.matmul %137, %135, %cst_109 {dimension_numbers = #tpu.dot_dimension_numbers<[1], [0], [0], [1], [0, 0, 1, 1], [], []>} : vector<64x32xbf16>, vector<32x16xbf16>, vector<64x16xf32> -> vector<64x16xf32>
    %c0_110 = arith.constant 0 : index
    %c27_111 = arith.constant 27 : index
    %139 = vector.load %arg83[%c0_110, %c27_111] : memref<32x70xf32, #tpu.memory_space<vmem>>, vector<32x16xf32>
    %140 = arith.truncf %139 : vector<32x16xf32> to vector<32x16xbf16>
    %c1_112 = arith.constant 1 : index
    %c0_113 = arith.constant 0 : index
    %c0_114 = arith.constant 0 : index
    %141 = vector.load %arg14[%c1_112, %c0_113, %c0_114] : memref<3x64x32xbf16, #tpu.memory_space<vmem>>, vector<1x64x32xbf16>
    %142 = vector.shape_cast %141 : vector<1x64x32xbf16> to vector<64x32xbf16>
    %cst_115 = arith.constant dense<0.000000e+00> : vector<64x16xf32>
    %143 = tpu.matmul %142, %140, %cst_115 {dimension_numbers = #tpu.dot_dimension_numbers<[1], [0], [0], [1], [0, 0, 1, 1], [], []>} : vector<64x32xbf16>, vector<32x16xbf16>, vector<64x16xf32> -> vector<64x16xf32>
    %144 = arith.addf %138, %143 : vector<64x16xf32>
    %c0_116 = arith.constant 0 : index
    %c54 = arith.constant 54 : index
    %145 = vector.load %arg83[%c0_116, %c54] : memref<32x70xf32, #tpu.memory_space<vmem>>, vector<32x16xf32>
    %146 = arith.truncf %145 : vector<32x16xf32> to vector<32x16xbf16>
    %c2_117 = arith.constant 2 : index
    %c0_118 = arith.constant 0 : index
    %c0_119 = arith.constant 0 : index
    %147 = vector.load %arg14[%c2_117, %c0_118, %c0_119] : memref<3x64x32xbf16, #tpu.memory_space<vmem>>, vector<1x64x32xbf16>
    %148 = vector.shape_cast %147 : vector<1x64x32xbf16> to vector<64x32xbf16>
    %cst_120 = arith.constant dense<0.000000e+00> : vector<64x16xf32>
    %149 = tpu.matmul %148, %146, %cst_120 {dimension_numbers = #tpu.dot_dimension_numbers<[1], [0], [0], [1], [0, 0, 1, 1], [], []>} : vector<64x32xbf16>, vector<32x16xbf16>, vector<64x16xf32> -> vector<64x16xf32>
    %150 = arith.addf %144, %149 : vector<64x16xf32>
    %c0_121 = arith.constant 0 : index
    %c0_122 = arith.constant 0 : index
    %151 = vector.load %arg15[%c0_121, %c0_122] : memref<64x1xf32, #tpu.memory_space<vmem>>, vector<64x1xf32>
    %152 = vector.broadcast %151 : vector<64x1xf32> to vector<64x16xf32>
    %153 = arith.addf %150, %152 : vector<64x16xf32>
    %154 = vector.extract_strided_slice %153 {offsets = [0, 0], sizes = [32, 16], strides = [1, 1]} : vector<64x16xf32> to vector<32x16xf32>
    %155 = arith.negf %154 : vector<32x16xf32>
    %156 = math.exp %155 : vector<32x16xf32>
    %cst_123 = arith.constant 1.000000e+00 : f32
    %157 = vector.broadcast %cst_123 : f32 to vector<32x16xf32>
    %158 = arith.addf %157, %156 : vector<32x16xf32>
    %159 = arith.divf %157, %158 : vector<32x16xf32>
    %c0_124 = arith.constant 0 : index
    %c27_125 = arith.constant 27 : index
    %160 = vector.load %arg83[%c0_124, %c27_125] : memref<32x70xf32, #tpu.memory_space<vmem>>, vector<32x16xf32>
    %161 = vector.extract_strided_slice %153 {offsets = [32, 0], sizes = [32, 16], strides = [1, 1]} : vector<64x16xf32> to vector<32x16xf32>
    %162 = arith.subf %161, %160 : vector<32x16xf32>
    %163 = arith.mulf %159, %162 : vector<32x16xf32>
    %164 = arith.addf %160, %163 : vector<32x16xf32>
    %c0_126 = arith.constant 0 : index
    %c27_127 = arith.constant 27 : index
    %165 = vector.load %arg83[%c0_126, %c27_127] : memref<32x70xf32, #tpu.memory_space<vmem>>, vector<32x16xf32>
    tpu.vector_store %arg83[%c0_126, %c27_127], %164 {strides = array<i32>} : memref<32x70xf32, #tpu.memory_space<vmem>>, vector<32x16xf32>,
    %c0_128 = arith.constant 0 : index
    %c26_129 = arith.constant 26 : index
    %166 = vector.load %arg83[%c0_128, %c26_129] : memref<32x70xf32, #tpu.memory_space<vmem>>, vector<32x16xf32>
    %167 = arith.truncf %166 : vector<32x16xf32> to vector<32x16xbf16>
    %c0_130 = arith.constant 0 : index
    %c0_131 = arith.constant 0 : index
    %c0_132 = arith.constant 0 : index
    %168 = vector.load %arg16[%c0_130, %c0_131, %c0_132] : memref<3x64x32xbf16, #tpu.memory_space<vmem>>, vector<1x64x32xbf16>
    %169 = vector.shape_cast %168 : vector<1x64x32xbf16> to vector<64x32xbf16>
    %cst_133 = arith.constant dense<0.000000e+00> : vector<64x16xf32>
    %170 = tpu.matmul %169, %167, %cst_133 {dimension_numbers = #tpu.dot_dimension_numbers<[1], [0], [0], [1], [0, 0, 1, 1], [], []>} : vector<64x32xbf16>, vector<32x16xbf16>, vector<64x16xf32> -> vector<64x16xf32>
    %c0_134 = arith.constant 0 : index
    %c27_135 = arith.constant 27 : index
    %171 = vector.load %arg83[%c0_134, %c27_135] : memref<32x70xf32, #tpu.memory_space<vmem>>, vector<32x16xf32>
    %172 = arith.truncf %171 : vector<32x16xf32> to vector<32x16xbf16>
    %c1_136 = arith.constant 1 : index
    %c0_137 = arith.constant 0 : index
    %c0_138 = arith.constant 0 : index
    %173 = vector.load %arg16[%c1_136, %c0_137, %c0_138] : memref<3x64x32xbf16, #tpu.memory_space<vmem>>, vector<1x64x32xbf16>
    %174 = vector.shape_cast %173 : vector<1x64x32xbf16> to vector<64x32xbf16>
    %cst_139 = arith.constant dense<0.000000e+00> : vector<64x16xf32>
    %175 = tpu.matmul %174, %172, %cst_139 {dimension_numbers = #tpu.dot_dimension_numbers<[1], [0], [0], [1], [0, 0, 1, 1], [], []>} : vector<64x32xbf16>, vector<32x16xbf16>, vector<64x16xf32> -> vector<64x16xf32>
    %176 = arith.addf %170, %175 : vector<64x16xf32>
    %c0_140 = arith.constant 0 : index
    %c28_141 = arith.constant 28 : index
    %177 = vector.load %arg83[%c0_140, %c28_141] : memref<32x70xf32, #tpu.memory_space<vmem>>, vector<32x16xf32>
    %178 = arith.truncf %177 : vector<32x16xf32> to vector<32x16xbf16>
    %c2_142 = arith.constant 2 : index
    %c0_143 = arith.constant 0 : index
    %c0_144 = arith.constant 0 : index
    %179 = vector.load %arg16[%c2_142, %c0_143, %c0_144] : memref<3x64x32xbf16, #tpu.memory_space<vmem>>, vector<1x64x32xbf16>
    %180 = vector.shape_cast %179 : vector<1x64x32xbf16> to vector<64x32xbf16>
    %cst_145 = arith.constant dense<0.000000e+00> : vector<64x16xf32>
    %181 = tpu.matmul %180, %178, %cst_145 {dimension_numbers = #tpu.dot_dimension_numbers<[1], [0], [0], [1], [0, 0, 1, 1], [], []>} : vector<64x32xbf16>, vector<32x16xbf16>, vector<64x16xf32> -> vector<64x16xf32>
    %182 = arith.addf %176, %181 : vector<64x16xf32>
    %c0_146 = arith.constant 0 : index
    %c0_147 = arith.constant 0 : index
    %183 = vector.load %arg17[%c0_146, %c0_147] : memref<64x1xf32, #tpu.memory_space<vmem>>, vector<64x1xf32>
    %184 = vector.broadcast %183 : vector<64x1xf32> to vector<64x16xf32>
    %185 = arith.addf %182, %184 : vector<64x16xf32>
    %186 = vector.extract_strided_slice %185 {offsets = [0, 0], sizes = [32, 16], strides = [1, 1]} : vector<64x16xf32> to vector<32x16xf32>
    %187 = arith.negf %186 : vector<32x16xf32>
    %188 = math.exp %187 : vector<32x16xf32>
    %cst_148 = arith.constant 1.000000e+00 : f32
    %189 = vector.broadcast %cst_148 : f32 to vector<32x16xf32>
    %190 = arith.addf %189, %188 : vector<32x16xf32>
    %191 = arith.divf %189, %190 : vector<32x16xf32>
    %c0_149 = arith.constant 0 : index
    %c27_150 = arith.constant 27 : index
    %192 = vector.load %arg83[%c0_149, %c27_150] : memref<32x70xf32, #tpu.memory_space<vmem>>, vector<32x16xf32>
    %193 = vector.extract_strided_slice %185 {offsets = [32, 0], sizes = [32, 16], strides = [1, 1]} : vector<64x16xf32> to vector<32x16xf32>
    %194 = arith.subf %193, %192 : vector<32x16xf32>
    %195 = arith.mulf %191, %194 : vector<32x16xf32>
    %196 = arith.addf %192, %195 : vector<32x16xf32>
    %c0_151 = arith.constant 0 : index
    %c27_152 = arith.constant 27 : index
    %197 = vector.load %arg83[%c0_151, %c27_152] : memref<32x70xf32, #tpu.memory_space<vmem>>, vector<32x16xf32>
    tpu.vector_store %arg83[%c0_151, %c27_152], %196 {strides = array<i32>} : memref<32x70xf32, #tpu.memory_space<vmem>>, vector<32x16xf32>,
    %c0_153 = arith.constant 0 : index
    %c24_154 = arith.constant 24 : index
    %198 = vector.load %arg83[%c0_153, %c24_154] : memref<32x70xf32, #tpu.memory_space<vmem>>, vector<32x16xf32>
    %199 = arith.truncf %198 : vector<32x16xf32> to vector<32x16xbf16>
    %c0_155 = arith.constant 0 : index
    %c0_156 = arith.constant 0 : index
    %c0_157 = arith.constant 0 : index
    %200 = vector.load %arg18[%c0_155, %c0_156, %c0_157] : memref<3x64x32xbf16, #tpu.memory_space<vmem>>, vector<1x64x32xbf16>
    %201 = vector.shape_cast %200 : vector<1x64x32xbf16> to vector<64x32xbf16>
    %cst_158 = arith.constant dense<0.000000e+00> : vector<64x16xf32>
    %202 = tpu.matmul %201, %199, %cst_158 {dimension_numbers = #tpu.dot_dimension_numbers<[1], [0], [0], [1], [0, 0, 1, 1], [], []>} : vector<64x32xbf16>, vector<32x16xbf16>, vector<64x16xf32> -> vector<64x16xf32>
    %c0_159 = arith.constant 0 : index
    %c27_160 = arith.constant 27 : index
    %203 = vector.load %arg83[%c0_159, %c27_160] : memref<32x70xf32, #tpu.memory_space<vmem>>, vector<32x16xf32>
    %204 = arith.truncf %203 : vector<32x16xf32> to vector<32x16xbf16>
    %c1_161 = arith.constant 1 : index
    %c0_162 = arith.constant 0 : index
    %c0_163 = arith.constant 0 : index
    %205 = vector.load %arg18[%c1_161, %c0_162, %c0_163] : memref<3x64x32xbf16, #tpu.memory_space<vmem>>, vector<1x64x32xbf16>
    %206 = vector.shape_cast %205 : vector<1x64x32xbf16> to vector<64x32xbf16>
    %cst_164 = arith.constant dense<0.000000e+00> : vector<64x16xf32>
    %207 = tpu.matmul %206, %204, %cst_164 {dimension_numbers = #tpu.dot_dimension_numbers<[1], [0], [0], [1], [0, 0, 1, 1], [], []>} : vector<64x32xbf16>, vector<32x16xbf16>, vector<64x16xf32> -> vector<64x16xf32>
    %208 = arith.addf %202, %207 : vector<64x16xf32>
    %c0_165 = arith.constant 0 : index
    %c30_166 = arith.constant 30 : index
    %209 = vector.load %arg83[%c0_165, %c30_166] : memref<32x70xf32, #tpu.memory_space<vmem>>, vector<32x16xf32>
    %210 = arith.truncf %209 : vector<32x16xf32> to vector<32x16xbf16>
    %c2_167 = arith.constant 2 : index
    %c0_168 = arith.constant 0 : index
    %c0_169 = arith.constant 0 : index
    %211 = vector.load %arg18[%c2_167, %c0_168, %c0_169] : memref<3x64x32xbf16, #tpu.memory_space<vmem>>, vector<1x64x32xbf16>
    %212 = vector.shape_cast %211 : vector<1x64x32xbf16> to vector<64x32xbf16>
    %cst_170 = arith.constant dense<0.000000e+00> : vector<64x16xf32>
    %213 = tpu.matmul %212, %210, %cst_170 {dimension_numbers = #tpu.dot_dimension_numbers<[1], [0], [0], [1], [0, 0, 1, 1], [], []>} : vector<64x32xbf16>, vector<32x16xbf16>, vector<64x16xf32> -> vector<64x16xf32>
    %214 = arith.addf %208, %213 : vector<64x16xf32>
    %c0_171 = arith.constant 0 : index
    %c0_172 = arith.constant 0 : index
    %215 = vector.load %arg19[%c0_171, %c0_172] : memref<64x1xf32, #tpu.memory_space<vmem>>, vector<64x1xf32>
    %216 = vector.broadcast %215 : vector<64x1xf32> to vector<64x16xf32>
    %217 = arith.addf %214, %216 : vector<64x16xf32>
    %218 = vector.extract_strided_slice %217 {offsets = [0, 0], sizes = [32, 16], strides = [1, 1]} : vector<64x16xf32> to vector<32x16xf32>
    %219 = arith.negf %218 : vector<32x16xf32>
    %220 = math.exp %219 : vector<32x16xf32>
    %cst_173 = arith.constant 1.000000e+00 : f32
    %221 = vector.broadcast %cst_173 : f32 to vector<32x16xf32>
    %222 = arith.addf %221, %220 : vector<32x16xf32>
    %223 = arith.divf %221, %222 : vector<32x16xf32>
    %c0_174 = arith.constant 0 : index
    %c27_175 = arith.constant 27 : index
    %224 = vector.load %arg83[%c0_174, %c27_175] : memref<32x70xf32, #tpu.memory_space<vmem>>, vector<32x16xf32>
    %225 = vector.extract_strided_slice %217 {offsets = [32, 0], sizes = [32, 16], strides = [1, 1]} : vector<64x16xf32> to vector<32x16xf32>
    %226 = arith.subf %225, %224 : vector<32x16xf32>
    %227 = arith.mulf %223, %226 : vector<32x16xf32>
    %228 = arith.addf %224, %227 : vector<32x16xf32>
    %c0_176 = arith.constant 0 : index
    %c27_177 = arith.constant 27 : index
    %229 = vector.load %arg83[%c0_176, %c27_177] : memref<32x70xf32, #tpu.memory_space<vmem>>, vector<32x16xf32>
    tpu.vector_store %arg83[%c0_176, %c27_177], %228 {strides = array<i32>} : memref<32x70xf32, #tpu.memory_space<vmem>>, vector<32x16xf32>,
    %c0_178 = arith.constant 0 : index
    %c18_179 = arith.constant 18 : index
    %230 = vector.load %arg83[%c0_178, %c18_179] : memref<32x70xf32, #tpu.memory_space<vmem>>, vector<32x16xf32>
    %231 = arith.truncf %230 : vector<32x16xf32> to vector<32x16xbf16>
    %c0_180 = arith.constant 0 : index
    %c0_181 = arith.constant 0 : index
    %c0_182 = arith.constant 0 : index
    %232 = vector.load %arg20[%c0_180, %c0_181, %c0_182] : memref<3x64x32xbf16, #tpu.memory_space<vmem>>, vector<1x64x32xbf16>
    %233 = vector.shape_cast %232 : vector<1x64x32xbf16> to vector<64x32xbf16>
    %cst_183 = arith.constant dense<0.000000e+00> : vector<64x16xf32>
    %234 = tpu.matmul %233, %231, %cst_183 {dimension_numbers = #tpu.dot_dimension_numbers<[1], [0], [0], [1], [0, 0, 1, 1], [], []>} : vector<64x32xbf16>, vector<32x16xbf16>, vector<64x16xf32> -> vector<64x16xf32>
    %c0_184 = arith.constant 0 : index
    %c27_185 = arith.constant 27 : index
    %235 = vector.load %arg83[%c0_184, %c27_185] : memref<32x70xf32, #tpu.memory_space<vmem>>, vector<32x16xf32>
    %236 = arith.truncf %235 : vector<32x16xf32> to vector<32x16xbf16>
    %c1_186 = arith.constant 1 : index
    %c0_187 = arith.constant 0 : index
    %c0_188 = arith.constant 0 : index
    %237 = vector.load %arg20[%c1_186, %c0_187, %c0_188] : memref<3x64x32xbf16, #tpu.memory_space<vmem>>, vector<1x64x32xbf16>
    %238 = vector.shape_cast %237 : vector<1x64x32xbf16> to vector<64x32xbf16>
    %cst_189 = arith.constant dense<0.000000e+00> : vector<64x16xf32>
    %239 = tpu.matmul %238, %236, %cst_189 {dimension_numbers = #tpu.dot_dimension_numbers<[1], [0], [0], [1], [0, 0, 1, 1], [], []>} : vector<64x32xbf16>, vector<32x16xbf16>, vector<64x16xf32> -> vector<64x16xf32>
    %240 = arith.addf %234, %239 : vector<64x16xf32>
    %c0_190 = arith.constant 0 : index
    %c36_191 = arith.constant 36 : index
    %241 = vector.load %arg83[%c0_190, %c36_191] : memref<32x70xf32, #tpu.memory_space<vmem>>, vector<32x16xf32>
    %242 = arith.truncf %241 : vector<32x16xf32> to vector<32x16xbf16>
    %c2_192 = arith.constant 2 : index
    %c0_193 = arith.constant 0 : index
    %c0_194 = arith.constant 0 : index
    %243 = vector.load %arg20[%c2_192, %c0_193, %c0_194] : memref<3x64x32xbf16, #tpu.memory_space<vmem>>, vector<1x64x32xbf16>
    %244 = vector.shape_cast %243 : vector<1x64x32xbf16> to vector<64x32xbf16>
    %cst_195 = arith.constant dense<0.000000e+00> : vector<64x16xf32>
    %245 = tpu.matmul %244, %242, %cst_195 {dimension_numbers = #tpu.dot_dimension_numbers<[1], [0], [0], [1], [0, 0, 1, 1], [], []>} : vector<64x32xbf16>, vector<32x16xbf16>, vector<64x16xf32> -> vector<64x16xf32>
    %246 = arith.addf %240, %245 : vector<64x16xf32>
    %c0_196 = arith.constant 0 : index
    %c0_197 = arith.constant 0 : index
    %247 = vector.load %arg21[%c0_196, %c0_197] : memref<64x1xf32, #tpu.memory_space<vmem>>, vector<64x1xf32>
    %248 = vector.broadcast %247 : vector<64x1xf32> to vector<64x16xf32>
    %249 = arith.addf %246, %248 : vector<64x16xf32>
    %250 = vector.extract_strided_slice %249 {offsets = [0, 0], sizes = [32, 16], strides = [1, 1]} : vector<64x16xf32> to vector<32x16xf32>
    %251 = arith.negf %250 : vector<32x16xf32>
    %252 = math.exp %251 : vector<32x16xf32>
    %cst_198 = arith.constant 1.000000e+00 : f32
    %253 = vector.broadcast %cst_198 : f32 to vector<32x16xf32>
    %254 = arith.addf %253, %252 : vector<32x16xf32>
    %255 = arith.divf %253, %254 : vector<32x16xf32>
    %c0_199 = arith.constant 0 : index
    %c27_200 = arith.constant 27 : index
    %256 = vector.load %arg83[%c0_199, %c27_200] : memref<32x70xf32, #tpu.memory_space<vmem>>, vector<32x16xf32>
    %257 = vector.extract_strided_slice %249 {offsets = [32, 0], sizes = [32, 16], strides = [1, 1]} : vector<64x16xf32> to vector<32x16xf32>
    %258 = arith.subf %257, %256 : vector<32x16xf32>
    %259 = arith.mulf %255, %258 : vector<32x16xf32>
    %260 = arith.addf %256, %259 : vector<32x16xf32>
    %c0_201 = arith.constant 0 : index
    %c27_202 = arith.constant 27 : index
    %261 = vector.load %arg83[%c0_201, %c27_202] : memref<32x70xf32, #tpu.memory_space<vmem>>, vector<32x16xf32>
    tpu.vector_store %arg83[%c0_201, %c27_202], %260 {strides = array<i32>} : memref<32x70xf32, #tpu.memory_space<vmem>>, vector<32x16xf32>,
    %c0_203 = arith.constant 0 : index
    %c0_204 = arith.constant 0 : index
    %262 = vector.load %arg83[%c0_203, %c0_204] : memref<32x70xf32, #tpu.memory_space<vmem>>, vector<32x16xf32>
    %263 = arith.truncf %262 : vector<32x16xf32> to vector<32x16xbf16>
    %c0_205 = arith.constant 0 : index
    %c0_206 = arith.constant 0 : index
    %c0_207 = arith.constant 0 : index
    %264 = vector.load %arg22[%c0_205, %c0_206, %c0_207] : memref<3x64x32xbf16, #tpu.memory_space<vmem>>, vector<1x64x32xbf16>
    %265 = vector.shape_cast %264 : vector<1x64x32xbf16> to vector<64x32xbf16>
    %cst_208 = arith.constant dense<0.000000e+00> : vector<64x16xf32>
    %266 = tpu.matmul %265, %263, %cst_208 {dimension_numbers = #tpu.dot_dimension_numbers<[1], [0], [0], [1], [0, 0, 1, 1], [], []>} : vector<64x32xbf16>, vector<32x16xbf16>, vector<64x16xf32> -> vector<64x16xf32>
    %c0_209 = arith.constant 0 : index
    %c27_210 = arith.constant 27 : index
    %267 = vector.load %arg83[%c0_209, %c27_210] : memref<32x70xf32, #tpu.memory_space<vmem>>, vector<32x16xf32>
    %268 = arith.truncf %267 : vector<32x16xf32> to vector<32x16xbf16>
    %c1_211 = arith.constant 1 : index
    %c0_212 = arith.constant 0 : index
    %c0_213 = arith.constant 0 : index
    %269 = vector.load %arg22[%c1_211, %c0_212, %c0_213] : memref<3x64x32xbf16, #tpu.memory_space<vmem>>, vector<1x64x32xbf16>
    %270 = vector.shape_cast %269 : vector<1x64x32xbf16> to vector<64x32xbf16>
    %cst_214 = arith.constant dense<0.000000e+00> : vector<64x16xf32>
    %271 = tpu.matmul %270, %268, %cst_214 {dimension_numbers = #tpu.dot_dimension_numbers<[1], [0], [0], [1], [0, 0, 1, 1], [], []>} : vector<64x32xbf16>, vector<32x16xbf16>, vector<64x16xf32> -> vector<64x16xf32>
    %272 = arith.addf %266, %271 : vector<64x16xf32>
    %c0_215 = arith.constant 0 : index
    %c54_216 = arith.constant 54 : index
    %273 = vector.load %arg83[%c0_215, %c54_216] : memref<32x70xf32, #tpu.memory_space<vmem>>, vector<32x16xf32>
    %274 = arith.truncf %273 : vector<32x16xf32> to vector<32x16xbf16>
    %c2_217 = arith.constant 2 : index
    %c0_218 = arith.constant 0 : index
    %c0_219 = arith.constant 0 : index
    %275 = vector.load %arg22[%c2_217, %c0_218, %c0_219] : memref<3x64x32xbf16, #tpu.memory_space<vmem>>, vector<1x64x32xbf16>
    %276 = vector.shape_cast %275 : vector<1x64x32xbf16> to vector<64x32xbf16>
    %cst_220 = arith.constant dense<0.000000e+00> : vector<64x16xf32>
    %277 = tpu.matmul %276, %274, %cst_220 {dimension_numbers = #tpu.dot_dimension_numbers<[1], [0], [0], [1], [0, 0, 1, 1], [], []>} : vector<64x32xbf16>, vector<32x16xbf16>, vector<64x16xf32> -> vector<64x16xf32>
    %278 = arith.addf %272, %277 : vector<64x16xf32>
    %c0_221 = arith.constant 0 : index
    %c0_222 = arith.constant 0 : index
    %279 = vector.load %arg23[%c0_221, %c0_222] : memref<64x1xf32, #tpu.memory_space<vmem>>, vector<64x1xf32>
    %280 = vector.broadcast %279 : vector<64x1xf32> to vector<64x16xf32>
    %281 = arith.addf %278, %280 : vector<64x16xf32>
    %282 = vector.extract_strided_slice %281 {offsets = [0, 0], sizes = [32, 16], strides = [1, 1]} : vector<64x16xf32> to vector<32x16xf32>
    %283 = arith.negf %282 : vector<32x16xf32>
    %284 = math.exp %283 : vector<32x16xf32>
    %cst_223 = arith.constant 1.000000e+00 : f32
    %285 = vector.broadcast %cst_223 : f32 to vector<32x16xf32>
    %286 = arith.addf %285, %284 : vector<32x16xf32>
    %287 = arith.divf %285, %286 : vector<32x16xf32>
    %c0_224 = arith.constant 0 : index
    %c27_225 = arith.constant 27 : index
    %288 = vector.load %arg83[%c0_224, %c27_225] : memref<32x70xf32, #tpu.memory_space<vmem>>, vector<32x16xf32>
    %289 = vector.extract_strided_slice %281 {offsets = [32, 0], sizes = [32, 16], strides = [1, 1]} : vector<64x16xf32> to vector<32x16xf32>
    %290 = arith.subf %289, %288 : vector<32x16xf32>
    %291 = arith.mulf %287, %290 : vector<32x16xf32>
    %292 = arith.addf %288, %291 : vector<32x16xf32>
    %c0_226 = arith.constant 0 : index
    %c27_227 = arith.constant 27 : index
    %293 = vector.load %arg83[%c0_226, %c27_227] : memref<32x70xf32, #tpu.memory_space<vmem>>, vector<32x16xf32>
    tpu.vector_store %arg83[%c0_226, %c27_227], %292 {strides = array<i32>} : memref<32x70xf32, #tpu.memory_space<vmem>>, vector<32x16xf32>,
    %c0_228 = arith.constant 0 : index
    %c26_229 = arith.constant 26 : index
    %294 = vector.load %arg83[%c0_228, %c26_229] : memref<32x70xf32, #tpu.memory_space<vmem>>, vector<32x16xf32>
    %295 = arith.truncf %294 : vector<32x16xf32> to vector<32x16xbf16>
    %c0_230 = arith.constant 0 : index
    %c0_231 = arith.constant 0 : index
    %c0_232 = arith.constant 0 : index
    %296 = vector.load %arg24[%c0_230, %c0_231, %c0_232] : memref<3x64x32xbf16, #tpu.memory_space<vmem>>, vector<1x64x32xbf16>
    %297 = vector.shape_cast %296 : vector<1x64x32xbf16> to vector<64x32xbf16>
    %cst_233 = arith.constant dense<0.000000e+00> : vector<64x16xf32>
    %298 = tpu.matmul %297, %295, %cst_233 {dimension_numbers = #tpu.dot_dimension_numbers<[1], [0], [0], [1], [0, 0, 1, 1], [], []>} : vector<64x32xbf16>, vector<32x16xbf16>, vector<64x16xf32> -> vector<64x16xf32>
    %c0_234 = arith.constant 0 : index
    %c27_235 = arith.constant 27 : index
    %299 = vector.load %arg83[%c0_234, %c27_235] : memref<32x70xf32, #tpu.memory_space<vmem>>, vector<32x16xf32>
    %300 = arith.truncf %299 : vector<32x16xf32> to vector<32x16xbf16>
    %c1_236 = arith.constant 1 : index
    %c0_237 = arith.constant 0 : index
    %c0_238 = arith.constant 0 : index
    %301 = vector.load %arg24[%c1_236, %c0_237, %c0_238] : memref<3x64x32xbf16, #tpu.memory_space<vmem>>, vector<1x64x32xbf16>
    %302 = vector.shape_cast %301 : vector<1x64x32xbf16> to vector<64x32xbf16>
    %cst_239 = arith.constant dense<0.000000e+00> : vector<64x16xf32>
    %303 = tpu.matmul %302, %300, %cst_239 {dimension_numbers = #tpu.dot_dimension_numbers<[1], [0], [0], [1], [0, 0, 1, 1], [], []>} : vector<64x32xbf16>, vector<32x16xbf16>, vector<64x16xf32> -> vector<64x16xf32>
    %304 = arith.addf %298, %303 : vector<64x16xf32>
    %c0_240 = arith.constant 0 : index
    %c28_241 = arith.constant 28 : index
    %305 = vector.load %arg83[%c0_240, %c28_241] : memref<32x70xf32, #tpu.memory_space<vmem>>, vector<32x16xf32>
    %306 = arith.truncf %305 : vector<32x16xf32> to vector<32x16xbf16>
    %c2_242 = arith.constant 2 : index
    %c0_243 = arith.constant 0 : index
    %c0_244 = arith.constant 0 : index
    %307 = vector.load %arg24[%c2_242, %c0_243, %c0_244] : memref<3x64x32xbf16, #tpu.memory_space<vmem>>, vector<1x64x32xbf16>
    %308 = vector.shape_cast %307 : vector<1x64x32xbf16> to vector<64x32xbf16>
    %cst_245 = arith.constant dense<0.000000e+00> : vector<64x16xf32>
    %309 = tpu.matmul %308, %306, %cst_245 {dimension_numbers = #tpu.dot_dimension_numbers<[1], [0], [0], [1], [0, 0, 1, 1], [], []>} : vector<64x32xbf16>, vector<32x16xbf16>, vector<64x16xf32> -> vector<64x16xf32>
    %310 = arith.addf %304, %309 : vector<64x16xf32>
    %c0_246 = arith.constant 0 : index
    %c0_247 = arith.constant 0 : index
    %311 = vector.load %arg25[%c0_246, %c0_247] : memref<64x1xf32, #tpu.memory_space<vmem>>, vector<64x1xf32>
    %312 = vector.broadcast %311 : vector<64x1xf32> to vector<64x16xf32>
    %313 = arith.addf %310, %312 : vector<64x16xf32>
    %314 = vector.extract_strided_slice %313 {offsets = [0, 0], sizes = [32, 16], strides = [1, 1]} : vector<64x16xf32> to vector<32x16xf32>
    %315 = arith.negf %314 : vector<32x16xf32>
    %316 = math.exp %315 : vector<32x16xf32>
    %cst_248 = arith.constant 1.000000e+00 : f32
    %317 = vector.broadcast %cst_248 : f32 to vector<32x16xf32>
    %318 = arith.addf %317, %316 : vector<32x16xf32>
    %319 = arith.divf %317, %318 : vector<32x16xf32>
    %c0_249 = arith.constant 0 : index
    %c27_250 = arith.constant 27 : index
    %320 = vector.load %arg83[%c0_249, %c27_250] : memref<32x70xf32, #tpu.memory_space<vmem>>, vector<32x16xf32>
    %321 = vector.extract_strided_slice %313 {offsets = [32, 0], sizes = [32, 16], strides = [1, 1]} : vector<64x16xf32> to vector<32x16xf32>
    %322 = arith.subf %321, %320 : vector<32x16xf32>
    %323 = arith.mulf %319, %322 : vector<32x16xf32>
    %324 = arith.addf %320, %323 : vector<32x16xf32>
    %c0_251 = arith.constant 0 : index
    %c27_252 = arith.constant 27 : index
    %325 = vector.load %arg83[%c0_251, %c27_252] : memref<32x70xf32, #tpu.memory_space<vmem>>, vector<32x16xf32>
    tpu.vector_store %arg83[%c0_251, %c27_252], %324 {strides = array<i32>} : memref<32x70xf32, #tpu.memory_space<vmem>>, vector<32x16xf32>,
    %c0_253 = arith.constant 0 : index
    %c26_254 = arith.constant 26 : index
    %326 = vector.load %arg83[%c0_253, %c26_254] : memref<32x70xf32, #tpu.memory_space<vmem>>, vector<32x16xf32>
    %327 = arith.truncf %326 : vector<32x16xf32> to vector<32x16xbf16>
    %c0_255 = arith.constant 0 : index
    %c0_256 = arith.constant 0 : index
    %c0_257 = arith.constant 0 : index
    %328 = vector.load %arg26[%c0_255, %c0_256, %c0_257] : memref<3x64x32xbf16, #tpu.memory_space<vmem>>, vector<1x64x32xbf16>
    %329 = vector.shape_cast %328 : vector<1x64x32xbf16> to vector<64x32xbf16>
    %cst_258 = arith.constant dense<0.000000e+00> : vector<64x16xf32>
    %330 = tpu.matmul %329, %327, %cst_258 {dimension_numbers = #tpu.dot_dimension_numbers<[1], [0], [0], [1], [0, 0, 1, 1], [], []>} : vector<64x32xbf16>, vector<32x16xbf16>, vector<64x16xf32> -> vector<64x16xf32>
    %c0_259 = arith.constant 0 : index
    %c27_260 = arith.constant 27 : index
    %331 = vector.load %arg83[%c0_259, %c27_260] : memref<32x70xf32, #tpu.memory_space<vmem>>, vector<32x16xf32>
    %332 = arith.truncf %331 : vector<32x16xf32> to vector<32x16xbf16>
    %c1_261 = arith.constant 1 : index
    %c0_262 = arith.constant 0 : index
    %c0_263 = arith.constant 0 : index
    %333 = vector.load %arg26[%c1_261, %c0_262, %c0_263] : memref<3x64x32xbf16, #tpu.memory_space<vmem>>, vector<1x64x32xbf16>
    %334 = vector.shape_cast %333 : vector<1x64x32xbf16> to vector<64x32xbf16>
    %cst_264 = arith.constant dense<0.000000e+00> : vector<64x16xf32>
    %335 = tpu.matmul %334, %332, %cst_264 {dimension_numbers = #tpu.dot_dimension_numbers<[1], [0], [0], [1], [0, 0, 1, 1], [], []>} : vector<64x32xbf16>, vector<32x16xbf16>, vector<64x16xf32> -> vector<64x16xf32>
    %336 = arith.addf %330, %335 : vector<64x16xf32>
    %c0_265 = arith.constant 0 : index
    %c28_266 = arith.constant 28 : index
    %337 = vector.load %arg83[%c0_265, %c28_266] : memref<32x70xf32, #tpu.memory_space<vmem>>, vector<32x16xf32>
    %338 = arith.truncf %337 : vector<32x16xf32> to vector<32x16xbf16>
    %c2_267 = arith.constant 2 : index
    %c0_268 = arith.constant 0 : index
    %c0_269 = arith.constant 0 : index
    %339 = vector.load %arg26[%c2_267, %c0_268, %c0_269] : memref<3x64x32xbf16, #tpu.memory_space<vmem>>, vector<1x64x32xbf16>
    %340 = vector.shape_cast %339 : vector<1x64x32xbf16> to vector<64x32xbf16>
    %cst_270 = arith.constant dense<0.000000e+00> : vector<64x16xf32>
    %341 = tpu.matmul %340, %338, %cst_270 {dimension_numbers = #tpu.dot_dimension_numbers<[1], [0], [0], [1], [0, 0, 1, 1], [], []>} : vector<64x32xbf16>, vector<32x16xbf16>, vector<64x16xf32> -> vector<64x16xf32>
    %342 = arith.addf %336, %341 : vector<64x16xf32>
    %c0_271 = arith.constant 0 : index
    %c0_272 = arith.constant 0 : index
    %343 = vector.load %arg27[%c0_271, %c0_272] : memref<64x1xf32, #tpu.memory_space<vmem>>, vector<64x1xf32>
    %344 = vector.broadcast %343 : vector<64x1xf32> to vector<64x16xf32>
    %345 = arith.addf %342, %344 : vector<64x16xf32>
    %346 = vector.extract_strided_slice %345 {offsets = [0, 0], sizes = [32, 16], strides = [1, 1]} : vector<64x16xf32> to vector<32x16xf32>
    %347 = arith.negf %346 : vector<32x16xf32>
    %348 = math.exp %347 : vector<32x16xf32>
    %cst_273 = arith.constant 1.000000e+00 : f32
    %349 = vector.broadcast %cst_273 : f32 to vector<32x16xf32>
    %350 = arith.addf %349, %348 : vector<32x16xf32>
    %351 = arith.divf %349, %350 : vector<32x16xf32>
    %c0_274 = arith.constant 0 : index
    %c27_275 = arith.constant 27 : index
    %352 = vector.load %arg83[%c0_274, %c27_275] : memref<32x70xf32, #tpu.memory_space<vmem>>, vector<32x16xf32>
    %353 = vector.extract_strided_slice %345 {offsets = [32, 0], sizes = [32, 16], strides = [1, 1]} : vector<64x16xf32> to vector<32x16xf32>
    %354 = arith.subf %353, %352 : vector<32x16xf32>
    %355 = arith.mulf %351, %354 : vector<32x16xf32>
    %356 = arith.addf %352, %355 : vector<32x16xf32>
    %c0_276 = arith.constant 0 : index
    %c27_277 = arith.constant 27 : index
    %357 = vector.load %arg83[%c0_276, %c27_277] : memref<32x70xf32, #tpu.memory_space<vmem>>, vector<32x16xf32>
    tpu.vector_store %arg83[%c0_276, %c27_277], %356 {strides = array<i32>} : memref<32x70xf32, #tpu.memory_space<vmem>>, vector<32x16xf32>,
    %c0_278 = arith.constant 0 : index
    %c27_279 = arith.constant 27 : index
    %358 = vector.load %arg83[%c0_278, %c27_279] : memref<32x70xf32, #tpu.memory_space<vmem>>, vector<32x16xf32>
    %359 = arith.truncf %358 : vector<32x16xf32> to vector<32x16xbf16>
    %c0_280 = arith.constant 0 : index
    %c0_281 = arith.constant 0 : index
    %c0_282 = arith.constant 0 : index
    %360 = vector.load %arg28[%c0_280, %c0_281, %c0_282] : memref<1x64x32xbf16, #tpu.memory_space<vmem>>, vector<1x64x32xbf16>
    %361 = vector.shape_cast %360 : vector<1x64x32xbf16> to vector<64x32xbf16>
    %cst_283 = arith.constant dense<0.000000e+00> : vector<64x16xf32>
    %362 = tpu.matmul %361, %359, %cst_283 {dimension_numbers = #tpu.dot_dimension_numbers<[1], [0], [0], [1], [0, 0, 1, 1], [], []>} : vector<64x32xbf16>, vector<32x16xbf16>, vector<64x16xf32> -> vector<64x16xf32>
    %c0_284 = arith.constant 0 : index
    %c0_285 = arith.constant 0 : index
    %363 = vector.load %arg29[%c0_284, %c0_285] : memref<64x1xf32, #tpu.memory_space<vmem>>, vector<64x1xf32>
    %364 = vector.broadcast %363 : vector<64x1xf32> to vector<64x16xf32>
    %365 = arith.addf %362, %364 : vector<64x16xf32>
    %366 = vector.extract_strided_slice %365 {offsets = [0, 0], sizes = [32, 16], strides = [1, 1]} : vector<64x16xf32> to vector<32x16xf32>
    %367 = arith.negf %366 : vector<32x16xf32>
    %368 = math.exp %367 : vector<32x16xf32>
    %cst_286 = arith.constant 1.000000e+00 : f32
    %369 = vector.broadcast %cst_286 : f32 to vector<32x16xf32>
    %370 = arith.addf %369, %368 : vector<32x16xf32>
    %371 = arith.divf %369, %370 : vector<32x16xf32>
    %c0_287 = arith.constant 0 : index
    %c27_288 = arith.constant 27 : index
    %372 = vector.load %arg83[%c0_287, %c27_288] : memref<32x70xf32, #tpu.memory_space<vmem>>, vector<32x16xf32>
    %373 = vector.extract_strided_slice %365 {offsets = [32, 0], sizes = [32, 16], strides = [1, 1]} : vector<64x16xf32> to vector<32x16xf32>
    %374 = arith.subf %373, %372 : vector<32x16xf32>
    %375 = arith.mulf %371, %374 : vector<32x16xf32>
    %376 = arith.addf %372, %375 : vector<32x16xf32>
    %c0_289 = arith.constant 0 : index
    %c27_290 = arith.constant 27 : index
    %377 = vector.load %arg83[%c0_289, %c27_290] : memref<32x70xf32, #tpu.memory_space<vmem>>, vector<32x16xf32>
    tpu.vector_store %arg83[%c0_289, %c27_290], %376 {strides = array<i32>} : memref<32x70xf32, #tpu.memory_space<vmem>>, vector<32x16xf32>,
    %c0_291 = arith.constant 0 : index
    %c27_292 = arith.constant 27 : index
    %378 = vector.load %arg83[%c0_291, %c27_292] : memref<32x70xf32, #tpu.memory_space<vmem>>, vector<32x16xf32>
    %379 = arith.truncf %378 : vector<32x16xf32> to vector<32x16xbf16>
    %c0_293 = arith.constant 0 : index
    %c0_294 = arith.constant 0 : index
    %c0_295 = arith.constant 0 : index
    %380 = vector.load %arg30[%c0_293, %c0_294, %c0_295] : memref<1x64x32xbf16, #tpu.memory_space<vmem>>, vector<1x64x32xbf16>
    %381 = vector.shape_cast %380 : vector<1x64x32xbf16> to vector<64x32xbf16>
    %cst_296 = arith.constant dense<0.000000e+00> : vector<64x16xf32>
    %382 = tpu.matmul %381, %379, %cst_296 {dimension_numbers = #tpu.dot_dimension_numbers<[1], [0], [0], [1], [0, 0, 1, 1], [], []>} : vector<64x32xbf16>, vector<32x16xbf16>, vector<64x16xf32> -> vector<64x16xf32>
    %c0_297 = arith.constant 0 : index
    %c0_298 = arith.constant 0 : index
    %383 = vector.load %arg31[%c0_297, %c0_298] : memref<64x1xf32, #tpu.memory_space<vmem>>, vector<64x1xf32>
    %384 = vector.broadcast %383 : vector<64x1xf32> to vector<64x16xf32>
    %385 = arith.addf %382, %384 : vector<64x16xf32>
    %386 = vector.extract_strided_slice %385 {offsets = [0, 0], sizes = [32, 16], strides = [1, 1]} : vector<64x16xf32> to vector<32x16xf32>
    %387 = arith.negf %386 : vector<32x16xf32>
    %388 = math.exp %387 : vector<32x16xf32>
    %cst_299 = arith.constant 1.000000e+00 : f32
    %389 = vector.broadcast %cst_299 : f32 to vector<32x16xf32>
    %390 = arith.addf %389, %388 : vector<32x16xf32>
    %391 = arith.divf %389, %390 : vector<32x16xf32>
    %c0_300 = arith.constant 0 : index
    %c27_301 = arith.constant 27 : index
    %392 = vector.load %arg83[%c0_300, %c27_301] : memref<32x70xf32, #tpu.memory_space<vmem>>, vector<32x16xf32>
    %393 = vector.extract_strided_slice %385 {offsets = [32, 0], sizes = [32, 16], strides = [1, 1]} : vector<64x16xf32> to vector<32x16xf32>
    %394 = arith.subf %393, %392 : vector<32x16xf32>
    %395 = arith.mulf %391, %394 : vector<32x16xf32>
    %396 = arith.addf %392, %395 : vector<32x16xf32>
    %c0_302 = arith.constant 0 : index
    %c27_303 = arith.constant 27 : index
    %397 = vector.load %arg83[%c0_302, %c27_303] : memref<32x70xf32, #tpu.memory_space<vmem>>, vector<32x16xf32>
    tpu.vector_store %arg83[%c0_302, %c27_303], %396 {strides = array<i32>} : memref<32x70xf32, #tpu.memory_space<vmem>>, vector<32x16xf32>,
    %c0_304 = arith.constant 0 : index
    %c0_305 = arith.constant 0 : index
    %c0_306 = arith.constant 0 : index
    %398 = vector.load %arg2[%c0_304, %c0_305, %c0_306] : memref<1x16x8xf32, #tpu.memory_space<vmem>>, vector<1x16x8xf32>
    %399 = vector.shape_cast %398 : vector<1x16x8xf32> to vector<16x8xf32>
    %400 = arith.truncf %399 : vector<16x8xf32> to vector<16x8xbf16>
    %c0_307 = arith.constant 0 : index
    %c0_308 = arith.constant 0 : index
    %c0_309 = arith.constant 0 : index
    %401 = vector.load %arg32[%c0_307, %c0_308, %c0_309] : memref<1x16x8xbf16, #tpu.memory_space<vmem>>, vector<1x16x8xbf16>
    %402 = vector.shape_cast %401 : vector<1x16x8xbf16> to vector<16x8xbf16>
    %cst_310 = arith.constant dense<0.000000e+00> : vector<16x16xf32>
    %403 = tpu.matmul %402, %400, %cst_310 {dimension_numbers = #tpu.dot_dimension_numbers<[1], [1], [0], [0], [0, 0, 1, 0], [], []>} : vector<16x8xbf16>, vector<16x8xbf16>, vector<16x16xf32> -> vector<16x16xf32>
    %c0_311 = arith.constant 0 : index
    %c0_312 = arith.constant 0 : index
    %404 = vector.load %arg33[%c0_311, %c0_312] : memref<16x1xf32, #tpu.memory_space<vmem>>, vector<16x1xf32>
    %405 = vector.broadcast %404 : vector<16x1xf32> to vector<16x16xf32>
    %406 = arith.addf %403, %405 : vector<16x16xf32>
    %cst_313 = arith.constant 0.000000e+00 : f32
    %407 = vector.broadcast %cst_313 : f32 to vector<16x16xf32>
    %408 = arith.maximumf %406, %407 : vector<16x16xf32>
    %c0_314 = arith.constant 0 : index
    %c54_315 = arith.constant 54 : index
    %409 = vector.load %arg84[%c0_314, %c54_315] : memref<16x70xf32, #tpu.memory_space<vmem>>, vector<16x16xf32>
    tpu.vector_store %arg84[%c0_314, %c54_315], %408 {strides = array<i32>} : memref<16x70xf32, #tpu.memory_space<vmem>>, vector<16x16xf32>,
    %c0_316 = arith.constant 0 : index
    %c54_317 = arith.constant 54 : index
    %410 = vector.load %arg84[%c0_316, %c54_317] : memref<16x70xf32, #tpu.memory_space<vmem>>, vector<16x16xf32>
    %411 = arith.truncf %410 : vector<16x16xf32> to vector<16x16xbf16>
    %c0_318 = arith.constant 0 : index
    %c0_319 = arith.constant 0 : index
    %c0_320 = arith.constant 0 : index
    %412 = vector.load %arg34[%c0_318, %c0_319, %c0_320] : memref<1x16x16xbf16, #tpu.memory_space<vmem>>, vector<1x16x16xbf16>
    %413 = vector.shape_cast %412 : vector<1x16x16xbf16> to vector<16x16xbf16>
    %cst_321 = arith.constant dense<0.000000e+00> : vector<16x16xf32>
    %414 = tpu.matmul %413, %411, %cst_321 {dimension_numbers = #tpu.dot_dimension_numbers<[1], [0], [0], [1], [0, 0, 1, 1], [], []>} : vector<16x16xbf16>, vector<16x16xbf16>, vector<16x16xf32> -> vector<16x16xf32>
    %c0_322 = arith.constant 0 : index
    %c0_323 = arith.constant 0 : index
    %415 = vector.load %arg35[%c0_322, %c0_323] : memref<16x1xf32, #tpu.memory_space<vmem>>, vector<16x1xf32>
    %416 = vector.broadcast %415 : vector<16x1xf32> to vector<16x16xf32>
    %417 = arith.addf %414, %416 : vector<16x16xf32>
    %cst_324 = arith.constant 0.000000e+00 : f32
    %418 = vector.broadcast %cst_324 : f32 to vector<16x16xf32>
    %419 = arith.maximumf %417, %418 : vector<16x16xf32>
    %c0_325 = arith.constant 0 : index
    %c54_326 = arith.constant 54 : index
    %420 = vector.load %arg84[%c0_325, %c54_326] : memref<16x70xf32, #tpu.memory_space<vmem>>, vector<16x16xf32>
    tpu.vector_store %arg84[%c0_325, %c54_326], %419 {strides = array<i32>} : memref<16x70xf32, #tpu.memory_space<vmem>>, vector<16x16xf32>,
    %c0_327 = arith.constant 0 : index
    %c54_328 = arith.constant 54 : index
    %421 = vector.load %arg84[%c0_327, %c54_328] : memref<16x70xf32, #tpu.memory_space<vmem>>, vector<16x16xf32>
    %422 = arith.truncf %421 : vector<16x16xf32> to vector<16x16xbf16>
    %c0_329 = arith.constant 0 : index
    %c0_330 = arith.constant 0 : index
    %c0_331 = arith.constant 0 : index
    %423 = vector.load %arg36[%c0_329, %c0_330, %c0_331] : memref<1x16x16xbf16, #tpu.memory_space<vmem>>, vector<1x16x16xbf16>
    %424 = vector.shape_cast %423 : vector<1x16x16xbf16> to vector<16x16xbf16>
    %cst_332 = arith.constant dense<0.000000e+00> : vector<16x16xf32>
    %425 = tpu.matmul %424, %422, %cst_332 {dimension_numbers = #tpu.dot_dimension_numbers<[1], [0], [0], [1], [0, 0, 1, 1], [], []>} : vector<16x16xbf16>, vector<16x16xbf16>, vector<16x16xf32> -> vector<16x16xf32>
    %c0_333 = arith.constant 0 : index
    %c0_334 = arith.constant 0 : index
    %426 = vector.load %arg37[%c0_333, %c0_334] : memref<16x1xf32, #tpu.memory_space<vmem>>, vector<16x1xf32>
    %427 = vector.broadcast %426 : vector<16x1xf32> to vector<16x16xf32>
    %428 = arith.addf %425, %427 : vector<16x16xf32>
    %c0_335 = arith.constant 0 : index
    %c54_336 = arith.constant 54 : index
    %429 = vector.load %arg84[%c0_335, %c54_336] : memref<16x70xf32, #tpu.memory_space<vmem>>, vector<16x16xf32>
    tpu.vector_store %arg84[%c0_335, %c54_336], %428 {strides = array<i32>} : memref<16x70xf32, #tpu.memory_space<vmem>>, vector<16x16xf32>,
    %c0_337 = arith.constant 0 : index
    %c52 = arith.constant 52 : index
    %430 = vector.load %arg84[%c0_337, %c52] : memref<16x70xf32, #tpu.memory_space<vmem>>, vector<16x16xf32>
    %431 = arith.truncf %430 : vector<16x16xf32> to vector<16x16xbf16>
    %c0_338 = arith.constant 0 : index
    %c0_339 = arith.constant 0 : index
    %c0_340 = arith.constant 0 : index
    %432 = vector.load %arg38[%c0_338, %c0_339, %c0_340] : memref<3x32x16xbf16, #tpu.memory_space<vmem>>, vector<1x32x16xbf16>
    %433 = vector.shape_cast %432 : vector<1x32x16xbf16> to vector<32x16xbf16>
    %cst_341 = arith.constant dense<0.000000e+00> : vector<32x16xf32>
    %434 = tpu.matmul %433, %431, %cst_341 {dimension_numbers = #tpu.dot_dimension_numbers<[1], [0], [0], [1], [0, 0, 1, 1], [], []>} : vector<32x16xbf16>, vector<16x16xbf16>, vector<32x16xf32> -> vector<32x16xf32>
    %c0_342 = arith.constant 0 : index
    %c53 = arith.constant 53 : index
    %435 = vector.load %arg84[%c0_342, %c53] : memref<16x70xf32, #tpu.memory_space<vmem>>, vector<16x16xf32>
    %436 = arith.truncf %435 : vector<16x16xf32> to vector<16x16xbf16>
    %c1_343 = arith.constant 1 : index
    %c0_344 = arith.constant 0 : index
    %c0_345 = arith.constant 0 : index
    %437 = vector.load %arg38[%c1_343, %c0_344, %c0_345] : memref<3x32x16xbf16, #tpu.memory_space<vmem>>, vector<1x32x16xbf16>
    %438 = vector.shape_cast %437 : vector<1x32x16xbf16> to vector<32x16xbf16>
    %cst_346 = arith.constant dense<0.000000e+00> : vector<32x16xf32>
    %439 = tpu.matmul %438, %436, %cst_346 {dimension_numbers = #tpu.dot_dimension_numbers<[1], [0], [0], [1], [0, 0, 1, 1], [], []>} : vector<32x16xbf16>, vector<16x16xbf16>, vector<32x16xf32> -> vector<32x16xf32>
    %440 = arith.addf %434, %439 : vector<32x16xf32>
    %c0_347 = arith.constant 0 : index
    %c54_348 = arith.constant 54 : index
    %441 = vector.load %arg84[%c0_347, %c54_348] : memref<16x70xf32, #tpu.memory_space<vmem>>, vector<16x16xf32>
    %442 = arith.truncf %441 : vector<16x16xf32> to vector<16x16xbf16>
    %c2_349 = arith.constant 2 : index
    %c0_350 = arith.constant 0 : index
    %c0_351 = arith.constant 0 : index
    %443 = vector.load %arg38[%c2_349, %c0_350, %c0_351] : memref<3x32x16xbf16, #tpu.memory_space<vmem>>, vector<1x32x16xbf16>
    %444 = vector.shape_cast %443 : vector<1x32x16xbf16> to vector<32x16xbf16>
    %cst_352 = arith.constant dense<0.000000e+00> : vector<32x16xf32>
    %445 = tpu.matmul %444, %442, %cst_352 {dimension_numbers = #tpu.dot_dimension_numbers<[1], [0], [0], [1], [0, 0, 1, 1], [], []>} : vector<32x16xbf16>, vector<16x16xbf16>, vector<32x16xf32> -> vector<32x16xf32>
    %446 = arith.addf %440, %445 : vector<32x16xf32>
    %c0_353 = arith.constant 0 : index
    %c0_354 = arith.constant 0 : index
    %447 = vector.load %arg39[%c0_353, %c0_354] : memref<32x1xf32, #tpu.memory_space<vmem>>, vector<32x1xf32>
    %448 = vector.broadcast %447 : vector<32x1xf32> to vector<32x16xf32>
    %449 = arith.addf %446, %448 : vector<32x16xf32>
    %450 = vector.extract_strided_slice %449 {offsets = [0, 0], sizes = [16, 16], strides = [1, 1]} : vector<32x16xf32> to vector<16x16xf32>
    %451 = arith.negf %450 : vector<16x16xf32>
    %452 = math.exp %451 : vector<16x16xf32>
    %cst_355 = arith.constant 1.000000e+00 : f32
    %453 = vector.broadcast %cst_355 : f32 to vector<16x16xf32>
    %454 = arith.addf %453, %452 : vector<16x16xf32>
    %455 = arith.divf %453, %454 : vector<16x16xf32>
    %c0_356 = arith.constant 0 : index
    %c54_357 = arith.constant 54 : index
    %456 = vector.load %arg84[%c0_356, %c54_357] : memref<16x70xf32, #tpu.memory_space<vmem>>, vector<16x16xf32>
    %457 = vector.extract_strided_slice %449 {offsets = [16, 0], sizes = [16, 16], strides = [1, 1]} : vector<32x16xf32> to vector<16x16xf32>
    %458 = arith.subf %457, %456 : vector<16x16xf32>
    %459 = arith.mulf %455, %458 : vector<16x16xf32>
    %460 = arith.addf %456, %459 : vector<16x16xf32>
    %c0_358 = arith.constant 0 : index
    %c54_359 = arith.constant 54 : index
    %461 = vector.load %arg84[%c0_358, %c54_359] : memref<16x70xf32, #tpu.memory_space<vmem>>, vector<16x16xf32>
    tpu.vector_store %arg84[%c0_358, %c54_359], %460 {strides = array<i32>} : memref<16x70xf32, #tpu.memory_space<vmem>>, vector<16x16xf32>,
    %c0_360 = arith.constant 0 : index
    %c48 = arith.constant 48 : index
    %462 = vector.load %arg84[%c0_360, %c48] : memref<16x70xf32, #tpu.memory_space<vmem>>, vector<16x16xf32>
    %463 = arith.truncf %462 : vector<16x16xf32> to vector<16x16xbf16>
    %c0_361 = arith.constant 0 : index
    %c0_362 = arith.constant 0 : index
    %c0_363 = arith.constant 0 : index
    %464 = vector.load %arg40[%c0_361, %c0_362, %c0_363] : memref<3x32x16xbf16, #tpu.memory_space<vmem>>, vector<1x32x16xbf16>
    %465 = vector.shape_cast %464 : vector<1x32x16xbf16> to vector<32x16xbf16>
    %cst_364 = arith.constant dense<0.000000e+00> : vector<32x16xf32>
    %466 = tpu.matmul %465, %463, %cst_364 {dimension_numbers = #tpu.dot_dimension_numbers<[1], [0], [0], [1], [0, 0, 1, 1], [], []>} : vector<32x16xbf16>, vector<16x16xbf16>, vector<32x16xf32> -> vector<32x16xf32>
    %c0_365 = arith.constant 0 : index
    %c51 = arith.constant 51 : index
    %467 = vector.load %arg84[%c0_365, %c51] : memref<16x70xf32, #tpu.memory_space<vmem>>, vector<16x16xf32>
    %468 = arith.truncf %467 : vector<16x16xf32> to vector<16x16xbf16>
    %c1_366 = arith.constant 1 : index
    %c0_367 = arith.constant 0 : index
    %c0_368 = arith.constant 0 : index
    %469 = vector.load %arg40[%c1_366, %c0_367, %c0_368] : memref<3x32x16xbf16, #tpu.memory_space<vmem>>, vector<1x32x16xbf16>
    %470 = vector.shape_cast %469 : vector<1x32x16xbf16> to vector<32x16xbf16>
    %cst_369 = arith.constant dense<0.000000e+00> : vector<32x16xf32>
    %471 = tpu.matmul %470, %468, %cst_369 {dimension_numbers = #tpu.dot_dimension_numbers<[1], [0], [0], [1], [0, 0, 1, 1], [], []>} : vector<32x16xbf16>, vector<16x16xbf16>, vector<32x16xf32> -> vector<32x16xf32>
    %472 = arith.addf %466, %471 : vector<32x16xf32>
    %c0_370 = arith.constant 0 : index
    %c54_371 = arith.constant 54 : index
    %473 = vector.load %arg84[%c0_370, %c54_371] : memref<16x70xf32, #tpu.memory_space<vmem>>, vector<16x16xf32>
    %474 = arith.truncf %473 : vector<16x16xf32> to vector<16x16xbf16>
    %c2_372 = arith.constant 2 : index
    %c0_373 = arith.constant 0 : index
    %c0_374 = arith.constant 0 : index
    %475 = vector.load %arg40[%c2_372, %c0_373, %c0_374] : memref<3x32x16xbf16, #tpu.memory_space<vmem>>, vector<1x32x16xbf16>
    %476 = vector.shape_cast %475 : vector<1x32x16xbf16> to vector<32x16xbf16>
    %cst_375 = arith.constant dense<0.000000e+00> : vector<32x16xf32>
    %477 = tpu.matmul %476, %474, %cst_375 {dimension_numbers = #tpu.dot_dimension_numbers<[1], [0], [0], [1], [0, 0, 1, 1], [], []>} : vector<32x16xbf16>, vector<16x16xbf16>, vector<32x16xf32> -> vector<32x16xf32>
    %478 = arith.addf %472, %477 : vector<32x16xf32>
    %c0_376 = arith.constant 0 : index
    %c0_377 = arith.constant 0 : index
    %479 = vector.load %arg41[%c0_376, %c0_377] : memref<32x1xf32, #tpu.memory_space<vmem>>, vector<32x1xf32>
    %480 = vector.broadcast %479 : vector<32x1xf32> to vector<32x16xf32>
    %481 = arith.addf %478, %480 : vector<32x16xf32>
    %482 = vector.extract_strided_slice %481 {offsets = [0, 0], sizes = [16, 16], strides = [1, 1]} : vector<32x16xf32> to vector<16x16xf32>
    %483 = arith.negf %482 : vector<16x16xf32>
    %484 = math.exp %483 : vector<16x16xf32>
    %cst_378 = arith.constant 1.000000e+00 : f32
    %485 = vector.broadcast %cst_378 : f32 to vector<16x16xf32>
    %486 = arith.addf %485, %484 : vector<16x16xf32>
    %487 = arith.divf %485, %486 : vector<16x16xf32>
    %c0_379 = arith.constant 0 : index
    %c54_380 = arith.constant 54 : index
    %488 = vector.load %arg84[%c0_379, %c54_380] : memref<16x70xf32, #tpu.memory_space<vmem>>, vector<16x16xf32>
    %489 = vector.extract_strided_slice %481 {offsets = [16, 0], sizes = [16, 16], strides = [1, 1]} : vector<32x16xf32> to vector<16x16xf32>
    %490 = arith.subf %489, %488 : vector<16x16xf32>
    %491 = arith.mulf %487, %490 : vector<16x16xf32>
    %492 = arith.addf %488, %491 : vector<16x16xf32>
    %c0_381 = arith.constant 0 : index
    %c54_382 = arith.constant 54 : index
    %493 = vector.load %arg84[%c0_381, %c54_382] : memref<16x70xf32, #tpu.memory_space<vmem>>, vector<16x16xf32>
    tpu.vector_store %arg84[%c0_381, %c54_382], %492 {strides = array<i32>} : memref<16x70xf32, #tpu.memory_space<vmem>>, vector<16x16xf32>,
    %c0_383 = arith.constant 0 : index
    %c36_384 = arith.constant 36 : index
    %494 = vector.load %arg84[%c0_383, %c36_384] : memref<16x70xf32, #tpu.memory_space<vmem>>, vector<16x16xf32>
    %495 = arith.truncf %494 : vector<16x16xf32> to vector<16x16xbf16>
    %c0_385 = arith.constant 0 : index
    %c0_386 = arith.constant 0 : index
    %c0_387 = arith.constant 0 : index
    %496 = vector.load %arg42[%c0_385, %c0_386, %c0_387] : memref<3x32x16xbf16, #tpu.memory_space<vmem>>, vector<1x32x16xbf16>
    %497 = vector.shape_cast %496 : vector<1x32x16xbf16> to vector<32x16xbf16>
    %cst_388 = arith.constant dense<0.000000e+00> : vector<32x16xf32>
    %498 = tpu.matmul %497, %495, %cst_388 {dimension_numbers = #tpu.dot_dimension_numbers<[1], [0], [0], [1], [0, 0, 1, 1], [], []>} : vector<32x16xbf16>, vector<16x16xbf16>, vector<32x16xf32> -> vector<32x16xf32>
    %c0_389 = arith.constant 0 : index
    %c45 = arith.constant 45 : index
    %499 = vector.load %arg84[%c0_389, %c45] : memref<16x70xf32, #tpu.memory_space<vmem>>, vector<16x16xf32>
    %500 = arith.truncf %499 : vector<16x16xf32> to vector<16x16xbf16>
    %c1_390 = arith.constant 1 : index
    %c0_391 = arith.constant 0 : index
    %c0_392 = arith.constant 0 : index
    %501 = vector.load %arg42[%c1_390, %c0_391, %c0_392] : memref<3x32x16xbf16, #tpu.memory_space<vmem>>, vector<1x32x16xbf16>
    %502 = vector.shape_cast %501 : vector<1x32x16xbf16> to vector<32x16xbf16>
    %cst_393 = arith.constant dense<0.000000e+00> : vector<32x16xf32>
    %503 = tpu.matmul %502, %500, %cst_393 {dimension_numbers = #tpu.dot_dimension_numbers<[1], [0], [0], [1], [0, 0, 1, 1], [], []>} : vector<32x16xbf16>, vector<16x16xbf16>, vector<32x16xf32> -> vector<32x16xf32>
    %504 = arith.addf %498, %503 : vector<32x16xf32>
    %c0_394 = arith.constant 0 : index
    %c54_395 = arith.constant 54 : index
    %505 = vector.load %arg84[%c0_394, %c54_395] : memref<16x70xf32, #tpu.memory_space<vmem>>, vector<16x16xf32>
    %506 = arith.truncf %505 : vector<16x16xf32> to vector<16x16xbf16>
    %c2_396 = arith.constant 2 : index
    %c0_397 = arith.constant 0 : index
    %c0_398 = arith.constant 0 : index
    %507 = vector.load %arg42[%c2_396, %c0_397, %c0_398] : memref<3x32x16xbf16, #tpu.memory_space<vmem>>, vector<1x32x16xbf16>
    %508 = vector.shape_cast %507 : vector<1x32x16xbf16> to vector<32x16xbf16>
    %cst_399 = arith.constant dense<0.000000e+00> : vector<32x16xf32>
    %509 = tpu.matmul %508, %506, %cst_399 {dimension_numbers = #tpu.dot_dimension_numbers<[1], [0], [0], [1], [0, 0, 1, 1], [], []>} : vector<32x16xbf16>, vector<16x16xbf16>, vector<32x16xf32> -> vector<32x16xf32>
    %510 = arith.addf %504, %509 : vector<32x16xf32>
    %c0_400 = arith.constant 0 : index
    %c0_401 = arith.constant 0 : index
    %511 = vector.load %arg43[%c0_400, %c0_401] : memref<32x1xf32, #tpu.memory_space<vmem>>, vector<32x1xf32>
    %512 = vector.broadcast %511 : vector<32x1xf32> to vector<32x16xf32>
    %513 = arith.addf %510, %512 : vector<32x16xf32>
    %514 = vector.extract_strided_slice %513 {offsets = [0, 0], sizes = [16, 16], strides = [1, 1]} : vector<32x16xf32> to vector<16x16xf32>
    %515 = arith.negf %514 : vector<16x16xf32>
    %516 = math.exp %515 : vector<16x16xf32>
    %cst_402 = arith.constant 1.000000e+00 : f32
    %517 = vector.broadcast %cst_402 : f32 to vector<16x16xf32>
    %518 = arith.addf %517, %516 : vector<16x16xf32>
    %519 = arith.divf %517, %518 : vector<16x16xf32>
    %c0_403 = arith.constant 0 : index
    %c54_404 = arith.constant 54 : index
    %520 = vector.load %arg84[%c0_403, %c54_404] : memref<16x70xf32, #tpu.memory_space<vmem>>, vector<16x16xf32>
    %521 = vector.extract_strided_slice %513 {offsets = [16, 0], sizes = [16, 16], strides = [1, 1]} : vector<32x16xf32> to vector<16x16xf32>
    %522 = arith.subf %521, %520 : vector<16x16xf32>
    %523 = arith.mulf %519, %522 : vector<16x16xf32>
    %524 = arith.addf %520, %523 : vector<16x16xf32>
    %c0_405 = arith.constant 0 : index
    %c54_406 = arith.constant 54 : index
    %525 = vector.load %arg84[%c0_405, %c54_406] : memref<16x70xf32, #tpu.memory_space<vmem>>, vector<16x16xf32>
    tpu.vector_store %arg84[%c0_405, %c54_406], %524 {strides = array<i32>} : memref<16x70xf32, #tpu.memory_space<vmem>>, vector<16x16xf32>,
    %c0_407 = arith.constant 0 : index
    %c0_408 = arith.constant 0 : index
    %526 = vector.load %arg84[%c0_407, %c0_408] : memref<16x70xf32, #tpu.memory_space<vmem>>, vector<16x16xf32>
    %527 = arith.truncf %526 : vector<16x16xf32> to vector<16x16xbf16>
    %c0_409 = arith.constant 0 : index
    %c0_410 = arith.constant 0 : index
    %c0_411 = arith.constant 0 : index
    %528 = vector.load %arg44[%c0_409, %c0_410, %c0_411] : memref<3x32x16xbf16, #tpu.memory_space<vmem>>, vector<1x32x16xbf16>
    %529 = vector.shape_cast %528 : vector<1x32x16xbf16> to vector<32x16xbf16>
    %cst_412 = arith.constant dense<0.000000e+00> : vector<32x16xf32>
    %530 = tpu.matmul %529, %527, %cst_412 {dimension_numbers = #tpu.dot_dimension_numbers<[1], [0], [0], [1], [0, 0, 1, 1], [], []>} : vector<32x16xbf16>, vector<16x16xbf16>, vector<32x16xf32> -> vector<32x16xf32>
    %c0_413 = arith.constant 0 : index
    %c27_414 = arith.constant 27 : index
    %531 = vector.load %arg84[%c0_413, %c27_414] : memref<16x70xf32, #tpu.memory_space<vmem>>, vector<16x16xf32>
    %532 = arith.truncf %531 : vector<16x16xf32> to vector<16x16xbf16>
    %c1_415 = arith.constant 1 : index
    %c0_416 = arith.constant 0 : index
    %c0_417 = arith.constant 0 : index
    %533 = vector.load %arg44[%c1_415, %c0_416, %c0_417] : memref<3x32x16xbf16, #tpu.memory_space<vmem>>, vector<1x32x16xbf16>
    %534 = vector.shape_cast %533 : vector<1x32x16xbf16> to vector<32x16xbf16>
    %cst_418 = arith.constant dense<0.000000e+00> : vector<32x16xf32>
    %535 = tpu.matmul %534, %532, %cst_418 {dimension_numbers = #tpu.dot_dimension_numbers<[1], [0], [0], [1], [0, 0, 1, 1], [], []>} : vector<32x16xbf16>, vector<16x16xbf16>, vector<32x16xf32> -> vector<32x16xf32>
    %536 = arith.addf %530, %535 : vector<32x16xf32>
    %c0_419 = arith.constant 0 : index
    %c54_420 = arith.constant 54 : index
    %537 = vector.load %arg84[%c0_419, %c54_420] : memref<16x70xf32, #tpu.memory_space<vmem>>, vector<16x16xf32>
    %538 = arith.truncf %537 : vector<16x16xf32> to vector<16x16xbf16>
    %c2_421 = arith.constant 2 : index
    %c0_422 = arith.constant 0 : index
    %c0_423 = arith.constant 0 : index
    %539 = vector.load %arg44[%c2_421, %c0_422, %c0_423] : memref<3x32x16xbf16, #tpu.memory_space<vmem>>, vector<1x32x16xbf16>
    %540 = vector.shape_cast %539 : vector<1x32x16xbf16> to vector<32x16xbf16>
    %cst_424 = arith.constant dense<0.000000e+00> : vector<32x16xf32>
    %541 = tpu.matmul %540, %538, %cst_424 {dimension_numbers = #tpu.dot_dimension_numbers<[1], [0], [0], [1], [0, 0, 1, 1], [], []>} : vector<32x16xbf16>, vector<16x16xbf16>, vector<32x16xf32> -> vector<32x16xf32>
    %542 = arith.addf %536, %541 : vector<32x16xf32>
    %c0_425 = arith.constant 0 : index
    %c0_426 = arith.constant 0 : index
    %543 = vector.load %arg45[%c0_425, %c0_426] : memref<32x1xf32, #tpu.memory_space<vmem>>, vector<32x1xf32>
    %544 = vector.broadcast %543 : vector<32x1xf32> to vector<32x16xf32>
    %545 = arith.addf %542, %544 : vector<32x16xf32>
    %546 = vector.extract_strided_slice %545 {offsets = [0, 0], sizes = [16, 16], strides = [1, 1]} : vector<32x16xf32> to vector<16x16xf32>
    %547 = arith.negf %546 : vector<16x16xf32>
    %548 = math.exp %547 : vector<16x16xf32>
    %cst_427 = arith.constant 1.000000e+00 : f32
    %549 = vector.broadcast %cst_427 : f32 to vector<16x16xf32>
    %550 = arith.addf %549, %548 : vector<16x16xf32>
    %551 = arith.divf %549, %550 : vector<16x16xf32>
    %c0_428 = arith.constant 0 : index
    %c54_429 = arith.constant 54 : index
    %552 = vector.load %arg84[%c0_428, %c54_429] : memref<16x70xf32, #tpu.memory_space<vmem>>, vector<16x16xf32>
    %553 = vector.extract_strided_slice %545 {offsets = [16, 0], sizes = [16, 16], strides = [1, 1]} : vector<32x16xf32> to vector<16x16xf32>
    %554 = arith.subf %553, %552 : vector<16x16xf32>
    %555 = arith.mulf %551, %554 : vector<16x16xf32>
    %556 = arith.addf %552, %555 : vector<16x16xf32>
    %c0_430 = arith.constant 0 : index
    %c54_431 = arith.constant 54 : index
    %557 = vector.load %arg84[%c0_430, %c54_431] : memref<16x70xf32, #tpu.memory_space<vmem>>, vector<16x16xf32>
    tpu.vector_store %arg84[%c0_430, %c54_431], %556 {strides = array<i32>} : memref<16x70xf32, #tpu.memory_space<vmem>>, vector<16x16xf32>,
    %c0_432 = arith.constant 0 : index
    %c52_433 = arith.constant 52 : index
    %558 = vector.load %arg84[%c0_432, %c52_433] : memref<16x70xf32, #tpu.memory_space<vmem>>, vector<16x16xf32>
    %559 = arith.truncf %558 : vector<16x16xf32> to vector<16x16xbf16>
    %c0_434 = arith.constant 0 : index
    %c0_435 = arith.constant 0 : index
    %c0_436 = arith.constant 0 : index
    %560 = vector.load %arg46[%c0_434, %c0_435, %c0_436] : memref<3x32x16xbf16, #tpu.memory_space<vmem>>, vector<1x32x16xbf16>
    %561 = vector.shape_cast %560 : vector<1x32x16xbf16> to vector<32x16xbf16>
    %cst_437 = arith.constant dense<0.000000e+00> : vector<32x16xf32>
    %562 = tpu.matmul %561, %559, %cst_437 {dimension_numbers = #tpu.dot_dimension_numbers<[1], [0], [0], [1], [0, 0, 1, 1], [], []>} : vector<32x16xbf16>, vector<16x16xbf16>, vector<32x16xf32> -> vector<32x16xf32>
    %c0_438 = arith.constant 0 : index
    %c53_439 = arith.constant 53 : index
    %563 = vector.load %arg84[%c0_438, %c53_439] : memref<16x70xf32, #tpu.memory_space<vmem>>, vector<16x16xf32>
    %564 = arith.truncf %563 : vector<16x16xf32> to vector<16x16xbf16>
    %c1_440 = arith.constant 1 : index
    %c0_441 = arith.constant 0 : index
    %c0_442 = arith.constant 0 : index
    %565 = vector.load %arg46[%c1_440, %c0_441, %c0_442] : memref<3x32x16xbf16, #tpu.memory_space<vmem>>, vector<1x32x16xbf16>
    %566 = vector.shape_cast %565 : vector<1x32x16xbf16> to vector<32x16xbf16>
    %cst_443 = arith.constant dense<0.000000e+00> : vector<32x16xf32>
    %567 = tpu.matmul %566, %564, %cst_443 {dimension_numbers = #tpu.dot_dimension_numbers<[1], [0], [0], [1], [0, 0, 1, 1], [], []>} : vector<32x16xbf16>, vector<16x16xbf16>, vector<32x16xf32> -> vector<32x16xf32>
    %568 = arith.addf %562, %567 : vector<32x16xf32>
    %c0_444 = arith.constant 0 : index
    %c54_445 = arith.constant 54 : index
    %569 = vector.load %arg84[%c0_444, %c54_445] : memref<16x70xf32, #tpu.memory_space<vmem>>, vector<16x16xf32>
    %570 = arith.truncf %569 : vector<16x16xf32> to vector<16x16xbf16>
    %c2_446 = arith.constant 2 : index
    %c0_447 = arith.constant 0 : index
    %c0_448 = arith.constant 0 : index
    %571 = vector.load %arg46[%c2_446, %c0_447, %c0_448] : memref<3x32x16xbf16, #tpu.memory_space<vmem>>, vector<1x32x16xbf16>
    %572 = vector.shape_cast %571 : vector<1x32x16xbf16> to vector<32x16xbf16>
    %cst_449 = arith.constant dense<0.000000e+00> : vector<32x16xf32>
    %573 = tpu.matmul %572, %570, %cst_449 {dimension_numbers = #tpu.dot_dimension_numbers<[1], [0], [0], [1], [0, 0, 1, 1], [], []>} : vector<32x16xbf16>, vector<16x16xbf16>, vector<32x16xf32> -> vector<32x16xf32>
    %574 = arith.addf %568, %573 : vector<32x16xf32>
    %c0_450 = arith.constant 0 : index
    %c0_451 = arith.constant 0 : index
    %575 = vector.load %arg47[%c0_450, %c0_451] : memref<32x1xf32, #tpu.memory_space<vmem>>, vector<32x1xf32>
    %576 = vector.broadcast %575 : vector<32x1xf32> to vector<32x16xf32>
    %577 = arith.addf %574, %576 : vector<32x16xf32>
    %578 = vector.extract_strided_slice %577 {offsets = [0, 0], sizes = [16, 16], strides = [1, 1]} : vector<32x16xf32> to vector<16x16xf32>
    %579 = arith.negf %578 : vector<16x16xf32>
    %580 = math.exp %579 : vector<16x16xf32>
    %cst_452 = arith.constant 1.000000e+00 : f32
    %581 = vector.broadcast %cst_452 : f32 to vector<16x16xf32>
    %582 = arith.addf %581, %580 : vector<16x16xf32>
    %583 = arith.divf %581, %582 : vector<16x16xf32>
    %c0_453 = arith.constant 0 : index
    %c54_454 = arith.constant 54 : index
    %584 = vector.load %arg84[%c0_453, %c54_454] : memref<16x70xf32, #tpu.memory_space<vmem>>, vector<16x16xf32>
    %585 = vector.extract_strided_slice %577 {offsets = [16, 0], sizes = [16, 16], strides = [1, 1]} : vector<32x16xf32> to vector<16x16xf32>
    %586 = arith.subf %585, %584 : vector<16x16xf32>
    %587 = arith.mulf %583, %586 : vector<16x16xf32>
    %588 = arith.addf %584, %587 : vector<16x16xf32>
    %c0_455 = arith.constant 0 : index
    %c54_456 = arith.constant 54 : index
    %589 = vector.load %arg84[%c0_455, %c54_456] : memref<16x70xf32, #tpu.memory_space<vmem>>, vector<16x16xf32>
    tpu.vector_store %arg84[%c0_455, %c54_456], %588 {strides = array<i32>} : memref<16x70xf32, #tpu.memory_space<vmem>>, vector<16x16xf32>,
    %c0_457 = arith.constant 0 : index
    %c48_458 = arith.constant 48 : index
    %590 = vector.load %arg84[%c0_457, %c48_458] : memref<16x70xf32, #tpu.memory_space<vmem>>, vector<16x16xf32>
    %591 = arith.truncf %590 : vector<16x16xf32> to vector<16x16xbf16>
    %c0_459 = arith.constant 0 : index
    %c0_460 = arith.constant 0 : index
    %c0_461 = arith.constant 0 : index
    %592 = vector.load %arg48[%c0_459, %c0_460, %c0_461] : memref<3x32x16xbf16, #tpu.memory_space<vmem>>, vector<1x32x16xbf16>
    %593 = vector.shape_cast %592 : vector<1x32x16xbf16> to vector<32x16xbf16>
    %cst_462 = arith.constant dense<0.000000e+00> : vector<32x16xf32>
    %594 = tpu.matmul %593, %591, %cst_462 {dimension_numbers = #tpu.dot_dimension_numbers<[1], [0], [0], [1], [0, 0, 1, 1], [], []>} : vector<32x16xbf16>, vector<16x16xbf16>, vector<32x16xf32> -> vector<32x16xf32>
    %c0_463 = arith.constant 0 : index
    %c51_464 = arith.constant 51 : index
    %595 = vector.load %arg84[%c0_463, %c51_464] : memref<16x70xf32, #tpu.memory_space<vmem>>, vector<16x16xf32>
    %596 = arith.truncf %595 : vector<16x16xf32> to vector<16x16xbf16>
    %c1_465 = arith.constant 1 : index
    %c0_466 = arith.constant 0 : index
    %c0_467 = arith.constant 0 : index
    %597 = vector.load %arg48[%c1_465, %c0_466, %c0_467] : memref<3x32x16xbf16, #tpu.memory_space<vmem>>, vector<1x32x16xbf16>
    %598 = vector.shape_cast %597 : vector<1x32x16xbf16> to vector<32x16xbf16>
    %cst_468 = arith.constant dense<0.000000e+00> : vector<32x16xf32>
    %599 = tpu.matmul %598, %596, %cst_468 {dimension_numbers = #tpu.dot_dimension_numbers<[1], [0], [0], [1], [0, 0, 1, 1], [], []>} : vector<32x16xbf16>, vector<16x16xbf16>, vector<32x16xf32> -> vector<32x16xf32>
    %600 = arith.addf %594, %599 : vector<32x16xf32>
    %c0_469 = arith.constant 0 : index
    %c54_470 = arith.constant 54 : index
    %601 = vector.load %arg84[%c0_469, %c54_470] : memref<16x70xf32, #tpu.memory_space<vmem>>, vector<16x16xf32>
    %602 = arith.truncf %601 : vector<16x16xf32> to vector<16x16xbf16>
    %c2_471 = arith.constant 2 : index
    %c0_472 = arith.constant 0 : index
    %c0_473 = arith.constant 0 : index
    %603 = vector.load %arg48[%c2_471, %c0_472, %c0_473] : memref<3x32x16xbf16, #tpu.memory_space<vmem>>, vector<1x32x16xbf16>
    %604 = vector.shape_cast %603 : vector<1x32x16xbf16> to vector<32x16xbf16>
    %cst_474 = arith.constant dense<0.000000e+00> : vector<32x16xf32>
    %605 = tpu.matmul %604, %602, %cst_474 {dimension_numbers = #tpu.dot_dimension_numbers<[1], [0], [0], [1], [0, 0, 1, 1], [], []>} : vector<32x16xbf16>, vector<16x16xbf16>, vector<32x16xf32> -> vector<32x16xf32>
    %606 = arith.addf %600, %605 : vector<32x16xf32>
    %c0_475 = arith.constant 0 : index
    %c0_476 = arith.constant 0 : index
    %607 = vector.load %arg49[%c0_475, %c0_476] : memref<32x1xf32, #tpu.memory_space<vmem>>, vector<32x1xf32>
    %608 = vector.broadcast %607 : vector<32x1xf32> to vector<32x16xf32>
    %609 = arith.addf %606, %608 : vector<32x16xf32>
    %610 = vector.extract_strided_slice %609 {offsets = [0, 0], sizes = [16, 16], strides = [1, 1]} : vector<32x16xf32> to vector<16x16xf32>
    %611 = arith.negf %610 : vector<16x16xf32>
    %612 = math.exp %611 : vector<16x16xf32>
    %cst_477 = arith.constant 1.000000e+00 : f32
    %613 = vector.broadcast %cst_477 : f32 to vector<16x16xf32>
    %614 = arith.addf %613, %612 : vector<16x16xf32>
    %615 = arith.divf %613, %614 : vector<16x16xf32>
    %c0_478 = arith.constant 0 : index
    %c54_479 = arith.constant 54 : index
    %616 = vector.load %arg84[%c0_478, %c54_479] : memref<16x70xf32, #tpu.memory_space<vmem>>, vector<16x16xf32>
    %617 = vector.extract_strided_slice %609 {offsets = [16, 0], sizes = [16, 16], strides = [1, 1]} : vector<32x16xf32> to vector<16x16xf32>
    %618 = arith.subf %617, %616 : vector<16x16xf32>
    %619 = arith.mulf %615, %618 : vector<16x16xf32>
    %620 = arith.addf %616, %619 : vector<16x16xf32>
    %c0_480 = arith.constant 0 : index
    %c54_481 = arith.constant 54 : index
    %621 = vector.load %arg84[%c0_480, %c54_481] : memref<16x70xf32, #tpu.memory_space<vmem>>, vector<16x16xf32>
    tpu.vector_store %arg84[%c0_480, %c54_481], %620 {strides = array<i32>} : memref<16x70xf32, #tpu.memory_space<vmem>>, vector<16x16xf32>,
    %c0_482 = arith.constant 0 : index
    %c36_483 = arith.constant 36 : index
    %622 = vector.load %arg84[%c0_482, %c36_483] : memref<16x70xf32, #tpu.memory_space<vmem>>, vector<16x16xf32>
    %623 = arith.truncf %622 : vector<16x16xf32> to vector<16x16xbf16>
    %c0_484 = arith.constant 0 : index
    %c0_485 = arith.constant 0 : index
    %c0_486 = arith.constant 0 : index
    %624 = vector.load %arg50[%c0_484, %c0_485, %c0_486] : memref<3x32x16xbf16, #tpu.memory_space<vmem>>, vector<1x32x16xbf16>
    %625 = vector.shape_cast %624 : vector<1x32x16xbf16> to vector<32x16xbf16>
    %cst_487 = arith.constant dense<0.000000e+00> : vector<32x16xf32>
    %626 = tpu.matmul %625, %623, %cst_487 {dimension_numbers = #tpu.dot_dimension_numbers<[1], [0], [0], [1], [0, 0, 1, 1], [], []>} : vector<32x16xbf16>, vector<16x16xbf16>, vector<32x16xf32> -> vector<32x16xf32>
    %c0_488 = arith.constant 0 : index
    %c45_489 = arith.constant 45 : index
    %627 = vector.load %arg84[%c0_488, %c45_489] : memref<16x70xf32, #tpu.memory_space<vmem>>, vector<16x16xf32>
    %628 = arith.truncf %627 : vector<16x16xf32> to vector<16x16xbf16>
    %c1_490 = arith.constant 1 : index
    %c0_491 = arith.constant 0 : index
    %c0_492 = arith.constant 0 : index
    %629 = vector.load %arg50[%c1_490, %c0_491, %c0_492] : memref<3x32x16xbf16, #tpu.memory_space<vmem>>, vector<1x32x16xbf16>
    %630 = vector.shape_cast %629 : vector<1x32x16xbf16> to vector<32x16xbf16>
    %cst_493 = arith.constant dense<0.000000e+00> : vector<32x16xf32>
    %631 = tpu.matmul %630, %628, %cst_493 {dimension_numbers = #tpu.dot_dimension_numbers<[1], [0], [0], [1], [0, 0, 1, 1], [], []>} : vector<32x16xbf16>, vector<16x16xbf16>, vector<32x16xf32> -> vector<32x16xf32>
    %632 = arith.addf %626, %631 : vector<32x16xf32>
    %c0_494 = arith.constant 0 : index
    %c54_495 = arith.constant 54 : index
    %633 = vector.load %arg84[%c0_494, %c54_495] : memref<16x70xf32, #tpu.memory_space<vmem>>, vector<16x16xf32>
    %634 = arith.truncf %633 : vector<16x16xf32> to vector<16x16xbf16>
    %c2_496 = arith.constant 2 : index
    %c0_497 = arith.constant 0 : index
    %c0_498 = arith.constant 0 : index
    %635 = vector.load %arg50[%c2_496, %c0_497, %c0_498] : memref<3x32x16xbf16, #tpu.memory_space<vmem>>, vector<1x32x16xbf16>
    %636 = vector.shape_cast %635 : vector<1x32x16xbf16> to vector<32x16xbf16>
    %cst_499 = arith.constant dense<0.000000e+00> : vector<32x16xf32>
    %637 = tpu.matmul %636, %634, %cst_499 {dimension_numbers = #tpu.dot_dimension_numbers<[1], [0], [0], [1], [0, 0, 1, 1], [], []>} : vector<32x16xbf16>, vector<16x16xbf16>, vector<32x16xf32> -> vector<32x16xf32>
    %638 = arith.addf %632, %637 : vector<32x16xf32>
    %c0_500 = arith.constant 0 : index
    %c0_501 = arith.constant 0 : index
    %639 = vector.load %arg51[%c0_500, %c0_501] : memref<32x1xf32, #tpu.memory_space<vmem>>, vector<32x1xf32>
    %640 = vector.broadcast %639 : vector<32x1xf32> to vector<32x16xf32>
    %641 = arith.addf %638, %640 : vector<32x16xf32>
    %642 = vector.extract_strided_slice %641 {offsets = [0, 0], sizes = [16, 16], strides = [1, 1]} : vector<32x16xf32> to vector<16x16xf32>
    %643 = arith.negf %642 : vector<16x16xf32>
    %644 = math.exp %643 : vector<16x16xf32>
    %cst_502 = arith.constant 1.000000e+00 : f32
    %645 = vector.broadcast %cst_502 : f32 to vector<16x16xf32>
    %646 = arith.addf %645, %644 : vector<16x16xf32>
    %647 = arith.divf %645, %646 : vector<16x16xf32>
    %c0_503 = arith.constant 0 : index
    %c54_504 = arith.constant 54 : index
    %648 = vector.load %arg84[%c0_503, %c54_504] : memref<16x70xf32, #tpu.memory_space<vmem>>, vector<16x16xf32>
    %649 = vector.extract_strided_slice %641 {offsets = [16, 0], sizes = [16, 16], strides = [1, 1]} : vector<32x16xf32> to vector<16x16xf32>
    %650 = arith.subf %649, %648 : vector<16x16xf32>
    %651 = arith.mulf %647, %650 : vector<16x16xf32>
    %652 = arith.addf %648, %651 : vector<16x16xf32>
    %c0_505 = arith.constant 0 : index
    %c54_506 = arith.constant 54 : index
    %653 = vector.load %arg84[%c0_505, %c54_506] : memref<16x70xf32, #tpu.memory_space<vmem>>, vector<16x16xf32>
    tpu.vector_store %arg84[%c0_505, %c54_506], %652 {strides = array<i32>} : memref<16x70xf32, #tpu.memory_space<vmem>>, vector<16x16xf32>,
    %c0_507 = arith.constant 0 : index
    %c0_508 = arith.constant 0 : index
    %654 = vector.load %arg84[%c0_507, %c0_508] : memref<16x70xf32, #tpu.memory_space<vmem>>, vector<16x16xf32>
    %655 = arith.truncf %654 : vector<16x16xf32> to vector<16x16xbf16>
    %c0_509 = arith.constant 0 : index
    %c0_510 = arith.constant 0 : index
    %c0_511 = arith.constant 0 : index
    %656 = vector.load %arg52[%c0_509, %c0_510, %c0_511] : memref<3x32x16xbf16, #tpu.memory_space<vmem>>, vector<1x32x16xbf16>
    %657 = vector.shape_cast %656 : vector<1x32x16xbf16> to vector<32x16xbf16>
    %cst_512 = arith.constant dense<0.000000e+00> : vector<32x16xf32>
    %658 = tpu.matmul %657, %655, %cst_512 {dimension_numbers = #tpu.dot_dimension_numbers<[1], [0], [0], [1], [0, 0, 1, 1], [], []>} : vector<32x16xbf16>, vector<16x16xbf16>, vector<32x16xf32> -> vector<32x16xf32>
    %c0_513 = arith.constant 0 : index
    %c27_514 = arith.constant 27 : index
    %659 = vector.load %arg84[%c0_513, %c27_514] : memref<16x70xf32, #tpu.memory_space<vmem>>, vector<16x16xf32>
    %660 = arith.truncf %659 : vector<16x16xf32> to vector<16x16xbf16>
    %c1_515 = arith.constant 1 : index
    %c0_516 = arith.constant 0 : index
    %c0_517 = arith.constant 0 : index
    %661 = vector.load %arg52[%c1_515, %c0_516, %c0_517] : memref<3x32x16xbf16, #tpu.memory_space<vmem>>, vector<1x32x16xbf16>
    %662 = vector.shape_cast %661 : vector<1x32x16xbf16> to vector<32x16xbf16>
    %cst_518 = arith.constant dense<0.000000e+00> : vector<32x16xf32>
    %663 = tpu.matmul %662, %660, %cst_518 {dimension_numbers = #tpu.dot_dimension_numbers<[1], [0], [0], [1], [0, 0, 1, 1], [], []>} : vector<32x16xbf16>, vector<16x16xbf16>, vector<32x16xf32> -> vector<32x16xf32>
    %664 = arith.addf %658, %663 : vector<32x16xf32>
    %c0_519 = arith.constant 0 : index
    %c54_520 = arith.constant 54 : index
    %665 = vector.load %arg84[%c0_519, %c54_520] : memref<16x70xf32, #tpu.memory_space<vmem>>, vector<16x16xf32>
    %666 = arith.truncf %665 : vector<16x16xf32> to vector<16x16xbf16>
    %c2_521 = arith.constant 2 : index
    %c0_522 = arith.constant 0 : index
    %c0_523 = arith.constant 0 : index
    %667 = vector.load %arg52[%c2_521, %c0_522, %c0_523] : memref<3x32x16xbf16, #tpu.memory_space<vmem>>, vector<1x32x16xbf16>
    %668 = vector.shape_cast %667 : vector<1x32x16xbf16> to vector<32x16xbf16>
    %cst_524 = arith.constant dense<0.000000e+00> : vector<32x16xf32>
    %669 = tpu.matmul %668, %666, %cst_524 {dimension_numbers = #tpu.dot_dimension_numbers<[1], [0], [0], [1], [0, 0, 1, 1], [], []>} : vector<32x16xbf16>, vector<16x16xbf16>, vector<32x16xf32> -> vector<32x16xf32>
    %670 = arith.addf %664, %669 : vector<32x16xf32>
    %c0_525 = arith.constant 0 : index
    %c0_526 = arith.constant 0 : index
    %671 = vector.load %arg53[%c0_525, %c0_526] : memref<32x1xf32, #tpu.memory_space<vmem>>, vector<32x1xf32>
    %672 = vector.broadcast %671 : vector<32x1xf32> to vector<32x16xf32>
    %673 = arith.addf %670, %672 : vector<32x16xf32>
    %674 = vector.extract_strided_slice %673 {offsets = [0, 0], sizes = [16, 16], strides = [1, 1]} : vector<32x16xf32> to vector<16x16xf32>
    %675 = arith.negf %674 : vector<16x16xf32>
    %676 = math.exp %675 : vector<16x16xf32>
    %cst_527 = arith.constant 1.000000e+00 : f32
    %677 = vector.broadcast %cst_527 : f32 to vector<16x16xf32>
    %678 = arith.addf %677, %676 : vector<16x16xf32>
    %679 = arith.divf %677, %678 : vector<16x16xf32>
    %c0_528 = arith.constant 0 : index
    %c54_529 = arith.constant 54 : index
    %680 = vector.load %arg84[%c0_528, %c54_529] : memref<16x70xf32, #tpu.memory_space<vmem>>, vector<16x16xf32>
    %681 = vector.extract_strided_slice %673 {offsets = [16, 0], sizes = [16, 16], strides = [1, 1]} : vector<32x16xf32> to vector<16x16xf32>
    %682 = arith.subf %681, %680 : vector<16x16xf32>
    %683 = arith.mulf %679, %682 : vector<16x16xf32>
    %684 = arith.addf %680, %683 : vector<16x16xf32>
    %c0_530 = arith.constant 0 : index
    %c54_531 = arith.constant 54 : index
    %685 = vector.load %arg84[%c0_530, %c54_531] : memref<16x70xf32, #tpu.memory_space<vmem>>, vector<16x16xf32>
    tpu.vector_store %arg84[%c0_530, %c54_531], %684 {strides = array<i32>} : memref<16x70xf32, #tpu.memory_space<vmem>>, vector<16x16xf32>,
    %c0_532 = arith.constant 0 : index
    %c48_533 = arith.constant 48 : index
    %686 = vector.load %arg84[%c0_532, %c48_533] : memref<16x70xf32, #tpu.memory_space<vmem>>, vector<16x16xf32>
    %687 = arith.truncf %686 : vector<16x16xf32> to vector<16x16xbf16>
    %c0_534 = arith.constant 0 : index
    %c0_535 = arith.constant 0 : index
    %c0_536 = arith.constant 0 : index
    %688 = vector.load %arg54[%c0_534, %c0_535, %c0_536] : memref<3x32x16xbf16, #tpu.memory_space<vmem>>, vector<1x32x16xbf16>
    %689 = vector.shape_cast %688 : vector<1x32x16xbf16> to vector<32x16xbf16>
    %cst_537 = arith.constant dense<0.000000e+00> : vector<32x16xf32>
    %690 = tpu.matmul %689, %687, %cst_537 {dimension_numbers = #tpu.dot_dimension_numbers<[1], [0], [0], [1], [0, 0, 1, 1], [], []>} : vector<32x16xbf16>, vector<16x16xbf16>, vector<32x16xf32> -> vector<32x16xf32>
    %c0_538 = arith.constant 0 : index
    %c51_539 = arith.constant 51 : index
    %691 = vector.load %arg84[%c0_538, %c51_539] : memref<16x70xf32, #tpu.memory_space<vmem>>, vector<16x16xf32>
    %692 = arith.truncf %691 : vector<16x16xf32> to vector<16x16xbf16>
    %c1_540 = arith.constant 1 : index
    %c0_541 = arith.constant 0 : index
    %c0_542 = arith.constant 0 : index
    %693 = vector.load %arg54[%c1_540, %c0_541, %c0_542] : memref<3x32x16xbf16, #tpu.memory_space<vmem>>, vector<1x32x16xbf16>
    %694 = vector.shape_cast %693 : vector<1x32x16xbf16> to vector<32x16xbf16>
    %cst_543 = arith.constant dense<0.000000e+00> : vector<32x16xf32>
    %695 = tpu.matmul %694, %692, %cst_543 {dimension_numbers = #tpu.dot_dimension_numbers<[1], [0], [0], [1], [0, 0, 1, 1], [], []>} : vector<32x16xbf16>, vector<16x16xbf16>, vector<32x16xf32> -> vector<32x16xf32>
    %696 = arith.addf %690, %695 : vector<32x16xf32>
    %c0_544 = arith.constant 0 : index
    %c54_545 = arith.constant 54 : index
    %697 = vector.load %arg84[%c0_544, %c54_545] : memref<16x70xf32, #tpu.memory_space<vmem>>, vector<16x16xf32>
    %698 = arith.truncf %697 : vector<16x16xf32> to vector<16x16xbf16>
    %c2_546 = arith.constant 2 : index
    %c0_547 = arith.constant 0 : index
    %c0_548 = arith.constant 0 : index
    %699 = vector.load %arg54[%c2_546, %c0_547, %c0_548] : memref<3x32x16xbf16, #tpu.memory_space<vmem>>, vector<1x32x16xbf16>
    %700 = vector.shape_cast %699 : vector<1x32x16xbf16> to vector<32x16xbf16>
    %cst_549 = arith.constant dense<0.000000e+00> : vector<32x16xf32>
    %701 = tpu.matmul %700, %698, %cst_549 {dimension_numbers = #tpu.dot_dimension_numbers<[1], [0], [0], [1], [0, 0, 1, 1], [], []>} : vector<32x16xbf16>, vector<16x16xbf16>, vector<32x16xf32> -> vector<32x16xf32>
    %702 = arith.addf %696, %701 : vector<32x16xf32>
    %c0_550 = arith.constant 0 : index
    %c0_551 = arith.constant 0 : index
    %703 = vector.load %arg55[%c0_550, %c0_551] : memref<32x1xf32, #tpu.memory_space<vmem>>, vector<32x1xf32>
    %704 = vector.broadcast %703 : vector<32x1xf32> to vector<32x16xf32>
    %705 = arith.addf %702, %704 : vector<32x16xf32>
    %706 = vector.extract_strided_slice %705 {offsets = [0, 0], sizes = [16, 16], strides = [1, 1]} : vector<32x16xf32> to vector<16x16xf32>
    %707 = arith.negf %706 : vector<16x16xf32>
    %708 = math.exp %707 : vector<16x16xf32>
    %cst_552 = arith.constant 1.000000e+00 : f32
    %709 = vector.broadcast %cst_552 : f32 to vector<16x16xf32>
    %710 = arith.addf %709, %708 : vector<16x16xf32>
    %711 = arith.divf %709, %710 : vector<16x16xf32>
    %c0_553 = arith.constant 0 : index
    %c54_554 = arith.constant 54 : index
    %712 = vector.load %arg84[%c0_553, %c54_554] : memref<16x70xf32, #tpu.memory_space<vmem>>, vector<16x16xf32>
    %713 = vector.extract_strided_slice %705 {offsets = [16, 0], sizes = [16, 16], strides = [1, 1]} : vector<32x16xf32> to vector<16x16xf32>
    %714 = arith.subf %713, %712 : vector<16x16xf32>
    %715 = arith.mulf %711, %714 : vector<16x16xf32>
    %716 = arith.addf %712, %715 : vector<16x16xf32>
    %c0_555 = arith.constant 0 : index
    %c54_556 = arith.constant 54 : index
    %717 = vector.load %arg84[%c0_555, %c54_556] : memref<16x70xf32, #tpu.memory_space<vmem>>, vector<16x16xf32>
    tpu.vector_store %arg84[%c0_555, %c54_556], %716 {strides = array<i32>} : memref<16x70xf32, #tpu.memory_space<vmem>>, vector<16x16xf32>,
    %c0_557 = arith.constant 0 : index
    %c48_558 = arith.constant 48 : index
    %718 = vector.load %arg84[%c0_557, %c48_558] : memref<16x70xf32, #tpu.memory_space<vmem>>, vector<16x16xf32>
    %719 = arith.truncf %718 : vector<16x16xf32> to vector<16x16xbf16>
    %c0_559 = arith.constant 0 : index
    %c0_560 = arith.constant 0 : index
    %c0_561 = arith.constant 0 : index
    %720 = vector.load %arg56[%c0_559, %c0_560, %c0_561] : memref<3x32x16xbf16, #tpu.memory_space<vmem>>, vector<1x32x16xbf16>
    %721 = vector.shape_cast %720 : vector<1x32x16xbf16> to vector<32x16xbf16>
    %cst_562 = arith.constant dense<0.000000e+00> : vector<32x16xf32>
    %722 = tpu.matmul %721, %719, %cst_562 {dimension_numbers = #tpu.dot_dimension_numbers<[1], [0], [0], [1], [0, 0, 1, 1], [], []>} : vector<32x16xbf16>, vector<16x16xbf16>, vector<32x16xf32> -> vector<32x16xf32>
    %c0_563 = arith.constant 0 : index
    %c51_564 = arith.constant 51 : index
    %723 = vector.load %arg84[%c0_563, %c51_564] : memref<16x70xf32, #tpu.memory_space<vmem>>, vector<16x16xf32>
    %724 = arith.truncf %723 : vector<16x16xf32> to vector<16x16xbf16>
    %c1_565 = arith.constant 1 : index
    %c0_566 = arith.constant 0 : index
    %c0_567 = arith.constant 0 : index
    %725 = vector.load %arg56[%c1_565, %c0_566, %c0_567] : memref<3x32x16xbf16, #tpu.memory_space<vmem>>, vector<1x32x16xbf16>
    %726 = vector.shape_cast %725 : vector<1x32x16xbf16> to vector<32x16xbf16>
    %cst_568 = arith.constant dense<0.000000e+00> : vector<32x16xf32>
    %727 = tpu.matmul %726, %724, %cst_568 {dimension_numbers = #tpu.dot_dimension_numbers<[1], [0], [0], [1], [0, 0, 1, 1], [], []>} : vector<32x16xbf16>, vector<16x16xbf16>, vector<32x16xf32> -> vector<32x16xf32>
    %728 = arith.addf %722, %727 : vector<32x16xf32>
    %c0_569 = arith.constant 0 : index
    %c54_570 = arith.constant 54 : index
    %729 = vector.load %arg84[%c0_569, %c54_570] : memref<16x70xf32, #tpu.memory_space<vmem>>, vector<16x16xf32>
    %730 = arith.truncf %729 : vector<16x16xf32> to vector<16x16xbf16>
    %c2_571 = arith.constant 2 : index
    %c0_572 = arith.constant 0 : index
    %c0_573 = arith.constant 0 : index
    %731 = vector.load %arg56[%c2_571, %c0_572, %c0_573] : memref<3x32x16xbf16, #tpu.memory_space<vmem>>, vector<1x32x16xbf16>
    %732 = vector.shape_cast %731 : vector<1x32x16xbf16> to vector<32x16xbf16>
    %cst_574 = arith.constant dense<0.000000e+00> : vector<32x16xf32>
    %733 = tpu.matmul %732, %730, %cst_574 {dimension_numbers = #tpu.dot_dimension_numbers<[1], [0], [0], [1], [0, 0, 1, 1], [], []>} : vector<32x16xbf16>, vector<16x16xbf16>, vector<32x16xf32> -> vector<32x16xf32>
    %734 = arith.addf %728, %733 : vector<32x16xf32>
    %c0_575 = arith.constant 0 : index
    %c0_576 = arith.constant 0 : index
    %735 = vector.load %arg57[%c0_575, %c0_576] : memref<32x1xf32, #tpu.memory_space<vmem>>, vector<32x1xf32>
    %736 = vector.broadcast %735 : vector<32x1xf32> to vector<32x16xf32>
    %737 = arith.addf %734, %736 : vector<32x16xf32>
    %738 = vector.extract_strided_slice %737 {offsets = [0, 0], sizes = [16, 16], strides = [1, 1]} : vector<32x16xf32> to vector<16x16xf32>
    %739 = arith.negf %738 : vector<16x16xf32>
    %740 = math.exp %739 : vector<16x16xf32>
    %cst_577 = arith.constant 1.000000e+00 : f32
    %741 = vector.broadcast %cst_577 : f32 to vector<16x16xf32>
    %742 = arith.addf %741, %740 : vector<16x16xf32>
    %743 = arith.divf %741, %742 : vector<16x16xf32>
    %c0_578 = arith.constant 0 : index
    %c54_579 = arith.constant 54 : index
    %744 = vector.load %arg84[%c0_578, %c54_579] : memref<16x70xf32, #tpu.memory_space<vmem>>, vector<16x16xf32>
    %745 = vector.extract_strided_slice %737 {offsets = [16, 0], sizes = [16, 16], strides = [1, 1]} : vector<32x16xf32> to vector<16x16xf32>
    %746 = arith.subf %745, %744 : vector<16x16xf32>
    %747 = arith.mulf %743, %746 : vector<16x16xf32>
    %748 = arith.addf %744, %747 : vector<16x16xf32>
    %c0_580 = arith.constant 0 : index
    %c54_581 = arith.constant 54 : index
    %749 = vector.load %arg84[%c0_580, %c54_581] : memref<16x70xf32, #tpu.memory_space<vmem>>, vector<16x16xf32>
    tpu.vector_store %arg84[%c0_580, %c54_581], %748 {strides = array<i32>} : memref<16x70xf32, #tpu.memory_space<vmem>>, vector<16x16xf32>,
    %c0_582 = arith.constant 0 : index
    %c27_583 = arith.constant 27 : index
    %750 = vector.load %arg83[%c0_582, %c27_583] : memref<32x70xf32, #tpu.memory_space<vmem>>, vector<16x16xf32>
    %c16 = arith.constant 16 : index
    %c27_584 = arith.constant 27 : index
    %751 = vector.load %arg83[%c16, %c27_584] : memref<32x70xf32, #tpu.memory_space<vmem>>, vector<16x16xf32>
    %c0_585 = arith.constant 0 : index
    %c54_586 = arith.constant 54 : index
    %752 = vector.load %arg84[%c0_585, %c54_586] : memref<16x70xf32, #tpu.memory_space<vmem>>, vector<16x16xf32>
    %753 = tpu.iota {dimensions = array<i32: 0>} : vector<16x16xi32>
    %754 = tpu.iota {dimensions = array<i32: 1>} : vector<16x16xi32>
    %755 = arith.cmpi eq, %753, %754 : vector<16x16xi32>
    %cst_587 = arith.constant 2.500000e-01 : f32
    %cst_588 = arith.constant 0.000000e+00 : f32
    %756 = vector.broadcast %cst_587 : f32 to vector<16x16xf32>
    %757 = vector.broadcast %cst_588 : f32 to vector<16x16xf32>
    %758 = arith.select %755, %756, %757 : vector<16x16xi1>, vector<16x16xf32>
    %cst_589 = arith.constant dense<0.000000e+00> : vector<16x16xf32>
    %759 = tpu.matmul %758, %750, %cst_589 {dimension_numbers = #tpu.dot_dimension_numbers<[1], [1], [0], [0], [0, 0, 1, 0], [], []>} : vector<16x16xf32>, vector<16x16xf32>, vector<16x16xf32> -> vector<16x16xf32>
    %cst_590 = arith.constant dense<0.000000e+00> : vector<16x16xf32>
    %760 = tpu.matmul %759, %752, %cst_590 {dimension_numbers = #tpu.dot_dimension_numbers<[1], [0], [0], [1], [0, 0, 1, 1], [], []>} : vector<16x16xf32>, vector<16x16xf32>, vector<16x16xf32> -> vector<16x16xf32>
    %cst_591 = arith.constant dense<0xFF800000> : vector<16xf32>
    %761 = vector.multi_reduction <maximumf>, %760, %cst_591 [0] : vector<16x16xf32> to vector<16xf32>
    %762 = vector.shape_cast %761 : vector<16xf32> to vector<1x16xf32>
    %763 = vector.broadcast %762 : vector<1x16xf32> to vector<16x16xf32>
    %764 = arith.subf %760, %763 : vector<16x16xf32>
    %765 = math.exp %764 : vector<16x16xf32>
    %cst_592 = arith.constant dense<0.000000e+00> : vector<16xf32>
    %766 = vector.multi_reduction <add>, %765, %cst_592 [0] : vector<16x16xf32> to vector<16xf32>
    %767 = vector.shape_cast %766 : vector<16xf32> to vector<1x16xf32>
    %768 = tpu.reciprocal %767 {approx = true} : vector<1x16xf32> -> vector<1x16xf32>
    %769 = vector.broadcast %768 : vector<1x16xf32> to vector<16x16xf32>
    %770 = arith.mulf %765, %769 : vector<16x16xf32>
    %c0_593 = arith.constant 0 : index
    %c0_594 = arith.constant 0 : index
    %c0_595 = arith.constant 0 : index
    %771 = vector.load %arg81[%c0_593, %c0_594, %c0_595] : memref<1x16x16xf32, #tpu.memory_space<vmem>>, vector<1x16x16xf32>
    %772 = vector.shape_cast %771 : vector<1x16x16xf32> to vector<16x16xf32>
    %773 = vector.shape_cast %770 : vector<16x16xf32> to vector<1x16x16xf32>
    tpu.vector_store %arg81[%c0_593, %c0_594, %c0_595], %773 {strides = array<i32>} : memref<1x16x16xf32, #tpu.memory_space<vmem>>, vector<1x16x16xf32>,
    %774 = tpu.iota {dimensions = array<i32: 0>} : vector<16x16xi32>
    %775 = vector.broadcast %762 : vector<1x16xf32> to vector<16x16xf32>
    %776 = arith.cmpf oge, %760, %775 : vector<16x16xf32>
    %c16_i32 = arith.constant 16 : i32
    %777 = vector.broadcast %c16_i32 : i32 to vector<16x16xi32>
    %778 = arith.select %776, %774, %777 : vector<16x16xi1>, vector<16x16xi32>
    %cst_596 = arith.constant dense<2147483647> : vector<16xi32>
    %779 = vector.multi_reduction <minsi>, %778, %cst_596 [0] : vector<16x16xi32> to vector<16xi32>
    %780 = vector.shape_cast %779 : vector<16xi32> to vector<1x16xi32>
    %c0_597 = arith.constant 0 : index
    %c0_598 = arith.constant 0 : index
    %c0_599 = arith.constant 0 : index
    %781 = vector.load %arg82[%c0_597, %c0_598, %c0_599] : memref<1x1x16xi32, #tpu.memory_space<vmem>>, vector<1x1x16xi32>
    %782 = vector.shape_cast %781 : vector<1x1x16xi32> to vector<1x16xi32>
    %783 = vector.shape_cast %780 : vector<1x16xi32> to vector<1x1x16xi32>
    tpu.vector_store %arg82[%c0_597, %c0_598, %c0_599], %783 {strides = array<i32>} : memref<1x1x16xi32, #tpu.memory_space<vmem>>, vector<1x1x16xi32>,
    %cst_600 = arith.constant dense<0.000000e+00> : vector<16x16xf32>
    %784 = tpu.matmul %751, %770, %cst_600 {dimension_numbers = #tpu.dot_dimension_numbers<[1], [0], [0], [1], [0, 0, 1, 1], [], []>} : vector<16x16xf32>, vector<16x16xf32>, vector<16x16xf32> -> vector<16x16xf32>
    %c0_601 = arith.constant 0 : index
    %c54_602 = arith.constant 54 : index
    %785 = vector.load %arg85[%c0_601, %c54_602] : memref<32x70xf32, #tpu.memory_space<vmem>>, vector<16x16xf32>
    tpu.vector_store %arg85[%c0_601, %c54_602], %784 {strides = array<i32>} : memref<32x70xf32, #tpu.memory_space<vmem>>, vector<16x16xf32>,
    %c16_603 = arith.constant 16 : index
    %c54_604 = arith.constant 54 : index
    %786 = vector.load %arg85[%c16_603, %c54_604] : memref<32x70xf32, #tpu.memory_space<vmem>>, vector<16x16xf32>
    tpu.vector_store %arg85[%c16_603, %c54_604], %752 {strides = array<i32>} : memref<32x70xf32, #tpu.memory_space<vmem>>, vector<16x16xf32>,
    %c0_605 = arith.constant 0 : index
    %c54_606 = arith.constant 54 : index
    %787 = vector.load %arg85[%c0_605, %c54_606] : memref<32x70xf32, #tpu.memory_space<vmem>>, vector<32x16xf32>
    %788 = arith.truncf %787 : vector<32x16xf32> to vector<32x16xbf16>
    %c0_607 = arith.constant 0 : index
    %c0_608 = arith.constant 0 : index
    %c0_609 = arith.constant 0 : index
    %789 = vector.load %arg58[%c0_607, %c0_608, %c0_609] : memref<1x16x32xbf16, #tpu.memory_space<vmem>>, vector<1x16x32xbf16>
    %790 = vector.shape_cast %789 : vector<1x16x32xbf16> to vector<16x32xbf16>
    %cst_610 = arith.constant dense<0.000000e+00> : vector<16x16xf32>
    %791 = tpu.matmul %790, %788, %cst_610 {dimension_numbers = #tpu.dot_dimension_numbers<[1], [0], [0], [1], [0, 0, 1, 1], [], []>} : vector<16x32xbf16>, vector<32x16xbf16>, vector<16x16xf32> -> vector<16x16xf32>
    %c0_611 = arith.constant 0 : index
    %c0_612 = arith.constant 0 : index
    %792 = vector.load %arg59[%c0_611, %c0_612] : memref<16x1xf32, #tpu.memory_space<vmem>>, vector<16x1xf32>
    %793 = vector.broadcast %792 : vector<16x1xf32> to vector<16x16xf32>
    %794 = arith.addf %791, %793 : vector<16x16xf32>
    %c0_613 = arith.constant 0 : index
    %c54_614 = arith.constant 54 : index
    %795 = vector.load %arg85[%c0_613, %c54_614] : memref<32x70xf32, #tpu.memory_space<vmem>>, vector<16x16xf32>
    tpu.vector_store %arg85[%c0_613, %c54_614], %794 {strides = array<i32>} : memref<32x70xf32, #tpu.memory_space<vmem>>, vector<16x16xf32>,
    %c0_615 = arith.constant 0 : index
    %c52_616 = arith.constant 52 : index
    %796 = vector.load %arg85[%c0_615, %c52_616] : memref<32x70xf32, #tpu.memory_space<vmem>>, vector<16x16xf32>
    %797 = arith.truncf %796 : vector<16x16xf32> to vector<16x16xbf16>
    %c0_617 = arith.constant 0 : index
    %c0_618 = arith.constant 0 : index
    %c0_619 = arith.constant 0 : index
    %798 = vector.load %arg60[%c0_617, %c0_618, %c0_619] : memref<3x32x16xbf16, #tpu.memory_space<vmem>>, vector<1x32x16xbf16>
    %799 = vector.shape_cast %798 : vector<1x32x16xbf16> to vector<32x16xbf16>
    %cst_620 = arith.constant dense<0.000000e+00> : vector<32x16xf32>
    %800 = tpu.matmul %799, %797, %cst_620 {dimension_numbers = #tpu.dot_dimension_numbers<[1], [0], [0], [1], [0, 0, 1, 1], [], []>} : vector<32x16xbf16>, vector<16x16xbf16>, vector<32x16xf32> -> vector<32x16xf32>
    %c0_621 = arith.constant 0 : index
    %c53_622 = arith.constant 53 : index
    %801 = vector.load %arg85[%c0_621, %c53_622] : memref<32x70xf32, #tpu.memory_space<vmem>>, vector<16x16xf32>
    %802 = arith.truncf %801 : vector<16x16xf32> to vector<16x16xbf16>
    %c1_623 = arith.constant 1 : index
    %c0_624 = arith.constant 0 : index
    %c0_625 = arith.constant 0 : index
    %803 = vector.load %arg60[%c1_623, %c0_624, %c0_625] : memref<3x32x16xbf16, #tpu.memory_space<vmem>>, vector<1x32x16xbf16>
    %804 = vector.shape_cast %803 : vector<1x32x16xbf16> to vector<32x16xbf16>
    %cst_626 = arith.constant dense<0.000000e+00> : vector<32x16xf32>
    %805 = tpu.matmul %804, %802, %cst_626 {dimension_numbers = #tpu.dot_dimension_numbers<[1], [0], [0], [1], [0, 0, 1, 1], [], []>} : vector<32x16xbf16>, vector<16x16xbf16>, vector<32x16xf32> -> vector<32x16xf32>
    %806 = arith.addf %800, %805 : vector<32x16xf32>
    %c0_627 = arith.constant 0 : index
    %c54_628 = arith.constant 54 : index
    %807 = vector.load %arg85[%c0_627, %c54_628] : memref<32x70xf32, #tpu.memory_space<vmem>>, vector<16x16xf32>
    %808 = arith.truncf %807 : vector<16x16xf32> to vector<16x16xbf16>
    %c2_629 = arith.constant 2 : index
    %c0_630 = arith.constant 0 : index
    %c0_631 = arith.constant 0 : index
    %809 = vector.load %arg60[%c2_629, %c0_630, %c0_631] : memref<3x32x16xbf16, #tpu.memory_space<vmem>>, vector<1x32x16xbf16>
    %810 = vector.shape_cast %809 : vector<1x32x16xbf16> to vector<32x16xbf16>
    %cst_632 = arith.constant dense<0.000000e+00> : vector<32x16xf32>
    %811 = tpu.matmul %810, %808, %cst_632 {dimension_numbers = #tpu.dot_dimension_numbers<[1], [0], [0], [1], [0, 0, 1, 1], [], []>} : vector<32x16xbf16>, vector<16x16xbf16>, vector<32x16xf32> -> vector<32x16xf32>
    %812 = arith.addf %806, %811 : vector<32x16xf32>
    %c0_633 = arith.constant 0 : index
    %c0_634 = arith.constant 0 : index
    %813 = vector.load %arg61[%c0_633, %c0_634] : memref<32x1xf32, #tpu.memory_space<vmem>>, vector<32x1xf32>
    %814 = vector.broadcast %813 : vector<32x1xf32> to vector<32x16xf32>
    %815 = arith.addf %812, %814 : vector<32x16xf32>
    %816 = vector.extract_strided_slice %815 {offsets = [0, 0], sizes = [16, 16], strides = [1, 1]} : vector<32x16xf32> to vector<16x16xf32>
    %817 = arith.negf %816 : vector<16x16xf32>
    %818 = math.exp %817 : vector<16x16xf32>
    %cst_635 = arith.constant 1.000000e+00 : f32
    %819 = vector.broadcast %cst_635 : f32 to vector<16x16xf32>
    %820 = arith.addf %819, %818 : vector<16x16xf32>
    %821 = arith.divf %819, %820 : vector<16x16xf32>
    %c0_636 = arith.constant 0 : index
    %c54_637 = arith.constant 54 : index
    %822 = vector.load %arg85[%c0_636, %c54_637] : memref<32x70xf32, #tpu.memory_space<vmem>>, vector<16x16xf32>
    %823 = vector.extract_strided_slice %815 {offsets = [16, 0], sizes = [16, 16], strides = [1, 1]} : vector<32x16xf32> to vector<16x16xf32>
    %824 = arith.subf %823, %822 : vector<16x16xf32>
    %825 = arith.mulf %821, %824 : vector<16x16xf32>
    %826 = arith.addf %822, %825 : vector<16x16xf32>
    %c0_638 = arith.constant 0 : index
    %c54_639 = arith.constant 54 : index
    %827 = vector.load %arg85[%c0_638, %c54_639] : memref<32x70xf32, #tpu.memory_space<vmem>>, vector<16x16xf32>
    tpu.vector_store %arg85[%c0_638, %c54_639], %826 {strides = array<i32>} : memref<32x70xf32, #tpu.memory_space<vmem>>, vector<16x16xf32>,
    %c0_640 = arith.constant 0 : index
    %c48_641 = arith.constant 48 : index
    %828 = vector.load %arg85[%c0_640, %c48_641] : memref<32x70xf32, #tpu.memory_space<vmem>>, vector<16x16xf32>
    %829 = arith.truncf %828 : vector<16x16xf32> to vector<16x16xbf16>
    %c0_642 = arith.constant 0 : index
    %c0_643 = arith.constant 0 : index
    %c0_644 = arith.constant 0 : index
    %830 = vector.load %arg62[%c0_642, %c0_643, %c0_644] : memref<3x32x16xbf16, #tpu.memory_space<vmem>>, vector<1x32x16xbf16>
    %831 = vector.shape_cast %830 : vector<1x32x16xbf16> to vector<32x16xbf16>
    %cst_645 = arith.constant dense<0.000000e+00> : vector<32x16xf32>
    %832 = tpu.matmul %831, %829, %cst_645 {dimension_numbers = #tpu.dot_dimension_numbers<[1], [0], [0], [1], [0, 0, 1, 1], [], []>} : vector<32x16xbf16>, vector<16x16xbf16>, vector<32x16xf32> -> vector<32x16xf32>
    %c0_646 = arith.constant 0 : index
    %c51_647 = arith.constant 51 : index
    %833 = vector.load %arg85[%c0_646, %c51_647] : memref<32x70xf32, #tpu.memory_space<vmem>>, vector<16x16xf32>
    %834 = arith.truncf %833 : vector<16x16xf32> to vector<16x16xbf16>
    %c1_648 = arith.constant 1 : index
    %c0_649 = arith.constant 0 : index
    %c0_650 = arith.constant 0 : index
    %835 = vector.load %arg62[%c1_648, %c0_649, %c0_650] : memref<3x32x16xbf16, #tpu.memory_space<vmem>>, vector<1x32x16xbf16>
    %836 = vector.shape_cast %835 : vector<1x32x16xbf16> to vector<32x16xbf16>
    %cst_651 = arith.constant dense<0.000000e+00> : vector<32x16xf32>
    %837 = tpu.matmul %836, %834, %cst_651 {dimension_numbers = #tpu.dot_dimension_numbers<[1], [0], [0], [1], [0, 0, 1, 1], [], []>} : vector<32x16xbf16>, vector<16x16xbf16>, vector<32x16xf32> -> vector<32x16xf32>
    %838 = arith.addf %832, %837 : vector<32x16xf32>
    %c0_652 = arith.constant 0 : index
    %c54_653 = arith.constant 54 : index
    %839 = vector.load %arg85[%c0_652, %c54_653] : memref<32x70xf32, #tpu.memory_space<vmem>>, vector<16x16xf32>
    %840 = arith.truncf %839 : vector<16x16xf32> to vector<16x16xbf16>
    %c2_654 = arith.constant 2 : index
    %c0_655 = arith.constant 0 : index
    %c0_656 = arith.constant 0 : index
    %841 = vector.load %arg62[%c2_654, %c0_655, %c0_656] : memref<3x32x16xbf16, #tpu.memory_space<vmem>>, vector<1x32x16xbf16>
    %842 = vector.shape_cast %841 : vector<1x32x16xbf16> to vector<32x16xbf16>
    %cst_657 = arith.constant dense<0.000000e+00> : vector<32x16xf32>
    %843 = tpu.matmul %842, %840, %cst_657 {dimension_numbers = #tpu.dot_dimension_numbers<[1], [0], [0], [1], [0, 0, 1, 1], [], []>} : vector<32x16xbf16>, vector<16x16xbf16>, vector<32x16xf32> -> vector<32x16xf32>
    %844 = arith.addf %838, %843 : vector<32x16xf32>
    %c0_658 = arith.constant 0 : index
    %c0_659 = arith.constant 0 : index
    %845 = vector.load %arg63[%c0_658, %c0_659] : memref<32x1xf32, #tpu.memory_space<vmem>>, vector<32x1xf32>
    %846 = vector.broadcast %845 : vector<32x1xf32> to vector<32x16xf32>
    %847 = arith.addf %844, %846 : vector<32x16xf32>
    %848 = vector.extract_strided_slice %847 {offsets = [0, 0], sizes = [16, 16], strides = [1, 1]} : vector<32x16xf32> to vector<16x16xf32>
    %849 = arith.negf %848 : vector<16x16xf32>
    %850 = math.exp %849 : vector<16x16xf32>
    %cst_660 = arith.constant 1.000000e+00 : f32
    %851 = vector.broadcast %cst_660 : f32 to vector<16x16xf32>
    %852 = arith.addf %851, %850 : vector<16x16xf32>
    %853 = arith.divf %851, %852 : vector<16x16xf32>
    %c0_661 = arith.constant 0 : index
    %c54_662 = arith.constant 54 : index
    %854 = vector.load %arg85[%c0_661, %c54_662] : memref<32x70xf32, #tpu.memory_space<vmem>>, vector<16x16xf32>
    %855 = vector.extract_strided_slice %847 {offsets = [16, 0], sizes = [16, 16], strides = [1, 1]} : vector<32x16xf32> to vector<16x16xf32>
    %856 = arith.subf %855, %854 : vector<16x16xf32>
    %857 = arith.mulf %853, %856 : vector<16x16xf32>
    %858 = arith.addf %854, %857 : vector<16x16xf32>
    %c0_663 = arith.constant 0 : index
    %c54_664 = arith.constant 54 : index
    %859 = vector.load %arg85[%c0_663, %c54_664] : memref<32x70xf32, #tpu.memory_space<vmem>>, vector<16x16xf32>
    tpu.vector_store %arg85[%c0_663, %c54_664], %858 {strides = array<i32>} : memref<32x70xf32, #tpu.memory_space<vmem>>, vector<16x16xf32>,
    %c0_665 = arith.constant 0 : index
    %c36_666 = arith.constant 36 : index
    %860 = vector.load %arg85[%c0_665, %c36_666] : memref<32x70xf32, #tpu.memory_space<vmem>>, vector<16x16xf32>
    %861 = arith.truncf %860 : vector<16x16xf32> to vector<16x16xbf16>
    %c0_667 = arith.constant 0 : index
    %c0_668 = arith.constant 0 : index
    %c0_669 = arith.constant 0 : index
    %862 = vector.load %arg64[%c0_667, %c0_668, %c0_669] : memref<3x32x16xbf16, #tpu.memory_space<vmem>>, vector<1x32x16xbf16>
    %863 = vector.shape_cast %862 : vector<1x32x16xbf16> to vector<32x16xbf16>
    %cst_670 = arith.constant dense<0.000000e+00> : vector<32x16xf32>
    %864 = tpu.matmul %863, %861, %cst_670 {dimension_numbers = #tpu.dot_dimension_numbers<[1], [0], [0], [1], [0, 0, 1, 1], [], []>} : vector<32x16xbf16>, vector<16x16xbf16>, vector<32x16xf32> -> vector<32x16xf32>
    %c0_671 = arith.constant 0 : index
    %c45_672 = arith.constant 45 : index
    %865 = vector.load %arg85[%c0_671, %c45_672] : memref<32x70xf32, #tpu.memory_space<vmem>>, vector<16x16xf32>
    %866 = arith.truncf %865 : vector<16x16xf32> to vector<16x16xbf16>
    %c1_673 = arith.constant 1 : index
    %c0_674 = arith.constant 0 : index
    %c0_675 = arith.constant 0 : index
    %867 = vector.load %arg64[%c1_673, %c0_674, %c0_675] : memref<3x32x16xbf16, #tpu.memory_space<vmem>>, vector<1x32x16xbf16>
    %868 = vector.shape_cast %867 : vector<1x32x16xbf16> to vector<32x16xbf16>
    %cst_676 = arith.constant dense<0.000000e+00> : vector<32x16xf32>
    %869 = tpu.matmul %868, %866, %cst_676 {dimension_numbers = #tpu.dot_dimension_numbers<[1], [0], [0], [1], [0, 0, 1, 1], [], []>} : vector<32x16xbf16>, vector<16x16xbf16>, vector<32x16xf32> -> vector<32x16xf32>
    %870 = arith.addf %864, %869 : vector<32x16xf32>
    %c0_677 = arith.constant 0 : index
    %c54_678 = arith.constant 54 : index
    %871 = vector.load %arg85[%c0_677, %c54_678] : memref<32x70xf32, #tpu.memory_space<vmem>>, vector<16x16xf32>
    %872 = arith.truncf %871 : vector<16x16xf32> to vector<16x16xbf16>
    %c2_679 = arith.constant 2 : index
    %c0_680 = arith.constant 0 : index
    %c0_681 = arith.constant 0 : index
    %873 = vector.load %arg64[%c2_679, %c0_680, %c0_681] : memref<3x32x16xbf16, #tpu.memory_space<vmem>>, vector<1x32x16xbf16>
    %874 = vector.shape_cast %873 : vector<1x32x16xbf16> to vector<32x16xbf16>
    %cst_682 = arith.constant dense<0.000000e+00> : vector<32x16xf32>
    %875 = tpu.matmul %874, %872, %cst_682 {dimension_numbers = #tpu.dot_dimension_numbers<[1], [0], [0], [1], [0, 0, 1, 1], [], []>} : vector<32x16xbf16>, vector<16x16xbf16>, vector<32x16xf32> -> vector<32x16xf32>
    %876 = arith.addf %870, %875 : vector<32x16xf32>
    %c0_683 = arith.constant 0 : index
    %c0_684 = arith.constant 0 : index
    %877 = vector.load %arg65[%c0_683, %c0_684] : memref<32x1xf32, #tpu.memory_space<vmem>>, vector<32x1xf32>
    %878 = vector.broadcast %877 : vector<32x1xf32> to vector<32x16xf32>
    %879 = arith.addf %876, %878 : vector<32x16xf32>
    %880 = vector.extract_strided_slice %879 {offsets = [0, 0], sizes = [16, 16], strides = [1, 1]} : vector<32x16xf32> to vector<16x16xf32>
    %881 = arith.negf %880 : vector<16x16xf32>
    %882 = math.exp %881 : vector<16x16xf32>
    %cst_685 = arith.constant 1.000000e+00 : f32
    %883 = vector.broadcast %cst_685 : f32 to vector<16x16xf32>
    %884 = arith.addf %883, %882 : vector<16x16xf32>
    %885 = arith.divf %883, %884 : vector<16x16xf32>
    %c0_686 = arith.constant 0 : index
    %c54_687 = arith.constant 54 : index
    %886 = vector.load %arg85[%c0_686, %c54_687] : memref<32x70xf32, #tpu.memory_space<vmem>>, vector<16x16xf32>
    %887 = vector.extract_strided_slice %879 {offsets = [16, 0], sizes = [16, 16], strides = [1, 1]} : vector<32x16xf32> to vector<16x16xf32>
    %888 = arith.subf %887, %886 : vector<16x16xf32>
    %889 = arith.mulf %885, %888 : vector<16x16xf32>
    %890 = arith.addf %886, %889 : vector<16x16xf32>
    %c0_688 = arith.constant 0 : index
    %c54_689 = arith.constant 54 : index
    %891 = vector.load %arg85[%c0_688, %c54_689] : memref<32x70xf32, #tpu.memory_space<vmem>>, vector<16x16xf32>
    tpu.vector_store %arg85[%c0_688, %c54_689], %890 {strides = array<i32>} : memref<32x70xf32, #tpu.memory_space<vmem>>, vector<16x16xf32>,
    %c0_690 = arith.constant 0 : index
    %c0_691 = arith.constant 0 : index
    %892 = vector.load %arg85[%c0_690, %c0_691] : memref<32x70xf32, #tpu.memory_space<vmem>>, vector<16x16xf32>
    %893 = arith.truncf %892 : vector<16x16xf32> to vector<16x16xbf16>
    %c0_692 = arith.constant 0 : index
    %c0_693 = arith.constant 0 : index
    %c0_694 = arith.constant 0 : index
    %894 = vector.load %arg66[%c0_692, %c0_693, %c0_694] : memref<3x32x16xbf16, #tpu.memory_space<vmem>>, vector<1x32x16xbf16>
    %895 = vector.shape_cast %894 : vector<1x32x16xbf16> to vector<32x16xbf16>
    %cst_695 = arith.constant dense<0.000000e+00> : vector<32x16xf32>
    %896 = tpu.matmul %895, %893, %cst_695 {dimension_numbers = #tpu.dot_dimension_numbers<[1], [0], [0], [1], [0, 0, 1, 1], [], []>} : vector<32x16xbf16>, vector<16x16xbf16>, vector<32x16xf32> -> vector<32x16xf32>
    %c0_696 = arith.constant 0 : index
    %c27_697 = arith.constant 27 : index
    %897 = vector.load %arg85[%c0_696, %c27_697] : memref<32x70xf32, #tpu.memory_space<vmem>>, vector<16x16xf32>
    %898 = arith.truncf %897 : vector<16x16xf32> to vector<16x16xbf16>
    %c1_698 = arith.constant 1 : index
    %c0_699 = arith.constant 0 : index
    %c0_700 = arith.constant 0 : index
    %899 = vector.load %arg66[%c1_698, %c0_699, %c0_700] : memref<3x32x16xbf16, #tpu.memory_space<vmem>>, vector<1x32x16xbf16>
    %900 = vector.shape_cast %899 : vector<1x32x16xbf16> to vector<32x16xbf16>
    %cst_701 = arith.constant dense<0.000000e+00> : vector<32x16xf32>
    %901 = tpu.matmul %900, %898, %cst_701 {dimension_numbers = #tpu.dot_dimension_numbers<[1], [0], [0], [1], [0, 0, 1, 1], [], []>} : vector<32x16xbf16>, vector<16x16xbf16>, vector<32x16xf32> -> vector<32x16xf32>
    %902 = arith.addf %896, %901 : vector<32x16xf32>
    %c0_702 = arith.constant 0 : index
    %c54_703 = arith.constant 54 : index
    %903 = vector.load %arg85[%c0_702, %c54_703] : memref<32x70xf32, #tpu.memory_space<vmem>>, vector<16x16xf32>
    %904 = arith.truncf %903 : vector<16x16xf32> to vector<16x16xbf16>
    %c2_704 = arith.constant 2 : index
    %c0_705 = arith.constant 0 : index
    %c0_706 = arith.constant 0 : index
    %905 = vector.load %arg66[%c2_704, %c0_705, %c0_706] : memref<3x32x16xbf16, #tpu.memory_space<vmem>>, vector<1x32x16xbf16>
    %906 = vector.shape_cast %905 : vector<1x32x16xbf16> to vector<32x16xbf16>
    %cst_707 = arith.constant dense<0.000000e+00> : vector<32x16xf32>
    %907 = tpu.matmul %906, %904, %cst_707 {dimension_numbers = #tpu.dot_dimension_numbers<[1], [0], [0], [1], [0, 0, 1, 1], [], []>} : vector<32x16xbf16>, vector<16x16xbf16>, vector<32x16xf32> -> vector<32x16xf32>
    %908 = arith.addf %902, %907 : vector<32x16xf32>
    %c0_708 = arith.constant 0 : index
    %c0_709 = arith.constant 0 : index
    %909 = vector.load %arg67[%c0_708, %c0_709] : memref<32x1xf32, #tpu.memory_space<vmem>>, vector<32x1xf32>
    %910 = vector.broadcast %909 : vector<32x1xf32> to vector<32x16xf32>
    %911 = arith.addf %908, %910 : vector<32x16xf32>
    %912 = vector.extract_strided_slice %911 {offsets = [0, 0], sizes = [16, 16], strides = [1, 1]} : vector<32x16xf32> to vector<16x16xf32>
    %913 = arith.negf %912 : vector<16x16xf32>
    %914 = math.exp %913 : vector<16x16xf32>
    %cst_710 = arith.constant 1.000000e+00 : f32
    %915 = vector.broadcast %cst_710 : f32 to vector<16x16xf32>
    %916 = arith.addf %915, %914 : vector<16x16xf32>
    %917 = arith.divf %915, %916 : vector<16x16xf32>
    %c0_711 = arith.constant 0 : index
    %c54_712 = arith.constant 54 : index
    %918 = vector.load %arg85[%c0_711, %c54_712] : memref<32x70xf32, #tpu.memory_space<vmem>>, vector<16x16xf32>
    %919 = vector.extract_strided_slice %911 {offsets = [16, 0], sizes = [16, 16], strides = [1, 1]} : vector<32x16xf32> to vector<16x16xf32>
    %920 = arith.subf %919, %918 : vector<16x16xf32>
    %921 = arith.mulf %917, %920 : vector<16x16xf32>
    %922 = arith.addf %918, %921 : vector<16x16xf32>
    %c0_713 = arith.constant 0 : index
    %c54_714 = arith.constant 54 : index
    %923 = vector.load %arg85[%c0_713, %c54_714] : memref<32x70xf32, #tpu.memory_space<vmem>>, vector<16x16xf32>
    tpu.vector_store %arg85[%c0_713, %c54_714], %922 {strides = array<i32>} : memref<32x70xf32, #tpu.memory_space<vmem>>, vector<16x16xf32>,
    %c0_715 = arith.constant 0 : index
    %c52_716 = arith.constant 52 : index
    %924 = vector.load %arg85[%c0_715, %c52_716] : memref<32x70xf32, #tpu.memory_space<vmem>>, vector<16x16xf32>
    %925 = arith.truncf %924 : vector<16x16xf32> to vector<16x16xbf16>
    %c0_717 = arith.constant 0 : index
    %c0_718 = arith.constant 0 : index
    %c0_719 = arith.constant 0 : index
    %926 = vector.load %arg68[%c0_717, %c0_718, %c0_719] : memref<3x32x16xbf16, #tpu.memory_space<vmem>>, vector<1x32x16xbf16>
    %927 = vector.shape_cast %926 : vector<1x32x16xbf16> to vector<32x16xbf16>
    %cst_720 = arith.constant dense<0.000000e+00> : vector<32x16xf32>
    %928 = tpu.matmul %927, %925, %cst_720 {dimension_numbers = #tpu.dot_dimension_numbers<[1], [0], [0], [1], [0, 0, 1, 1], [], []>} : vector<32x16xbf16>, vector<16x16xbf16>, vector<32x16xf32> -> vector<32x16xf32>
    %c0_721 = arith.constant 0 : index
    %c53_722 = arith.constant 53 : index
    %929 = vector.load %arg85[%c0_721, %c53_722] : memref<32x70xf32, #tpu.memory_space<vmem>>, vector<16x16xf32>
    %930 = arith.truncf %929 : vector<16x16xf32> to vector<16x16xbf16>
    %c1_723 = arith.constant 1 : index
    %c0_724 = arith.constant 0 : index
    %c0_725 = arith.constant 0 : index
    %931 = vector.load %arg68[%c1_723, %c0_724, %c0_725] : memref<3x32x16xbf16, #tpu.memory_space<vmem>>, vector<1x32x16xbf16>
    %932 = vector.shape_cast %931 : vector<1x32x16xbf16> to vector<32x16xbf16>
    %cst_726 = arith.constant dense<0.000000e+00> : vector<32x16xf32>
    %933 = tpu.matmul %932, %930, %cst_726 {dimension_numbers = #tpu.dot_dimension_numbers<[1], [0], [0], [1], [0, 0, 1, 1], [], []>} : vector<32x16xbf16>, vector<16x16xbf16>, vector<32x16xf32> -> vector<32x16xf32>
    %934 = arith.addf %928, %933 : vector<32x16xf32>
    %c0_727 = arith.constant 0 : index
    %c54_728 = arith.constant 54 : index
    %935 = vector.load %arg85[%c0_727, %c54_728] : memref<32x70xf32, #tpu.memory_space<vmem>>, vector<16x16xf32>
    %936 = arith.truncf %935 : vector<16x16xf32> to vector<16x16xbf16>
    %c2_729 = arith.constant 2 : index
    %c0_730 = arith.constant 0 : index
    %c0_731 = arith.constant 0 : index
    %937 = vector.load %arg68[%c2_729, %c0_730, %c0_731] : memref<3x32x16xbf16, #tpu.memory_space<vmem>>, vector<1x32x16xbf16>
    %938 = vector.shape_cast %937 : vector<1x32x16xbf16> to vector<32x16xbf16>
    %cst_732 = arith.constant dense<0.000000e+00> : vector<32x16xf32>
    %939 = tpu.matmul %938, %936, %cst_732 {dimension_numbers = #tpu.dot_dimension_numbers<[1], [0], [0], [1], [0, 0, 1, 1], [], []>} : vector<32x16xbf16>, vector<16x16xbf16>, vector<32x16xf32> -> vector<32x16xf32>
    %940 = arith.addf %934, %939 : vector<32x16xf32>
    %c0_733 = arith.constant 0 : index
    %c0_734 = arith.constant 0 : index
    %941 = vector.load %arg69[%c0_733, %c0_734] : memref<32x1xf32, #tpu.memory_space<vmem>>, vector<32x1xf32>
    %942 = vector.broadcast %941 : vector<32x1xf32> to vector<32x16xf32>
    %943 = arith.addf %940, %942 : vector<32x16xf32>
    %944 = vector.extract_strided_slice %943 {offsets = [0, 0], sizes = [16, 16], strides = [1, 1]} : vector<32x16xf32> to vector<16x16xf32>
    %945 = arith.negf %944 : vector<16x16xf32>
    %946 = math.exp %945 : vector<16x16xf32>
    %cst_735 = arith.constant 1.000000e+00 : f32
    %947 = vector.broadcast %cst_735 : f32 to vector<16x16xf32>
    %948 = arith.addf %947, %946 : vector<16x16xf32>
    %949 = arith.divf %947, %948 : vector<16x16xf32>
    %c0_736 = arith.constant 0 : index
    %c54_737 = arith.constant 54 : index
    %950 = vector.load %arg85[%c0_736, %c54_737] : memref<32x70xf32, #tpu.memory_space<vmem>>, vector<16x16xf32>
    %951 = vector.extract_strided_slice %943 {offsets = [16, 0], sizes = [16, 16], strides = [1, 1]} : vector<32x16xf32> to vector<16x16xf32>
    %952 = arith.subf %951, %950 : vector<16x16xf32>
    %953 = arith.mulf %949, %952 : vector<16x16xf32>
    %954 = arith.addf %950, %953 : vector<16x16xf32>
    %c0_738 = arith.constant 0 : index
    %c54_739 = arith.constant 54 : index
    %955 = vector.load %arg85[%c0_738, %c54_739] : memref<32x70xf32, #tpu.memory_space<vmem>>, vector<16x16xf32>
    tpu.vector_store %arg85[%c0_738, %c54_739], %954 {strides = array<i32>} : memref<32x70xf32, #tpu.memory_space<vmem>>, vector<16x16xf32>,
    %c0_740 = arith.constant 0 : index
    %c52_741 = arith.constant 52 : index
    %956 = vector.load %arg85[%c0_740, %c52_741] : memref<32x70xf32, #tpu.memory_space<vmem>>, vector<16x16xf32>
    %957 = arith.truncf %956 : vector<16x16xf32> to vector<16x16xbf16>
    %c0_742 = arith.constant 0 : index
    %c0_743 = arith.constant 0 : index
    %c0_744 = arith.constant 0 : index
    %958 = vector.load %arg70[%c0_742, %c0_743, %c0_744] : memref<3x32x16xbf16, #tpu.memory_space<vmem>>, vector<1x32x16xbf16>
    %959 = vector.shape_cast %958 : vector<1x32x16xbf16> to vector<32x16xbf16>
    %cst_745 = arith.constant dense<0.000000e+00> : vector<32x16xf32>
    %960 = tpu.matmul %959, %957, %cst_745 {dimension_numbers = #tpu.dot_dimension_numbers<[1], [0], [0], [1], [0, 0, 1, 1], [], []>} : vector<32x16xbf16>, vector<16x16xbf16>, vector<32x16xf32> -> vector<32x16xf32>
    %c0_746 = arith.constant 0 : index
    %c53_747 = arith.constant 53 : index
    %961 = vector.load %arg85[%c0_746, %c53_747] : memref<32x70xf32, #tpu.memory_space<vmem>>, vector<16x16xf32>
    %962 = arith.truncf %961 : vector<16x16xf32> to vector<16x16xbf16>
    %c1_748 = arith.constant 1 : index
    %c0_749 = arith.constant 0 : index
    %c0_750 = arith.constant 0 : index
    %963 = vector.load %arg70[%c1_748, %c0_749, %c0_750] : memref<3x32x16xbf16, #tpu.memory_space<vmem>>, vector<1x32x16xbf16>
    %964 = vector.shape_cast %963 : vector<1x32x16xbf16> to vector<32x16xbf16>
    %cst_751 = arith.constant dense<0.000000e+00> : vector<32x16xf32>
    %965 = tpu.matmul %964, %962, %cst_751 {dimension_numbers = #tpu.dot_dimension_numbers<[1], [0], [0], [1], [0, 0, 1, 1], [], []>} : vector<32x16xbf16>, vector<16x16xbf16>, vector<32x16xf32> -> vector<32x16xf32>
    %966 = arith.addf %960, %965 : vector<32x16xf32>
    %c0_752 = arith.constant 0 : index
    %c54_753 = arith.constant 54 : index
    %967 = vector.load %arg85[%c0_752, %c54_753] : memref<32x70xf32, #tpu.memory_space<vmem>>, vector<16x16xf32>
    %968 = arith.truncf %967 : vector<16x16xf32> to vector<16x16xbf16>
    %c2_754 = arith.constant 2 : index
    %c0_755 = arith.constant 0 : index
    %c0_756 = arith.constant 0 : index
    %969 = vector.load %arg70[%c2_754, %c0_755, %c0_756] : memref<3x32x16xbf16, #tpu.memory_space<vmem>>, vector<1x32x16xbf16>
    %970 = vector.shape_cast %969 : vector<1x32x16xbf16> to vector<32x16xbf16>
    %cst_757 = arith.constant dense<0.000000e+00> : vector<32x16xf32>
    %971 = tpu.matmul %970, %968, %cst_757 {dimension_numbers = #tpu.dot_dimension_numbers<[1], [0], [0], [1], [0, 0, 1, 1], [], []>} : vector<32x16xbf16>, vector<16x16xbf16>, vector<32x16xf32> -> vector<32x16xf32>
    %972 = arith.addf %966, %971 : vector<32x16xf32>
    %c0_758 = arith.constant 0 : index
    %c0_759 = arith.constant 0 : index
    %973 = vector.load %arg71[%c0_758, %c0_759] : memref<32x1xf32, #tpu.memory_space<vmem>>, vector<32x1xf32>
    %974 = vector.broadcast %973 : vector<32x1xf32> to vector<32x16xf32>
    %975 = arith.addf %972, %974 : vector<32x16xf32>
    %976 = vector.extract_strided_slice %975 {offsets = [0, 0], sizes = [16, 16], strides = [1, 1]} : vector<32x16xf32> to vector<16x16xf32>
    %977 = arith.negf %976 : vector<16x16xf32>
    %978 = math.exp %977 : vector<16x16xf32>
    %cst_760 = arith.constant 1.000000e+00 : f32
    %979 = vector.broadcast %cst_760 : f32 to vector<16x16xf32>
    %980 = arith.addf %979, %978 : vector<16x16xf32>
    %981 = arith.divf %979, %980 : vector<16x16xf32>
    %c0_761 = arith.constant 0 : index
    %c54_762 = arith.constant 54 : index
    %982 = vector.load %arg85[%c0_761, %c54_762] : memref<32x70xf32, #tpu.memory_space<vmem>>, vector<16x16xf32>
    %983 = vector.extract_strided_slice %975 {offsets = [16, 0], sizes = [16, 16], strides = [1, 1]} : vector<32x16xf32> to vector<16x16xf32>
    %984 = arith.subf %983, %982 : vector<16x16xf32>
    %985 = arith.mulf %981, %984 : vector<16x16xf32>
    %986 = arith.addf %982, %985 : vector<16x16xf32>
    %c0_763 = arith.constant 0 : index
    %c54_764 = arith.constant 54 : index
    %987 = vector.load %arg85[%c0_763, %c54_764] : memref<32x70xf32, #tpu.memory_space<vmem>>, vector<16x16xf32>
    tpu.vector_store %arg85[%c0_763, %c54_764], %986 {strides = array<i32>} : memref<32x70xf32, #tpu.memory_space<vmem>>, vector<16x16xf32>,
    %c0_765 = arith.constant 0 : index
    %c54_766 = arith.constant 54 : index
    %988 = vector.load %arg85[%c0_765, %c54_766] : memref<32x70xf32, #tpu.memory_space<vmem>>, vector<16x16xf32>
    %989 = arith.truncf %988 : vector<16x16xf32> to vector<16x16xbf16>
    %c0_767 = arith.constant 0 : index
    %c0_768 = arith.constant 0 : index
    %c0_769 = arith.constant 0 : index
    %990 = vector.load %arg72[%c0_767, %c0_768, %c0_769] : memref<1x16x16xbf16, #tpu.memory_space<vmem>>, vector<1x16x16xbf16>
    %991 = vector.shape_cast %990 : vector<1x16x16xbf16> to vector<16x16xbf16>
    %cst_770 = arith.constant dense<0.000000e+00> : vector<16x16xf32>
    %992 = tpu.matmul %991, %989, %cst_770 {dimension_numbers = #tpu.dot_dimension_numbers<[1], [0], [0], [1], [0, 0, 1, 1], [], []>} : vector<16x16xbf16>, vector<16x16xbf16>, vector<16x16xf32> -> vector<16x16xf32>
    %c0_771 = arith.constant 0 : index
    %c0_772 = arith.constant 0 : index
    %993 = vector.load %arg73[%c0_771, %c0_772] : memref<16x1xf32, #tpu.memory_space<vmem>>, vector<16x1xf32>
    %994 = vector.broadcast %993 : vector<16x1xf32> to vector<16x16xf32>
    %995 = arith.addf %992, %994 : vector<16x16xf32>
    %cst_773 = arith.constant 0.000000e+00 : f32
    %996 = vector.broadcast %cst_773 : f32 to vector<16x16xf32>
    %997 = arith.maximumf %995, %996 : vector<16x16xf32>
    %c0_774 = arith.constant 0 : index
    %c54_775 = arith.constant 54 : index
    %998 = vector.load %arg85[%c0_774, %c54_775] : memref<32x70xf32, #tpu.memory_space<vmem>>, vector<16x16xf32>
    tpu.vector_store %arg85[%c0_774, %c54_775], %997 {strides = array<i32>} : memref<32x70xf32, #tpu.memory_space<vmem>>, vector<16x16xf32>,
    %c0_776 = arith.constant 0 : index
    %c54_777 = arith.constant 54 : index
    %999 = vector.load %arg85[%c0_776, %c54_777] : memref<32x70xf32, #tpu.memory_space<vmem>>, vector<16x16xf32>
    %1000 = arith.truncf %999 : vector<16x16xf32> to vector<16x16xbf16>
    %c0_778 = arith.constant 0 : index
    %c0_779 = arith.constant 0 : index
    %c0_780 = arith.constant 0 : index
    %1001 = vector.load %arg74[%c0_778, %c0_779, %c0_780] : memref<1x16x16xbf16, #tpu.memory_space<vmem>>, vector<1x16x16xbf16>
    %1002 = vector.shape_cast %1001 : vector<1x16x16xbf16> to vector<16x16xbf16>
    %cst_781 = arith.constant dense<0.000000e+00> : vector<16x16xf32>
    %1003 = tpu.matmul %1002, %1000, %cst_781 {dimension_numbers = #tpu.dot_dimension_numbers<[1], [0], [0], [1], [0, 0, 1, 1], [], []>} : vector<16x16xbf16>, vector<16x16xbf16>, vector<16x16xf32> -> vector<16x16xf32>
    %c0_782 = arith.constant 0 : index
    %c0_783 = arith.constant 0 : index
    %1004 = vector.load %arg75[%c0_782, %c0_783] : memref<16x1xf32, #tpu.memory_space<vmem>>, vector<16x1xf32>
    %1005 = vector.broadcast %1004 : vector<16x1xf32> to vector<16x16xf32>
    %1006 = arith.addf %1003, %1005 : vector<16x16xf32>
    %cst_784 = arith.constant 0.000000e+00 : f32
    %1007 = vector.broadcast %cst_784 : f32 to vector<16x16xf32>
    %1008 = arith.maximumf %1006, %1007 : vector<16x16xf32>
    %c0_785 = arith.constant 0 : index
    %c54_786 = arith.constant 54 : index
    %1009 = vector.load %arg85[%c0_785, %c54_786] : memref<32x70xf32, #tpu.memory_space<vmem>>, vector<16x16xf32>
    tpu.vector_store %arg85[%c0_785, %c54_786], %1008 {strides = array<i32>} : memref<32x70xf32, #tpu.memory_space<vmem>>, vector<16x16xf32>,
    %c0_787 = arith.constant 0 : index
    %c54_788 = arith.constant 54 : index
    %1010 = vector.load %arg85[%c0_787, %c54_788] : memref<32x70xf32, #tpu.memory_space<vmem>>, vector<16x16xf32>
    %1011 = arith.truncf %1010 : vector<16x16xf32> to vector<16x16xbf16>
    %c0_789 = arith.constant 0 : index
    %c0_790 = arith.constant 0 : index
    %c0_791 = arith.constant 0 : index
    %1012 = vector.load %arg76[%c0_789, %c0_790, %c0_791] : memref<1x16x16xbf16, #tpu.memory_space<vmem>>, vector<1x16x16xbf16>
    %1013 = vector.shape_cast %1012 : vector<1x16x16xbf16> to vector<16x16xbf16>
    %cst_792 = arith.constant dense<0.000000e+00> : vector<16x16xf32>
    %1014 = tpu.matmul %1013, %1011, %cst_792 {dimension_numbers = #tpu.dot_dimension_numbers<[1], [0], [0], [1], [0, 0, 1, 1], [], []>} : vector<16x16xbf16>, vector<16x16xbf16>, vector<16x16xf32> -> vector<16x16xf32>
    %c0_793 = arith.constant 0 : index
    %c0_794 = arith.constant 0 : index
    %1015 = vector.load %arg77[%c0_793, %c0_794] : memref<16x1xf32, #tpu.memory_space<vmem>>, vector<16x1xf32>
    %1016 = vector.broadcast %1015 : vector<16x1xf32> to vector<16x16xf32>
    %1017 = arith.addf %1014, %1016 : vector<16x16xf32>
    %cst_795 = arith.constant 0.000000e+00 : f32
    %1018 = vector.broadcast %cst_795 : f32 to vector<16x16xf32>
    %1019 = arith.maximumf %1017, %1018 : vector<16x16xf32>
    %c0_796 = arith.constant 0 : index
    %c54_797 = arith.constant 54 : index
    %1020 = vector.load %arg85[%c0_796, %c54_797] : memref<32x70xf32, #tpu.memory_space<vmem>>, vector<16x16xf32>
    tpu.vector_store %arg85[%c0_796, %c54_797], %1019 {strides = array<i32>} : memref<32x70xf32, #tpu.memory_space<vmem>>, vector<16x16xf32>,
    %c0_798 = arith.constant 0 : index
    %c54_799 = arith.constant 54 : index
    %1021 = vector.load %arg85[%c0_798, %c54_799] : memref<32x70xf32, #tpu.memory_space<vmem>>, vector<16x16xf32>
    %1022 = arith.truncf %1021 : vector<16x16xf32> to vector<16x16xbf16>
    %c0_800 = arith.constant 0 : index
    %c0_801 = arith.constant 0 : index
    %c0_802 = arith.constant 0 : index
    %1023 = vector.load %arg78[%c0_800, %c0_801, %c0_802] : memref<1x8x16xbf16, #tpu.memory_space<vmem>>, vector<1x8x16xbf16>
    %1024 = vector.shape_cast %1023 : vector<1x8x16xbf16> to vector<8x16xbf16>
    %cst_803 = arith.constant dense<0.000000e+00> : vector<8x16xf32>
    %1025 = tpu.matmul %1024, %1022, %cst_803 {dimension_numbers = #tpu.dot_dimension_numbers<[1], [0], [0], [1], [0, 0, 1, 1], [], []>} : vector<8x16xbf16>, vector<16x16xbf16>, vector<8x16xf32> -> vector<8x16xf32>
    %c0_804 = arith.constant 0 : index
    %c0_805 = arith.constant 0 : index
    %1026 = vector.load %arg79[%c0_804, %c0_805] : memref<8x1xf32, #tpu.memory_space<vmem>>, vector<8x1xf32>
    %1027 = vector.broadcast %1026 : vector<8x1xf32> to vector<8x16xf32>
    %1028 = arith.addf %1025, %1027 : vector<8x16xf32>
    %1029 = arith.negf %1028 : vector<8x16xf32>
    %1030 = math.exp %1029 : vector<8x16xf32>
    %cst_806 = arith.constant 1.000000e+00 : f32
    %1031 = vector.broadcast %cst_806 : f32 to vector<8x16xf32>
    %1032 = arith.addf %1031, %1030 : vector<8x16xf32>
    %1033 = arith.divf %1031, %1032 : vector<8x16xf32>
    %c0_807 = arith.constant 0 : index
    %c0_808 = arith.constant 0 : index
    %c0_809 = arith.constant 0 : index
    %1034 = vector.load %arg80[%c0_807, %c0_808, %c0_809] : memref<1x8x16xf32, #tpu.memory_space<vmem>>, vector<1x8x16xf32>
    %1035 = vector.shape_cast %1034 : vector<1x8x16xf32> to vector<8x16xf32>
    %1036 = vector.shape_cast %1033 : vector<8x16xf32> to vector<1x8x16xf32>
    tpu.vector_store %arg80[%c0_807, %c0_808, %c0_809], %1036 {strides = array<i32>} : memref<1x8x16xf32, #tpu.memory_space<vmem>>, vector<1x8x16xf32>,
    return
  }
  func.func @transform_0(%arg0: i32) -> (i32, i32, i32) {
    %c0_i32 = arith.constant 0 : i32
    %c0_i32_0 = arith.constant 0 : i32
    %c0_i32_1 = arith.constant 0 : i32
    return %arg0, %c0_i32, %c0_i32_0 : i32, i32, i32
  }
  func.func @transform_1(%arg0: i32) -> (i32, i32, i32) {
    %c0_i32 = arith.constant 0 : i32
    %c0_i32_0 = arith.constant 0 : i32
    %c0_i32_1 = arith.constant 0 : i32
    return %arg0, %c0_i32, %c0_i32_0 : i32, i32, i32
  }
  func.func @transform_2(%arg0: i32) -> (i32, i32) {
    %c0_i32 = arith.constant 0 : i32
    %c0_i32_0 = arith.constant 0 : i32
    %c0_i32_1 = arith.constant 0 : i32
    return %c0_i32, %c0_i32_0 : i32, i32
  }
  func.func @transform_3(%arg0: i32) -> (i32, i32, i32) {
    %c0_i32 = arith.constant 0 : i32
    %c0_i32_0 = arith.constant 0 : i32
    %c0_i32_1 = arith.constant 0 : i32
    %c0_i32_2 = arith.constant 0 : i32
    return %c0_i32, %c0_i32_0, %c0_i32_1 : i32, i32, i32
  }
  func.func @transform_4(%arg0: i32) -> (i32, i32) {
    %c0_i32 = arith.constant 0 : i32
    %c0_i32_0 = arith.constant 0 : i32
    %c0_i32_1 = arith.constant 0 : i32
    return %c0_i32, %c0_i32_0 : i32, i32
  }
  func.func @transform_5(%arg0: i32) -> (i32, i32, i32) {
    %c0_i32 = arith.constant 0 : i32
    %c0_i32_0 = arith.constant 0 : i32
    %c0_i32_1 = arith.constant 0 : i32
    %c0_i32_2 = arith.constant 0 : i32
    return %c0_i32, %c0_i32_0, %c0_i32_1 : i32, i32, i32
  }
  func.func @transform_6(%arg0: i32) -> (i32, i32) {
    %c0_i32 = arith.constant 0 : i32
    %c0_i32_0 = arith.constant 0 : i32
    %c0_i32_1 = arith.constant 0 : i32
    return %c0_i32, %c0_i32_0 : i32, i32
  }
  func.func @transform_7(%arg0: i32) -> (i32, i32, i32) {
    %c0_i32 = arith.constant 0 : i32
    %c0_i32_0 = arith.constant 0 : i32
    %c0_i32_1 = arith.constant 0 : i32
    %c0_i32_2 = arith.constant 0 : i32
    return %c0_i32, %c0_i32_0, %c0_i32_1 : i32, i32, i32
  }
  func.func @transform_8(%arg0: i32) -> (i32, i32) {
    %c0_i32 = arith.constant 0 : i32
    %c0_i32_0 = arith.constant 0 : i32
    %c0_i32_1 = arith.constant 0 : i32
    return %c0_i32, %c0_i32_0 : i32, i32
  }
  func.func @transform_9(%arg0: i32) -> (i32, i32, i32) {
    %c0_i32 = arith.constant 0 : i32
    %c0_i32_0 = arith.constant 0 : i32
    %c0_i32_1 = arith.constant 0 : i32
    %c0_i32_2 = arith.constant 0 : i32
    return %c0_i32, %c0_i32_0, %c0_i32_1 : i32, i32, i32
  }
  func.func @transform_10(%arg0: i32) -> (i32, i32) {
    %c0_i32 = arith.constant 0 : i32
    %c0_i32_0 = arith.constant 0 : i32
    %c0_i32_1 = arith.constant 0 : i32
    return %c0_i32, %c0_i32_0 : i32, i32
  }
  func.func @transform_11(%arg0: i32) -> (i32, i32, i32) {
    %c0_i32 = arith.constant 0 : i32
    %c0_i32_0 = arith.constant 0 : i32
    %c0_i32_1 = arith.constant 0 : i32
    %c0_i32_2 = arith.constant 0 : i32
    return %c0_i32, %c0_i32_0, %c0_i32_1 : i32, i32, i32
  }
  func.func @transform_12(%arg0: i32) -> (i32, i32) {
    %c0_i32 = arith.constant 0 : i32
    %c0_i32_0 = arith.constant 0 : i32
    %c0_i32_1 = arith.constant 0 : i32
    return %c0_i32, %c0_i32_0 : i32, i32
  }
  func.func @transform_13(%arg0: i32) -> (i32, i32, i32) {
    %c0_i32 = arith.constant 0 : i32
    %c0_i32_0 = arith.constant 0 : i32
    %c0_i32_1 = arith.constant 0 : i32
    %c0_i32_2 = arith.constant 0 : i32
    return %c0_i32, %c0_i32_0, %c0_i32_1 : i32, i32, i32
  }
  func.func @transform_14(%arg0: i32) -> (i32, i32) {
    %c0_i32 = arith.constant 0 : i32
    %c0_i32_0 = arith.constant 0 : i32
    %c0_i32_1 = arith.constant 0 : i32
    return %c0_i32, %c0_i32_0 : i32, i32
  }
  func.func @transform_15(%arg0: i32) -> (i32, i32, i32) {
    %c0_i32 = arith.constant 0 : i32
    %c0_i32_0 = arith.constant 0 : i32
    %c0_i32_1 = arith.constant 0 : i32
    %c0_i32_2 = arith.constant 0 : i32
    return %c0_i32, %c0_i32_0, %c0_i32_1 : i32, i32, i32
  }
  func.func @transform_16(%arg0: i32) -> (i32, i32) {
    %c0_i32 = arith.constant 0 : i32
    %c0_i32_0 = arith.constant 0 : i32
    %c0_i32_1 = arith.constant 0 : i32
    return %c0_i32, %c0_i32_0 : i32, i32
  }
  func.func @transform_17(%arg0: i32) -> (i32, i32, i32) {
    %c0_i32 = arith.constant 0 : i32
    %c0_i32_0 = arith.constant 0 : i32
    %c0_i32_1 = arith.constant 0 : i32
    %c0_i32_2 = arith.constant 0 : i32
    return %c0_i32, %c0_i32_0, %c0_i32_1 : i32, i32, i32
  }
  func.func @transform_18(%arg0: i32) -> (i32, i32) {
    %c0_i32 = arith.constant 0 : i32
    %c0_i32_0 = arith.constant 0 : i32
    %c0_i32_1 = arith.constant 0 : i32
    return %c0_i32, %c0_i32_0 : i32, i32
  }
  func.func @transform_19(%arg0: i32) -> (i32, i32, i32) {
    %c0_i32 = arith.constant 0 : i32
    %c0_i32_0 = arith.constant 0 : i32
    %c0_i32_1 = arith.constant 0 : i32
    %c0_i32_2 = arith.constant 0 : i32
    return %c0_i32, %c0_i32_0, %c0_i32_1 : i32, i32, i32
  }
  func.func @transform_20(%arg0: i32) -> (i32, i32) {
    %c0_i32 = arith.constant 0 : i32
    %c0_i32_0 = arith.constant 0 : i32
    %c0_i32_1 = arith.constant 0 : i32
    return %c0_i32, %c0_i32_0 : i32, i32
  }
  func.func @transform_21(%arg0: i32) -> (i32, i32, i32) {
    %c0_i32 = arith.constant 0 : i32
    %c0_i32_0 = arith.constant 0 : i32
    %c0_i32_1 = arith.constant 0 : i32
    %c0_i32_2 = arith.constant 0 : i32
    return %c0_i32, %c0_i32_0, %c0_i32_1 : i32, i32, i32
  }
  func.func @transform_22(%arg0: i32) -> (i32, i32) {
    %c0_i32 = arith.constant 0 : i32
    %c0_i32_0 = arith.constant 0 : i32
    %c0_i32_1 = arith.constant 0 : i32
    return %c0_i32, %c0_i32_0 : i32, i32
  }
  func.func @transform_23(%arg0: i32) -> (i32, i32, i32) {
    %c0_i32 = arith.constant 0 : i32
    %c0_i32_0 = arith.constant 0 : i32
    %c0_i32_1 = arith.constant 0 : i32
    %c0_i32_2 = arith.constant 0 : i32
    return %c0_i32, %c0_i32_0, %c0_i32_1 : i32, i32, i32
  }
  func.func @transform_24(%arg0: i32) -> (i32, i32) {
    %c0_i32 = arith.constant 0 : i32
    %c0_i32_0 = arith.constant 0 : i32
    %c0_i32_1 = arith.constant 0 : i32
    return %c0_i32, %c0_i32_0 : i32, i32
  }
  func.func @transform_25(%arg0: i32) -> (i32, i32, i32) {
    %c0_i32 = arith.constant 0 : i32
    %c0_i32_0 = arith.constant 0 : i32
    %c0_i32_1 = arith.constant 0 : i32
    %c0_i32_2 = arith.constant 0 : i32
    return %c0_i32, %c0_i32_0, %c0_i32_1 : i32, i32, i32
  }
  func.func @transform_26(%arg0: i32) -> (i32, i32) {
    %c0_i32 = arith.constant 0 : i32
    %c0_i32_0 = arith.constant 0 : i32
    %c0_i32_1 = arith.constant 0 : i32
    return %c0_i32, %c0_i32_0 : i32, i32
  }
  func.func @transform_27(%arg0: i32) -> (i32, i32, i32) {
    %c0_i32 = arith.constant 0 : i32
    %c0_i32_0 = arith.constant 0 : i32
    %c0_i32_1 = arith.constant 0 : i32
    %c0_i32_2 = arith.constant 0 : i32
    return %c0_i32, %c0_i32_0, %c0_i32_1 : i32, i32, i32
  }
  func.func @transform_28(%arg0: i32) -> (i32, i32) {
    %c0_i32 = arith.constant 0 : i32
    %c0_i32_0 = arith.constant 0 : i32
    %c0_i32_1 = arith.constant 0 : i32
    return %c0_i32, %c0_i32_0 : i32, i32
  }
  func.func @transform_29(%arg0: i32) -> (i32, i32, i32) {
    %c0_i32 = arith.constant 0 : i32
    %c0_i32_0 = arith.constant 0 : i32
    %c0_i32_1 = arith.constant 0 : i32
    %c0_i32_2 = arith.constant 0 : i32
    return %c0_i32, %c0_i32_0, %c0_i32_1 : i32, i32, i32
  }
  func.func @transform_30(%arg0: i32) -> (i32, i32) {
    %c0_i32 = arith.constant 0 : i32
    %c0_i32_0 = arith.constant 0 : i32
    %c0_i32_1 = arith.constant 0 : i32
    return %c0_i32, %c0_i32_0 : i32, i32
  }
  func.func @transform_31(%arg0: i32) -> (i32, i32, i32) {
    %c0_i32 = arith.constant 0 : i32
    %c0_i32_0 = arith.constant 0 : i32
    %c0_i32_1 = arith.constant 0 : i32
    %c0_i32_2 = arith.constant 0 : i32
    return %c0_i32, %c0_i32_0, %c0_i32_1 : i32, i32, i32
  }
  func.func @transform_32(%arg0: i32) -> (i32, i32) {
    %c0_i32 = arith.constant 0 : i32
    %c0_i32_0 = arith.constant 0 : i32
    %c0_i32_1 = arith.constant 0 : i32
    return %c0_i32, %c0_i32_0 : i32, i32
  }
  func.func @transform_33(%arg0: i32) -> (i32, i32, i32) {
    %c0_i32 = arith.constant 0 : i32
    %c0_i32_0 = arith.constant 0 : i32
    %c0_i32_1 = arith.constant 0 : i32
    %c0_i32_2 = arith.constant 0 : i32
    return %c0_i32, %c0_i32_0, %c0_i32_1 : i32, i32, i32
  }
  func.func @transform_34(%arg0: i32) -> (i32, i32) {
    %c0_i32 = arith.constant 0 : i32
    %c0_i32_0 = arith.constant 0 : i32
    %c0_i32_1 = arith.constant 0 : i32
    return %c0_i32, %c0_i32_0 : i32, i32
  }
  func.func @transform_35(%arg0: i32) -> (i32, i32, i32) {
    %c0_i32 = arith.constant 0 : i32
    %c0_i32_0 = arith.constant 0 : i32
    %c0_i32_1 = arith.constant 0 : i32
    %c0_i32_2 = arith.constant 0 : i32
    return %c0_i32, %c0_i32_0, %c0_i32_1 : i32, i32, i32
  }
  func.func @transform_36(%arg0: i32) -> (i32, i32) {
    %c0_i32 = arith.constant 0 : i32
    %c0_i32_0 = arith.constant 0 : i32
    %c0_i32_1 = arith.constant 0 : i32
    return %c0_i32, %c0_i32_0 : i32, i32
  }
  func.func @transform_37(%arg0: i32) -> (i32, i32, i32) {
    %c0_i32 = arith.constant 0 : i32
    %c0_i32_0 = arith.constant 0 : i32
    %c0_i32_1 = arith.constant 0 : i32
    %c0_i32_2 = arith.constant 0 : i32
    return %c0_i32, %c0_i32_0, %c0_i32_1 : i32, i32, i32
  }
  func.func @transform_38(%arg0: i32) -> (i32, i32) {
    %c0_i32 = arith.constant 0 : i32
    %c0_i32_0 = arith.constant 0 : i32
    %c0_i32_1 = arith.constant 0 : i32
    return %c0_i32, %c0_i32_0 : i32, i32
  }
  func.func @transform_39(%arg0: i32) -> (i32, i32, i32) {
    %c0_i32 = arith.constant 0 : i32
    %c0_i32_0 = arith.constant 0 : i32
    %c0_i32_1 = arith.constant 0 : i32
    %c0_i32_2 = arith.constant 0 : i32
    return %c0_i32, %c0_i32_0, %c0_i32_1 : i32, i32, i32
  }
  func.func @transform_40(%arg0: i32) -> (i32, i32) {
    %c0_i32 = arith.constant 0 : i32
    %c0_i32_0 = arith.constant 0 : i32
    %c0_i32_1 = arith.constant 0 : i32
    return %c0_i32, %c0_i32_0 : i32, i32
  }
  func.func @transform_41(%arg0: i32) -> (i32, i32, i32) {
    %c0_i32 = arith.constant 0 : i32
    %c0_i32_0 = arith.constant 0 : i32
    %c0_i32_1 = arith.constant 0 : i32
    %c0_i32_2 = arith.constant 0 : i32
    return %c0_i32, %c0_i32_0, %c0_i32_1 : i32, i32, i32
  }
  func.func @transform_42(%arg0: i32) -> (i32, i32) {
    %c0_i32 = arith.constant 0 : i32
    %c0_i32_0 = arith.constant 0 : i32
    %c0_i32_1 = arith.constant 0 : i32
    return %c0_i32, %c0_i32_0 : i32, i32
  }
  func.func @transform_43(%arg0: i32) -> (i32, i32, i32) {
    %c0_i32 = arith.constant 0 : i32
    %c0_i32_0 = arith.constant 0 : i32
    %c0_i32_1 = arith.constant 0 : i32
    %c0_i32_2 = arith.constant 0 : i32
    return %c0_i32, %c0_i32_0, %c0_i32_1 : i32, i32, i32
  }
  func.func @transform_44(%arg0: i32) -> (i32, i32) {
    %c0_i32 = arith.constant 0 : i32
    %c0_i32_0 = arith.constant 0 : i32
    %c0_i32_1 = arith.constant 0 : i32
    return %c0_i32, %c0_i32_0 : i32, i32
  }
  func.func @transform_45(%arg0: i32) -> (i32, i32, i32) {
    %c0_i32 = arith.constant 0 : i32
    %c0_i32_0 = arith.constant 0 : i32
    %c0_i32_1 = arith.constant 0 : i32
    %c0_i32_2 = arith.constant 0 : i32
    return %c0_i32, %c0_i32_0, %c0_i32_1 : i32, i32, i32
  }
  func.func @transform_46(%arg0: i32) -> (i32, i32) {
    %c0_i32 = arith.constant 0 : i32
    %c0_i32_0 = arith.constant 0 : i32
    %c0_i32_1 = arith.constant 0 : i32
    return %c0_i32, %c0_i32_0 : i32, i32
  }
  func.func @transform_47(%arg0: i32) -> (i32, i32, i32) {
    %c0_i32 = arith.constant 0 : i32
    %c0_i32_0 = arith.constant 0 : i32
    %c0_i32_1 = arith.constant 0 : i32
    %c0_i32_2 = arith.constant 0 : i32
    return %c0_i32, %c0_i32_0, %c0_i32_1 : i32, i32, i32
  }
  func.func @transform_48(%arg0: i32) -> (i32, i32) {
    %c0_i32 = arith.constant 0 : i32
    %c0_i32_0 = arith.constant 0 : i32
    %c0_i32_1 = arith.constant 0 : i32
    return %c0_i32, %c0_i32_0 : i32, i32
  }
  func.func @transform_49(%arg0: i32) -> (i32, i32, i32) {
    %c0_i32 = arith.constant 0 : i32
    %c0_i32_0 = arith.constant 0 : i32
    %c0_i32_1 = arith.constant 0 : i32
    %c0_i32_2 = arith.constant 0 : i32
    return %c0_i32, %c0_i32_0, %c0_i32_1 : i32, i32, i32
  }
  func.func @transform_50(%arg0: i32) -> (i32, i32) {
    %c0_i32 = arith.constant 0 : i32
    %c0_i32_0 = arith.constant 0 : i32
    %c0_i32_1 = arith.constant 0 : i32
    return %c0_i32, %c0_i32_0 : i32, i32
  }
  func.func @transform_51(%arg0: i32) -> (i32, i32, i32) {
    %c0_i32 = arith.constant 0 : i32
    %c0_i32_0 = arith.constant 0 : i32
    %c0_i32_1 = arith.constant 0 : i32
    %c0_i32_2 = arith.constant 0 : i32
    return %c0_i32, %c0_i32_0, %c0_i32_1 : i32, i32, i32
  }
  func.func @transform_52(%arg0: i32) -> (i32, i32) {
    %c0_i32 = arith.constant 0 : i32
    %c0_i32_0 = arith.constant 0 : i32
    %c0_i32_1 = arith.constant 0 : i32
    return %c0_i32, %c0_i32_0 : i32, i32
  }
  func.func @transform_53(%arg0: i32) -> (i32, i32, i32) {
    %c0_i32 = arith.constant 0 : i32
    %c0_i32_0 = arith.constant 0 : i32
    %c0_i32_1 = arith.constant 0 : i32
    %c0_i32_2 = arith.constant 0 : i32
    return %c0_i32, %c0_i32_0, %c0_i32_1 : i32, i32, i32
  }
  func.func @transform_54(%arg0: i32) -> (i32, i32) {
    %c0_i32 = arith.constant 0 : i32
    %c0_i32_0 = arith.constant 0 : i32
    %c0_i32_1 = arith.constant 0 : i32
    return %c0_i32, %c0_i32_0 : i32, i32
  }
  func.func @transform_55(%arg0: i32) -> (i32, i32, i32) {
    %c0_i32 = arith.constant 0 : i32
    %c0_i32_0 = arith.constant 0 : i32
    %c0_i32_1 = arith.constant 0 : i32
    %c0_i32_2 = arith.constant 0 : i32
    return %c0_i32, %c0_i32_0, %c0_i32_1 : i32, i32, i32
  }
  func.func @transform_56(%arg0: i32) -> (i32, i32) {
    %c0_i32 = arith.constant 0 : i32
    %c0_i32_0 = arith.constant 0 : i32
    %c0_i32_1 = arith.constant 0 : i32
    return %c0_i32, %c0_i32_0 : i32, i32
  }
  func.func @transform_57(%arg0: i32) -> (i32, i32, i32) {
    %c0_i32 = arith.constant 0 : i32
    %c0_i32_0 = arith.constant 0 : i32
    %c0_i32_1 = arith.constant 0 : i32
    %c0_i32_2 = arith.constant 0 : i32
    return %c0_i32, %c0_i32_0, %c0_i32_1 : i32, i32, i32
  }
  func.func @transform_58(%arg0: i32) -> (i32, i32) {
    %c0_i32 = arith.constant 0 : i32
    %c0_i32_0 = arith.constant 0 : i32
    %c0_i32_1 = arith.constant 0 : i32
    return %c0_i32, %c0_i32_0 : i32, i32
  }
  func.func @transform_59(%arg0: i32) -> (i32, i32, i32) {
    %c0_i32 = arith.constant 0 : i32
    %c0_i32_0 = arith.constant 0 : i32
    %c0_i32_1 = arith.constant 0 : i32
    %c0_i32_2 = arith.constant 0 : i32
    return %c0_i32, %c0_i32_0, %c0_i32_1 : i32, i32, i32
  }
  func.func @transform_60(%arg0: i32) -> (i32, i32) {
    %c0_i32 = arith.constant 0 : i32
    %c0_i32_0 = arith.constant 0 : i32
    %c0_i32_1 = arith.constant 0 : i32
    return %c0_i32, %c0_i32_0 : i32, i32
  }
  func.func @transform_61(%arg0: i32) -> (i32, i32, i32) {
    %c0_i32 = arith.constant 0 : i32
    %c0_i32_0 = arith.constant 0 : i32
    %c0_i32_1 = arith.constant 0 : i32
    %c0_i32_2 = arith.constant 0 : i32
    return %c0_i32, %c0_i32_0, %c0_i32_1 : i32, i32, i32
  }
  func.func @transform_62(%arg0: i32) -> (i32, i32) {
    %c0_i32 = arith.constant 0 : i32
    %c0_i32_0 = arith.constant 0 : i32
    %c0_i32_1 = arith.constant 0 : i32
    return %c0_i32, %c0_i32_0 : i32, i32
  }
  func.func @transform_63(%arg0: i32) -> (i32, i32, i32) {
    %c0_i32 = arith.constant 0 : i32
    %c0_i32_0 = arith.constant 0 : i32
    %c0_i32_1 = arith.constant 0 : i32
    %c0_i32_2 = arith.constant 0 : i32
    return %c0_i32, %c0_i32_0, %c0_i32_1 : i32, i32, i32
  }
  func.func @transform_64(%arg0: i32) -> (i32, i32) {
    %c0_i32 = arith.constant 0 : i32
    %c0_i32_0 = arith.constant 0 : i32
    %c0_i32_1 = arith.constant 0 : i32
    return %c0_i32, %c0_i32_0 : i32, i32
  }
  func.func @transform_65(%arg0: i32) -> (i32, i32, i32) {
    %c0_i32 = arith.constant 0 : i32
    %c0_i32_0 = arith.constant 0 : i32
    %c0_i32_1 = arith.constant 0 : i32
    %c0_i32_2 = arith.constant 0 : i32
    return %c0_i32, %c0_i32_0, %c0_i32_1 : i32, i32, i32
  }
  func.func @transform_66(%arg0: i32) -> (i32, i32) {
    %c0_i32 = arith.constant 0 : i32
    %c0_i32_0 = arith.constant 0 : i32
    %c0_i32_1 = arith.constant 0 : i32
    return %c0_i32, %c0_i32_0 : i32, i32
  }
  func.func @transform_67(%arg0: i32) -> (i32, i32, i32) {
    %c0_i32 = arith.constant 0 : i32
    %c0_i32_0 = arith.constant 0 : i32
    %c0_i32_1 = arith.constant 0 : i32
    %c0_i32_2 = arith.constant 0 : i32
    return %c0_i32, %c0_i32_0, %c0_i32_1 : i32, i32, i32
  }
  func.func @transform_68(%arg0: i32) -> (i32, i32) {
    %c0_i32 = arith.constant 0 : i32
    %c0_i32_0 = arith.constant 0 : i32
    %c0_i32_1 = arith.constant 0 : i32
    return %c0_i32, %c0_i32_0 : i32, i32
  }
  func.func @transform_69(%arg0: i32) -> (i32, i32, i32) {
    %c0_i32 = arith.constant 0 : i32
    %c0_i32_0 = arith.constant 0 : i32
    %c0_i32_1 = arith.constant 0 : i32
    %c0_i32_2 = arith.constant 0 : i32
    return %c0_i32, %c0_i32_0, %c0_i32_1 : i32, i32, i32
  }
  func.func @transform_70(%arg0: i32) -> (i32, i32) {
    %c0_i32 = arith.constant 0 : i32
    %c0_i32_0 = arith.constant 0 : i32
    %c0_i32_1 = arith.constant 0 : i32
    return %c0_i32, %c0_i32_0 : i32, i32
  }
  func.func @transform_71(%arg0: i32) -> (i32, i32, i32) {
    %c0_i32 = arith.constant 0 : i32
    %c0_i32_0 = arith.constant 0 : i32
    %c0_i32_1 = arith.constant 0 : i32
    %c0_i32_2 = arith.constant 0 : i32
    return %c0_i32, %c0_i32_0, %c0_i32_1 : i32, i32, i32
  }
  func.func @transform_72(%arg0: i32) -> (i32, i32) {
    %c0_i32 = arith.constant 0 : i32
    %c0_i32_0 = arith.constant 0 : i32
    %c0_i32_1 = arith.constant 0 : i32
    return %c0_i32, %c0_i32_0 : i32, i32
  }
  func.func @transform_73(%arg0: i32) -> (i32, i32, i32) {
    %c0_i32 = arith.constant 0 : i32
    %c0_i32_0 = arith.constant 0 : i32
    %c0_i32_1 = arith.constant 0 : i32
    %c0_i32_2 = arith.constant 0 : i32
    return %c0_i32, %c0_i32_0, %c0_i32_1 : i32, i32, i32
  }
  func.func @transform_74(%arg0: i32) -> (i32, i32) {
    %c0_i32 = arith.constant 0 : i32
    %c0_i32_0 = arith.constant 0 : i32
    %c0_i32_1 = arith.constant 0 : i32
    return %c0_i32, %c0_i32_0 : i32, i32
  }
  func.func @transform_75(%arg0: i32) -> (i32, i32, i32) {
    %c0_i32 = arith.constant 0 : i32
    %c0_i32_0 = arith.constant 0 : i32
    %c0_i32_1 = arith.constant 0 : i32
    %c0_i32_2 = arith.constant 0 : i32
    return %c0_i32, %c0_i32_0, %c0_i32_1 : i32, i32, i32
  }
  func.func @transform_76(%arg0: i32) -> (i32, i32) {
    %c0_i32 = arith.constant 0 : i32
    %c0_i32_0 = arith.constant 0 : i32
    %c0_i32_1 = arith.constant 0 : i32
    return %c0_i32, %c0_i32_0 : i32, i32
  }
  func.func @transform_77(%arg0: i32) -> (i32, i32, i32) {
    %c0_i32 = arith.constant 0 : i32
    %c0_i32_0 = arith.constant 0 : i32
    %c0_i32_1 = arith.constant 0 : i32
    %c0_i32_2 = arith.constant 0 : i32
    return %c0_i32, %c0_i32_0, %c0_i32_1 : i32, i32, i32
  }
  func.func @transform_78(%arg0: i32) -> (i32, i32) {
    %c0_i32 = arith.constant 0 : i32
    %c0_i32_0 = arith.constant 0 : i32
    %c0_i32_1 = arith.constant 0 : i32
    return %c0_i32, %c0_i32_0 : i32, i32
  }
  func.func @transform_79(%arg0: i32) -> (i32, i32, i32) {
    %c0_i32 = arith.constant 0 : i32
    %c0_i32_0 = arith.constant 0 : i32
    %c0_i32_1 = arith.constant 0 : i32
    return %arg0, %c0_i32, %c0_i32_0 : i32, i32, i32
  }
  func.func @transform_80(%arg0: i32) -> (i32, i32, i32) {
    %c0_i32 = arith.constant 0 : i32
    %c0_i32_0 = arith.constant 0 : i32
    %c0_i32_1 = arith.constant 0 : i32
    return %arg0, %c0_i32, %c0_i32_0 : i32, i32, i32
  }
  func.func @transform_81(%arg0: i32) -> (i32, i32, i32) {
    %c0_i32 = arith.constant 0 : i32
    %c0_i32_0 = arith.constant 0 : i32
    %c0_i32_1 = arith.constant 0 : i32
    return %arg0, %c0_i32, %c0_i32_0 : i32, i32, i32
  }
}

</mosaic_0001>

<bundles_post_ra>
// kernel: t2m_forward.1
= control target key start
LH: loop header
LB: loop body
LE: loop exit
PB: predicated region body
PF: predicated region fallthrough
CT: control target
= control target key end

     0   :  { %s17088_s6 = smov 1   ;;  %s17089_s10 = smov 2   ;;  %s19318_s0 = inlined_call_operand.smem [shape: u32[82], index: -1, kind: input, shape index: {}] }
   0x1   :  { %s17201_s5 = sld [smem:[%s19318_s0]]   ;;  %s17090_s14 = smov 3  }
   0x2   :  { %s17206_s9 = sld [smem:[%s19318_s0 + %s17088_s6]]   ;;  %s17091_s18 = smov 4  }
   0x3   :  { %s17211_s13 = sld [smem:[%s19318_s0 + %s17089_s10]]   ;;  %s17092_s22 = smov 5  }
   0x4   :  { %s17216_s17 = sld [smem:[%s19318_s0 + %s17090_s14]]   ;;  %s17093_s26 = smov 6  }
   0x5   :  { %s17221_s21 = sld [smem:[%s19318_s0 + %s17091_s18]]   ;;  %s17094_s30 = smov 7  }
   0x6   :  { %s17226_s25 = sld [smem:[%s19318_s0 + %s17092_s22]]   ;;  %s17095_s4 = smov 8  }
   0x7   :  { %19469 = sst [smem:[#allocation12_spill]] %s17201_s5  ;;  %s17096_s10 = smov 9  }
   0x8   :  { %19470 = sst [smem:[#allocation13_spill]] %s17206_s9  ;;  %s17097_s15 = smov 10  }
   0x9   :  { %19471 = sst [smem:[#allocation14_spill]] %s17211_s13  ;;  %s17098_s20 = smov 11  }
   0xa   :  { %19472 = sst [smem:[#allocation15_spill]] %s17216_s17  ;;  %s17100_s1 = smov 13  }
   0xb   :  { %19473 = sst [smem:[#allocation16_spill]] %s17221_s21  ;;  %s17101_s7 = smov 14  }
   0xc   :  { %s17231_s29 = sld [smem:[%s19318_s0 + %s17093_s26]]   ;;  %s17099_s26 = smov 12  }
   0xd   :  { %s17236_s3 = sld [smem:[%s19318_s0 + %s17094_s30]]   ;;  %s17103_s22 = smov 16  }
   0xe   :  { %s17241_s8 = sld [smem:[%s19318_s0 + %s17095_s4]]   ;;  %s17104_s28 = smov 17  }
   0xf   :  { %s17246_s14 = sld [smem:[%s19318_s0 + %s17096_s10]]  }
  0x10   :  { %s17251_s19 = sld [smem:[%s19318_s0 + %s17097_s15]]   ;;  %s17102_s15 = smov 15  }
  0x11   :  { %s17256_s24 = sld [smem:[%s19318_s0 + %s17098_s20]]  }
  0x12   :  { %s17261_s30 = sld [smem:[%s19318_s0 + %s17099_s26]]  }
  0x13   :  { %19474 = sst [smem:[#allocation17_spill]] %s17236_s3 }
  0x14   :  { %19475 = sst [smem:[#allocation18_spill]] %s17241_s8 }
  0x15   :  { %19476 = sst [smem:[#allocation19_spill]] %s17246_s14 }
  0x16   :  { %19477 = sst [smem:[#allocation20_spill]] %s17251_s19 }
  0x17   :  { %19478 = sst [smem:[#allocation21_spill]] %s17256_s24 }
  0x18   :  { %s17266_s6 = sld [smem:[%s19318_s0 + %s17100_s1]]  }
  0x19   :  { %s17271_s12 = sld [smem:[%s19318_s0 + %s17101_s7]]   ;;  %s17105_s7 = smov 18  }
  0x1a   :  { %s17276_s20 = sld [smem:[%s19318_s0 + %s17102_s15]]   ;;  %s17106_s15 = smov 19  }
  0x1b   :  { %s17281_s27 = sld [smem:[%s19318_s0 + %s17103_s22]]   ;;  %s17107_s22 = smov 20  }
  0x1c   :  { %s17286_s4 = sld [smem:[%s19318_s0 + %s17104_s28]]   ;;  %s17108_s28 = smov 21  }
  0x1d   :  { %s17291_s9 = sld [smem:[%s19318_s0 + %s17105_s7]]   ;;  %s17109_s7 = smov 22  }
  0x1e   :  { %19479 = sst [smem:[#allocation22_spill]] %s17266_s6 }
  0x1f   :  { %19480 = sst [smem:[#allocation23_spill]] %s17271_s12 }
  0x20   :  { %19481 = sst [smem:[#allocation24_spill]] %s17276_s20 }
  0x21   :  { %19482 = sst [smem:[#allocation25_spill]] %s17281_s27 }
  0x22   :  { %19483 = sst [smem:[#allocation26_spill]] %s17286_s4 }
  0x23   :  { %19484 = sst [smem:[#allocation27_spill]] %s17291_s9 }
  0x24   :  { %s17296_s20 = sld [smem:[%s19318_s0 + %s17106_s15]]   ;;  %s17110_s15 = smov 23  }
  0x25   :  { %s17301_s27 = sld [smem:[%s19318_s0 + %s17107_s22]]   ;;  %s17111_s22 = smov 24  }
  0x26   :  { %s17306_s4 = sld [smem:[%s19318_s0 + %s17108_s28]]   ;;  %s17112_s28 = smov 25  }
  0x27   :  { %s17311_s9 = sld [smem:[%s19318_s0 + %s17109_s7]]   ;;  %s17113_s7 = smov 26  }
  0x2a   :  { %19485 = sst [smem:[#allocation28_spill]] %s17296_s20 }
  0x2b   :  { %19486 = sst [smem:[#allocation29_spill]] %s17301_s27 }
  0x2c   :  { %19487 = sst [smem:[#allocation30_spill]] %s17306_s4 }
  0x2d   :  { %19488 = sst [smem:[#allocation31_spill]] %s17311_s9 }
  0x2e   :  { %s17316_s20 = sld [smem:[%s19318_s0 + %s17110_s15]]   ;;  %s17114_s15 = smov 27  }
  0x2f   :  { %s17321_s27 = sld [smem:[%s19318_s0 + %s17111_s22]]   ;;  %s17115_s22 = smov 28  }
  0x30   :  { %s17326_s4 = sld [smem:[%s19318_s0 + %s17112_s28]]   ;;  %s17116_s28 = smov 29  }
  0x31   :  { %s17331_s9 = sld [smem:[%s19318_s0 + %s17113_s7]]   ;;  %s17117_s7 = smov 30  }
  0x34   :  { %19489 = sst [smem:[#allocation32_spill]] %s17316_s20 }
  0x35   :  { %19490 = sst [smem:[#allocation33_spill]] %s17321_s27 }
  0x36   :  { %19491 = sst [smem:[#allocation34_spill]] %s17326_s4 }
  0x37   :  { %19492 = sst [smem:[#allocation35_spill]] %s17331_s9 }
  0x38   :  { %s17336_s20 = sld [smem:[%s19318_s0 + %s17114_s15]]   ;;  %s17118_s15 = smov 31  }
  0x39   :  { %s17341_s27 = sld [smem:[%s19318_s0 + %s17115_s22]]   ;;  %s17119_s22 = smov 32  }
  0x3a   :  { %s17346_s4 = sld [smem:[%s19318_s0 + %s17116_s28]]   ;;  %s17120_s28 = smov 33  }
  0x3b   :  { %s17351_s9 = sld [smem:[%s19318_s0 + %s17117_s7]]   ;;  %s17121_s7 = smov 34  }
  0x3e   :  { %19493 = sst [smem:[#allocation36_spill]] %s17336_s20 }
  0x3f   :  { %19494 = sst [smem:[#allocation37_spill]] %s17341_s27 }
  0x40   :  { %19495 = sst [smem:[#allocation38_spill]] %s17346_s4 }
  0x41   :  { %19496 = sst [smem:[#allocation39_spill]] %s17351_s9 }
  0x42   :  { %s17356_s20 = sld [smem:[%s19318_s0 + %s17118_s15]]   ;;  %s17122_s15 = smov 35  }
  0x43   :  { %s17361_s27 = sld [smem:[%s19318_s0 + %s17119_s22]]   ;;  %s17123_s22 = smov 36  }
  0x44   :  { %s17366_s4 = sld [smem:[%s19318_s0 + %s17120_s28]]   ;;  %s17124_s28 = smov 37  }
  0x45   :  { %s17371_s9 = sld [smem:[%s19318_s0 + %s17121_s7]]   ;;  %s17125_s7 = smov 38  }
  0x48   :  { %19497 = sst [smem:[#allocation40_spill]] %s17356_s20 }
  0x49   :  { %19498 = sst [smem:[#allocation41_spill]] %s17361_s27 }
  0x4a   :  { %19499 = sst [smem:[#allocation42_spill]] %s17366_s4 }
  0x4b   :  { %19500 = sst [smem:[#allocation43_spill]] %s17371_s9 }
  0x4c   :  { %s17376_s20 = sld [smem:[%s19318_s0 + %s17122_s15]]   ;;  %s17126_s15 = smov 39  }
  0x4d   :  { %s17381_s27 = sld [smem:[%s19318_s0 + %s17123_s22]]   ;;  %s17127_s22 = smov 40  }
  0x4e   :  { %s17386_s4 = sld [smem:[%s19318_s0 + %s17124_s28]]   ;;  %s17128_s28 = smov 41  }
  0x4f   :  { %s17391_s9 = sld [smem:[%s19318_s0 + %s17125_s7]]   ;;  %s17129_s7 = smov 42  }
  0x52   :  { %19501 = sst [smem:[#allocation44_spill]] %s17376_s20 }
  0x53   :  { %19502 = sst [smem:[#allocation45_spill]] %s17381_s27 }
  0x54   :  { %19503 = sst [smem:[#allocation46_spill]] %s17386_s4 }
  0x55   :  { %19504 = sst [smem:[#allocation47_spill]] %s17391_s9 }
  0x56   :  { %s17396_s20 = sld [smem:[%s19318_s0 + %s17126_s15]]   ;;  %s17130_s15 = smov 43  }
  0x57   :  { %s17401_s27 = sld [smem:[%s19318_s0 + %s17127_s22]]   ;;  %s17131_s22 = smov 44  }
  0x58   :  { %s17406_s4 = sld [smem:[%s19318_s0 + %s17128_s28]]   ;;  %s17132_s28 = smov 45  }
  0x59   :  { %s17411_s9 = sld [smem:[%s19318_s0 + %s17129_s7]]   ;;  %s17133_s7 = smov 46  }
  0x5c   :  { %19505 = sst [smem:[#allocation48_spill]] %s17396_s20 }
  0x5d   :  { %19506 = sst [smem:[#allocation49_spill]] %s17401_s27 }
  0x5e   :  { %19507 = sst [smem:[#allocation50_spill]] %s17406_s4 }
  0x5f   :  { %19508 = sst [smem:[#allocation51_spill]] %s17411_s9 }
  0x60   :  { %s17416_s20 = sld [smem:[%s19318_s0 + %s17130_s15]]   ;;  %s17134_s15 = smov 47  }
  0x61   :  { %s17421_s27 = sld [smem:[%s19318_s0 + %s17131_s22]]   ;;  %s17135_s22 = smov 48  }
  0x62   :  { %s17426_s4 = sld [smem:[%s19318_s0 + %s17132_s28]]   ;;  %s17136_s28 = smov 49  }
  0x63   :  { %s17431_s9 = sld [smem:[%s19318_s0 + %s17133_s7]]   ;;  %s17137_s7 = smov 50  }
  0x66   :  { %19509 = sst [smem:[#allocation52_spill]] %s17416_s20 }
  0x67   :  { %19510 = sst [smem:[#allocation53_spill]] %s17421_s27 }
  0x68   :  { %19511 = sst [smem:[#allocation54_spill]] %s17426_s4 }
  0x69   :  { %19512 = sst [smem:[#allocation55_spill]] %s17431_s9 }
  0x6a   :  { %s17436_s20 = sld [smem:[%s19318_s0 + %s17134_s15]]   ;;  %s17138_s15 = smov 51  }
  0x6b   :  { %s17441_s27 = sld [smem:[%s19318_s0 + %s17135_s22]]   ;;  %s17139_s22 = smov 52  }
  0x6c   :  { %s17446_s4 = sld [smem:[%s19318_s0 + %s17136_s28]]   ;;  %s17140_s28 = smov 53  }
  0x6d   :  { %s17451_s9 = sld [smem:[%s19318_s0 + %s17137_s7]]   ;;  %s17141_s7 = smov 54  }
  0x70   :  { %19513 = sst [smem:[#allocation56_spill]] %s17436_s20 }
  0x71   :  { %19514 = sst [smem:[#allocation57_spill]] %s17441_s27 }
  0x72   :  { %19515 = sst [smem:[#allocation58_spill]] %s17446_s4 }
  0x73   :  { %19516 = sst [smem:[#allocation59_spill]] %s17451_s9 }
  0x74   :  { %s17456_s20 = sld [smem:[%s19318_s0 + %s17138_s15]]   ;;  %s17142_s15 = smov 55  }
  0x75   :  { %s17461_s27 = sld [smem:[%s19318_s0 + %s17139_s22]]   ;;  %s17143_s22 = smov 56  }
  0x76   :  { %s17466_s4 = sld [smem:[%s19318_s0 + %s17140_s28]]   ;;  %s17144_s28 = smov 57  }
  0x77   :  { %s17471_s9 = sld [smem:[%s19318_s0 + %s17141_s7]]   ;;  %s17145_s7 = smov 58  }
  0x7a   :  { %19517 = sst [smem:[#allocation60_spill]] %s17456_s20 }
  0x7b   :  { %19518 = sst [smem:[#allocation61_spill]] %s17461_s27 }
  0x7c   :  { %19519 = sst [smem:[#allocation62_spill]] %s17466_s4 }
  0x7d   :  { %19520 = sst [smem:[#allocation63_spill]] %s17471_s9 }
  0x7e   :  { %s17476_s20 = sld [smem:[%s19318_s0 + %s17142_s15]]   ;;  %s17146_s15 = smov 59  }
  0x7f   :  { %s17481_s27 = sld [smem:[%s19318_s0 + %s17143_s22]]   ;;  %s17147_s22 = smov 60  }
  0x80   :  { %s17486_s4 = sld [smem:[%s19318_s0 + %s17144_s28]]   ;;  %s17148_s28 = smov 61  }
  0x81   :  { %s17491_s9 = sld [smem:[%s19318_s0 + %s17145_s7]]   ;;  %s17149_s7 = smov 62  }
  0x84   :  { %19521 = sst [smem:[#allocation64_spill]] %s17476_s20 }
  0x85   :  { %19522 = sst [smem:[#allocation65_spill]] %s17481_s27 }
  0x86   :  { %19523 = sst [smem:[#allocation66_spill]] %s17486_s4 }
  0x87   :  { %19524 = sst [smem:[#allocation67_spill]] %s17491_s9 }
  0x88   :  { %s17496_s20 = sld [smem:[%s19318_s0 + %s17146_s15]]   ;;  %s17150_s15 = smov 63  }
  0x89   :  { %s17501_s27 = sld [smem:[%s19318_s0 + %s17147_s22]]   ;;  %s17151_s22 = smov 64  }
  0x8a   :  { %s17506_s4 = sld [smem:[%s19318_s0 + %s17148_s28]]   ;;  %s17152_s28 = smov 65  }
  0x8b   :  { %s17511_s9 = sld [smem:[%s19318_s0 + %s17149_s7]]   ;;  %s17153_s7 = smov 66  }
  0x8e   :  { %19525 = sst [smem:[#allocation68_spill]] %s17496_s20 }
  0x8f   :  { %19526 = sst [smem:[#allocation69_spill]] %s17501_s27 }
  0x90   :  { %19527 = sst [smem:[#allocation70_spill]] %s17506_s4 }
  0x91   :  { %19528 = sst [smem:[#allocation71_spill]] %s17511_s9 }
  0x92   :  { %s17516_s20 = sld [smem:[%s19318_s0 + %s17150_s15]]   ;;  %s17154_s15 = smov 67  }
  0x93   :  { %s17521_s27 = sld [smem:[%s19318_s0 + %s17151_s22]]   ;;  %s17155_s22 = smov 68  }
  0x94   :  { %s17526_s4 = sld [smem:[%s19318_s0 + %s17152_s28]]   ;;  %s17156_s28 = smov 69  }
  0x95   :  { %s17531_s9 = sld [smem:[%s19318_s0 + %s17153_s7]]   ;;  %s17157_s7 = smov 70  }
  0x98   :  { %19529 = sst [smem:[#allocation72_spill]] %s17516_s20 }
  0x99   :  { %19530 = sst [smem:[#allocation73_spill]] %s17521_s27 }
  0x9a   :  { %19531 = sst [smem:[#allocation74_spill]] %s17526_s4 }
  0x9b   :  { %19532 = sst [smem:[#allocation75_spill]] %s17531_s9 }
  0x9c   :  { %s17536_s20 = sld [smem:[%s19318_s0 + %s17154_s15]]   ;;  %s17158_s15 = smov 71  }
  0x9d   :  { %s17541_s27 = sld [smem:[%s19318_s0 + %s17155_s22]]   ;;  %s17159_s22 = smov 72  }
  0x9e   :  { %s17546_s4 = sld [smem:[%s19318_s0 + %s17156_s28]]   ;;  %s17160_s28 = smov 73  }
  0x9f   :  { %s17551_s9 = sld [smem:[%s19318_s0 + %s17157_s7]]   ;;  %s17161_s7 = smov 74  }
  0xa2   :  { %19533 = sst [smem:[#allocation76_spill]] %s17536_s20 }
  0xa3   :  { %19534 = sst [smem:[#allocation77_spill]] %s17541_s27 }
  0xa4   :  { %19535 = sst [smem:[#allocation78_spill]] %s17546_s4 }
  0xa5   :  { %19536 = sst [smem:[#allocation79_spill]] %s17551_s9 }
  0xa6   :  { %s17556_s20 = sld [smem:[%s19318_s0 + %s17158_s15]]   ;;  %s17162_s15 = smov 75  }
  0xa7   :  { %s17561_s27 = sld [smem:[%s19318_s0 + %s17159_s22]]   ;;  %s17163_s22 = smov 76  }
  0xa8   :  { %s17566_s4 = sld [smem:[%s19318_s0 + %s17160_s28]]   ;;  %s17164_s28 = smov 77  }
  0xa9   :  { %s17571_s9 = sld [smem:[%s19318_s0 + %s17161_s7]]   ;;  %s17165_s7 = smov 78  }
  0xac   :  { %19537 = sst [smem:[#allocation80_spill]] %s17556_s20 }
  0xad   :  { %19538 = sst [smem:[#allocation81_spill]] %s17561_s27 }
  0xae   :  { %19539 = sst [smem:[#allocation82_spill]] %s17566_s4 }
  0xaf   :  { %19540 = sst [smem:[#allocation83_spill]] %s17571_s9 }
  0xb0   :  { %s17576_s20 = sld [smem:[%s19318_s0 + %s17162_s15]]   ;;  %s17166_s15 = smov 79  }
  0xb1   :  { %s17581_s27 = sld [smem:[%s19318_s0 + %s17163_s22]]   ;;  %s17167_s22 = smov 80  }
  0xb2   :  { %s17586_s4 = sld [smem:[%s19318_s0 + %s17164_s28]]   ;;  %s17168_s28 = smov 81  }
  0xb3   :  { %s17591_s9 = sld [smem:[%s19318_s0 + %s17165_s7]]  }
  0xb6   :  { %19541 = sst [smem:[#allocation84_spill]] %s17576_s20 }
  0xb7   :  { %19542 = sst [smem:[#allocation85_spill]] %s17581_s27 }
  0xb8   :  { %19543 = sst [smem:[#allocation86_spill]] %s17586_s4 }
  0xb9   :  { %19544 = sst [smem:[#allocation87_spill]] %s17591_s9 }
  0xba   :  { %s17596_s20 = sld [smem:[%s19318_s0 + %s17166_s15]]  }
  0xbb   :  { %s17601_s27 = sld [smem:[%s19318_s0 + %s17167_s22]]  }
  0xbc   :  { %s17606_s4 = sld [smem:[%s19318_s0 + %s17168_s28]]  }
  0xbd   :  { %169 = vsyncpa [#allocation6], 0 }
  0xbe   :  { %171 = vsyncpa [#allocation6 + $0x1], 0 }
  0xbf   :  { %172 = vsyncpa [#allocation8], 0 }
  0xc0   :  { %174 = vsyncpa [#allocation8 + $0x1], 0  ;;  %s17608_s7 = smov 0   ;;  %s17610_s10 = smov 0  }
  0xc1   :  { %s17612_s11 = smov 0   ;;  %s17614_s15 = smov 0  }
  0xc2 LB: > { %s19545_s24 = sld [smem:[#allocation21_spill]]  ;;  %s19546_s21 = sld [smem:[#allocation16_spill]]  ;;  %s17078_s10 = sphi %s17610_s10, %s19641_s10   ;;  %s17074_s7 = sphi %s17608_s7, %s19640_s7   ;;  %s17086_s15 = sphi %s17614_s15, %s19643_s15   ;;  %s17082_s11 = sphi %s17612_s11, %s19642_s11  }
  0xc3   : > { %s19547_s19 = sld [smem:[#allocation20_spill]]  ;;  %s19548_s17 = sld [smem:[#allocation15_spill]] }
  0xc4   : > { %s19549_s14 = sld [smem:[#allocation19_spill]]  ;;  %s19550_s13 = sld [smem:[#allocation14_spill]] }
  0xc5   : > { %s19551_s12 = sld [smem:[#allocation23_spill]]  ;;  %s19552_s8 = sld [smem:[#allocation18_spill]] }
  0xc6   : > { %s19553_s6 = sld [smem:[#allocation22_spill]]  ;;  %s19554_s3 = sld [smem:[#allocation17_spill]] }
  0xc7   : > { %s17629_s0 = sadd.s32 4294967295, %s17086_s15   ;;  %s19374_s16 = sadd.s32 4294967294, %s17086_s15  }
  0xc8   : > { %s17633_s18 = sadd.s32 1, %s17086_s15   ;;  %s1856_s22 = sadd.s32 1, %s17082_s11 }
  0xc9   : > { %s1853_s23 = ssub.s32 %s17086_s15, %s17633_s18  ;;  %p1866_p0 = scmp.ne.s32.totalorder %s17082_s11, %s17078_s10 }
  0xca   : > { %p1854_p1 = scmp.eq.s32.totalorder %s1853_s23, 0  ;;  %p1867_p2 = scmp.eq.s32.totalorder %s17629_s0, 1 }
  0xcb   : > { %p1872_p3 = scmp.ne.s32.totalorder %s17078_s10, %s17074_s7  ;;  %p1873_p4 = scmp.eq.s32.totalorder %s19374_s16, 1 }
  0xcc   : > { %s17646_s26 = scalar_select %p1854_p1, %s17082_s11, %s1856_s22  }
  0xcd   : > { %p17648_p5 = por %p1867_p2, %p1866_p0  ;;  %p17652_p6 = por %p1873_p4, %p1872_p3 }
  0xce   : > { %p13902_p7 = scmp.ge.s32.totalorder %s17086_s15, 1  ;;  %p2188_p8 = scmp.lt.s32.totalorder %s17086_s15, 3 }
  0xd0   : > { %p2189_p9 = pnand %p13902_p7, %p2188_p8 }
  0xd1   : > { %s19557_s5 = sld [smem:[#allocation12_spill]] (!%p2189_p9)  ;;  %p2380_p10 = scmp.lt.s32.totalorder (!%p2189_p9), %s17629_s0, 1  ;;  %v2407_v0 = vlaneseq (!%p2189_p9)  ;;  %v2428_v1 = vld [vmem:[%s19550_s13] sm:$0xff] (!%p2189_p9)  ;;  %vm2430_vm0 = vcmask (!%p2189_p9), 261120   ;;  %v17169_v7 = vmov (!%p2189_p9), 1.0|1.0  }
  0xd2   : > { %2192 = sbr.rel (%p2189_p9) target bundleno = 19469 (0x4c0d), region = 336  ;;  %15162 = vmatprep.mubr.msk.f32.mxu0 (!%p2189_p9), %vm2430_vm0, %v2428_v1  ;;  %v2429_v8 = vld [vmem:[%s19550_s13 + $0x8] sm:$0xff] (!%p2189_p9)  ;;  %vm2389_vm7 = vcmask (!%p2189_p9), 220160   ;;  %vm2394_vm8 = vcmask (!%p2189_p9), 572760   ;;  %v17170_v9 = vmov (!%p2189_p9), 0.0   ;;  %s19375_s23 = smov (!%p2189_p9), 27  }
  0xd3   : > { %v17665_v2 = vshrl.u32 (!%p2189_p9), %v2407_v0, 7  ;;  %2390 = vst.msk [vmem:[#allocation2] sm:$0xff] (!%p2189_p9), %vm2389_vm7, %v17170_v9  ;;  %2391 = vst.msk [vmem:[#allocation2 + $0x8] sm:$0xff] (!%p2189_p9), %vm2389_vm7, %v17170_v9  ;;  %vm2520_vm9 = vcmask (!%p2189_p9), 351448   ;;  %v16395_v13 = vld [vmem:[%s19548_s17] sm:$0xff] (!%p2189_p9)   ;;  %vm2568_vm10 = vcmask (!%p2189_p9), 130048  }
  0xd4   : > { %2392 = vst.msk [vmem:[#allocation2 + $0x10] sm:$0xff] (!%p2189_p9), %vm2389_vm7, %v17170_v9  ;;  %2393 = vst.msk [vmem:[#allocation2 + $0x18] sm:$0xff] (!%p2189_p9), %vm2389_vm7, %v17170_v9  ;;  %15167 = vmatprep.mubr.msk.bf16.mxu1 (!%p2189_p9), %vm2568_vm10, %v16395_v13  ;;  %v17172_v15 = vmov (!%p2189_p9), 0   ;;  %v2531_v16 = vld [vmem:[%s19546_s21 + $0x8] sm:$0xff] (!%p2189_p9)  ;;  %v2530_v20 = vld [vmem:[%s19546_s21] sm:$0xff] (!%p2189_p9)  ;;  %s19379_s16 = smov (!%p2189_p9), 102  }
  0xd5   : > { %v17670_v3 = vadd.s32 (!%p2189_p9), 8, %v17665_v2  ;;  %v2410_v4 = vadd.s32 (!%p2189_p9), 16, %v17665_v2  ;;  %v2411_v5 = vadd.s32 (!%p2189_p9), 24, %v17665_v2  ;;  %2395 = vst.msk [vmem:[#allocation2] sm:$0xff] (!%p2189_p9), %vm2394_vm8, %v17170_v9  ;;  %2396 = vst.msk [vmem:[#allocation2 + $0x8] sm:$0xff] (!%p2189_p9), %vm2394_vm8, %v17170_v9  ;;  %16383 = vset.pattern.permute.xlu1 (!%p2189_p9), %v17172_v15  ;;  %16384 = vset.pattern.permute.xlu0 (!%p2189_p9), %v17172_v15  ;;  %v2532_v21 = vld [vmem:[%s19546_s21 + $0x10] sm:$0xff] (!%p2189_p9) }
  0xd6   : > { %2397 = vst.msk [vmem:[#allocation2 + $0x10] sm:$0xff] (!%p2189_p9), %vm2394_vm8, %v17170_v9  ;;  %2398 = vst.msk [vmem:[#allocation2 + $0x18] sm:$0xff] (!%p2189_p9), %vm2394_vm8, %v17170_v9  ;;  %v2533_v22 = vld [vmem:[%s19546_s21 + $0x18] sm:$0xff] (!%p2189_p9)  ;;  %v16396_v24 = vld [vmem:[%s19548_s17 + $0x8] sm:$0xff] (!%p2189_p9)   ;;  %s19567_s13 = smov (!%p2189_p9), 98   ;;  %s19583_s17 = sld [smem:[#allocation40_spill]] (!%p2189_p9) }
  0xd7   : > { %v16397_v44 = vld [vmem:[%s17226_s25] sm:$0xff] (!%p2189_p9)   ;;  %v2660_v53 = vld [vmem:[%s17231_s29 + $0x10] sm:$0xff] (!%p2189_p9)  ;;  %v2659_v54 = vld [vmem:[%s17231_s29 + $0x8] sm:$0xff] (!%p2189_p9)  ;;  %vm8053_vm11 = vcmask (!%p2189_p9), 64512   ;;  %vm17181_vm12 = vmmov (!%p2189_p9), 0   ;;  %vm2399_vm13 = vcmask (!%p2189_p9), 441344  }
  0xd8   : > { %v2658_v49 = vld [vmem:[%s17231_s29] sm:$0xff] (!%p2189_p9)  ;;  %v2661_v55 = vld [vmem:[%s17231_s29 + $0x18] sm:$0xff] (!%p2189_p9)  ;;  %v16398_v58 = vld [vmem:[%s17226_s25 + $0x8] sm:$0xff] (!%p2189_p9)   ;;  %2400 = vst.msk [vmem:[#allocation3] sm:$0xff] (!%p2189_p9), %vm2399_vm13, %v17170_v9  ;;  %vm8111_vm14 = vcmask (!%p2189_p9), 572848   ;;  %s19615_s21 = sld [smem:[#allocation65_spill]] (!%p2189_p9) }
  0xd9   : > { %s17662_s2 = scalar_select %p2380_p10, %s17629_s0, 1  ;;  %2401 = vst.msk [vmem:[#allocation3 + $0x8] sm:$0xff] %vm2399_vm13, %v17170_v9  ;;  %2402 = vst.msk [vmem:[#allocation4] sm:$0xff] %vm2399_vm13, %v17170_v9  ;;  %vm11408_vm8 = vcmask 122880  }
  0xda   : > { %2403 = vst.msk [vmem:[#allocation4 + $0x8] sm:$0xff] %vm2399_vm13, %v17170_v9  ;;  %2404 = vst.msk [vmem:[#allocation4 + $0x10] sm:$0xff] %vm2399_vm13, %v17170_v9  ;;  %s19636_s9 = sld [smem:[#allocation87_spill]] }
  0xdb   : > { %s2382_s22 = scalar_lea.vmem %s19557_s5, %s17662_s2  ;;  %s19561_s5 = smov 102   ;;  %2405 = vst.msk [vmem:[#allocation4 + $0x18] sm:$0xff] %vm2399_vm13, %v17170_v9 }
  0xdc   : > { %v13907_v6 = vld [vmem:[%s2382_s22] ss:$0 sm:$0xff]  ;;  %s19393_s22 = smov 101  }
  0xdd   : > { %vm2416_vm1 = vcmp.eq.s32.totalorder %v17665_v2, %v13907_v6  ;;  %vm2417_vm2 = vcmp.eq.s32.totalorder %v17670_v3, %v13907_v6  ;;  %vm2418_vm3 = vcmp.eq.s32.totalorder %v2410_v4, %v13907_v6  ;;  %vm2419_vm4 = vcmp.eq.s32.totalorder %v2411_v5, %v13907_v6 }
  0xde   : > { %vm15922_vm5 = vmpackc.low %vm2417_vm2, %vm2416_vm1 }
  0xdf   : > { %15923 = vmatprep.subr.msk.bf16.mxu0 %vm15922_vm5, %v17169_v7  ;;  %vm15926_vm6 = vmpackc.low %vm2419_vm4, %vm2418_vm3 }
  0xe0   : > { %15925 = vmatpush3.bf16.msk.msra.mxu0 %vm15922_vm5, %v17169_v7  ;;  %vm15931_vm1 = vmpackc.low %vm2568_vm10, %vm2568_vm10 }
  0xe1   : > { %15927 = vmatprep.subr.msk.bf16.mxu0 %vm15926_vm6, %v17169_v7 }
  0xe4   : > { %15929 = vmatpush3.bf16.msk.msra.mxu0 %vm15926_vm6, %v17169_v7 }
  0xe7   : > { %15163 = vmatmul.mubr.msk.f32.vlgmr.msra.gmra.mrb[0].mxu0 %vm2430_vm0, %v2429_v8 }
 0x1ba   : > { %v15164_v10 = vpop.f32.mrb[0].mxu0 }
 0x1bb   : > { %v2503_v11 = vpop.f32.mrb[1].mxu0 }
 0x1bc   : > { %2514 = vrot.lane.b32.xlu0 %v2503_v11, %s19375_s23 }
 0x1c0   : > { %2516 = vrot.lane.b32.xlu0 %v15164_v10, %s19375_s23 }
 0x1c4   : > { %2541 = vperm.xlu0 %16384, %v2531_v16  }
 0x22e   : > { %v2515_v12 = vpop.permute.xlu0 %2514 }
 0x22f   : > { %2521 = vst.msk [vmem:[#allocation2] sm:$0xff] %vm2520_vm9, %v2515_v12 }
 0x232   : > { %v2517_v14 = vpop.permute.xlu0 %2516 }
 0x233   : > { %2522 = vst.msk [vmem:[#allocation2 + $0x8] sm:$0xff] %vm2520_vm9, %v2517_v14  ;;  %v16399_v14 = vld [vmem:[%s19554_s3 + $0x20] sm:$0xff]  }
 0x234   : > { %15183 = vmatprep.mubr.msk.bf16.mxu0 %vm2430_vm0, %v16399_v14 }
 0x236   : > { %v2523_v17 = vld [vmem:[#allocation2] sm:$0xff] }
 0x23a   : > { %v2524_v18 = vld [vmem:[#allocation2 + $0x8] sm:$0xff] }
 0x23b   : > { %v2525_v19 = vpack.c.bf16 %v2524_v18, %v2523_v17 }
 0x23d   : > { %2565 = vrot.lane.b32.xlu1 %v2525_v19, %s19393_s22 }
 0x241   : > { %2536 = vperm.xlu1 %16383, %v2530_v20  }
 0x243   : > { %v2542_v29 = vpop.permute.xlu0 %2541 }
 0x245   : > { %2546 = vperm.xlu1 %16383, %v2532_v21  }
 0x249   : > { %2551 = vperm.xlu1 %16383, %v2533_v22   ;;  %v3126_v22 = vld [vmem:[%s19552_s8] sm:$0xff] }
 0x2af   : > { %v2566_v23 = vpop.permute.xlu1 %2565 }
 0x2b0   : > { %15165 = vmatprep.subr.bf16.mxu1 %v2566_v23 }
 0x2b1   : > { %15166 = vmatpush3.bf16.msra.mxu1 %v2566_v23  ;;  %v3128_v23 = vld [vmem:[%s19552_s8 + $0x10] sm:$0xff] }
 0x2b4   : > { %15168 = vmatmul.mubr.msk.bf16.vlgmr.msra.gmra.mrb[0].mxu1 %vm2568_vm10, %v16396_v24  ;;  %v3127_v24 = vld [vmem:[%s19552_s8 + $0x8] sm:$0xff] }
 0x2b5   : > { %15175 = vmatprep.mubr.msk.bf16.mxu1 %vm2430_vm0, %v16397_v44  ;;  %v16408_v44 = vld [vmem:[%s19554_s3 + $0x48] sm:$0xff]  }
 0x2c0   : > { %v2537_v25 = vpop.permute.xlu1 %2536 }
 0x2c4   : > { %v2547_v26 = vpop.permute.xlu1 %2546 }
 0x2c8   : > { %v2552_v36 = vpop.permute.xlu1 %2551 }
 0x387   : > { %v15169_v27 = vpop.f32.mrb[0].mxu1 }
 0x388   : > { %v2609_v28 = vpop.f32.mrb[1].mxu1  ;;  %v2618_v33 = vadd.f32 %v15169_v27, %v2547_v26  ;;  %v3129_v26 = vld [vmem:[%s19552_s8 + $0x18] sm:$0xff]  ;;  %v3132_v27 = vld [vmem:[%s19552_s8 + $0x30] sm:$0xff] }
 0x389   : > { %v2610_v30 = vadd.f32 %v2609_v28, %v2537_v25  ;;  %v15170_v31 = vpop.f32.mrb[2].mxu1  ;;  %v3130_v25 = vld [vmem:[%s19552_s8 + $0x20] sm:$0xff]  ;;  %v3131_v28 = vld [vmem:[%s19552_s8 + $0x28] sm:$0xff] }
 0x38a   : > { %v2612_v32 = vpop.f32.mrb[3].mxu1  ;;  %v2621_v37 = vadd.f32 %v15170_v31, %v2552_v36  ;;  %v2626_v39 = vmax.f32 %v2618_v33, 0.0  ;;  %v16402_v36 = vld [vmem:[%s19554_s3 + $0x38] sm:$0xff]  }
 0x38b   : > { %v2624_v34 = vmax.f32 %v2610_v30, 0.0  ;;  %v2613_v35 = vadd.f32 %v2612_v32, %v2542_v29  ;;  %v3133_v29 = vld [vmem:[%s19552_s8 + $0x38] sm:$0xff]  ;;  %v16400_v32 = vld [vmem:[%s19554_s3 + $0x28] sm:$0xff]   ;;  %s19565_s8 = smov 101  }
 0x38c   : > { %v2627_v40 = vmax.f32 %v2621_v37, 0.0 }
 0x38d   : > { %v2625_v38 = vmax.f32 %v2613_v35, 0.0  ;;  %2632 = vrot.lane.b32.xlu0 %v2624_v34, %s19375_s23  ;;  %v16401_v34 = vld [vmem:[%s19554_s3 + $0x30] sm:$0xff]  }
 0x38f   : > { %2634 = vrot.lane.b32.xlu1 %v2625_v38, %s19375_s23  ;;  %v16403_v38 = vld [vmem:[%s19554_s3] sm:$0xff]  }
 0x391   : > { %2636 = vrot.lane.b32.xlu0 %v2626_v39, %s19375_s23  ;;  %v16404_v39 = vld [vmem:[%s19554_s3 + $0x8] sm:$0xff]  }
 0x393   : > { %2638 = vrot.lane.b32.xlu1 %v2627_v40, %s19375_s23  ;;  %v16405_v40 = vld [vmem:[%s19554_s3 + $0x10] sm:$0xff]  }
 0x3ff   : > { %v2633_v41 = vpop.permute.xlu0 %2632 }
 0x400   : > { %2644 = vst.msk [vmem:[#allocation2] sm:$0xff] %vm2520_vm9, %v2633_v41 }
 0x401   : > { %v2635_v42 = vpop.permute.xlu1 %2634 }
 0x402   : > { %2645 = vst.msk [vmem:[#allocation2 + $0x8] sm:$0xff] %vm2520_vm9, %v2635_v42  ;;  %v16406_v42 = vld [vmem:[%s19554_s3 + $0x18] sm:$0xff]  }
 0x403   : > { %v2637_v43 = vpop.permute.xlu0 %2636 }
 0x404   : > { %2646 = vst.msk [vmem:[#allocation2 + $0x10] sm:$0xff] %vm2520_vm9, %v2637_v43  ;;  %v16407_v43 = vld [vmem:[%s19554_s3 + $0x40] sm:$0xff]  }
 0x405   : > { %v2639_v45 = vpop.permute.xlu1 %2638 }
 0x406   : > { %2647 = vst.msk [vmem:[#allocation2 + $0x18] sm:$0xff] %vm2520_vm9, %v2639_v45  ;;  %v16409_v45 = vld [vmem:[%s19554_s3 + $0x50] sm:$0xff]  }
 0x407   : > { %v2648_v46 = vld [vmem:[#allocation2] sm:$0xff] }
 0x409   : > { %v2649_v47 = vld [vmem:[#allocation2 + $0x8] sm:$0xff] }
 0x40a   : > { %v2652_v48 = vpack.c.bf16 %v2649_v47, %v2648_v46  ;;  %v16410_v46 = vld [vmem:[%s19554_s3 + $0x58] sm:$0xff]   ;;  %s19382_s3 = smov 98  }
 0x40b   : > { %v2650_v50 = vld [vmem:[#allocation2 + $0x10] sm:$0xff] }
 0x40c   : > { %2694 = vrot.lane.b32.xlu0 %v2652_v48, %s19393_s22 }
 0x40d   : > { %v2651_v51 = vld [vmem:[#allocation2 + $0x18] sm:$0xff] }
 0x40e   : > { %v2653_v52 = vpack.c.bf16 %v2651_v51, %v2650_v50 }
 0x410   : > { %2664 = vperm.xlu0 %16384, %v2658_v49   ;;  %2696 = vrot.lane.b32.xlu1 %v2653_v52, %s19393_s22 }
 0x414   : > { %2674 = vperm.xlu0 %16384, %v2660_v53   ;;  %2669 = vperm.xlu1 %16383, %v2659_v54  }
 0x418   : > { %2679 = vperm.xlu1 %16383, %v2661_v55  }
 0x47e   : > { %v2695_v56 = vpop.permute.xlu0 %2694 }
 0x47f   : > { %15171 = vmatprep.subr.bf16.mxu1 %v2695_v56 }
 0x480   : > { %15172 = vmatpush3.bf16.msra.mxu1 %v2695_v56 }
 0x482   : > { %v2697_v57 = vpop.permute.xlu1 %2696 }
 0x483   : > { %15173 = vmatprep.subr.bf16.mxu1 %v2697_v57 }
 0x484   : > { %15174 = vmatpush3.bf16.msra.mxu1 %v2697_v57 }
 0x487   : > { %15176 = vmatmul.mubr.msk.bf16.vlgmr.msra.gmra.mrb[4].mxu1 %vm2430_vm0, %v16398_v58 }
 0x48f   : > { %v2665_v59 = vpop.permute.xlu0 %2664 }
 0x493   : > { %v2670_v61 = vpop.permute.xlu1 %2669  ;;  %v2675_v6 = vpop.permute.xlu0 %2674 }
 0x497   : > { %v2680_v8 = vpop.permute.xlu1 %2679 }
 0x55a   : > { %v15177_v60 = vpop.f32.mrb[4].mxu1 }
 0x55b   : > { %v2740_v62 = vpop.f32.mrb[5].mxu1  ;;  %v2749_v7 = vadd.f32 %v15177_v60, %v2675_v6 }
 0x55c   : > { %v2741_v63 = vadd.f32 %v2740_v62, %v2665_v59  ;;  %v15178_v1 = vpop.f32.mrb[6].mxu1 }
 0x55d   : > { %v2743_v4 = vpop.f32.mrb[7].mxu1  ;;  %v2752_v10 = vadd.f32 %v15178_v1, %v2680_v8 }
 0x55e   : > { %v2744_v5 = vadd.f32 %v2743_v4, %v2670_v61  ;;  %2759 = vrot.lane.b32.xlu0 %v2741_v63, %s19375_s23 }
 0x560   : > { %2761 = vrot.lane.b32.xlu1 %v2744_v5, %s19375_s23 }
 0x562   : > { %2763 = vrot.lane.b32.xlu0 %v2749_v7, %s19375_s23 }
 0x564   : > { %2765 = vrot.lane.b32.xlu1 %v2752_v10, %s19375_s23  ;;  %s19377_s23 = smov 100  }
 0x5d0   : > { %v2760_v11 = vpop.permute.xlu0 %2759 }
 0x5d1   : > { %2771 = vst.msk [vmem:[#allocation2] sm:$0xff] %vm2520_vm9, %v2760_v11 }
 0x5d2   : > { %v2762_v12 = vpop.permute.xlu1 %2761 }
 0x5d3   : > { %2772 = vst.msk [vmem:[#allocation2 + $0x8] sm:$0xff] %vm2520_vm9, %v2762_v12 }
 0x5d4   : > { %v2764_v13 = vpop.permute.xlu0 %2763 }
 0x5d5   : > { %2773 = vst.msk [vmem:[#allocation2 + $0x10] sm:$0xff] %vm2520_vm9, %v2764_v13 }
 0x5d6   : > { %v2766_v15 = vpop.permute.xlu1 %2765 }
 0x5d7   : > { %2774 = vst.msk [vmem:[#allocation2 + $0x18] sm:$0xff] %vm2520_vm9, %v2766_v15 }
 0x5d8   : > { %v17727_v16 = vld [vmem:[#allocation2] sm:$0xff] }
 0x5da   : > { %v17729_v17 = vld [vmem:[#allocation2 + $0x8] sm:$0xff] }
 0x5db   : > { %v2779_v18 = vpack.c.bf16 %v17729_v17, %v17727_v16 }
 0x5dc   : > { %v17734_v19 = vld [vmem:[#allocation2 + $0x10] sm:$0xff] }
 0x5dd   : > { %2820 = vrot.lane.b32.xlu0 %v2779_v18, %s19393_s22 }
 0x5de   : > { %v17736_v20 = vld [vmem:[#allocation2 + $0x18] sm:$0xff] }
 0x5df   : > { %v2780_v21 = vpack.c.bf16 %v17736_v20, %v17734_v19 }
 0x5e1   : > { %2923 = vrot.lane.b32.xlu0 %v2779_v18, %s19379_s16  ;;  %2822 = vrot.lane.b32.xlu1 %v2780_v21, %s19393_s22 }
 0x5e5   : > { %3035 = vrot.lane.b32.xlu0 %v2779_v18, %s19377_s23  ;;  %2925 = vrot.lane.b32.xlu1 %v2780_v21, %s19379_s16  ;;  %s19384_s16 = smov 104  }
 0x5e9   : > { %3136 = vperm.xlu0 %16384, %v3126_v22   ;;  %3037 = vrot.lane.b32.xlu1 %v2780_v21, %s19377_s23  ;;  %s19558_s23 = smov 27  }
 0x5ed   : > { %3146 = vperm.xlu0 %16384, %v3128_v23   ;;  %3141 = vperm.xlu1 %16383, %v3127_v24  }
 0x5f1   : > { %3156 = vperm.xlu0 %16384, %v3130_v25   ;;  %3151 = vperm.xlu1 %16383, %v3129_v26  }
 0x5f5   : > { %3166 = vperm.xlu0 %16384, %v3132_v27   ;;  %3161 = vperm.xlu1 %16383, %v3131_v28  }
 0x5f9   : > { %3210 = vrot.lane.b32.xlu0 %v17727_v16, %s19393_s22  ;;  %3171 = vperm.xlu1 %16383, %v3133_v29  }
 0x5fd   : > { %3214 = vrot.lane.b32.xlu0 %v17734_v19, %s19393_s22  ;;  %3212 = vrot.lane.b32.xlu1 %v17729_v17, %s19393_s22 }
 0x601   : > { %3216 = vrot.lane.b32.xlu1 %v17736_v20, %s19393_s22 }
 0x64f   : > { %v2821_v30 = vpop.permute.xlu0 %2820 }
 0x650   : > { %15179 = vmatprep.subr.bf16.mxu0 %v2821_v30 }
 0x651   : > { %15180 = vmatpush3.bf16.msra.mxu0 %v2821_v30 }
 0x653   : > { %v2823_v31 = vpop.permute.xlu1 %2822  ;;  %v2924_v33 = vpop.permute.xlu0 %2923 }
 0x654   : > { %15181 = vmatprep.subr.bf16.mxu0 %v2823_v31 }
 0x655   : > { %15182 = vmatpush3.bf16.msra.mxu0 %v2823_v31 }
 0x656   : > { %15191 = vmatprep.subr.bf16.mxu0 %v2924_v33 }
 0x657   : > { %v2926_v35 = vpop.permute.xlu1 %2925  ;;  %v3036_v37 = vpop.permute.xlu0 %3035 }
 0x658   : > { %15184 = vmatmul.mubr.msk.bf16.vlgmr.msra.gmra.mrb[4].mxu0 %vm2430_vm0, %v16400_v32 }
 0x659   : > { %15192 = vmatpush3.bf16.msra.mxu0 %v2924_v33  ;;  %15187 = vmatprep.mubr.msk.bf16.mxu0 %vm2430_vm0, %v16401_v34 }
 0x65a   : > { %15193 = vmatprep.subr.bf16.mxu0 %v2926_v35 }
 0x65b   : > { %v3038_v41 = vpop.permute.xlu1 %3037 }
 0x65d   : > { %15194 = vmatpush3.bf16.msra.mxu0 %v2926_v35 }
 0x65e   : > { %15203 = vmatprep.subr.bf16.mxu0 %v3036_v37 }
 0x660   : > { %15188 = vmatmul.mubr.msk.bf16.gmra.mrb[8].mxu0 %vm2430_vm0, %v16402_v36 }
 0x661   : > { %15195 = vmatprep.mubr.msk.bf16.mxu0 %vm2430_vm0, %v16403_v38 }
 0x668   : > { %15196 = vmatmul.mubr.msk.bf16.vlgmr.msra.gmra.mrb[4].mxu0 %vm2430_vm0, %v16404_v39  ;;  %v3137_v47 = vpop.permute.xlu0 %3136 }
 0x669   : > { %15204 = vmatpush3.bf16.msra.mxu0 %v3036_v37  ;;  %15199 = vmatprep.mubr.msk.bf16.mxu0 %vm2430_vm0, %v16405_v40 }
 0x66a   : > { %15205 = vmatprep.subr.bf16.mxu0 %v3038_v41 }
 0x66c   : > { %v3142_v48 = vpop.permute.xlu1 %3141  ;;  %v3147_v49 = vpop.permute.xlu0 %3146 }
 0x66d   : > { %15206 = vmatpush3.bf16.msra.mxu0 %v3038_v41 }
 0x670   : > { %15200 = vmatmul.mubr.msk.bf16.gmra.mrb[8].mxu0 %vm2430_vm0, %v16406_v42  ;;  %v3152_v53 = vpop.permute.xlu1 %3151  ;;  %v3157_v63 = vpop.permute.xlu0 %3156 }
 0x671   : > { %15207 = vmatprep.mubr.msk.bf16.mxu0 %vm2430_vm0, %v16407_v43 }
 0x674   : > { %v3162_v5 = vpop.permute.xlu1 %3161  ;;  %v3167_v8 = vpop.permute.xlu0 %3166 }
 0x678   : > { %15208 = vmatmul.mubr.msk.bf16.vlgmr.msra.gmra.mrb[4].mxu0 %vm2430_vm0, %v16408_v44  ;;  %v3172_v12 = vpop.permute.xlu1 %3171  ;;  %v3211_v23 = vpop.permute.xlu0 %3210 }
 0x679   : > { %15211 = vmatprep.mubr.msk.bf16.mxu0 %vm2430_vm0, %v16409_v45 }
 0x67c   : > { %v3213_v24 = vpop.permute.xlu1 %3212  ;;  %v3215_v28 = vpop.permute.xlu0 %3214 }
 0x680   : > { %15212 = vmatmul.mubr.msk.bf16.gmra.mrb[8].mxu0 %vm2430_vm0, %v16410_v46  ;;  %v3217_v32 = vpop.permute.xlu1 %3216 }
 0x74b   : > { %v15209_v50 = vpop.f32.mrb[4].mxu0 }
 0x74c   : > { %v3176_v51 = vadd.f32 %v15209_v50, %v3147_v49  ;;  %v3087_v52 = vpop.f32.mrb[5].mxu0 }
 0x74d   : > { %v3174_v54 = vadd.f32 %v3137_v47, %v3087_v52  ;;  %v15210_v55 = vpop.f32.mrb[6].mxu0 }
 0x74e   : > { %v13968_v56 = vmul.f32 -1.442695, %v3176_v51  ;;  %v3177_v57 = vadd.f32 %v15210_v55, %v3152_v53  ;;  %v3090_v58 = vpop.f32.mrb[7].mxu0  ;;  %v16411_v51 = vld [vmem:[%s19549_s14 + $0x20] sm:$0xff]   ;;  %v3607_v55 = vld [vmem:[%s19547_s19 + $0x10] sm:$0xff] }
 0x74f   : > { %v13966_v59 = vmul.f32 -1.442695, %v3174_v54  ;;  %v3175_v60 = vadd.f32 %v3142_v48, %v3090_v58  ;;  %15219 = vmatprep.mubr.msk.bf16.mxu1 %vm2430_vm0, %v16411_v51  ;;  %v3605_v54 = vld [vmem:[%s19547_s19] sm:$0xff]  ;;  %v3608_v58 = vld [vmem:[%s19547_s19 + $0x18] sm:$0xff] }
 0x750   : > { %16630 = vpow2.f32 %v13968_v56  ;;  %v13969_v61 = vmul.f32 -1.442695, %v3177_v57  ;;  %v3606_v56 = vld [vmem:[%s19547_s19 + $0x8] sm:$0xff]  ;;  %v3609_v57 = vld [vmem:[%s19547_s19 + $0x20] sm:$0xff] }
 0x751   : > { %16632 = vpow2.f32 %v13966_v59  ;;  %v13967_v62 = vmul.f32 -1.442695, %v3175_v60  ;;  %v3611_v59 = vld [vmem:[%s19547_s19 + $0x30] sm:$0xff]  ;;  %v3610_v60 = vld [vmem:[%s19547_s19 + $0x28] sm:$0xff] }
 0x752   : > { %16634 = vpow2.f32 %v13969_v61  ;;  %v3612_v61 = vld [vmem:[%s19547_s19 + $0x38] sm:$0xff]  ;;  %s19608_s19 = smov 83  }
 0x753   : > { %16636 = vpow2.f32 %v13967_v62  ;;  %v15213_v1 = vpop.f32.mrb[8].mxu0 }
 0x754   : > { %v3103_v4 = vpop.f32.mrb[9].mxu0  ;;  %v3180_v25 = vadd.f32 %v15213_v1, %v3167_v8  ;;  %v16412_v1 = vld [vmem:[%s19549_s14 + $0x28] sm:$0xff]  }
 0x755   : > { %v15214_v6 = vpop.f32.mrb[10].mxu0  ;;  %v3178_v26 = vadd.f32 %v3157_v63, %v3103_v4 }
 0x756   : > { %v3106_v7 = vpop.f32.mrb[11].mxu0  ;;  %v3181_v27 = vadd.f32 %v15214_v6, %v3172_v12  ;;  %v3224_v30 = vsub.f32 %v3180_v25, %v3215_v28  ;;  %v16417_v12 = vld [vmem:[%s19549_s14 + $0x10] sm:$0xff]  }
 0x757   : > { %v3179_v29 = vadd.f32 %v3162_v5, %v3106_v7  ;;  %v3222_v33 = vsub.f32 %v3178_v26, %v3211_v23  ;;  %v16413_v5 = vld [vmem:[%s19549_s14 + $0x30] sm:$0xff]   ;;  %v16414_v7 = vld [vmem:[%s19549_s14 + $0x38] sm:$0xff]  }
 0x758   : > { %v3225_v35 = vsub.f32 %v3181_v27, %v3217_v32 }
 0x759   : > { %v3223_v38 = vsub.f32 %v3179_v29, %v3213_v24 }
 0x75a   : > { %v16631_v10 = vpop.eup %16630 }
 0x75b   : > { %v16633_v11 = vpop.eup %16632  ;;  %v3196_v13 = vadd.f32 1.0, %v16631_v10  ;;  %v16415_v10 = vld [vmem:[%s19549_s14] sm:$0xff]  }
 0x75c   : > { %v16635_v14 = vpop.eup %16634  ;;  %v3194_v15 = vadd.f32 1.0, %v16633_v11  ;;  %v16416_v11 = vld [vmem:[%s19549_s14 + $0x8] sm:$0xff]  }
 0x75d   : > { %v16637_v18 = vpop.eup %16636  ;;  %16638 = vrcp.f32 %v3196_v13  ;;  %v3197_v21 = vadd.f32 1.0, %v16635_v14  ;;  %v16418_v14 = vld [vmem:[%s19549_s14 + $0x18] sm:$0xff]  }
 0x75e   : > { %16640 = vrcp.f32 %v3194_v15  ;;  %v3195_v22 = vadd.f32 1.0, %v16637_v18  ;;  %v16419_v15 = vld [vmem:[%s19549_s14 + $0x40] sm:$0xff]   ;;  %v16420_v18 = vld [vmem:[%s19549_s14 + $0x48] sm:$0xff]  }
 0x75f   : > { %16642 = vrcp.f32 %v3197_v21  ;;  %v16421_v21 = vld [vmem:[%s19549_s14 + $0x50] sm:$0xff]  }
 0x760   : > { %16644 = vrcp.f32 %v3195_v22  ;;  %v16422_v22 = vld [vmem:[%s19549_s14 + $0x58] sm:$0xff]   ;;  %s19571_s14 = smov 92  }
 0x767   : > { %v16639_v31 = vpop.eup %16638 }
 0x768   : > { %v16641_v34 = vpop.eup %16640  ;;  %v3228_v36 = vmul.f32 %v16639_v31, %v3224_v30 }
 0x769   : > { %v16643_v37 = vpop.eup %16642  ;;  %v3226_v39 = vmul.f32 %v16641_v34, %v3222_v33 }
 0x76a   : > { %v16645_v40 = vpop.eup %16644  ;;  %v3229_v41 = vmul.f32 %v16643_v37, %v3225_v35 }
 0x76b   : > { %3234 = vrot.lane.b32.xlu0 %v3226_v39, %s19558_s23  ;;  %v3227_v42 = vmul.f32 %v16645_v40, %v3223_v38 }
 0x76d   : > { %3236 = vrot.lane.b32.xlu1 %v3227_v42, %s19558_s23 }
 0x76f   : > { %3238 = vrot.lane.b32.xlu0 %v3228_v36, %s19558_s23 }
 0x771   : > { %3240 = vrot.lane.b32.xlu1 %v3229_v41, %s19558_s23 }
 0x7dd   : > { %v3235_v43 = vpop.permute.xlu0 %3234 }
 0x7de   : > { %v3246_v44 = vadd.f32 %v3235_v43, %v17727_v16 }
 0x7df   : > { %v3237_v45 = vpop.permute.xlu1 %3236 }
 0x7e0   : > { %3250 = vst.msk [vmem:[#allocation2] sm:$0xff] %vm2520_vm9, %v3246_v44  ;;  %v3247_v46 = vadd.f32 %v3237_v45, %v17729_v17 }
 0x7e1   : > { %v3239_v47 = vpop.permute.xlu0 %3238 }
 0x7e2   : > { %3251 = vst.msk [vmem:[#allocation2 + $0x8] sm:$0xff] %vm2520_vm9, %v3247_v46  ;;  %v3248_v48 = vadd.f32 %v3239_v47, %v17734_v19 }
 0x7e3   : > { %v3241_v49 = vpop.permute.xlu1 %3240 }
 0x7e4   : > { %3252 = vst.msk [vmem:[#allocation2 + $0x10] sm:$0xff] %vm2520_vm9, %v3248_v48  ;;  %v3249_v50 = vadd.f32 %v3241_v49, %v17736_v20 }
 0x7e6   : > { %3253 = vst.msk [vmem:[#allocation2 + $0x18] sm:$0xff] %vm2520_vm9, %v3249_v50 }
 0x7e7   : > { %v17797_v16 = vld [vmem:[#allocation2] sm:$0xff] }
 0x7e9   : > { %v17799_v17 = vld [vmem:[#allocation2 + $0x8] sm:$0xff] }
 0x7ea   : > { %v3258_v19 = vpack.c.bf16 %v17799_v17, %v17797_v16 }
 0x7eb   : > { %v17804_v52 = vld [vmem:[#allocation2 + $0x10] sm:$0xff] }
 0x7ec   : > { %3299 = vrot.lane.b32.xlu0 %v3258_v19, %s19393_s22 }
 0x7ed   : > { %v17806_v20 = vld [vmem:[#allocation2 + $0x18] sm:$0xff] }
 0x7ee   : > { %v3259_v53 = vpack.c.bf16 %v17806_v20, %v17804_v52 }
 0x7f0   : > { %3402 = vrot.lane.b32.xlu0 %v3258_v19, %s19384_s16  ;;  %3301 = vrot.lane.b32.xlu1 %v3259_v53, %s19393_s22 }
 0x7f4   : > { %3514 = vrot.lane.b32.xlu0 %v3258_v19, %s19382_s3  ;;  %3404 = vrot.lane.b32.xlu1 %v3259_v53, %s19384_s16  ;;  %s19386_s16 = smov 92  }
 0x7f8   : > { %3615 = vperm.xlu0 %16384, %v3605_v54   ;;  %3516 = vrot.lane.b32.xlu1 %v3259_v53, %s19382_s3  ;;  %s19390_s3 = smov 110  }
 0x7fc   : > { %3625 = vperm.xlu0 %16384, %v3607_v55   ;;  %3620 = vperm.xlu1 %16383, %v3606_v56  }
 0x800   : > { %3635 = vperm.xlu0 %16384, %v3609_v57   ;;  %3630 = vperm.xlu1 %16383, %v3608_v58  }
 0x804   : > { %3645 = vperm.xlu0 %16384, %v3611_v59   ;;  %3640 = vperm.xlu1 %16383, %v3610_v60  }
 0x808   : > { %3689 = vrot.lane.b32.xlu0 %v17797_v16, %s19393_s22  ;;  %3650 = vperm.xlu1 %16383, %v3612_v61  }
 0x80c   : > { %3693 = vrot.lane.b32.xlu0 %v17804_v52, %s19393_s22  ;;  %3691 = vrot.lane.b32.xlu1 %v17799_v17, %s19393_s22 }
 0x810   : > { %3695 = vrot.lane.b32.xlu1 %v17806_v20, %s19393_s22 }
 0x85e   : > { %v3300_v62 = vpop.permute.xlu0 %3299 }
 0x85f   : > { %15215 = vmatprep.subr.bf16.mxu1 %v3300_v62 }
 0x860   : > { %15216 = vmatpush3.bf16.msra.mxu1 %v3300_v62 }
 0x862   : > { %v3302_v63 = vpop.permute.xlu1 %3301  ;;  %v3403_v4 = vpop.permute.xlu0 %3402 }
 0x863   : > { %15217 = vmatprep.subr.bf16.mxu1 %v3302_v63 }
 0x864   : > { %15218 = vmatpush3.bf16.msra.mxu1 %v3302_v63 }
 0x865   : > { %15227 = vmatprep.subr.bf16.mxu1 %v3403_v4 }
 0x866   : > { %v3405_v6 = vpop.permute.xlu1 %3404  ;;  %v3515_v8 = vpop.permute.xlu0 %3514 }
 0x867   : > { %15220 = vmatmul.mubr.msk.bf16.vlgmr.msra.gmra.mrb[8].mxu1 %vm2430_vm0, %v16412_v1 }
 0x868   : > { %15228 = vmatpush3.bf16.msra.mxu1 %v3403_v4  ;;  %15223 = vmatprep.mubr.msk.bf16.mxu1 %vm2430_vm0, %v16413_v5 }
 0x869   : > { %15229 = vmatprep.subr.bf16.mxu1 %v3405_v6 }
 0x86a   : > { %v3517_v13 = vpop.permute.xlu1 %3516 }
 0x86c   : > { %15230 = vmatpush3.bf16.msra.mxu1 %v3405_v6 }
 0x86d   : > { %15239 = vmatprep.subr.bf16.mxu1 %v3515_v8 }
 0x86f   : > { %15224 = vmatmul.mubr.msk.bf16.gmra.mrb[12].mxu1 %vm2430_vm0, %v16414_v7 }
 0x870   : > { %15231 = vmatprep.mubr.msk.bf16.mxu1 %vm2430_vm0, %v16415_v10 }
 0x877   : > { %15232 = vmatmul.mubr.msk.bf16.vlgmr.msra.gmra.mrb[8].mxu1 %vm2430_vm0, %v16416_v11  ;;  %v3616_v23 = vpop.permute.xlu0 %3615 }
 0x878   : > { %15240 = vmatpush3.bf16.msra.mxu1 %v3515_v8  ;;  %15235 = vmatprep.mubr.msk.bf16.mxu1 %vm2430_vm0, %v16417_v12 }
 0x879   : > { %15241 = vmatprep.subr.bf16.mxu1 %v3517_v13 }
 0x87b   : > { %v3621_v24 = vpop.permute.xlu1 %3620  ;;  %v3626_v25 = vpop.permute.xlu0 %3625 }
 0x87c   : > { %15242 = vmatpush3.bf16.msra.mxu1 %v3517_v13 }
 0x87f   : > { %15236 = vmatmul.mubr.msk.bf16.gmra.mrb[12].mxu1 %vm2430_vm0, %v16418_v14  ;;  %v3631_v29 = vpop.permute.xlu1 %3630  ;;  %v3636_v39 = vpop.permute.xlu0 %3635 }
 0x880   : > { %15243 = vmatprep.mubr.msk.bf16.mxu1 %vm2430_vm0, %v16419_v15 }
 0x883   : > { %v3641_v42 = vpop.permute.xlu1 %3640  ;;  %v3646_v45 = vpop.permute.xlu0 %3645 }
 0x887   : > { %15244 = vmatmul.mubr.msk.bf16.vlgmr.msra.gmra.mrb[8].mxu1 %vm2430_vm0, %v16420_v18  ;;  %v3651_v48 = vpop.permute.xlu1 %3650  ;;  %v3690_v55 = vpop.permute.xlu0 %3689 }
 0x888   : > { %15247 = vmatprep.mubr.msk.bf16.mxu1 %vm2430_vm0, %v16421_v21 }
 0x88b   : > { %v3692_v56 = vpop.permute.xlu1 %3691  ;;  %v3694_v60 = vpop.permute.xlu0 %3693 }
 0x88f   : > { %15248 = vmatmul.mubr.msk.bf16.gmra.mrb[12].mxu1 %vm2430_vm0, %v16422_v22  ;;  %v3696_v1 = vpop.permute.xlu1 %3695 }
 0x95a   : > { %v15245_v26 = vpop.f32.mrb[8].mxu1 }
 0x95b   : > { %v3655_v27 = vadd.f32 %v15245_v26, %v3626_v25  ;;  %v3566_v28 = vpop.f32.mrb[9].mxu1 }
 0x95c   : > { %v3653_v30 = vadd.f32 %v3616_v23, %v3566_v28  ;;  %v15246_v31 = vpop.f32.mrb[10].mxu1 }
 0x95d   : > { %v14012_v32 = vmul.f32 -1.442695, %v3655_v27  ;;  %v3656_v33 = vadd.f32 %v15246_v31, %v3631_v29  ;;  %v3569_v34 = vpop.f32.mrb[11].mxu1  ;;  %v16423_v27 = vld [vmem:[%s19545_s24 + $0x20] sm:$0xff]   ;;  %v4086_v31 = vld [vmem:[%s17261_s30 + $0x10] sm:$0xff] }
 0x95e   : > { %v14010_v35 = vmul.f32 -1.442695, %v3653_v30  ;;  %v3654_v36 = vadd.f32 %v3621_v24, %v3569_v34  ;;  %15255 = vmatprep.mubr.msk.bf16.mxu0 %vm2430_vm0, %v16423_v27  ;;  %v4084_v30 = vld [vmem:[%s17261_s30] sm:$0xff]  ;;  %v4087_v34 = vld [vmem:[%s17261_s30 + $0x18] sm:$0xff] }
 0x95f   : > { %16646 = vpow2.f32 %v14012_v32  ;;  %v14013_v37 = vmul.f32 -1.442695, %v3656_v33  ;;  %v4085_v32 = vld [vmem:[%s17261_s30 + $0x8] sm:$0xff]  ;;  %v4088_v33 = vld [vmem:[%s17261_s30 + $0x20] sm:$0xff] }
 0x960   : > { %16648 = vpow2.f32 %v14010_v35  ;;  %v14011_v38 = vmul.f32 -1.442695, %v3654_v36  ;;  %v4090_v35 = vld [vmem:[%s17261_s30 + $0x30] sm:$0xff]  ;;  %v4089_v36 = vld [vmem:[%s17261_s30 + $0x28] sm:$0xff] }
 0x961   : > { %16650 = vpow2.f32 %v14013_v37  ;;  %v4091_v37 = vld [vmem:[%s17261_s30 + $0x38] sm:$0xff] }
 0x962   : > { %16652 = vpow2.f32 %v14011_v38  ;;  %v15249_v40 = vpop.f32.mrb[12].mxu1 }
 0x963   : > { %v3582_v41 = vpop.f32.mrb[13].mxu1  ;;  %v3659_v57 = vadd.f32 %v15249_v40, %v3646_v45  ;;  %v16424_v40 = vld [vmem:[%s19545_s24 + $0x28] sm:$0xff]  }
 0x964   : > { %v15250_v43 = vpop.f32.mrb[14].mxu1  ;;  %v3657_v58 = vadd.f32 %v3636_v39, %v3582_v41 }
 0x965   : > { %v3585_v44 = vpop.f32.mrb[15].mxu1  ;;  %v3660_v59 = vadd.f32 %v15250_v43, %v3651_v48  ;;  %v3703_v62 = vsub.f32 %v3659_v57, %v3694_v60  ;;  %v16429_v48 = vld [vmem:[%s19545_s24 + $0x10] sm:$0xff]  }
 0x966   : > { %v3658_v61 = vadd.f32 %v3641_v42, %v3585_v44  ;;  %v3701_v4 = vsub.f32 %v3657_v58, %v3690_v55  ;;  %v16425_v42 = vld [vmem:[%s19545_s24 + $0x30] sm:$0xff]   ;;  %v16426_v44 = vld [vmem:[%s19545_s24 + $0x38] sm:$0xff]  }
 0x967   : > { %v3704_v6 = vsub.f32 %v3660_v59, %v3696_v1 }
 0x968   : > { %v3702_v10 = vsub.f32 %v3658_v61, %v3692_v56 }
 0x969   : > { %v16647_v46 = vpop.eup %16646 }
 0x96a   : > { %v16649_v47 = vpop.eup %16648  ;;  %v3675_v49 = vadd.f32 1.0, %v16647_v46  ;;  %v16427_v46 = vld [vmem:[%s19545_s24] sm:$0xff]  }
 0x96b   : > { %v16651_v50 = vpop.eup %16650  ;;  %v3673_v51 = vadd.f32 1.0, %v16649_v47  ;;  %v16428_v47 = vld [vmem:[%s19545_s24 + $0x8] sm:$0xff]  }
 0x96c   : > { %v16653_v19 = vpop.eup %16652  ;;  %16654 = vrcp.f32 %v3675_v49  ;;  %v3676_v53 = vadd.f32 1.0, %v16651_v50  ;;  %v16430_v50 = vld [vmem:[%s19545_s24 + $0x18] sm:$0xff]  }
 0x96d   : > { %16656 = vrcp.f32 %v3673_v51  ;;  %v3674_v54 = vadd.f32 1.0, %v16653_v19  ;;  %v16431_v51 = vld [vmem:[%s19545_s24 + $0x40] sm:$0xff]   ;;  %v16432_v19 = vld [vmem:[%s19545_s24 + $0x48] sm:$0xff]  }
 0x96e   : > { %16658 = vrcp.f32 %v3676_v53  ;;  %v16433_v53 = vld [vmem:[%s19545_s24 + $0x50] sm:$0xff]  }
 0x96f   : > { %16660 = vrcp.f32 %v3674_v54  ;;  %v16434_v54 = vld [vmem:[%s19545_s24 + $0x58] sm:$0xff]   ;;  %s19619_s24 = sld [smem:[#allocation69_spill]] }
 0x976   : > { %v16655_v63 = vpop.eup %16654 }
 0x977   : > { %v16657_v5 = vpop.eup %16656  ;;  %v3707_v7 = vmul.f32 %v16655_v63, %v3703_v62 }
 0x978   : > { %v16659_v8 = vpop.eup %16658  ;;  %v3705_v11 = vmul.f32 %v16657_v5, %v3701_v4 }
 0x979   : > { %v16661_v12 = vpop.eup %16660  ;;  %v3708_v13 = vmul.f32 %v16659_v8, %v3704_v6 }
 0x97a   : > { %3713 = vrot.lane.b32.xlu0 %v3705_v11, %s19558_s23  ;;  %v3706_v14 = vmul.f32 %v16661_v12, %v3702_v10 }
 0x97c   : > { %3715 = vrot.lane.b32.xlu1 %v3706_v14, %s19558_s23 }
 0x97e   : > { %3717 = vrot.lane.b32.xlu0 %v3707_v7, %s19558_s23 }
 0x980   : > { %3719 = vrot.lane.b32.xlu1 %v3708_v13, %s19558_s23 }
 0x9ec   : > { %v3714_v15 = vpop.permute.xlu0 %3713 }
 0x9ed   : > { %v3725_v18 = vadd.f32 %v3714_v15, %v17797_v16 }
 0x9ee   : > { %v3716_v21 = vpop.permute.xlu1 %3715 }
 0x9ef   : > { %3729 = vst.msk [vmem:[#allocation2] sm:$0xff] %vm2520_vm9, %v3725_v18  ;;  %v3726_v22 = vadd.f32 %v3716_v21, %v17799_v17 }
 0x9f0   : > { %v3718_v23 = vpop.permute.xlu0 %3717 }
 0x9f1   : > { %3730 = vst.msk [vmem:[#allocation2 + $0x8] sm:$0xff] %vm2520_vm9, %v3726_v22  ;;  %v3727_v24 = vadd.f32 %v3718_v23, %v17804_v52 }
 0x9f2   : > { %v3720_v25 = vpop.permute.xlu1 %3719 }
 0x9f3   : > { %3731 = vst.msk [vmem:[#allocation2 + $0x10] sm:$0xff] %vm2520_vm9, %v3727_v24  ;;  %v3728_v26 = vadd.f32 %v3720_v25, %v17806_v20 }
 0x9f5   : > { %3732 = vst.msk [vmem:[#allocation2 + $0x18] sm:$0xff] %vm2520_vm9, %v3728_v26 }
 0x9f6   : > { %v17867_v16 = vld [vmem:[#allocation2] sm:$0xff] }
 0x9f8   : > { %v17869_v17 = vld [vmem:[#allocation2 + $0x8] sm:$0xff] }
 0x9f9   : > { %v3737_v52 = vpack.c.bf16 %v17869_v17, %v17867_v16 }
 0x9fa   : > { %v17874_v28 = vld [vmem:[#allocation2 + $0x10] sm:$0xff] }
 0x9fb   : > { %3778 = vrot.lane.b32.xlu0 %v3737_v52, %s19393_s22 }
 0x9fc   : > { %v17876_v20 = vld [vmem:[#allocation2 + $0x18] sm:$0xff] }
 0x9fd   : > { %v3738_v29 = vpack.c.bf16 %v17876_v20, %v17874_v28 }
 0x9ff   : > { %3881 = vrot.lane.b32.xlu0 %v3737_v52, %s19390_s3  ;;  %3780 = vrot.lane.b32.xlu1 %v3738_v29, %s19393_s22 }
 0xa03   : > { %3993 = vrot.lane.b32.xlu0 %v3737_v52, %s19386_s16  ;;  %3883 = vrot.lane.b32.xlu1 %v3738_v29, %s19390_s3  ;;  %s19560_s3 = sld [smem:[#allocation25_spill]] }
 0xa07   : > { %4094 = vperm.xlu0 %16384, %v4084_v30   ;;  %3995 = vrot.lane.b32.xlu1 %v3738_v29, %s19386_s16  ;;  %s19388_s16 = smov 74  }
 0xa0b   : > { %4104 = vperm.xlu0 %16384, %v4086_v31   ;;  %4099 = vperm.xlu1 %16383, %v4085_v32  }
 0xa0f   : > { %4114 = vperm.xlu0 %16384, %v4088_v33   ;;  %4109 = vperm.xlu1 %16383, %v4087_v34  }
 0xa13   : > { %4124 = vperm.xlu0 %16384, %v4090_v35   ;;  %4119 = vperm.xlu1 %16383, %v4089_v36  }
 0xa17   : > { %4168 = vrot.lane.b32.xlu0 %v17867_v16, %s19393_s22  ;;  %4129 = vperm.xlu1 %16383, %v4091_v37  }
 0xa1b   : > { %4172 = vrot.lane.b32.xlu0 %v17874_v28, %s19393_s22  ;;  %4170 = vrot.lane.b32.xlu1 %v17869_v17, %s19393_s22 }
 0xa1f   : > { %4174 = vrot.lane.b32.xlu1 %v17876_v20, %s19393_s22 }
 0xa6d   : > { %v3779_v38 = vpop.permute.xlu0 %3778 }
 0xa6e   : > { %15251 = vmatprep.subr.bf16.mxu0 %v3779_v38 }
 0xa6f   : > { %15252 = vmatpush3.bf16.msra.mxu0 %v3779_v38 }
 0xa71   : > { %v3781_v39 = vpop.permute.xlu1 %3780  ;;  %v3882_v41 = vpop.permute.xlu0 %3881 }
 0xa72   : > { %15253 = vmatprep.subr.bf16.mxu0 %v3781_v39 }
 0xa73   : > { %15254 = vmatpush3.bf16.msra.mxu0 %v3781_v39 }
 0xa74   : > { %15263 = vmatprep.subr.bf16.mxu0 %v3882_v41 }
 0xa75   : > { %v3884_v43 = vpop.permute.xlu1 %3883  ;;  %v3994_v45 = vpop.permute.xlu0 %3993 }
 0xa76   : > { %15256 = vmatmul.mubr.msk.bf16.vlgmr.msra.gmra.mrb[12].mxu0 %vm2430_vm0, %v16424_v40 }
 0xa77   : > { %15264 = vmatpush3.bf16.msra.mxu0 %v3882_v41  ;;  %15259 = vmatprep.mubr.msk.bf16.mxu0 %vm2430_vm0, %v16425_v42 }
 0xa78   : > { %15265 = vmatprep.subr.bf16.mxu0 %v3884_v43 }
 0xa79   : > { %v3996_v49 = vpop.permute.xlu1 %3995 }
 0xa7b   : > { %15266 = vmatpush3.bf16.msra.mxu0 %v3884_v43 }
 0xa7c   : > { %15275 = vmatprep.subr.bf16.mxu0 %v3994_v45 }
 0xa7e   : > { %15260 = vmatmul.mubr.msk.bf16.gmra.mrb[16].mxu0 %vm2430_vm0, %v16426_v44 }
 0xa7f   : > { %15267 = vmatprep.mubr.msk.bf16.mxu0 %vm2430_vm0, %v16427_v46 }
 0xa86   : > { %15268 = vmatmul.mubr.msk.bf16.vlgmr.msra.gmra.mrb[12].mxu0 %vm2430_vm0, %v16428_v47  ;;  %v4095_v55 = vpop.permute.xlu0 %4094 }
 0xa87   : > { %15276 = vmatpush3.bf16.msra.mxu0 %v3994_v45  ;;  %15271 = vmatprep.mubr.msk.bf16.mxu0 %vm2430_vm0, %v16429_v48 }
 0xa88   : > { %15277 = vmatprep.subr.bf16.mxu0 %v3996_v49 }
 0xa8a   : > { %v4100_v56 = vpop.permute.xlu1 %4099  ;;  %v4105_v57 = vpop.permute.xlu0 %4104 }
 0xa8b   : > { %15278 = vmatpush3.bf16.msra.mxu0 %v3996_v49 }
 0xa8e   : > { %15272 = vmatmul.mubr.msk.bf16.gmra.mrb[16].mxu0 %vm2430_vm0, %v16430_v50  ;;  %v4110_v61 = vpop.permute.xlu1 %4109  ;;  %v4115_v11 = vpop.permute.xlu0 %4114 }
 0xa8f   : > { %15279 = vmatprep.mubr.msk.bf16.mxu0 %vm2430_vm0, %v16431_v51 }
 0xa92   : > { %v4120_v14 = vpop.permute.xlu1 %4119  ;;  %v4125_v21 = vpop.permute.xlu0 %4124 }
 0xa96   : > { %15280 = vmatmul.mubr.msk.bf16.vlgmr.msra.gmra.mrb[12].mxu0 %vm2430_vm0, %v16432_v19  ;;  %v4130_v24 = vpop.permute.xlu1 %4129  ;;  %v4169_v31 = vpop.permute.xlu0 %4168 }
 0xa97   : > { %15283 = vmatprep.mubr.msk.bf16.mxu0 %vm2430_vm0, %v16433_v53 }
 0xa9a   : > { %v4171_v32 = vpop.permute.xlu1 %4170  ;;  %v4173_v36 = vpop.permute.xlu0 %4172 }
 0xa9e   : > { %15284 = vmatmul.mubr.msk.bf16.gmra.mrb[16].mxu0 %vm2430_vm0, %v16434_v54  ;;  %v4175_v40 = vpop.permute.xlu1 %4174 }
 0xb69   : > { %v15281_v58 = vpop.f32.mrb[12].mxu0 }
 0xb6a   : > { %v4134_v59 = vadd.f32 %v15281_v58, %v4105_v57  ;;  %v4045_v60 = vpop.f32.mrb[13].mxu0 }
 0xb6b   : > { %v4132_v62 = vadd.f32 %v4095_v55, %v4045_v60  ;;  %v15282_v63 = vpop.f32.mrb[14].mxu0 }
 0xb6c   : > { %v14056_v1 = vmul.f32 -1.442695, %v4134_v59  ;;  %v4135_v4 = vadd.f32 %v15282_v63, %v4110_v61  ;;  %v4048_v5 = vpop.f32.mrb[15].mxu0  ;;  %v16435_v59 = vld [vmem:[%s19553_s6 + $0x20] sm:$0xff]   ;;  %v4559_v63 = vld [vmem:[%s19551_s12 + $0x10] sm:$0xff] }
 0xb6d   : > { %v14054_v6 = vmul.f32 -1.442695, %v4132_v62  ;;  %v4133_v7 = vadd.f32 %v4100_v56, %v4048_v5  ;;  %15291 = vmatprep.mubr.msk.bf16.mxu1 %vm2430_vm0, %v16435_v59  ;;  %v4557_v62 = vld [vmem:[%s19551_s12] sm:$0xff]  ;;  %v4560_v5 = vld [vmem:[%s19551_s12 + $0x18] sm:$0xff] }
 0xb6e   : > { %16662 = vpow2.f32 %v14056_v1  ;;  %v14057_v8 = vmul.f32 -1.442695, %v4135_v4  ;;  %v4558_v1 = vld [vmem:[%s19551_s12 + $0x8] sm:$0xff]  ;;  %v4561_v4 = vld [vmem:[%s19551_s12 + $0x20] sm:$0xff] }
 0xb6f   : > { %16664 = vpow2.f32 %v14054_v6  ;;  %v14055_v10 = vmul.f32 -1.442695, %v4133_v7  ;;  %v4563_v6 = vld [vmem:[%s19551_s12 + $0x30] sm:$0xff]  ;;  %v4562_v7 = vld [vmem:[%s19551_s12 + $0x28] sm:$0xff] }
 0xb70   : > { %16666 = vpow2.f32 %v14057_v8  ;;  %v4564_v8 = vld [vmem:[%s19551_s12 + $0x38] sm:$0xff]  ;;  %s19566_s12 = smov 104  }
 0xb71   : > { %16668 = vpow2.f32 %v14055_v10  ;;  %v15285_v12 = vpop.f32.mrb[16].mxu0 }
 0xb72   : > { %v4061_v13 = vpop.f32.mrb[17].mxu0  ;;  %v4138_v33 = vadd.f32 %v15285_v12, %v4125_v21  ;;  %v16436_v12 = vld [vmem:[%s19553_s6 + $0x28] sm:$0xff]  }
 0xb73   : > { %v15286_v15 = vpop.f32.mrb[18].mxu0  ;;  %v4136_v34 = vadd.f32 %v4115_v11, %v4061_v13  ;;  %v16437_v13 = vld [vmem:[%s19553_s6 + $0x30] sm:$0xff]   ;;  %v16440_v21 = vld [vmem:[%s19553_s6 + $0x8] sm:$0xff]  }
 0xb74   : > { %v4064_v18 = vpop.f32.mrb[19].mxu0  ;;  %v4139_v35 = vadd.f32 %v15286_v15, %v4130_v24  ;;  %v4182_v38 = vsub.f32 %v4138_v33, %v4173_v36  ;;  %v16442_v24 = vld [vmem:[%s19553_s6 + $0x18] sm:$0xff]  }
 0xb75   : > { %v4137_v37 = vadd.f32 %v4120_v14, %v4064_v18  ;;  %v4180_v41 = vsub.f32 %v4136_v34, %v4169_v31  ;;  %v16438_v14 = vld [vmem:[%s19553_s6 + $0x38] sm:$0xff]   ;;  %v16439_v18 = vld [vmem:[%s19553_s6] sm:$0xff]  }
 0xb76   : > { %v4183_v43 = vsub.f32 %v4139_v35, %v4175_v40 }
 0xb77   : > { %v4181_v46 = vsub.f32 %v4137_v37, %v4171_v32 }
 0xb78   : > { %v16663_v22 = vpop.eup %16662 }
 0xb79   : > { %v16665_v23 = vpop.eup %16664  ;;  %v4154_v25 = vadd.f32 1.0, %v16663_v22  ;;  %v16441_v22 = vld [vmem:[%s19553_s6 + $0x10] sm:$0xff]  }
 0xb7a   : > { %v16667_v26 = vpop.eup %16666  ;;  %v4152_v27 = vadd.f32 1.0, %v16665_v23 }
 0xb7b   : > { %v16669_v52 = vpop.eup %16668  ;;  %16670 = vrcp.f32 %v4154_v25  ;;  %v4155_v29 = vadd.f32 1.0, %v16667_v26  ;;  %v16443_v25 = vld [vmem:[%s19553_s6 + $0x40] sm:$0xff]   ;;  %v16444_v26 = vld [vmem:[%s19553_s6 + $0x48] sm:$0xff]  }
 0xb7c   : > { %16672 = vrcp.f32 %v4152_v27  ;;  %v4153_v30 = vadd.f32 1.0, %v16669_v52  ;;  %v16445_v27 = vld [vmem:[%s19553_s6 + $0x50] sm:$0xff]   ;;  %v16446_v52 = vld [vmem:[%s19553_s6 + $0x58] sm:$0xff]   ;;  %s19562_s6 = smov 100  }
 0xb7d   : > { %16674 = vrcp.f32 %v4155_v29 }
 0xb7e   : > { %16676 = vrcp.f32 %v4153_v30 }
 0xb85   : > { %v16671_v39 = vpop.eup %16670 }
 0xb86   : > { %v16673_v42 = vpop.eup %16672  ;;  %v4186_v44 = vmul.f32 %v16671_v39, %v4182_v38 }
 0xb87   : > { %v16675_v45 = vpop.eup %16674  ;;  %v4184_v47 = vmul.f32 %v16673_v42, %v4180_v41 }
 0xb88   : > { %v16677_v48 = vpop.eup %16676  ;;  %v4187_v49 = vmul.f32 %v16675_v45, %v4183_v43 }
 0xb89   : > { %4192 = vrot.lane.b32.xlu0 %v4184_v47, %s19558_s23  ;;  %v4185_v50 = vmul.f32 %v16677_v48, %v4181_v46 }
 0xb8b   : > { %4194 = vrot.lane.b32.xlu1 %v4185_v50, %s19558_s23 }
 0xb8d   : > { %4196 = vrot.lane.b32.xlu0 %v4186_v44, %s19558_s23 }
 0xb8f   : > { %4198 = vrot.lane.b32.xlu1 %v4187_v49, %s19558_s23 }
 0xbfb   : > { %v4193_v51 = vpop.permute.xlu0 %4192 }
 0xbfc   : > { %v4204_v19 = vadd.f32 %v4193_v51, %v17867_v16 }
 0xbfd   : > { %v4195_v53 = vpop.permute.xlu1 %4194 }
 0xbfe   : > { %4208 = vst.msk [vmem:[#allocation2] sm:$0xff] %vm2520_vm9, %v4204_v19  ;;  %v4205_v54 = vadd.f32 %v4195_v53, %v17869_v17 }
 0xbff   : > { %v4197_v55 = vpop.permute.xlu0 %4196 }
 0xc00   : > { %4209 = vst.msk [vmem:[#allocation2 + $0x8] sm:$0xff] %vm2520_vm9, %v4205_v54  ;;  %v4206_v56 = vadd.f32 %v4197_v55, %v17874_v28 }
 0xc01   : > { %v4199_v57 = vpop.permute.xlu1 %4198 }
 0xc02   : > { %4210 = vst.msk [vmem:[#allocation2 + $0x10] sm:$0xff] %vm2520_vm9, %v4206_v56  ;;  %v4207_v58 = vadd.f32 %v4199_v57, %v17876_v20 }
 0xc04   : > { %4211 = vst.msk [vmem:[#allocation2 + $0x18] sm:$0xff] %vm2520_vm9, %v4207_v58 }
 0xc05   : > { %v17937_v16 = vld [vmem:[#allocation2] sm:$0xff] }
 0xc07   : > { %v17939_v17 = vld [vmem:[#allocation2 + $0x8] sm:$0xff] }
 0xc08   : > { %v4216_v28 = vpack.c.bf16 %v17939_v17, %v17937_v16 }
 0xc09   : > { %v17944_v60 = vld [vmem:[#allocation2 + $0x10] sm:$0xff] }
 0xc0a   : > { %4257 = vrot.lane.b32.xlu0 %v4216_v28, %s19393_s22 }
 0xc0b   : > { %v17946_v20 = vld [vmem:[#allocation2 + $0x18] sm:$0xff] }
 0xc0c   : > { %v4217_v61 = vpack.c.bf16 %v17946_v20, %v17944_v60 }
 0xc0e   : > { %4466 = vrot.lane.b32.xlu0 %v4216_v28, %s19388_s16  ;;  %4259 = vrot.lane.b32.xlu1 %v4217_v61, %s19393_s22 }
 0xc12   : > { %4567 = vperm.xlu0 %16384, %v4557_v62   ;;  %4468 = vrot.lane.b32.xlu1 %v4217_v61, %s19388_s16  ;;  %s19559_s16 = sld [smem:[#allocation24_spill]] }
 0xc16   : > { %4577 = vperm.xlu0 %16384, %v4559_v63   ;;  %4572 = vperm.xlu1 %16383, %v4558_v1  }
 0xc1a   : > { %4587 = vperm.xlu0 %16384, %v4561_v4   ;;  %4582 = vperm.xlu1 %16383, %v4560_v5  }
 0xc1e   : > { %4597 = vperm.xlu0 %16384, %v4563_v6   ;;  %4592 = vperm.xlu1 %16383, %v4562_v7  }
 0xc22   : > { %4641 = vrot.lane.b32.xlu0 %v17937_v16, %s19393_s22  ;;  %4602 = vperm.xlu1 %16383, %v4564_v8  }
 0xc26   : > { %4645 = vrot.lane.b32.xlu0 %v17944_v60, %s19393_s22  ;;  %4643 = vrot.lane.b32.xlu1 %v17939_v17, %s19393_s22 }
 0xc2a   : > { %4647 = vrot.lane.b32.xlu1 %v17946_v20, %s19393_s22 }
 0xc7c   : > { %v4258_v10 = vpop.permute.xlu0 %4257 }
 0xc7d   : > { %15287 = vmatprep.subr.bf16.mxu1 %v4258_v10 }
 0xc7e   : > { %15288 = vmatpush3.bf16.msra.mxu1 %v4258_v10 }
 0xc80   : > { %v4260_v11 = vpop.permute.xlu1 %4259  ;;  %v4467_v15 = vpop.permute.xlu0 %4466 }
 0xc81   : > { %15289 = vmatprep.subr.bf16.mxu1 %v4260_v11 }
 0xc82   : > { %15290 = vmatpush3.bf16.msra.mxu1 %v4260_v11 }
 0xc83   : > { %15299 = vmatprep.subr.bf16.mxu1 %v4216_v28 }
 0xc84   : > { %v4469_v23 = vpop.permute.xlu1 %4468 }
 0xc85   : > { %15292 = vmatmul.mubr.msk.bf16.vlgmr.msra.gmra.mrb[16].mxu1 %vm2430_vm0, %v16436_v12 }
 0xc86   : > { %15300 = vmatpush3.bf16.msra.mxu1 %v4216_v28  ;;  %15295 = vmatprep.mubr.msk.bf16.mxu1 %vm2430_vm0, %v16437_v13 }
 0xc87   : > { %15301 = vmatprep.subr.bf16.mxu1 %v4217_v61 }
 0xc8a   : > { %15302 = vmatpush3.bf16.msra.mxu1 %v4217_v61 }
 0xc8b   : > { %15311 = vmatprep.subr.bf16.mxu1 %v4467_v15 }
 0xc8d   : > { %15296 = vmatmul.mubr.msk.bf16.gmra.mrb[20].mxu1 %vm2430_vm0, %v16438_v14 }
 0xc8e   : > { %15303 = vmatprep.mubr.msk.bf16.mxu1 %vm2430_vm0, %v16439_v18 }
 0xc91   : > { %v4568_v29 = vpop.permute.xlu0 %4567 }
 0xc95   : > { %15304 = vmatmul.mubr.msk.bf16.vlgmr.msra.gmra.mrb[16].mxu1 %vm2430_vm0, %v16440_v21  ;;  %v4573_v30 = vpop.permute.xlu1 %4572  ;;  %v4578_v31 = vpop.permute.xlu0 %4577 }
 0xc96   : > { %15312 = vmatpush3.bf16.msra.mxu1 %v4467_v15  ;;  %15307 = vmatprep.mubr.msk.bf16.mxu1 %vm2430_vm0, %v16441_v22 }
 0xc97   : > { %15313 = vmatprep.subr.bf16.mxu1 %v4469_v23 }
 0xc99   : > { %v4583_v35 = vpop.permute.xlu1 %4582  ;;  %v4588_v45 = vpop.permute.xlu0 %4587 }
 0xc9a   : > { %15314 = vmatpush3.bf16.msra.mxu1 %v4469_v23 }
 0xc9d   : > { %15308 = vmatmul.mubr.msk.bf16.gmra.mrb[20].mxu1 %vm2430_vm0, %v16442_v24  ;;  %v4593_v48 = vpop.permute.xlu1 %4592  ;;  %v4598_v51 = vpop.permute.xlu0 %4597 }
 0xc9e   : > { %15315 = vmatprep.mubr.msk.bf16.mxu1 %vm2430_vm0, %v16443_v25 }
 0xca1   : > { %v4603_v54 = vpop.permute.xlu1 %4602  ;;  %v4642_v61 = vpop.permute.xlu0 %4641 }
 0xca5   : > { %15316 = vmatmul.mubr.msk.bf16.vlgmr.msra.gmra.mrb[16].mxu1 %vm2430_vm0, %v16444_v26  ;;  %v4644_v62 = vpop.permute.xlu1 %4643  ;;  %v4646_v5 = vpop.permute.xlu0 %4645 }
 0xca6   : > { %15319 = vmatprep.mubr.msk.bf16.mxu1 %vm2430_vm0, %v16445_v27 }
 0xca9   : > { %v4648_v10 = vpop.permute.xlu1 %4647 }
 0xcad   : > { %15320 = vmatmul.mubr.msk.bf16.gmra.mrb[20].mxu1 %vm2430_vm0, %v16446_v52 }
 0xd78   : > { %v15317_v32 = vpop.f32.mrb[16].mxu1 }
 0xd79   : > { %v4607_v33 = vadd.f32 %v15317_v32, %v4578_v31  ;;  %v4518_v34 = vpop.f32.mrb[17].mxu1 }
 0xd7a   : > { %v4605_v36 = vadd.f32 %v4568_v29, %v4518_v34  ;;  %v15318_v37 = vpop.f32.mrb[18].mxu1 }
 0xd7b   : > { %v14100_v38 = vmul.f32 -1.442695, %v4607_v33  ;;  %v4608_v39 = vadd.f32 %v15318_v37, %v4583_v35  ;;  %v4521_v40 = vpop.f32.mrb[19].mxu1  ;;  %v16447_v33 = vld [vmem:[%s19559_s16 + $0x20] sm:$0xff]   ;;  %v5038_v37 = vld [vmem:[%s19560_s3 + $0x10] sm:$0xff] }
 0xd7c   : > { %v14098_v41 = vmul.f32 -1.442695, %v4605_v36  ;;  %v4606_v42 = vadd.f32 %v4573_v30, %v4521_v40  ;;  %15327 = vmatprep.mubr.msk.bf16.mxu0 %vm2430_vm0, %v16447_v33  ;;  %v5036_v36 = vld [vmem:[%s19560_s3] sm:$0xff]  ;;  %v5039_v40 = vld [vmem:[%s19560_s3 + $0x18] sm:$0xff] }
 0xd7d   : > { %16678 = vpow2.f32 %v14100_v38  ;;  %v14101_v43 = vmul.f32 -1.442695, %v4608_v39  ;;  %v5037_v38 = vld [vmem:[%s19560_s3 + $0x8] sm:$0xff]  ;;  %v5040_v39 = vld [vmem:[%s19560_s3 + $0x20] sm:$0xff] }
 0xd7e   : > { %16680 = vpow2.f32 %v14098_v41  ;;  %v14099_v44 = vmul.f32 -1.442695, %v4606_v42  ;;  %v5042_v41 = vld [vmem:[%s19560_s3 + $0x30] sm:$0xff]  ;;  %v5041_v42 = vld [vmem:[%s19560_s3 + $0x28] sm:$0xff] }
 0xd7f   : > { %16682 = vpow2.f32 %v14101_v43  ;;  %v5043_v43 = vld [vmem:[%s19560_s3 + $0x38] sm:$0xff]  ;;  %s19564_s3 = sld [smem:[#allocation27_spill]] }
 0xd80   : > { %16684 = vpow2.f32 %v14099_v44  ;;  %v15321_v46 = vpop.f32.mrb[20].mxu1 }
 0xd81   : > { %v4534_v47 = vpop.f32.mrb[21].mxu1  ;;  %v4611_v63 = vadd.f32 %v15321_v46, %v4598_v51  ;;  %v16448_v46 = vld [vmem:[%s19559_s16 + $0x28] sm:$0xff]  }
 0xd82   : > { %v15322_v49 = vpop.f32.mrb[22].mxu1  ;;  %v4609_v1 = vadd.f32 %v4588_v45, %v4534_v47 }
 0xd83   : > { %v4537_v50 = vpop.f32.mrb[23].mxu1  ;;  %v4612_v4 = vadd.f32 %v15322_v49, %v4603_v54  ;;  %v4655_v7 = vsub.f32 %v4611_v63, %v4646_v5  ;;  %v16453_v54 = vld [vmem:[%s19559_s16 + $0x10] sm:$0xff]  }
 0xd84   : > { %v4610_v6 = vadd.f32 %v4593_v48, %v4537_v50  ;;  %v4653_v11 = vsub.f32 %v4609_v1, %v4642_v61  ;;  %v16449_v48 = vld [vmem:[%s19559_s16 + $0x30] sm:$0xff]   ;;  %v16450_v50 = vld [vmem:[%s19559_s16 + $0x38] sm:$0xff]  }
 0xd85   : > { %v4656_v14 = vsub.f32 %v4612_v4, %v4648_v10 }
 0xd86   : > { %v4654_v21 = vsub.f32 %v4610_v6, %v4644_v62 }
 0xd87   : > { %v16679_v19 = vpop.eup %16678 }
 0xd88   : > { %v16681_v53 = vpop.eup %16680  ;;  %v4627_v55 = vadd.f32 1.0, %v16679_v19  ;;  %v16451_v19 = vld [vmem:[%s19559_s16] sm:$0xff]  }
 0xd89   : > { %v16683_v56 = vpop.eup %16682  ;;  %v4625_v57 = vadd.f32 1.0, %v16681_v53  ;;  %v16452_v53 = vld [vmem:[%s19559_s16 + $0x8] sm:$0xff]  }
 0xd8a   : > { %v16685_v58 = vpop.eup %16684  ;;  %16686 = vrcp.f32 %v4627_v55  ;;  %v4628_v59 = vadd.f32 1.0, %v16683_v56  ;;  %v16454_v56 = vld [vmem:[%s19559_s16 + $0x18] sm:$0xff]  }
 0xd8b   : > { %16688 = vrcp.f32 %v4625_v57  ;;  %v4626_v28 = vadd.f32 1.0, %v16685_v58  ;;  %v16455_v57 = vld [vmem:[%s19559_s16 + $0x40] sm:$0xff]   ;;  %v16456_v58 = vld [vmem:[%s19559_s16 + $0x48] sm:$0xff]  }
 0xd8c   : > { %16690 = vrcp.f32 %v4628_v59  ;;  %v16457_v59 = vld [vmem:[%s19559_s16 + $0x50] sm:$0xff]  }
 0xd8d   : > { %16692 = vrcp.f32 %v4626_v28  ;;  %v16458_v28 = vld [vmem:[%s19559_s16 + $0x58] sm:$0xff]  }
 0xd94   : > { %v16687_v8 = vpop.eup %16686 }
 0xd95   : > { %v16689_v12 = vpop.eup %16688  ;;  %v4659_v13 = vmul.f32 %v16687_v8, %v4655_v7 }
 0xd96   : > { %v16691_v15 = vpop.eup %16690  ;;  %v4657_v18 = vmul.f32 %v16689_v12, %v4653_v11 }
 0xd97   : > { %v16693_v22 = vpop.eup %16692  ;;  %v4660_v23 = vmul.f32 %v16691_v15, %v4656_v14 }
 0xd98   : > { %v4658_v24 = vmul.f32 %v16693_v22, %v4654_v21  ;;  %4665 = vrot.lane.b32.xlu0 %v4657_v18, %s19558_s23 }
 0xd9a   : > { %4667 = vrot.lane.b32.xlu1 %v4658_v24, %s19558_s23 }
 0xd9c   : > { %4669 = vrot.lane.b32.xlu0 %v4659_v13, %s19558_s23 }
 0xd9e   : > { %4671 = vrot.lane.b32.xlu1 %v4660_v23, %s19558_s23 }
 0xe0a   : > { %v4666_v25 = vpop.permute.xlu0 %4665 }
 0xe0b   : > { %v4677_v26 = vadd.f32 %v4666_v25, %v17937_v16 }
 0xe0c   : > { %v4668_v27 = vpop.permute.xlu1 %4667 }
 0xe0d   : > { %4681 = vst.msk [vmem:[#allocation2] sm:$0xff] %vm2520_vm9, %v4677_v26  ;;  %v4678_v52 = vadd.f32 %v4668_v27, %v17939_v17 }
 0xe0e   : > { %v4670_v29 = vpop.permute.xlu0 %4669 }
 0xe0f   : > { %4682 = vst.msk [vmem:[#allocation2 + $0x8] sm:$0xff] %vm2520_vm9, %v4678_v52  ;;  %v4679_v30 = vadd.f32 %v4670_v29, %v17944_v60 }
 0xe10   : > { %v4672_v31 = vpop.permute.xlu1 %4671 }
 0xe11   : > { %4683 = vst.msk [vmem:[#allocation2 + $0x10] sm:$0xff] %vm2520_vm9, %v4679_v30  ;;  %v4680_v32 = vadd.f32 %v4672_v31, %v17946_v20 }
 0xe13   : > { %4684 = vst.msk [vmem:[#allocation2 + $0x18] sm:$0xff] %vm2520_vm9, %v4680_v32 }
 0xe14   : > { %v18005_v16 = vld [vmem:[#allocation2] sm:$0xff] }
 0xe16   : > { %v18007_v17 = vld [vmem:[#allocation2 + $0x8] sm:$0xff] }
 0xe17   : > { %v4689_v60 = vpack.c.bf16 %v18007_v17, %v18005_v16 }
 0xe18   : > { %v18012_v34 = vld [vmem:[#allocation2 + $0x10] sm:$0xff] }
 0xe19   : > { %4730 = vrot.lane.b32.xlu0 %v4689_v60, %s19393_s22 }
 0xe1a   : > { %v18014_v20 = vld [vmem:[#allocation2 + $0x18] sm:$0xff] }
 0xe1b   : > { %v4690_v35 = vpack.c.bf16 %v18014_v20, %v18012_v34 }
 0xe1d   : > { %4833 = vrot.lane.b32.xlu0 %v4689_v60, %s19561_s5  ;;  %4732 = vrot.lane.b32.xlu1 %v4690_v35, %s19393_s22 }
 0xe21   : > { %4945 = vrot.lane.b32.xlu0 %v4689_v60, %s19562_s6  ;;  %4835 = vrot.lane.b32.xlu1 %v4690_v35, %s19561_s5 }
 0xe25   : > { %5046 = vperm.xlu0 %16384, %v5036_v36   ;;  %4947 = vrot.lane.b32.xlu1 %v4690_v35, %s19562_s6 }
 0xe29   : > { %5056 = vperm.xlu0 %16384, %v5038_v37   ;;  %5051 = vperm.xlu1 %16383, %v5037_v38  }
 0xe2d   : > { %5066 = vperm.xlu0 %16384, %v5040_v39   ;;  %5061 = vperm.xlu1 %16383, %v5039_v40  }
 0xe31   : > { %5076 = vperm.xlu0 %16384, %v5042_v41   ;;  %5071 = vperm.xlu1 %16383, %v5041_v42  }
 0xe35   : > { %5120 = vrot.lane.b32.xlu0 %v18005_v16, %s19393_s22  ;;  %5081 = vperm.xlu1 %16383, %v5043_v43  }
 0xe39   : > { %5124 = vrot.lane.b32.xlu0 %v18012_v34, %s19393_s22  ;;  %5122 = vrot.lane.b32.xlu1 %v18007_v17, %s19393_s22 }
 0xe3d   : > { %5126 = vrot.lane.b32.xlu1 %v18014_v20, %s19393_s22  ;;  %s19563_s22 = sld [smem:[#allocation26_spill]] }
 0xe8b   : > { %v4731_v44 = vpop.permute.xlu0 %4730 }
 0xe8c   : > { %15323 = vmatprep.subr.bf16.mxu0 %v4731_v44 }
 0xe8d   : > { %15324 = vmatpush3.bf16.msra.mxu0 %v4731_v44 }
 0xe8f   : > { %v4733_v45 = vpop.permute.xlu1 %4732  ;;  %v4834_v47 = vpop.permute.xlu0 %4833 }
 0xe90   : > { %15325 = vmatprep.subr.bf16.mxu0 %v4733_v45 }
 0xe91   : > { %15326 = vmatpush3.bf16.msra.mxu0 %v4733_v45 }
 0xe92   : > { %15335 = vmatprep.subr.bf16.mxu0 %v4834_v47 }
 0xe93   : > { %v4836_v49 = vpop.permute.xlu1 %4835  ;;  %v4946_v51 = vpop.permute.xlu0 %4945 }
 0xe94   : > { %15328 = vmatmul.mubr.msk.bf16.vlgmr.msra.gmra.mrb[20].mxu0 %vm2430_vm0, %v16448_v46 }
 0xe95   : > { %15336 = vmatpush3.bf16.msra.mxu0 %v4834_v47  ;;  %15331 = vmatprep.mubr.msk.bf16.mxu0 %vm2430_vm0, %v16449_v48 }
 0xe96   : > { %15337 = vmatprep.subr.bf16.mxu0 %v4836_v49 }
 0xe97   : > { %v4948_v55 = vpop.permute.xlu1 %4947 }
 0xe99   : > { %15338 = vmatpush3.bf16.msra.mxu0 %v4836_v49 }
 0xe9a   : > { %15347 = vmatprep.subr.bf16.mxu0 %v4946_v51 }
 0xe9c   : > { %15332 = vmatmul.mubr.msk.bf16.gmra.mrb[24].mxu0 %vm2430_vm0, %v16450_v50 }
 0xe9d   : > { %15339 = vmatprep.mubr.msk.bf16.mxu0 %vm2430_vm0, %v16451_v19 }
 0xea4   : > { %15340 = vmatmul.mubr.msk.bf16.vlgmr.msra.gmra.mrb[20].mxu0 %vm2430_vm0, %v16452_v53  ;;  %v5047_v61 = vpop.permute.xlu0 %5046 }
 0xea5   : > { %15348 = vmatpush3.bf16.msra.mxu0 %v4946_v51  ;;  %15343 = vmatprep.mubr.msk.bf16.mxu0 %vm2430_vm0, %v16453_v54 }
 0xea6   : > { %15349 = vmatprep.subr.bf16.mxu0 %v4948_v55 }
 0xea8   : > { %v5052_v62 = vpop.permute.xlu1 %5051  ;;  %v5057_v63 = vpop.permute.xlu0 %5056 }
 0xea9   : > { %15350 = vmatpush3.bf16.msra.mxu0 %v4948_v55 }
 0xeac   : > { %15344 = vmatmul.mubr.msk.bf16.gmra.mrb[24].mxu0 %vm2430_vm0, %v16454_v56  ;;  %v5062_v6 = vpop.permute.xlu1 %5061  ;;  %v5067_v21 = vpop.permute.xlu0 %5066 }
 0xead   : > { %15351 = vmatprep.mubr.msk.bf16.mxu0 %vm2430_vm0, %v16455_v57 }
 0xeb0   : > { %v5072_v24 = vpop.permute.xlu1 %5071  ;;  %v5077_v27 = vpop.permute.xlu0 %5076 }
 0xeb4   : > { %15352 = vmatmul.mubr.msk.bf16.vlgmr.msra.gmra.mrb[20].mxu0 %vm2430_vm0, %v16456_v58  ;;  %v5082_v30 = vpop.permute.xlu1 %5081  ;;  %v5121_v37 = vpop.permute.xlu0 %5120 }
 0xeb5   : > { %15355 = vmatprep.mubr.msk.bf16.mxu0 %vm2430_vm0, %v16457_v59 }
 0xeb8   : > { %v5123_v38 = vpop.permute.xlu1 %5122  ;;  %v5125_v42 = vpop.permute.xlu0 %5124 }
 0xebc   : > { %15356 = vmatmul.mubr.msk.bf16.gmra.mrb[24].mxu0 %vm2430_vm0, %v16458_v28  ;;  %v5127_v46 = vpop.permute.xlu1 %5126 }
 0xf87   : > { %v15353_v1 = vpop.f32.mrb[20].mxu0 }
 0xf88   : > { %v5086_v4 = vadd.f32 %v15353_v1, %v5057_v63  ;;  %v4997_v5 = vpop.f32.mrb[21].mxu0 }
 0xf89   : > { %v5084_v7 = vadd.f32 %v5047_v61, %v4997_v5  ;;  %v15354_v8 = vpop.f32.mrb[22].mxu0 }
 0xf8a   : > { %v14144_v10 = vmul.f32 -1.442695, %v5086_v4  ;;  %v5087_v11 = vadd.f32 %v15354_v8, %v5062_v6  ;;  %v5000_v12 = vpop.f32.mrb[23].mxu0  ;;  %v16459_v4 = vld [vmem:[%s19563_s22 + $0x20] sm:$0xff]   ;;  %v5517_v8 = vld [vmem:[%s19564_s3 + $0x10] sm:$0xff] }
 0xf8b   : > { %v14142_v13 = vmul.f32 -1.442695, %v5084_v7  ;;  %v5085_v14 = vadd.f32 %v5052_v62, %v5000_v12  ;;  %15363 = vmatprep.mubr.msk.bf16.mxu1 %vm2430_vm0, %v16459_v4  ;;  %v5515_v7 = vld [vmem:[%s19564_s3] sm:$0xff]  ;;  %v5518_v12 = vld [vmem:[%s19564_s3 + $0x18] sm:$0xff] }
 0xf8c   : > { %16694 = vpow2.f32 %v14144_v10  ;;  %v14145_v15 = vmul.f32 -1.442695, %v5087_v11  ;;  %v5516_v10 = vld [vmem:[%s19564_s3 + $0x8] sm:$0xff]  ;;  %v5519_v11 = vld [vmem:[%s19564_s3 + $0x20] sm:$0xff] }
 0xf8d   : > { %16696 = vpow2.f32 %v14142_v13  ;;  %v14143_v18 = vmul.f32 -1.442695, %v5085_v14  ;;  %v5521_v13 = vld [vmem:[%s19564_s3 + $0x30] sm:$0xff]  ;;  %v5520_v14 = vld [vmem:[%s19564_s3 + $0x28] sm:$0xff] }
 0xf8e   : > { %16698 = vpow2.f32 %v14145_v15  ;;  %v5522_v15 = vld [vmem:[%s19564_s3 + $0x38] sm:$0xff]  ;;  %s19570_s3 = smov 110  }
 0xf8f   : > { %16700 = vpow2.f32 %v14143_v18  ;;  %v15357_v22 = vpop.f32.mrb[24].mxu0 }
 0xf90   : > { %v5013_v23 = vpop.f32.mrb[25].mxu0  ;;  %v5090_v39 = vadd.f32 %v15357_v22, %v5077_v27  ;;  %v16460_v22 = vld [vmem:[%s19563_s22 + $0x28] sm:$0xff]  }
 0xf91   : > { %v15358_v25 = vpop.f32.mrb[26].mxu0  ;;  %v5088_v40 = vadd.f32 %v5067_v21, %v5013_v23 }
 0xf92   : > { %v5016_v26 = vpop.f32.mrb[27].mxu0  ;;  %v5091_v41 = vadd.f32 %v15358_v25, %v5082_v30  ;;  %v5134_v44 = vsub.f32 %v5090_v39, %v5125_v42  ;;  %v16465_v30 = vld [vmem:[%s19563_s22 + $0x10] sm:$0xff]  }
 0xf93   : > { %v5089_v43 = vadd.f32 %v5072_v24, %v5016_v26  ;;  %v5132_v47 = vsub.f32 %v5088_v40, %v5121_v37  ;;  %v16461_v24 = vld [vmem:[%s19563_s22 + $0x30] sm:$0xff]   ;;  %v16462_v26 = vld [vmem:[%s19563_s22 + $0x38] sm:$0xff]  }
 0xf94   : > { %v5135_v50 = vsub.f32 %v5091_v41, %v5127_v46 }
 0xf95   : > { %v5133_v53 = vsub.f32 %v5089_v43, %v5123_v38 }
 0xf96   : > { %v16695_v52 = vpop.eup %16694 }
 0xf97   : > { %v16697_v29 = vpop.eup %16696  ;;  %v5106_v31 = vadd.f32 1.0, %v16695_v52  ;;  %v16463_v52 = vld [vmem:[%s19563_s22] sm:$0xff]  }
 0xf98   : > { %v16699_v32 = vpop.eup %16698  ;;  %v5104_v33 = vadd.f32 1.0, %v16697_v29  ;;  %v16464_v29 = vld [vmem:[%s19563_s22 + $0x8] sm:$0xff]  }
 0xf99   : > { %v16701_v60 = vpop.eup %16700  ;;  %16702 = vrcp.f32 %v5106_v31  ;;  %v5107_v35 = vadd.f32 1.0, %v16699_v32  ;;  %v16466_v32 = vld [vmem:[%s19563_s22 + $0x18] sm:$0xff]  }
 0xf9a   : > { %16704 = vrcp.f32 %v5104_v33  ;;  %v5105_v36 = vadd.f32 1.0, %v16701_v60  ;;  %v16467_v33 = vld [vmem:[%s19563_s22 + $0x40] sm:$0xff]   ;;  %v16468_v60 = vld [vmem:[%s19563_s22 + $0x48] sm:$0xff]  }
 0xf9b   : > { %16706 = vrcp.f32 %v5107_v35  ;;  %v16469_v35 = vld [vmem:[%s19563_s22 + $0x50] sm:$0xff]  }
 0xf9c   : > { %16708 = vrcp.f32 %v5105_v36  ;;  %v16470_v36 = vld [vmem:[%s19563_s22 + $0x58] sm:$0xff]   ;;  %s19616_s22 = sld [smem:[#allocation67_spill]] }
 0xfa3   : > { %v16703_v45 = vpop.eup %16702 }
 0xfa4   : > { %v16705_v48 = vpop.eup %16704  ;;  %v5138_v49 = vmul.f32 %v16703_v45, %v5134_v44 }
 0xfa5   : > { %v16707_v51 = vpop.eup %16706  ;;  %v5136_v19 = vmul.f32 %v16705_v48, %v5132_v47 }
 0xfa6   : > { %v16709_v54 = vpop.eup %16708  ;;  %v5139_v55 = vmul.f32 %v16707_v51, %v5135_v50 }
 0xfa7   : > { %v5137_v56 = vmul.f32 %v16709_v54, %v5133_v53  ;;  %5144 = vrot.lane.b32.xlu0 %v5136_v19, %s19558_s23 }
 0xfa9   : > { %5146 = vrot.lane.b32.xlu1 %v5137_v56, %s19558_s23 }
 0xfab   : > { %5148 = vrot.lane.b32.xlu0 %v5138_v49, %s19558_s23 }
 0xfad   : > { %5150 = vrot.lane.b32.xlu1 %v5139_v55, %s19558_s23 }
0x1019   : > { %v5145_v57 = vpop.permute.xlu0 %5144 }
0x101a   : > { %v5156_v58 = vadd.f32 %v5145_v57, %v18005_v16 }
0x101b   : > { %v5147_v59 = vpop.permute.xlu1 %5146 }
0x101c   : > { %5160 = vst.msk [vmem:[#allocation2] sm:$0xff] %vm2520_vm9, %v5156_v58  ;;  %v5157_v28 = vadd.f32 %v5147_v59, %v18007_v17 }
0x101d   : > { %v5149_v61 = vpop.permute.xlu0 %5148 }
0x101e   : > { %5161 = vst.msk [vmem:[#allocation2 + $0x8] sm:$0xff] %vm2520_vm9, %v5157_v28  ;;  %v5158_v62 = vadd.f32 %v5149_v61, %v18012_v34 }
0x101f   : > { %v5151_v63 = vpop.permute.xlu1 %5150 }
0x1020   : > { %5162 = vst.msk [vmem:[#allocation2 + $0x10] sm:$0xff] %vm2520_vm9, %v5158_v62  ;;  %v5159_v1 = vadd.f32 %v5151_v63, %v18014_v20 }
0x1022   : > { %5163 = vst.msk [vmem:[#allocation2 + $0x18] sm:$0xff] %vm2520_vm9, %v5159_v1 }
0x1023   : > { %v18075_v16 = vld [vmem:[#allocation2] sm:$0xff] }
0x1025   : > { %v18077_v17 = vld [vmem:[#allocation2 + $0x8] sm:$0xff] }
0x1026   : > { %v5168_v34 = vpack.c.bf16 %v18077_v17, %v18075_v16 }
0x1027   : > { %v18082_v5 = vld [vmem:[#allocation2 + $0x10] sm:$0xff] }
0x1028   : > { %5209 = vrot.lane.b32.xlu0 %v5168_v34, %s19565_s8 }
0x1029   : > { %v18084_v20 = vld [vmem:[#allocation2 + $0x18] sm:$0xff] }
0x102a   : > { %v5169_v6 = vpack.c.bf16 %v18084_v20, %v18082_v5 }
0x102c   : > { %5312 = vrot.lane.b32.xlu0 %v5168_v34, %s19566_s12  ;;  %5211 = vrot.lane.b32.xlu1 %v5169_v6, %s19565_s8 }
0x1030   : > { %5424 = vrot.lane.b32.xlu0 %v5168_v34, %s19567_s13  ;;  %5314 = vrot.lane.b32.xlu1 %v5169_v6, %s19566_s12  ;;  %s19569_s12 = sld [smem:[#allocation29_spill]] }
0x1034   : > { %5525 = vperm.xlu0 %16384, %v5515_v7   ;;  %5426 = vrot.lane.b32.xlu1 %v5169_v6, %s19567_s13  ;;  %s19568_s13 = sld [smem:[#allocation28_spill]] }
0x1038   : > { %5535 = vperm.xlu0 %16384, %v5517_v8   ;;  %5530 = vperm.xlu1 %16383, %v5516_v10  }
0x103c   : > { %5545 = vperm.xlu0 %16384, %v5519_v11   ;;  %5540 = vperm.xlu1 %16383, %v5518_v12  }
0x1040   : > { %5555 = vperm.xlu0 %16384, %v5521_v13   ;;  %5550 = vperm.xlu1 %16383, %v5520_v14  }
0x1044   : > { %5599 = vrot.lane.b32.xlu0 %v18075_v16, %s19565_s8  ;;  %5560 = vperm.xlu1 %16383, %v5522_v15  }
0x1048   : > { %5603 = vrot.lane.b32.xlu0 %v18082_v5, %s19565_s8  ;;  %5601 = vrot.lane.b32.xlu1 %v18077_v17, %s19565_s8 }
0x104c   : > { %5605 = vrot.lane.b32.xlu1 %v18084_v20, %s19565_s8 }
0x109a   : > { %v5210_v18 = vpop.permute.xlu0 %5209 }
0x109b   : > { %15359 = vmatprep.subr.bf16.mxu1 %v5210_v18 }
0x109c   : > { %15360 = vmatpush3.bf16.msra.mxu1 %v5210_v18 }
0x109e   : > { %v5212_v21 = vpop.permute.xlu1 %5211  ;;  %v5313_v23 = vpop.permute.xlu0 %5312 }
0x109f   : > { %15361 = vmatprep.subr.bf16.mxu1 %v5212_v21 }
0x10a0   : > { %15362 = vmatpush3.bf16.msra.mxu1 %v5212_v21 }
0x10a1   : > { %15371 = vmatprep.subr.bf16.mxu1 %v5313_v23 }
0x10a2   : > { %v5315_v25 = vpop.permute.xlu1 %5314  ;;  %v5425_v27 = vpop.permute.xlu0 %5424 }
0x10a3   : > { %15364 = vmatmul.mubr.msk.bf16.vlgmr.msra.gmra.mrb[24].mxu1 %vm2430_vm0, %v16460_v22 }
0x10a4   : > { %15372 = vmatpush3.bf16.msra.mxu1 %v5313_v23  ;;  %15367 = vmatprep.mubr.msk.bf16.mxu1 %vm2430_vm0, %v16461_v24 }
0x10a5   : > { %15373 = vmatprep.subr.bf16.mxu1 %v5315_v25 }
0x10a6   : > { %v5427_v31 = vpop.permute.xlu1 %5426 }
0x10a8   : > { %15374 = vmatpush3.bf16.msra.mxu1 %v5315_v25 }
0x10a9   : > { %15383 = vmatprep.subr.bf16.mxu1 %v5425_v27 }
0x10ab   : > { %15368 = vmatmul.mubr.msk.bf16.gmra.mrb[28].mxu1 %vm2430_vm0, %v16462_v26 }
0x10ac   : > { %15375 = vmatprep.mubr.msk.bf16.mxu1 %vm2430_vm0, %v16463_v52 }
0x10b3   : > { %15376 = vmatmul.mubr.msk.bf16.vlgmr.msra.gmra.mrb[24].mxu1 %vm2430_vm0, %v16464_v29  ;;  %v5526_v37 = vpop.permute.xlu0 %5525 }
0x10b4   : > { %15384 = vmatpush3.bf16.msra.mxu1 %v5425_v27  ;;  %15379 = vmatprep.mubr.msk.bf16.mxu1 %vm2430_vm0, %v16465_v30 }
0x10b5   : > { %15385 = vmatprep.subr.bf16.mxu1 %v5427_v31 }
0x10b7   : > { %v5531_v38 = vpop.permute.xlu1 %5530  ;;  %v5536_v39 = vpop.permute.xlu0 %5535 }
0x10b8   : > { %15386 = vmatpush3.bf16.msra.mxu1 %v5427_v31 }
0x10bb   : > { %15380 = vmatmul.mubr.msk.bf16.gmra.mrb[28].mxu1 %vm2430_vm0, %v16466_v32  ;;  %v5541_v43 = vpop.permute.xlu1 %5540  ;;  %v5546_v53 = vpop.permute.xlu0 %5545 }
0x10bc   : > { %15387 = vmatprep.mubr.msk.bf16.mxu1 %vm2430_vm0, %v16467_v33 }
0x10bf   : > { %v5551_v56 = vpop.permute.xlu1 %5550  ;;  %v5556_v59 = vpop.permute.xlu0 %5555 }
0x10c3   : > { %15388 = vmatmul.mubr.msk.bf16.vlgmr.msra.gmra.mrb[24].mxu1 %vm2430_vm0, %v16468_v60  ;;  %v5561_v62 = vpop.permute.xlu1 %5560  ;;  %v5600_v8 = vpop.permute.xlu0 %5599 }
0x10c4   : > { %15391 = vmatprep.mubr.msk.bf16.mxu1 %vm2430_vm0, %v16469_v35 }
0x10c7   : > { %v5602_v10 = vpop.permute.xlu1 %5601  ;;  %v5604_v14 = vpop.permute.xlu0 %5603 }
0x10cb   : > { %15392 = vmatmul.mubr.msk.bf16.gmra.mrb[28].mxu1 %vm2430_vm0, %v16470_v36  ;;  %v5606_v22 = vpop.permute.xlu1 %5605 }
0x1196   : > { %v15389_v40 = vpop.f32.mrb[24].mxu1 }
0x1197   : > { %v5565_v41 = vadd.f32 %v15389_v40, %v5536_v39  ;;  %v5476_v42 = vpop.f32.mrb[25].mxu1 }
0x1198   : > { %v5563_v44 = vadd.f32 %v5526_v37, %v5476_v42  ;;  %v15390_v45 = vpop.f32.mrb[26].mxu1 }
0x1199   : > { %v14188_v46 = vmul.f32 -1.442695, %v5565_v41  ;;  %v5566_v47 = vadd.f32 %v15390_v45, %v5541_v43  ;;  %v5479_v48 = vpop.f32.mrb[27].mxu1  ;;  %v16471_v41 = vld [vmem:[%s19568_s13 + $0x20] sm:$0xff]   ;;  %v5996_v45 = vld [vmem:[%s19569_s12 + $0x10] sm:$0xff] }
0x119a   : > { %v14186_v49 = vmul.f32 -1.442695, %v5563_v44  ;;  %v5564_v50 = vadd.f32 %v5531_v38, %v5479_v48  ;;  %15399 = vmatprep.mubr.msk.bf16.mxu0 %vm2430_vm0, %v16471_v41  ;;  %v5994_v44 = vld [vmem:[%s19569_s12] sm:$0xff]  ;;  %v5997_v48 = vld [vmem:[%s19569_s12 + $0x18] sm:$0xff] }
0x119b   : > { %16710 = vpow2.f32 %v14188_v46  ;;  %v14189_v51 = vmul.f32 -1.442695, %v5566_v47  ;;  %v5995_v46 = vld [vmem:[%s19569_s12 + $0x8] sm:$0xff]  ;;  %v5998_v47 = vld [vmem:[%s19569_s12 + $0x20] sm:$0xff] }
0x119c   : > { %16712 = vpow2.f32 %v14186_v49  ;;  %v14187_v19 = vmul.f32 -1.442695, %v5564_v50  ;;  %v6000_v49 = vld [vmem:[%s19569_s12 + $0x30] sm:$0xff]  ;;  %v5999_v50 = vld [vmem:[%s19569_s12 + $0x28] sm:$0xff] }
0x119d   : > { %16714 = vpow2.f32 %v14189_v51  ;;  %v6001_v51 = vld [vmem:[%s19569_s12 + $0x38] sm:$0xff]  ;;  %s19573_s12 = sld [smem:[#allocation31_spill]] }
0x119e   : > { %16716 = vpow2.f32 %v14187_v19  ;;  %v15393_v54 = vpop.f32.mrb[28].mxu1 }
0x119f   : > { %v5492_v55 = vpop.f32.mrb[29].mxu1  ;;  %v5569_v11 = vadd.f32 %v15393_v54, %v5556_v59  ;;  %v16472_v54 = vld [vmem:[%s19568_s13 + $0x28] sm:$0xff]  }
0x11a0   : > { %v15394_v57 = vpop.f32.mrb[30].mxu1  ;;  %v5567_v12 = vadd.f32 %v5546_v53, %v5492_v55 }
0x11a1   : > { %v5495_v58 = vpop.f32.mrb[31].mxu1  ;;  %v5570_v13 = vadd.f32 %v15394_v57, %v5561_v62  ;;  %v5613_v18 = vsub.f32 %v5569_v11, %v5604_v14  ;;  %v16477_v62 = vld [vmem:[%s19568_s13 + $0x10] sm:$0xff]  }
0x11a2   : > { %v5568_v15 = vadd.f32 %v5551_v56, %v5495_v58  ;;  %v5611_v23 = vsub.f32 %v5567_v12, %v5600_v8  ;;  %v16473_v56 = vld [vmem:[%s19568_s13 + $0x30] sm:$0xff]   ;;  %v16474_v58 = vld [vmem:[%s19568_s13 + $0x38] sm:$0xff]  }
0x11a3   : > { %v5614_v26 = vsub.f32 %v5570_v13, %v5606_v22 }
0x11a4   : > { %v5612_v29 = vsub.f32 %v5568_v15, %v5602_v10 }
0x11a5   : > { %v16711_v28 = vpop.eup %16710 }
0x11a6   : > { %v16713_v61 = vpop.eup %16712  ;;  %v5585_v63 = vadd.f32 1.0, %v16711_v28  ;;  %v16475_v28 = vld [vmem:[%s19568_s13] sm:$0xff]  }
0x11a7   : > { %v16715_v1 = vpop.eup %16714  ;;  %v5583_v4 = vadd.f32 1.0, %v16713_v61  ;;  %v16476_v61 = vld [vmem:[%s19568_s13 + $0x8] sm:$0xff]  }
0x11a8   : > { %v16717_v34 = vpop.eup %16716  ;;  %16718 = vrcp.f32 %v5585_v63  ;;  %v5586_v6 = vadd.f32 1.0, %v16715_v1  ;;  %v16478_v1 = vld [vmem:[%s19568_s13 + $0x18] sm:$0xff]  }
0x11a9   : > { %16720 = vrcp.f32 %v5583_v4  ;;  %v5584_v7 = vadd.f32 1.0, %v16717_v34  ;;  %v16479_v4 = vld [vmem:[%s19568_s13 + $0x40] sm:$0xff]   ;;  %v16480_v34 = vld [vmem:[%s19568_s13 + $0x48] sm:$0xff]  }
0x11aa   : > { %16722 = vrcp.f32 %v5586_v6  ;;  %v16481_v6 = vld [vmem:[%s19568_s13 + $0x50] sm:$0xff]  }
0x11ab   : > { %16724 = vrcp.f32 %v5584_v7  ;;  %v16482_v7 = vld [vmem:[%s19568_s13 + $0x58] sm:$0xff]   ;;  %s19574_s13 = smov 74  }
0x11b2   : > { %v16719_v21 = vpop.eup %16718 }
0x11b3   : > { %v16721_v24 = vpop.eup %16720  ;;  %v5617_v25 = vmul.f32 %v16719_v21, %v5613_v18 }
0x11b4   : > { %v16723_v27 = vpop.eup %16722  ;;  %v5615_v52 = vmul.f32 %v16721_v24, %v5611_v23 }
0x11b5   : > { %v16725_v30 = vpop.eup %16724  ;;  %v5618_v31 = vmul.f32 %v16723_v27, %v5614_v26 }
0x11b6   : > { %v5616_v32 = vmul.f32 %v16725_v30, %v5612_v29  ;;  %5623 = vrot.lane.b32.xlu0 %v5615_v52, %s19558_s23 }
0x11b8   : > { %5625 = vrot.lane.b32.xlu1 %v5616_v32, %s19558_s23 }
0x11ba   : > { %5627 = vrot.lane.b32.xlu0 %v5617_v25, %s19558_s23 }
0x11bc   : > { %5629 = vrot.lane.b32.xlu1 %v5618_v31, %s19558_s23 }
0x1228   : > { %v5624_v33 = vpop.permute.xlu0 %5623 }
0x1229   : > { %v5635_v60 = vadd.f32 %v5624_v33, %v18075_v16 }
0x122a   : > { %v5626_v35 = vpop.permute.xlu1 %5625 }
0x122b   : > { %5639 = vst.msk [vmem:[#allocation2] sm:$0xff] %vm2520_vm9, %v5635_v60  ;;  %v5636_v36 = vadd.f32 %v5626_v35, %v18077_v17 }
0x122c   : > { %v5628_v37 = vpop.permute.xlu0 %5627 }
0x122d   : > { %5640 = vst.msk [vmem:[#allocation2 + $0x8] sm:$0xff] %vm2520_vm9, %v5636_v36  ;;  %v5637_v38 = vadd.f32 %v5628_v37, %v18082_v5 }
0x122e   : > { %v5630_v39 = vpop.permute.xlu1 %5629 }
0x122f   : > { %5641 = vst.msk [vmem:[#allocation2 + $0x10] sm:$0xff] %vm2520_vm9, %v5637_v38  ;;  %v5638_v40 = vadd.f32 %v5630_v39, %v18084_v20 }
0x1231   : > { %5642 = vst.msk [vmem:[#allocation2 + $0x18] sm:$0xff] %vm2520_vm9, %v5638_v40 }
0x1232   : > { %v18145_v16 = vld [vmem:[#allocation2] sm:$0xff] }
0x1234   : > { %v18147_v17 = vld [vmem:[#allocation2 + $0x8] sm:$0xff] }
0x1235   : > { %v5647_v5 = vpack.c.bf16 %v18147_v17, %v18145_v16 }
0x1236   : > { %v18152_v42 = vld [vmem:[#allocation2 + $0x10] sm:$0xff] }
0x1237   : > { %5688 = vrot.lane.b32.xlu0 %v5647_v5, %s19565_s8 }
0x1238   : > { %v18154_v20 = vld [vmem:[#allocation2 + $0x18] sm:$0xff] }
0x1239   : > { %v5648_v43 = vpack.c.bf16 %v18154_v20, %v18152_v42 }
0x123b   : > { %5791 = vrot.lane.b32.xlu0 %v5647_v5, %s19570_s3  ;;  %5690 = vrot.lane.b32.xlu1 %v5648_v43, %s19565_s8 }
0x123f   : > { %5903 = vrot.lane.b32.xlu0 %v5647_v5, %s19571_s14  ;;  %5793 = vrot.lane.b32.xlu1 %v5648_v43, %s19570_s3  ;;  %s19572_s3 = sld [smem:[#allocation30_spill]] }
0x1243   : > { %6004 = vperm.xlu0 %16384, %v5994_v44   ;;  %5905 = vrot.lane.b32.xlu1 %v5648_v43, %s19571_s14 }
0x1247   : > { %6014 = vperm.xlu0 %16384, %v5996_v45   ;;  %6009 = vperm.xlu1 %16383, %v5995_v46  }
0x124b   : > { %6024 = vperm.xlu0 %16384, %v5998_v47   ;;  %6019 = vperm.xlu1 %16383, %v5997_v48  }
0x124f   : > { %6034 = vperm.xlu0 %16384, %v6000_v49   ;;  %6029 = vperm.xlu1 %16383, %v5999_v50  }
0x1253   : > { %6078 = vrot.lane.b32.xlu0 %v18145_v16, %s19565_s8  ;;  %6039 = vperm.xlu1 %16383, %v6001_v51  }
0x1257   : > { %6082 = vrot.lane.b32.xlu0 %v18152_v42, %s19565_s8  ;;  %6080 = vrot.lane.b32.xlu1 %v18147_v17, %s19565_s8 }
0x125b   : > { %6084 = vrot.lane.b32.xlu1 %v18154_v20, %s19565_s8 }
0x12a9   : > { %v5689_v19 = vpop.permute.xlu0 %5688 }
0x12aa   : > { %15395 = vmatprep.subr.bf16.mxu0 %v5689_v19 }
0x12ab   : > { %15396 = vmatpush3.bf16.msra.mxu0 %v5689_v19 }
0x12ad   : > { %v5691_v53 = vpop.permute.xlu1 %5690  ;;  %v5792_v55 = vpop.permute.xlu0 %5791 }
0x12ae   : > { %15397 = vmatprep.subr.bf16.mxu0 %v5691_v53 }
0x12af   : > { %15398 = vmatpush3.bf16.msra.mxu0 %v5691_v53 }
0x12b0   : > { %15407 = vmatprep.subr.bf16.mxu0 %v5792_v55 }
0x12b1   : > { %v5794_v57 = vpop.permute.xlu1 %5793  ;;  %v5904_v59 = vpop.permute.xlu0 %5903 }
0x12b2   : > { %15400 = vmatmul.mubr.msk.bf16.vlgmr.msra.gmra.mrb[28].mxu0 %vm2430_vm0, %v16472_v54 }
0x12b3   : > { %15408 = vmatpush3.bf16.msra.mxu0 %v5792_v55  ;;  %15403 = vmatprep.mubr.msk.bf16.mxu0 %vm2430_vm0, %v16473_v56 }
0x12b4   : > { %15409 = vmatprep.subr.bf16.mxu0 %v5794_v57 }
0x12b5   : > { %v5906_v63 = vpop.permute.xlu1 %5905 }
0x12b7   : > { %15410 = vmatpush3.bf16.msra.mxu0 %v5794_v57 }
0x12b8   : > { %15419 = vmatprep.subr.bf16.mxu0 %v5904_v59 }
0x12ba   : > { %15404 = vmatmul.mubr.msk.bf16.gmra.mrb[32].mxu0 %vm2430_vm0, %v16474_v58 }
0x12bb   : > { %15411 = vmatprep.mubr.msk.bf16.mxu0 %vm2430_vm0, %v16475_v28 }
0x12c2   : > { %15412 = vmatmul.mubr.msk.bf16.vlgmr.msra.gmra.mrb[28].mxu0 %vm2430_vm0, %v16476_v61  ;;  %v6005_v8 = vpop.permute.xlu0 %6004 }
0x12c3   : > { %15420 = vmatpush3.bf16.msra.mxu0 %v5904_v59  ;;  %15415 = vmatprep.mubr.msk.bf16.mxu0 %vm2430_vm0, %v16477_v62 }
0x12c4   : > { %15421 = vmatprep.subr.bf16.mxu0 %v5906_v63 }
0x12c6   : > { %v6010_v10 = vpop.permute.xlu1 %6009  ;;  %v6015_v11 = vpop.permute.xlu0 %6014 }
0x12c7   : > { %15422 = vmatpush3.bf16.msra.mxu0 %v5906_v63 }
0x12ca   : > { %15416 = vmatmul.mubr.msk.bf16.gmra.mrb[32].mxu0 %vm2430_vm0, %v16478_v1  ;;  %v6020_v15 = vpop.permute.xlu1 %6019  ;;  %v6025_v29 = vpop.permute.xlu0 %6024 }
0x12cb   : > { %15423 = vmatprep.mubr.msk.bf16.mxu0 %vm2430_vm0, %v16479_v4 }
0x12ce   : > { %v6030_v32 = vpop.permute.xlu1 %6029  ;;  %v6035_v35 = vpop.permute.xlu0 %6034 }
0x12d2   : > { %15424 = vmatmul.mubr.msk.bf16.vlgmr.msra.gmra.mrb[28].mxu0 %vm2430_vm0, %v16480_v34  ;;  %v6040_v38 = vpop.permute.xlu1 %6039  ;;  %v6079_v45 = vpop.permute.xlu0 %6078 }
0x12d3   : > { %15427 = vmatprep.mubr.msk.bf16.mxu0 %vm2430_vm0, %v16481_v6 }
0x12d6   : > { %v6081_v46 = vpop.permute.xlu1 %6080  ;;  %v6083_v50 = vpop.permute.xlu0 %6082 }
0x12da   : > { %15428 = vmatmul.mubr.msk.bf16.gmra.mrb[32].mxu0 %vm2430_vm0, %v16482_v7  ;;  %v6085_v54 = vpop.permute.xlu1 %6084 }
0x13a5   : > { %v15425_v12 = vpop.f32.mrb[28].mxu0 }
0x13a6   : > { %v6044_v13 = vadd.f32 %v15425_v12, %v6015_v11  ;;  %v5955_v14 = vpop.f32.mrb[29].mxu0 }
0x13a7   : > { %v6042_v18 = vadd.f32 %v6005_v8, %v5955_v14  ;;  %v15426_v21 = vpop.f32.mrb[30].mxu0 }
0x13a8   : > { %v14232_v22 = vmul.f32 -1.442695, %v6044_v13  ;;  %v6045_v23 = vadd.f32 %v15426_v21, %v6020_v15  ;;  %v5958_v24 = vpop.f32.mrb[31].mxu0  ;;  %v16483_v13 = vld [vmem:[%s19572_s3 + $0x20] sm:$0xff]   ;;  %v6469_v21 = vld [vmem:[%s19573_s12 + $0x10] sm:$0xff] }
0x13a9   : > { %v14230_v25 = vmul.f32 -1.442695, %v6042_v18  ;;  %v6043_v26 = vadd.f32 %v6010_v10, %v5958_v24  ;;  %15435 = vmatprep.mubr.msk.bf16.mxu1 %vm2430_vm0, %v16483_v13  ;;  %v6467_v18 = vld [vmem:[%s19573_s12] sm:$0xff]  ;;  %v6470_v24 = vld [vmem:[%s19573_s12 + $0x18] sm:$0xff] }
0x13aa   : > { %16726 = vpow2.f32 %v14232_v22  ;;  %v14233_v27 = vmul.f32 -1.442695, %v6045_v23  ;;  %v6468_v22 = vld [vmem:[%s19573_s12 + $0x8] sm:$0xff]  ;;  %v6471_v23 = vld [vmem:[%s19573_s12 + $0x20] sm:$0xff] }
0x13ab   : > { %16728 = vpow2.f32 %v14230_v25  ;;  %v14231_v52 = vmul.f32 -1.442695, %v6043_v26  ;;  %v6473_v25 = vld [vmem:[%s19573_s12 + $0x30] sm:$0xff]  ;;  %v6472_v26 = vld [vmem:[%s19573_s12 + $0x28] sm:$0xff] }
0x13ac   : > { %16730 = vpow2.f32 %v14233_v27  ;;  %v6474_v27 = vld [vmem:[%s19573_s12 + $0x38] sm:$0xff]  ;;  %s19576_s12 = sld [smem:[#allocation33_spill]] }
0x13ad   : > { %16732 = vpow2.f32 %v14231_v52  ;;  %v15429_v30 = vpop.f32.mrb[32].mxu0 }
0x13ae   : > { %v5971_v31 = vpop.f32.mrb[33].mxu0  ;;  %v6048_v47 = vadd.f32 %v15429_v30, %v6035_v35  ;;  %v16484_v30 = vld [vmem:[%s19572_s3 + $0x28] sm:$0xff]  }
0x13af   : > { %v15430_v33 = vpop.f32.mrb[34].mxu0  ;;  %v6046_v48 = vadd.f32 %v6025_v29, %v5971_v31  ;;  %v16485_v31 = vld [vmem:[%s19572_s3 + $0x30] sm:$0xff]   ;;  %v16488_v35 = vld [vmem:[%s19572_s3 + $0x8] sm:$0xff]  }
0x13b0   : > { %v5974_v60 = vpop.f32.mrb[35].mxu0  ;;  %v6049_v49 = vadd.f32 %v15430_v33, %v6040_v38  ;;  %v6092_v19 = vsub.f32 %v6048_v47, %v6083_v50  ;;  %v16490_v38 = vld [vmem:[%s19572_s3 + $0x18] sm:$0xff]  }
0x13b1   : > { %v6047_v51 = vadd.f32 %v6030_v32, %v5974_v60  ;;  %v6090_v55 = vsub.f32 %v6046_v48, %v6079_v45  ;;  %v16486_v32 = vld [vmem:[%s19572_s3 + $0x38] sm:$0xff]   ;;  %v16487_v60 = vld [vmem:[%s19572_s3] sm:$0xff]  }
0x13b2   : > { %v6093_v58 = vsub.f32 %v6049_v49, %v6085_v54 }
0x13b3   : > { %v6091_v61 = vsub.f32 %v6047_v51, %v6081_v46 }
0x13b4   : > { %v16727_v36 = vpop.eup %16726 }
0x13b5   : > { %v16729_v37 = vpop.eup %16728  ;;  %v6064_v39 = vadd.f32 1.0, %v16727_v36  ;;  %v16489_v36 = vld [vmem:[%s19572_s3 + $0x10] sm:$0xff]  }
0x13b6   : > { %v16731_v40 = vpop.eup %16730  ;;  %v6062_v41 = vadd.f32 1.0, %v16729_v37 }
0x13b7   : > { %v16733_v5 = vpop.eup %16732  ;;  %16734 = vrcp.f32 %v6064_v39  ;;  %v6065_v43 = vadd.f32 1.0, %v16731_v40  ;;  %v16491_v39 = vld [vmem:[%s19572_s3 + $0x40] sm:$0xff]   ;;  %v16492_v40 = vld [vmem:[%s19572_s3 + $0x48] sm:$0xff]  }
0x13b8   : > { %16736 = vrcp.f32 %v6062_v41  ;;  %v6063_v44 = vadd.f32 1.0, %v16733_v5  ;;  %v16493_v41 = vld [vmem:[%s19572_s3 + $0x50] sm:$0xff]   ;;  %v16494_v5 = vld [vmem:[%s19572_s3 + $0x58] sm:$0xff]   ;;  %s19575_s3 = sld [smem:[#allocation32_spill]] }
0x13b9   : > { %16738 = vrcp.f32 %v6065_v43 }
0x13ba   : > { %16740 = vrcp.f32 %v6063_v44 }
0x13c1   : > { %v16735_v53 = vpop.eup %16734 }
0x13c2   : > { %v16737_v56 = vpop.eup %16736  ;;  %v6096_v57 = vmul.f32 %v16735_v53, %v6092_v19 }
0x13c3   : > { %v16739_v59 = vpop.eup %16738  ;;  %v6094_v28 = vmul.f32 %v16737_v56, %v6090_v55 }
0x13c4   : > { %v16741_v62 = vpop.eup %16740  ;;  %v6097_v63 = vmul.f32 %v16739_v59, %v6093_v58 }
0x13c5   : > { %v6095_v1 = vmul.f32 %v16741_v62, %v6091_v61  ;;  %6102 = vrot.lane.b32.xlu0 %v6094_v28, %s19558_s23 }
0x13c7   : > { %6104 = vrot.lane.b32.xlu1 %v6095_v1, %s19558_s23 }
0x13c9   : > { %6106 = vrot.lane.b32.xlu0 %v6096_v57, %s19558_s23 }
0x13cb   : > { %6108 = vrot.lane.b32.xlu1 %v6097_v63, %s19558_s23 }
0x1437   : > { %v6103_v4 = vpop.permute.xlu0 %6102 }
0x1438   : > { %v6114_v34 = vadd.f32 %v6103_v4, %v18145_v16 }
0x1439   : > { %v6105_v6 = vpop.permute.xlu1 %6104 }
0x143a   : > { %6118 = vst.msk [vmem:[#allocation2] sm:$0xff] %vm2520_vm9, %v6114_v34  ;;  %v6115_v7 = vadd.f32 %v6105_v6, %v18147_v17 }
0x143b   : > { %v6107_v8 = vpop.permute.xlu0 %6106 }
0x143c   : > { %6119 = vst.msk [vmem:[#allocation2 + $0x8] sm:$0xff] %vm2520_vm9, %v6115_v7  ;;  %v6116_v10 = vadd.f32 %v6107_v8, %v18152_v42 }
0x143d   : > { %v6109_v11 = vpop.permute.xlu1 %6108 }
0x143e   : > { %6120 = vst.msk [vmem:[#allocation2 + $0x10] sm:$0xff] %vm2520_vm9, %v6116_v10  ;;  %v6117_v12 = vadd.f32 %v6109_v11, %v18154_v20 }
0x1440   : > { %6121 = vst.msk [vmem:[#allocation2 + $0x18] sm:$0xff] %vm2520_vm9, %v6117_v12 }
0x1441   : > { %v18215_v16 = vld [vmem:[#allocation2] sm:$0xff] }
0x1443   : > { %v18217_v17 = vld [vmem:[#allocation2 + $0x8] sm:$0xff] }
0x1444   : > { %v6126_v42 = vpack.c.bf16 %v18217_v17, %v18215_v16 }
0x1445   : > { %v18222_v14 = vld [vmem:[#allocation2 + $0x10] sm:$0xff] }
0x1446   : > { %6167 = vrot.lane.b32.xlu0 %v6126_v42, %s19565_s8 }
0x1447   : > { %v18224_v20 = vld [vmem:[#allocation2 + $0x18] sm:$0xff] }
0x1448   : > { %v6127_v15 = vpack.c.bf16 %v18224_v20, %v18222_v14 }
0x144a   : > { %6376 = vrot.lane.b32.xlu0 %v6126_v42, %s19574_s13  ;;  %6169 = vrot.lane.b32.xlu1 %v6127_v15, %s19565_s8 }
0x144e   : > { %6477 = vperm.xlu0 %16384, %v6467_v18   ;;  %6378 = vrot.lane.b32.xlu1 %v6127_v15, %s19574_s13 }
0x1452   : > { %6487 = vperm.xlu0 %16384, %v6469_v21   ;;  %6482 = vperm.xlu1 %16383, %v6468_v22  }
0x1456   : > { %6497 = vperm.xlu0 %16384, %v6471_v23   ;;  %6492 = vperm.xlu1 %16383, %v6470_v24  }
0x145a   : > { %6507 = vperm.xlu0 %16384, %v6473_v25   ;;  %6502 = vperm.xlu1 %16383, %v6472_v26  }
0x145e   : > { %6551 = vrot.lane.b32.xlu0 %v18215_v16, %s19565_s8  ;;  %6512 = vperm.xlu1 %16383, %v6474_v27  }
0x1462   : > { %6555 = vrot.lane.b32.xlu0 %v18222_v14, %s19565_s8  ;;  %6553 = vrot.lane.b32.xlu1 %v18217_v17, %s19565_s8 }
0x1466   : > { %6557 = vrot.lane.b32.xlu1 %v18224_v20, %s19565_s8 }
0x14b8   : > { %v6168_v52 = vpop.permute.xlu0 %6167 }
0x14b9   : > { %15431 = vmatprep.subr.bf16.mxu1 %v6168_v52 }
0x14ba   : > { %15432 = vmatpush3.bf16.msra.mxu1 %v6168_v52 }
0x14bc   : > { %v6170_v29 = vpop.permute.xlu1 %6169  ;;  %v6377_v33 = vpop.permute.xlu0 %6376 }
0x14bd   : > { %15433 = vmatprep.subr.bf16.mxu1 %v6170_v29 }
0x14be   : > { %15434 = vmatpush3.bf16.msra.mxu1 %v6170_v29 }
0x14bf   : > { %15443 = vmatprep.subr.bf16.mxu1 %v6126_v42 }
0x14c0   : > { %v6379_v37 = vpop.permute.xlu1 %6378 }
0x14c1   : > { %15436 = vmatmul.mubr.msk.bf16.vlgmr.msra.gmra.mrb[32].mxu1 %vm2430_vm0, %v16484_v30 }
0x14c2   : > { %15444 = vmatpush3.bf16.msra.mxu1 %v6126_v42  ;;  %15439 = vmatprep.mubr.msk.bf16.mxu1 %vm2430_vm0, %v16485_v31 }
0x14c3   : > { %15445 = vmatprep.subr.bf16.mxu1 %v6127_v15 }
0x14c6   : > { %15446 = vmatpush3.bf16.msra.mxu1 %v6127_v15 }
0x14c7   : > { %15455 = vmatprep.subr.bf16.mxu1 %v6377_v33 }
0x14c9   : > { %15440 = vmatmul.mubr.msk.bf16.gmra.mrb[36].mxu1 %vm2430_vm0, %v16486_v32 }
0x14ca   : > { %15447 = vmatprep.mubr.msk.bf16.mxu1 %vm2430_vm0, %v16487_v60 }
0x14cd   : > { %v6478_v43 = vpop.permute.xlu0 %6477 }
0x14d1   : > { %15448 = vmatmul.mubr.msk.bf16.vlgmr.msra.gmra.mrb[32].mxu1 %vm2430_vm0, %v16488_v35  ;;  %v6483_v44 = vpop.permute.xlu1 %6482  ;;  %v6488_v45 = vpop.permute.xlu0 %6487 }
0x14d2   : > { %15456 = vmatpush3.bf16.msra.mxu1 %v6377_v33  ;;  %15451 = vmatprep.mubr.msk.bf16.mxu1 %vm2430_vm0, %v16489_v36 }
0x14d3   : > { %15457 = vmatprep.subr.bf16.mxu1 %v6379_v37 }
0x14d5   : > { %v6493_v49 = vpop.permute.xlu1 %6492  ;;  %v6498_v59 = vpop.permute.xlu0 %6497 }
0x14d6   : > { %15458 = vmatpush3.bf16.msra.mxu1 %v6379_v37 }
0x14d9   : > { %15452 = vmatmul.mubr.msk.bf16.gmra.mrb[36].mxu1 %vm2430_vm0, %v16490_v38  ;;  %v6503_v62 = vpop.permute.xlu1 %6502  ;;  %v6508_v4 = vpop.permute.xlu0 %6507 }
0x14da   : > { %15459 = vmatprep.mubr.msk.bf16.mxu1 %vm2430_vm0, %v16491_v39 }
0x14dd   : > { %v6513_v7 = vpop.permute.xlu1 %6512  ;;  %v6552_v15 = vpop.permute.xlu0 %6551 }
0x14e1   : > { %15460 = vmatmul.mubr.msk.bf16.vlgmr.msra.gmra.mrb[32].mxu1 %vm2430_vm0, %v16492_v40  ;;  %v6554_v18 = vpop.permute.xlu1 %6553  ;;  %v6556_v24 = vpop.permute.xlu0 %6555 }
0x14e2   : > { %15463 = vmatprep.mubr.msk.bf16.mxu1 %vm2430_vm0, %v16493_v41 }
0x14e5   : > { %v6558_v52 = vpop.permute.xlu1 %6557 }
0x14e9   : > { %15464 = vmatmul.mubr.msk.bf16.gmra.mrb[36].mxu1 %vm2430_vm0, %v16494_v5 }
0x15b4   : > { %v15461_v46 = vpop.f32.mrb[32].mxu1 }
0x15b5   : > { %v6517_v47 = vadd.f32 %v15461_v46, %v6488_v45  ;;  %v6428_v48 = vpop.f32.mrb[33].mxu1 }
0x15b6   : > { %v6515_v50 = vadd.f32 %v6478_v43, %v6428_v48  ;;  %v15462_v51 = vpop.f32.mrb[34].mxu1 }
0x15b7   : > { %v14276_v19 = vmul.f32 -1.442695, %v6517_v47  ;;  %v6518_v53 = vadd.f32 %v15462_v51, %v6493_v49  ;;  %v6431_v54 = vpop.f32.mrb[35].mxu1  ;;  %v16495_v47 = vld [vmem:[%s19575_s3 + $0x20] sm:$0xff]   ;;  %v6948_v51 = vld [vmem:[%s19576_s12 + $0x10] sm:$0xff] }
0x15b8   : > { %v14274_v55 = vmul.f32 -1.442695, %v6515_v50  ;;  %v6516_v56 = vadd.f32 %v6483_v44, %v6431_v54  ;;  %15471 = vmatprep.mubr.msk.bf16.mxu0 %vm2430_vm0, %v16495_v47  ;;  %v6946_v50 = vld [vmem:[%s19576_s12] sm:$0xff]  ;;  %v6949_v54 = vld [vmem:[%s19576_s12 + $0x18] sm:$0xff] }
0x15b9   : > { %16742 = vpow2.f32 %v14276_v19  ;;  %v14277_v57 = vmul.f32 -1.442695, %v6518_v53  ;;  %v6947_v19 = vld [vmem:[%s19576_s12 + $0x8] sm:$0xff]  ;;  %v6950_v53 = vld [vmem:[%s19576_s12 + $0x20] sm:$0xff] }
0x15ba   : > { %16744 = vpow2.f32 %v14274_v55  ;;  %v14275_v58 = vmul.f32 -1.442695, %v6516_v56  ;;  %v6952_v55 = vld [vmem:[%s19576_s12 + $0x30] sm:$0xff]  ;;  %v6951_v56 = vld [vmem:[%s19576_s12 + $0x28] sm:$0xff] }
0x15bb   : > { %16746 = vpow2.f32 %v14277_v57  ;;  %v6953_v57 = vld [vmem:[%s19576_s12 + $0x38] sm:$0xff]  ;;  %s19578_s12 = sld [smem:[#allocation35_spill]] }
0x15bc   : > { %16748 = vpow2.f32 %v14275_v58  ;;  %v15465_v28 = vpop.f32.mrb[36].mxu1 }
0x15bd   : > { %v6444_v61 = vpop.f32.mrb[37].mxu1  ;;  %v6521_v21 = vadd.f32 %v15465_v28, %v6508_v4  ;;  %v16496_v28 = vld [vmem:[%s19575_s3 + $0x28] sm:$0xff]  }
0x15be   : > { %v15466_v63 = vpop.f32.mrb[38].mxu1  ;;  %v6519_v22 = vadd.f32 %v6498_v59, %v6444_v61 }
0x15bf   : > { %v6447_v1 = vpop.f32.mrb[39].mxu1  ;;  %v6522_v23 = vadd.f32 %v15466_v63, %v6513_v7  ;;  %v6565_v26 = vsub.f32 %v6521_v21, %v6556_v24  ;;  %v16501_v7 = vld [vmem:[%s19575_s3 + $0x10] sm:$0xff]  }
0x15c0   : > { %v6520_v25 = vadd.f32 %v6503_v62, %v6447_v1  ;;  %v6563_v29 = vsub.f32 %v6519_v22, %v6552_v15  ;;  %v16497_v62 = vld [vmem:[%s19575_s3 + $0x30] sm:$0xff]   ;;  %v16498_v1 = vld [vmem:[%s19575_s3 + $0x38] sm:$0xff]  }
0x15c1   : > { %v6566_v32 = vsub.f32 %v6522_v23, %v6558_v52 }
0x15c2   : > { %v6564_v35 = vsub.f32 %v6520_v25, %v6554_v18 }
0x15c3   : > { %v16743_v34 = vpop.eup %16742 }
0x15c4   : > { %v16745_v6 = vpop.eup %16744  ;;  %v6537_v8 = vadd.f32 1.0, %v16743_v34  ;;  %v16499_v34 = vld [vmem:[%s19575_s3] sm:$0xff]  }
0x15c5   : > { %v16747_v10 = vpop.eup %16746  ;;  %v6535_v11 = vadd.f32 1.0, %v16745_v6  ;;  %v16500_v6 = vld [vmem:[%s19575_s3 + $0x8] sm:$0xff]  }
0x15c6   : > { %v16749_v12 = vpop.eup %16748  ;;  %16750 = vrcp.f32 %v6537_v8  ;;  %v6538_v13 = vadd.f32 1.0, %v16747_v10  ;;  %v16502_v10 = vld [vmem:[%s19575_s3 + $0x18] sm:$0xff]  }
0x15c7   : > { %16752 = vrcp.f32 %v6535_v11  ;;  %v6536_v42 = vadd.f32 1.0, %v16749_v12  ;;  %v16503_v11 = vld [vmem:[%s19575_s3 + $0x40] sm:$0xff]   ;;  %v16504_v12 = vld [vmem:[%s19575_s3 + $0x48] sm:$0xff]  }
0x15c8   : > { %16754 = vrcp.f32 %v6538_v13  ;;  %v16505_v13 = vld [vmem:[%s19575_s3 + $0x50] sm:$0xff]  }
0x15c9   : > { %16756 = vrcp.f32 %v6536_v42  ;;  %v16506_v42 = vld [vmem:[%s19575_s3 + $0x58] sm:$0xff]   ;;  %s19577_s3 = sld [smem:[#allocation34_spill]] }
0x15d0   : > { %v16751_v27 = vpop.eup %16750 }
0x15d1   : > { %v16753_v30 = vpop.eup %16752  ;;  %v6569_v31 = vmul.f32 %v16751_v27, %v6565_v26 }
0x15d2   : > { %v16755_v33 = vpop.eup %16754  ;;  %v6567_v60 = vmul.f32 %v16753_v30, %v6563_v29 }
0x15d3   : > { %v16757_v36 = vpop.eup %16756  ;;  %v6570_v37 = vmul.f32 %v16755_v33, %v6566_v32 }
0x15d4   : > { %v6568_v38 = vmul.f32 %v16757_v36, %v6564_v35  ;;  %6575 = vrot.lane.b32.xlu0 %v6567_v60, %s19558_s23 }
0x15d6   : > { %6577 = vrot.lane.b32.xlu1 %v6568_v38, %s19558_s23 }
0x15d8   : > { %6579 = vrot.lane.b32.xlu0 %v6569_v31, %s19558_s23 }
0x15da   : > { %6581 = vrot.lane.b32.xlu1 %v6570_v37, %s19558_s23 }
0x1646   : > { %v6576_v39 = vpop.permute.xlu0 %6575 }
0x1647   : > { %v6587_v40 = vadd.f32 %v6576_v39, %v18215_v16 }
0x1648   : > { %v6578_v41 = vpop.permute.xlu1 %6577 }
0x1649   : > { %6591 = vst.msk [vmem:[#allocation2] sm:$0xff] %vm2520_vm9, %v6587_v40  ;;  %v6588_v5 = vadd.f32 %v6578_v41, %v18217_v17 }
0x164a   : > { %v6580_v43 = vpop.permute.xlu0 %6579 }
0x164b   : > { %6592 = vst.msk [vmem:[#allocation2 + $0x8] sm:$0xff] %vm2520_vm9, %v6588_v5  ;;  %v6589_v44 = vadd.f32 %v6580_v43, %v18222_v14 }
0x164c   : > { %v6582_v45 = vpop.permute.xlu1 %6581 }
0x164d   : > { %6593 = vst.msk [vmem:[#allocation2 + $0x10] sm:$0xff] %vm2520_vm9, %v6589_v44  ;;  %v6590_v46 = vadd.f32 %v6582_v45, %v18224_v20 }
0x164f   : > { %6594 = vst.msk [vmem:[#allocation2 + $0x18] sm:$0xff] %vm2520_vm9, %v6590_v46 }
0x1650   : > { %v18283_v16 = vld [vmem:[#allocation2] sm:$0xff] }
0x1652   : > { %v18285_v17 = vld [vmem:[#allocation2 + $0x8] sm:$0xff] }
0x1653   : > { %v6599_v14 = vpack.c.bf16 %v18285_v17, %v18283_v16 }
0x1654   : > { %v18290_v48 = vld [vmem:[#allocation2 + $0x10] sm:$0xff] }
0x1655   : > { %6640 = vrot.lane.b32.xlu0 %v6599_v14, %s19565_s8 }
0x1656   : > { %v18292_v20 = vld [vmem:[#allocation2 + $0x18] sm:$0xff] }
0x1657   : > { %v6600_v49 = vpack.c.bf16 %v18292_v20, %v18290_v48 }
0x1659   : > { %6743 = vrot.lane.b32.xlu0 %v6599_v14, %s19561_s5  ;;  %6642 = vrot.lane.b32.xlu1 %v6600_v49, %s19565_s8 }
0x165d   : > { %6855 = vrot.lane.b32.xlu0 %v6599_v14, %s19562_s6  ;;  %6745 = vrot.lane.b32.xlu1 %v6600_v49, %s19561_s5 }
0x1661   : > { %6956 = vperm.xlu0 %16384, %v6946_v50   ;;  %6857 = vrot.lane.b32.xlu1 %v6600_v49, %s19562_s6 }
0x1665   : > { %6966 = vperm.xlu0 %16384, %v6948_v51   ;;  %6961 = vperm.xlu1 %16383, %v6947_v19  }
0x1669   : > { %6976 = vperm.xlu0 %16384, %v6950_v53   ;;  %6971 = vperm.xlu1 %16383, %v6949_v54  }
0x166d   : > { %6986 = vperm.xlu0 %16384, %v6952_v55   ;;  %6981 = vperm.xlu1 %16383, %v6951_v56  }
0x1671   : > { %7030 = vrot.lane.b32.xlu0 %v18283_v16, %s19565_s8  ;;  %6991 = vperm.xlu1 %16383, %v6953_v57  }
0x1675   : > { %7034 = vrot.lane.b32.xlu0 %v18290_v48, %s19565_s8  ;;  %7032 = vrot.lane.b32.xlu1 %v18285_v17, %s19565_s8 }
0x1679   : > { %7036 = vrot.lane.b32.xlu1 %v18292_v20, %s19565_s8 }
0x16c7   : > { %v6641_v58 = vpop.permute.xlu0 %6640 }
0x16c8   : > { %15467 = vmatprep.subr.bf16.mxu0 %v6641_v58 }
0x16c9   : > { %15468 = vmatpush3.bf16.msra.mxu0 %v6641_v58 }
0x16cb   : > { %v6643_v59 = vpop.permute.xlu1 %6642  ;;  %v6744_v61 = vpop.permute.xlu0 %6743 }
0x16cc   : > { %15469 = vmatprep.subr.bf16.mxu0 %v6643_v59 }
0x16cd   : > { %15470 = vmatpush3.bf16.msra.mxu0 %v6643_v59 }
0x16ce   : > { %15479 = vmatprep.subr.bf16.mxu0 %v6744_v61 }
0x16cf   : > { %v6746_v63 = vpop.permute.xlu1 %6745  ;;  %v6856_v4 = vpop.permute.xlu0 %6855 }
0x16d0   : > { %15472 = vmatmul.mubr.msk.bf16.vlgmr.msra.gmra.mrb[36].mxu0 %vm2430_vm0, %v16496_v28 }
0x16d1   : > { %15480 = vmatpush3.bf16.msra.mxu0 %v6744_v61  ;;  %15475 = vmatprep.mubr.msk.bf16.mxu0 %vm2430_vm0, %v16497_v62 }
0x16d2   : > { %15481 = vmatprep.subr.bf16.mxu0 %v6746_v63 }
0x16d3   : > { %v6858_v8 = vpop.permute.xlu1 %6857 }
0x16d5   : > { %15482 = vmatpush3.bf16.msra.mxu0 %v6746_v63 }
0x16d6   : > { %15491 = vmatprep.subr.bf16.mxu0 %v6856_v4 }
0x16d8   : > { %15476 = vmatmul.mubr.msk.bf16.gmra.mrb[40].mxu0 %vm2430_vm0, %v16498_v1 }
0x16d9   : > { %15483 = vmatprep.mubr.msk.bf16.mxu0 %vm2430_vm0, %v16499_v34 }
0x16e0   : > { %15484 = vmatmul.mubr.msk.bf16.vlgmr.msra.gmra.mrb[36].mxu0 %vm2430_vm0, %v16500_v6  ;;  %v6957_v15 = vpop.permute.xlu0 %6956 }
0x16e1   : > { %15492 = vmatpush3.bf16.msra.mxu0 %v6856_v4  ;;  %15487 = vmatprep.mubr.msk.bf16.mxu0 %vm2430_vm0, %v16501_v7 }
0x16e2   : > { %15493 = vmatprep.subr.bf16.mxu0 %v6858_v8 }
0x16e4   : > { %v6962_v18 = vpop.permute.xlu1 %6961  ;;  %v6967_v21 = vpop.permute.xlu0 %6966 }
0x16e5   : > { %15494 = vmatpush3.bf16.msra.mxu0 %v6858_v8 }
0x16e8   : > { %15488 = vmatmul.mubr.msk.bf16.gmra.mrb[40].mxu0 %vm2430_vm0, %v16502_v10  ;;  %v6972_v25 = vpop.permute.xlu1 %6971  ;;  %v6977_v35 = vpop.permute.xlu0 %6976 }
0x16e9   : > { %15495 = vmatprep.mubr.msk.bf16.mxu0 %vm2430_vm0, %v16503_v11 }
0x16ec   : > { %v6982_v38 = vpop.permute.xlu1 %6981  ;;  %v6987_v41 = vpop.permute.xlu0 %6986 }
0x16f0   : > { %15496 = vmatmul.mubr.msk.bf16.vlgmr.msra.gmra.mrb[36].mxu0 %vm2430_vm0, %v16504_v12  ;;  %v6992_v44 = vpop.permute.xlu1 %6991  ;;  %v7031_v51 = vpop.permute.xlu0 %7030 }
0x16f1   : > { %15499 = vmatprep.mubr.msk.bf16.mxu0 %vm2430_vm0, %v16505_v13 }
0x16f4   : > { %v7033_v19 = vpop.permute.xlu1 %7032  ;;  %v7035_v56 = vpop.permute.xlu0 %7034 }
0x16f8   : > { %15500 = vmatmul.mubr.msk.bf16.gmra.mrb[40].mxu0 %vm2430_vm0, %v16506_v42  ;;  %v7037_v28 = vpop.permute.xlu1 %7036 }
0x17c3   : > { %v15497_v22 = vpop.f32.mrb[36].mxu0 }
0x17c4   : > { %v6996_v23 = vadd.f32 %v15497_v22, %v6967_v21  ;;  %v6907_v24 = vpop.f32.mrb[37].mxu0 }
0x17c5   : > { %v6994_v26 = vadd.f32 %v6957_v15, %v6907_v24  ;;  %v15498_v27 = vpop.f32.mrb[38].mxu0 }
0x17c6   : > { %v14320_v52 = vmul.f32 -1.442695, %v6996_v23  ;;  %v6997_v29 = vadd.f32 %v15498_v27, %v6972_v25  ;;  %v6910_v30 = vpop.f32.mrb[39].mxu0  ;;  %v16507_v23 = vld [vmem:[%s19577_s3 + $0x20] sm:$0xff]   ;;  %v7427_v27 = vld [vmem:[%s19578_s12 + $0x10] sm:$0xff] }
0x17c7   : > { %v14318_v31 = vmul.f32 -1.442695, %v6994_v26  ;;  %v6995_v32 = vadd.f32 %v6962_v18, %v6910_v30  ;;  %15507 = vmatprep.mubr.msk.bf16.mxu1 %vm2430_vm0, %v16507_v23  ;;  %v7425_v26 = vld [vmem:[%s19578_s12] sm:$0xff]  ;;  %v7428_v30 = vld [vmem:[%s19578_s12 + $0x18] sm:$0xff] }
0x17c8   : > { %16758 = vpow2.f32 %v14320_v52  ;;  %v14321_v33 = vmul.f32 -1.442695, %v6997_v29  ;;  %v7426_v52 = vld [vmem:[%s19578_s12 + $0x8] sm:$0xff]  ;;  %v7429_v29 = vld [vmem:[%s19578_s12 + $0x20] sm:$0xff] }
0x17c9   : > { %16760 = vpow2.f32 %v14318_v31  ;;  %v14319_v60 = vmul.f32 -1.442695, %v6995_v32  ;;  %v7431_v31 = vld [vmem:[%s19578_s12 + $0x30] sm:$0xff]  ;;  %v7430_v32 = vld [vmem:[%s19578_s12 + $0x28] sm:$0xff] }
0x17ca   : > { %16762 = vpow2.f32 %v14321_v33  ;;  %v7432_v33 = vld [vmem:[%s19578_s12 + $0x38] sm:$0xff]  ;;  %s19582_s12 = sld [smem:[#allocation13_spill]] }
0x17cb   : > { %16764 = vpow2.f32 %v14319_v60  ;;  %v15501_v36 = vpop.f32.mrb[40].mxu0 }
0x17cc   : > { %v6923_v37 = vpop.f32.mrb[41].mxu0  ;;  %v7000_v53 = vadd.f32 %v15501_v36, %v6987_v41  ;;  %v16508_v36 = vld [vmem:[%s19577_s3 + $0x28] sm:$0xff]  }
0x17cd   : > { %v15502_v39 = vpop.f32.mrb[42].mxu0  ;;  %v6998_v54 = vadd.f32 %v6977_v35, %v6923_v37 }
0x17ce   : > { %v6926_v40 = vpop.f32.mrb[43].mxu0  ;;  %v7001_v55 = vadd.f32 %v15502_v39, %v6992_v44  ;;  %v7044_v58 = vsub.f32 %v7000_v53, %v7035_v56  ;;  %v16513_v44 = vld [vmem:[%s19577_s3 + $0x10] sm:$0xff]  }
0x17cf   : > { %v6999_v57 = vadd.f32 %v6982_v38, %v6926_v40  ;;  %v7042_v61 = vsub.f32 %v6998_v54, %v7031_v51  ;;  %v16509_v38 = vld [vmem:[%s19577_s3 + $0x30] sm:$0xff]   ;;  %v16510_v40 = vld [vmem:[%s19577_s3 + $0x38] sm:$0xff]  }
0x17d0   : > { %v7045_v1 = vsub.f32 %v7001_v55, %v7037_v28 }
0x17d1   : > { %v7043_v6 = vsub.f32 %v6999_v57, %v7033_v19 }
0x17d2   : > { %v16759_v5 = vpop.eup %16758 }
0x17d3   : > { %v16761_v43 = vpop.eup %16760  ;;  %v7016_v45 = vadd.f32 1.0, %v16759_v5  ;;  %v16511_v5 = vld [vmem:[%s19577_s3] sm:$0xff]  }
0x17d4   : > { %v16763_v46 = vpop.eup %16762  ;;  %v7014_v47 = vadd.f32 1.0, %v16761_v43  ;;  %v16512_v43 = vld [vmem:[%s19577_s3 + $0x8] sm:$0xff]  }
0x17d5   : > { %v16765_v14 = vpop.eup %16764  ;;  %16766 = vrcp.f32 %v7016_v45  ;;  %v7017_v49 = vadd.f32 1.0, %v16763_v46  ;;  %v16514_v46 = vld [vmem:[%s19577_s3 + $0x18] sm:$0xff]  }
0x17d6   : > { %16768 = vrcp.f32 %v7014_v47  ;;  %v7015_v50 = vadd.f32 1.0, %v16765_v14  ;;  %v16515_v47 = vld [vmem:[%s19577_s3 + $0x40] sm:$0xff]   ;;  %v16516_v14 = vld [vmem:[%s19577_s3 + $0x48] sm:$0xff]  }
0x17d7   : > { %16770 = vrcp.f32 %v7017_v49  ;;  %v16517_v49 = vld [vmem:[%s19577_s3 + $0x50] sm:$0xff]  }
0x17d8   : > { %16772 = vrcp.f32 %v7015_v50  ;;  %v16518_v50 = vld [vmem:[%s19577_s3 + $0x58] sm:$0xff]   ;;  %s19581_s3 = sld [smem:[#allocation41_spill]] }
0x17df   : > { %v16767_v59 = vpop.eup %16766 }
0x17e0   : > { %v16769_v62 = vpop.eup %16768  ;;  %v7048_v63 = vmul.f32 %v16767_v59, %v7044_v58 }
0x17e1   : > { %v16771_v4 = vpop.eup %16770  ;;  %v7046_v34 = vmul.f32 %v16769_v62, %v7042_v61 }
0x17e2   : > { %v16773_v7 = vpop.eup %16772  ;;  %v7049_v8 = vmul.f32 %v16771_v4, %v7045_v1 }
0x17e3   : > { %v7047_v10 = vmul.f32 %v16773_v7, %v7043_v6  ;;  %7054 = vrot.lane.b32.xlu0 %v7046_v34, %s19558_s23 }
0x17e5   : > { %7056 = vrot.lane.b32.xlu1 %v7047_v10, %s19558_s23 }
0x17e7   : > { %7058 = vrot.lane.b32.xlu0 %v7048_v63, %s19558_s23 }
0x17e9   : > { %7060 = vrot.lane.b32.xlu1 %v7049_v8, %s19558_s23 }
0x1855   : > { %v7055_v11 = vpop.permute.xlu0 %7054 }
0x1856   : > { %v7066_v12 = vadd.f32 %v7055_v11, %v18283_v16 }
0x1857   : > { %v7057_v13 = vpop.permute.xlu1 %7056 }
0x1858   : > { %7070 = vst.msk [vmem:[#allocation2] sm:$0xff] %vm2520_vm9, %v7066_v12  ;;  %v7067_v42 = vadd.f32 %v7057_v13, %v18285_v17 }
0x1859   : > { %v7059_v15 = vpop.permute.xlu0 %7058 }
0x185a   : > { %7071 = vst.msk [vmem:[#allocation2 + $0x8] sm:$0xff] %vm2520_vm9, %v7067_v42  ;;  %v7068_v18 = vadd.f32 %v7059_v15, %v18290_v48 }
0x185b   : > { %v7061_v21 = vpop.permute.xlu1 %7060 }
0x185c   : > { %7072 = vst.msk [vmem:[#allocation2 + $0x10] sm:$0xff] %vm2520_vm9, %v7068_v18  ;;  %v7069_v22 = vadd.f32 %v7061_v21, %v18292_v20 }
0x185e   : > { %7073 = vst.msk [vmem:[#allocation2 + $0x18] sm:$0xff] %vm2520_vm9, %v7069_v22 }
0x185f   : > { %v18353_v16 = vld [vmem:[#allocation2] sm:$0xff] }
0x1861   : > { %v18355_v17 = vld [vmem:[#allocation2 + $0x8] sm:$0xff] }
0x1862   : > { %v7078_v48 = vpack.c.bf16 %v18355_v17, %v18353_v16 }
0x1863   : > { %v18360_v24 = vld [vmem:[#allocation2 + $0x10] sm:$0xff] }
0x1864   : > { %7119 = vrot.lane.b32.xlu0 %v7078_v48, %s19565_s8 }
0x1865   : > { %v18362_v20 = vld [vmem:[#allocation2 + $0x18] sm:$0xff] }
0x1866   : > { %v7079_v25 = vpack.c.bf16 %v18362_v20, %v18360_v24 }
0x1868   : > { %7222 = vrot.lane.b32.xlu0 %v7078_v48, %s19561_s5  ;;  %7121 = vrot.lane.b32.xlu1 %v7079_v25, %s19565_s8 }
0x186c   : > { %7334 = vrot.lane.b32.xlu0 %v7078_v48, %s19562_s6  ;;  %7224 = vrot.lane.b32.xlu1 %v7079_v25, %s19561_s5  ;;  %s19579_s5 = sld [smem:[#allocation36_spill]] }
0x1870   : > { %7435 = vperm.xlu0 %16384, %v7425_v26   ;;  %7336 = vrot.lane.b32.xlu1 %v7079_v25, %s19562_s6  ;;  %s19580_s6 = sld [smem:[#allocation37_spill]] }
0x1874   : > { %7445 = vperm.xlu0 %16384, %v7427_v27   ;;  %7440 = vperm.xlu1 %16383, %v7426_v52  }
0x1878   : > { %7455 = vperm.xlu0 %16384, %v7429_v29   ;;  %7450 = vperm.xlu1 %16383, %v7428_v30  }
0x187c   : > { %7465 = vperm.xlu0 %16384, %v7431_v31   ;;  %7460 = vperm.xlu1 %16383, %v7430_v32  }
0x1880   : > { %7509 = vrot.lane.b32.xlu0 %v18353_v16, %s19565_s8  ;;  %7470 = vperm.xlu1 %16383, %v7432_v33  }
0x1884   : > { %7513 = vrot.lane.b32.xlu0 %v18360_v24, %s19565_s8  ;;  %7511 = vrot.lane.b32.xlu1 %v18355_v17, %s19565_s8 }
0x1888   : > { %7515 = vrot.lane.b32.xlu1 %v18362_v20, %s19565_s8 }
0x18d6   : > { %v7120_v60 = vpop.permute.xlu0 %7119 }
0x18d7   : > { %15503 = vmatprep.subr.bf16.mxu1 %v7120_v60 }
0x18d8   : > { %15504 = vmatpush3.bf16.msra.mxu1 %v7120_v60 }
0x18da   : > { %v7122_v35 = vpop.permute.xlu1 %7121  ;;  %v7223_v37 = vpop.permute.xlu0 %7222 }
0x18db   : > { %15505 = vmatprep.subr.bf16.mxu1 %v7122_v35 }
0x18dc   : > { %15506 = vmatpush3.bf16.msra.mxu1 %v7122_v35 }
0x18dd   : > { %15515 = vmatprep.subr.bf16.mxu1 %v7223_v37 }
0x18de   : > { %v7225_v39 = vpop.permute.xlu1 %7224  ;;  %v7335_v41 = vpop.permute.xlu0 %7334 }
0x18df   : > { %15508 = vmatmul.mubr.msk.bf16.vlgmr.msra.gmra.mrb[40].mxu1 %vm2430_vm0, %v16508_v36 }
0x18e0   : > { %15516 = vmatpush3.bf16.msra.mxu1 %v7223_v37  ;;  %15511 = vmatprep.mubr.msk.bf16.mxu1 %vm2430_vm0, %v16509_v38 }
0x18e1   : > { %15517 = vmatprep.subr.bf16.mxu1 %v7225_v39 }
0x18e2   : > { %v7337_v45 = vpop.permute.xlu1 %7336 }
0x18e4   : > { %15518 = vmatpush3.bf16.msra.mxu1 %v7225_v39 }
0x18e5   : > { %15527 = vmatprep.subr.bf16.mxu1 %v7335_v41 }
0x18e7   : > { %15512 = vmatmul.mubr.msk.bf16.gmra.mrb[44].mxu1 %vm2430_vm0, %v16510_v40 }
0x18e8   : > { %15519 = vmatprep.mubr.msk.bf16.mxu1 %vm2430_vm0, %v16511_v5 }
0x18ef   : > { %15520 = vmatmul.mubr.msk.bf16.vlgmr.msra.gmra.mrb[40].mxu1 %vm2430_vm0, %v16512_v43  ;;  %v7436_v51 = vpop.permute.xlu0 %7435 }
0x18f0   : > { %15528 = vmatpush3.bf16.msra.mxu1 %v7335_v41  ;;  %15523 = vmatprep.mubr.msk.bf16.mxu1 %vm2430_vm0, %v16513_v44 }
0x18f1   : > { %15529 = vmatprep.subr.bf16.mxu1 %v7337_v45 }
0x18f3   : > { %v7441_v19 = vpop.permute.xlu1 %7440  ;;  %v7446_v53 = vpop.permute.xlu0 %7445 }
0x18f4   : > { %15530 = vmatpush3.bf16.msra.mxu1 %v7337_v45 }
0x18f7   : > { %15524 = vmatmul.mubr.msk.bf16.gmra.mrb[44].mxu1 %vm2430_vm0, %v16514_v46  ;;  %v7451_v57 = vpop.permute.xlu1 %7450  ;;  %v7456_v6 = vpop.permute.xlu0 %7455 }
0x18f8   : > { %15531 = vmatprep.mubr.msk.bf16.mxu1 %vm2430_vm0, %v16515_v47 }
0x18fb   : > { %v7461_v10 = vpop.permute.xlu1 %7460  ;;  %v7466_v13 = vpop.permute.xlu0 %7465 }
0x18ff   : > { %15532 = vmatmul.mubr.msk.bf16.vlgmr.msra.gmra.mrb[40].mxu1 %vm2430_vm0, %v16516_v14  ;;  %v7471_v18 = vpop.permute.xlu1 %7470  ;;  %v7510_v27 = vpop.permute.xlu0 %7509 }
0x1900   : > { %15535 = vmatprep.mubr.msk.bf16.mxu1 %vm2430_vm0, %v16517_v49 }
0x1903   : > { %v7512_v52 = vpop.permute.xlu1 %7511  ;;  %v7514_v32 = vpop.permute.xlu0 %7513 }
0x1907   : > { %15536 = vmatmul.mubr.msk.bf16.gmra.mrb[44].mxu1 %vm2430_vm0, %v16518_v50  ;;  %v7516_v36 = vpop.permute.xlu1 %7515 }
0x19d2   : > { %v15533_v54 = vpop.f32.mrb[40].mxu1 }
0x19d3   : > { %v7475_v55 = vadd.f32 %v15533_v54, %v7446_v53  ;;  %v7386_v56 = vpop.f32.mrb[41].mxu1 }
0x19d4   : > { %v7473_v58 = vadd.f32 %v7436_v51, %v7386_v56  ;;  %v15534_v59 = vpop.f32.mrb[42].mxu1  ;;  %v7567_v56 = vld [vmem:[%s19580_s6] sm:$0xff] }
0x19d5   : > { %v14364_v28 = vmul.f32 -1.442695, %v7475_v55  ;;  %v7476_v61 = vadd.f32 %v15534_v59, %v7451_v57  ;;  %v7389_v62 = vpop.f32.mrb[43].mxu1  ;;  %v16519_v55 = vld [vmem:[%s19579_s5] sm:$0xff]   ;;  %v7569_v59 = vld [vmem:[%s19580_s6 + $0x10] sm:$0xff] }
0x19d6   : > { %v14362_v63 = vmul.f32 -1.442695, %v7473_v58  ;;  %v7474_v1 = vadd.f32 %v7441_v19, %v7389_v62  ;;  %15543 = vmatprep.mubr.msk.bf16.mxu0 %vm2430_vm0, %v16519_v55  ;;  %v7570_v62 = vld [vmem:[%s19580_s6 + $0x18] sm:$0xff] }
0x19d7   : > { %16774 = vpow2.f32 %v14364_v28  ;;  %v14365_v4 = vmul.f32 -1.442695, %v7476_v61  ;;  %v7568_v28 = vld [vmem:[%s19580_s6 + $0x8] sm:$0xff]  ;;  %v7571_v61 = vld [vmem:[%s19580_s6 + $0x20] sm:$0xff] }
0x19d8   : > { %16776 = vpow2.f32 %v14362_v63  ;;  %v14363_v34 = vmul.f32 -1.442695, %v7474_v1  ;;  %v7573_v63 = vld [vmem:[%s19580_s6 + $0x30] sm:$0xff]  ;;  %v7572_v1 = vld [vmem:[%s19580_s6 + $0x28] sm:$0xff] }
0x19d9   : > { %16778 = vpow2.f32 %v14365_v4  ;;  %v7574_v4 = vld [vmem:[%s19580_s6 + $0x38] sm:$0xff]  ;;  %s14774_s6 = sshll.u32 %s17662_s2, 4  ;;  %s19585_s2 = sld [smem:[#allocation43_spill]] }
0x19da   : > { %16780 = vpow2.f32 %v14363_v34  ;;  %v15537_v7 = vpop.f32.mrb[44].mxu1  ;;  %v8036_v34 = vld [vmem:[%s19581_s3] sm:$0xff]  ;;  %s2387_s16 = scalar_lea.vmem %s19582_s12, %s14774_s6  ;;  %s19586_s12 = sld [smem:[#allocation42_spill]] }
0x19db   : > { %v7402_v8 = vpop.f32.mrb[45].mxu1  ;;  %v7479_v29 = vadd.f32 %v15537_v7, %v7466_v13  ;;  %v16521_v13 = vld [vmem:[%s19579_s5 + $0x10] sm:$0xff]   ;;  %s19587_s6 = sld [smem:[#allocation45_spill]] }
0x19dc   : > { %v15538_v11 = vpop.f32.mrb[46].mxu1  ;;  %v7477_v30 = vadd.f32 %v7456_v6, %v7402_v8  ;;  %v8037_v6 = vld [vmem:[%s19581_s3 + $0x8] sm:$0xff]  ;;  %s19590_s3 = sld [smem:[#allocation47_spill]] }
0x19dd   : > { %v7405_v12 = vpop.f32.mrb[47].mxu1  ;;  %v7480_v31 = vadd.f32 %v15538_v11, %v7471_v18  ;;  %v7523_v60 = vsub.f32 %v7479_v29, %v7514_v32  ;;  %v8031_v11 = vld [vmem:[%s2387_s16] sm:$0xff]  ;;  %v16522_v18 = vld [vmem:[%s19579_s5 + $0x18] sm:$0xff]  }
0x19de   : > { %v7478_v33 = vadd.f32 %v7461_v10, %v7405_v12  ;;  %v7521_v37 = vsub.f32 %v7477_v30, %v7510_v27  ;;  %v16520_v10 = vld [vmem:[%s19579_s5 + $0x8] sm:$0xff]   ;;  %s19423_s5 = smov 77  }
0x19df   : > { %v7524_v40 = vsub.f32 %v7480_v31, %v7516_v36  ;;  %v8032_v12 = vld [vmem:[%s2387_s16 + $0x8] sm:$0xff]  ;;  %s19414_s16 = smov 54  }
0x19e0   : > { %v7522_v43 = vsub.f32 %v7478_v33, %v7512_v52 }
0x19e1   : > { %v16775_v42 = vpop.eup %16774 }
0x19e2   : > { %v16777_v15 = vpop.eup %16776  ;;  %v7495_v21 = vadd.f32 1.0, %v16775_v42  ;;  %v8033_v42 = vpack.c.bf16 %v8032_v12, %v8031_v11 }
0x19e3   : > { %v16779_v22 = vpop.eup %16778  ;;  %v7493_v23 = vadd.f32 1.0, %v16777_v15 }
0x19e4   : > { %v16781_v48 = vpop.eup %16780  ;;  %16782 = vrcp.f32 %v7495_v21  ;;  %v7496_v25 = vadd.f32 1.0, %v16779_v22  ;;  %v8058_v15 = vsel %vm8053_vm11, %v8033_v42, 0  ;;  %v16523_v21 = vld [vmem:[%s19583_s17] sm:$0xff]   ;;  %s19584_s17 = sld [smem:[#allocation38_spill]] }
0x19e5   : > { %16784 = vrcp.f32 %v7493_v23  ;;  %v7494_v26 = vadd.f32 1.0, %v16781_v48 }
0x19e6   : > { %16786 = vrcp.f32 %v7496_v25 }
0x19e7   : > { %16788 = vrcp.f32 %v7494_v26 }
0x19ee   : > { %v16783_v35 = vpop.eup %16782 }
0x19ef   : > { %v16785_v38 = vpop.eup %16784  ;;  %v7527_v39 = vmul.f32 %v16783_v35, %v7523_v60 }
0x19f0   : > { %v16787_v41 = vpop.eup %16786  ;;  %v7525_v5 = vmul.f32 %v16785_v38, %v7521_v37 }
0x19f1   : > { %v16789_v44 = vpop.eup %16788  ;;  %v7528_v45 = vmul.f32 %v16787_v41, %v7524_v40 }
0x19f2   : > { %v7526_v46 = vmul.f32 %v16789_v44, %v7522_v43  ;;  %7533 = vrot.lane.b32.xlu0 %v7525_v5, %s19558_s23 }
0x19f4   : > { %7535 = vrot.lane.b32.xlu1 %v7526_v46, %s19558_s23 }
0x19f6   : > { %7537 = vrot.lane.b32.xlu0 %v7527_v39, %s19558_s23 }
0x19f8   : > { %7539 = vrot.lane.b32.xlu1 %v7528_v45, %s19558_s23 }
0x1a64   : > { %v7534_v47 = vpop.permute.xlu0 %7533 }
0x1a65   : > { %v7545_v14 = vadd.f32 %v7534_v47, %v18353_v16 }
0x1a66   : > { %v7536_v49 = vpop.permute.xlu1 %7535 }
0x1a67   : > { %7549 = vst.msk [vmem:[#allocation2] sm:$0xff] %vm2520_vm9, %v7545_v14  ;;  %v7546_v50 = vadd.f32 %v7536_v49, %v18355_v17 }
0x1a68   : > { %v7538_v51 = vpop.permute.xlu0 %7537 }
0x1a69   : > { %7550 = vst.msk [vmem:[#allocation2 + $0x8] sm:$0xff] %vm2520_vm9, %v7546_v50  ;;  %v7547_v19 = vadd.f32 %v7538_v51, %v18360_v24 }
0x1a6a   : > { %v7540_v53 = vpop.permute.xlu1 %7539 }
0x1a6b   : > { %7551 = vst.msk [vmem:[#allocation2 + $0x10] sm:$0xff] %vm2520_vm9, %v7547_v19  ;;  %v7548_v54 = vadd.f32 %v7540_v53, %v18362_v20 }
0x1a6d   : > { %7552 = vst.msk [vmem:[#allocation2 + $0x18] sm:$0xff] %vm2520_vm9, %v7548_v54 }
0x1a6e   : > { %v18423_v16 = vld [vmem:[#allocation2] sm:$0xff] }
0x1a70   : > { %v18425_v17 = vld [vmem:[#allocation2 + $0x8] sm:$0xff] }
0x1a71   : > { %v7557_v24 = vpack.c.bf16 %v18425_v17, %v18423_v16 }
0x1a72   : > { %v18431_v20 = vld [vmem:[#allocation2 + $0x10] sm:$0xff] }
0x1a73   : > { %7637 = vrot.lane.b32.xlu0 %v7557_v24, %s19565_s8 }
0x1a74   : > { %v18433_v57 = vld [vmem:[#allocation2 + $0x18] sm:$0xff] }
0x1a75   : > { %v7558_v58 = vpack.c.bf16 %v18433_v57, %v18431_v20 }
0x1a77   : > { %7577 = vperm.xlu0 %16384, %v7567_v56   ;;  %7639 = vrot.lane.b32.xlu1 %v7558_v58, %s19565_s8 }
0x1a7b   : > { %7587 = vperm.xlu0 %16384, %v7569_v59   ;;  %7582 = vperm.xlu1 %16383, %v7568_v28  }
0x1a7f   : > { %7597 = vperm.xlu0 %16384, %v7571_v61   ;;  %7592 = vperm.xlu1 %16383, %v7570_v62  }
0x1a83   : > { %7607 = vperm.xlu0 %16384, %v7573_v63   ;;  %7602 = vperm.xlu1 %16383, %v7572_v1  }
0x1a87   : > { %7748 = vrot.lane.b32.xlu0 %v18423_v16, %s19565_s8  ;;  %7612 = vperm.xlu1 %16383, %v7574_v4  }
0x1a8b   : > { %7752 = vrot.lane.b32.xlu0 %v18431_v20, %s19565_s8  ;;  %7750 = vrot.lane.b32.xlu1 %v18425_v17, %s19565_s8 }
0x1a8f   : > { %8040 = vperm.xlu0 %16384, %v8036_v34   ;;  %7754 = vrot.lane.b32.xlu1 %v18433_v57, %s19565_s8 }
0x1a93   : > { %8045 = vperm.xlu1 %16383, %v8037_v6  }
0x1ae5   : > { %v7638_v7 = vpop.permute.xlu0 %7637 }
0x1ae6   : > { %15539 = vmatprep.subr.bf16.mxu0 %v7638_v7 }
0x1ae7   : > { %15540 = vmatpush3.bf16.msra.mxu0 %v7638_v7 }
0x1ae9   : > { %v7640_v8 = vpop.permute.xlu1 %7639 }
0x1aea   : > { %15541 = vmatprep.subr.bf16.mxu0 %v7640_v8 }
0x1aeb   : > { %15542 = vmatpush3.bf16.msra.mxu0 %v7640_v8 }
0x1aec   : > { %15563 = vmatprep.subr.bf16.mxu0 %v17170_v9 }
0x1aee   : > { %15544 = vmatmul.mubr.msk.bf16.vlgmr.msra.gmra.mrb[44].mxu0 %vm2430_vm0, %v16520_v10 }
0x1aef   : > { %15547 = vmatprep.mubr.msk.bf16.mxu0 %vm2430_vm0, %v16521_v13 }
0x1af4   : > { %15564 = vmatpush3.bf16.xpose.msra.mxu0 %v8058_v15 }
0x1af5   : > { %15575 = vmatprep.subr.bf16.mxu0 %v17170_v9 }
0x1af6   : > { %15548 = vmatmul.mubr.msk.bf16.gmra.mrb[48].mxu0 %vm2430_vm0, %v16522_v18  ;;  %v7578_v22 = vpop.permute.xlu0 %7577 }
0x1af7   : > { %15565 = vmatprep.mubr.msk.bf16.mxu0 %vm17181_vm12, %v17170_v9 }
0x1afa   : > { %v7583_v23 = vpop.permute.xlu1 %7582  ;;  %v7588_v48 = vpop.permute.xlu0 %7587 }
0x1afe   : > { %15566 = vmatmul.mubr.msk.bf16.vlgmr.msra.gmra.mrb[52].mxu0 %vm8053_vm11, %v16523_v21  ;;  %v7593_v52 = vpop.permute.xlu1 %7592  ;;  %v7598_v38 = vpop.permute.xlu0 %7597 }
0x1aff   : > { %15577 = vmatprep.mubr.msk.bf16.mxu0 %vm17181_vm12, %v17170_v9 }
0x1b02   : > { %v7603_v41 = vpop.permute.xlu1 %7602  ;;  %v7608_v44 = vpop.permute.xlu0 %7607 }
0x1b06   : > { %v7613_v47 = vpop.permute.xlu1 %7612  ;;  %v7749_v58 = vpop.permute.xlu0 %7748 }
0x1b0a   : > { %v7751_v59 = vpop.permute.xlu1 %7750  ;;  %v7753_v63 = vpop.permute.xlu0 %7752 }
0x1b0e   : > { %v7755_v6 = vpop.permute.xlu1 %7754 }
0x1bc1   : > { %v15545_v25 = vpop.f32.mrb[44].mxu0 }
0x1bc2   : > { %v7698_v26 = vadd.f32 %v15545_v25, %v7588_v48  ;;  %v7689_v27 = vpop.f32.mrb[45].mxu0  ;;  %v8046_v48 = vpop.permute.xlu1 %8045 }
0x1bc3   : > { %v7690_v29 = vadd.f32 %v7689_v27, %v7578_v22  ;;  %v15546_v30 = vpop.f32.mrb[46].mxu0  ;;  %v8041_v22 = vpop.permute.xlu0 %8040 }
0x1bc4   : > { %v14376_v31 = vmul.f32 -1.442695, %v7698_v26  ;;  %v7701_v32 = vadd.f32 %v15546_v30, %v7593_v52  ;;  %v7692_v33 = vpop.f32.mrb[47].mxu0 }
0x1bc5   : > { %v14374_v60 = vmul.f32 -1.442695, %v7690_v29  ;;  %v7693_v35 = vadd.f32 %v7692_v33, %v7583_v23 }
0x1bc6   : > { %16790 = vpow2.f32 %v14376_v31  ;;  %v14377_v36 = vmul.f32 -1.442695, %v7701_v32 }
0x1bc7   : > { %16792 = vpow2.f32 %v14374_v60  ;;  %v14375_v37 = vmul.f32 -1.442695, %v7693_v35 }
0x1bc8   : > { %16794 = vpow2.f32 %v14377_v36  ;;  %v16524_v36 = vld [vmem:[%s19584_s17] sm:$0xff]  }
0x1bc9   : > { %16796 = vpow2.f32 %v14375_v37  ;;  %v15549_v39 = vpop.f32.mrb[48].mxu0  ;;  %15555 = vmatprep.mubr.msk.bf16.mxu1 %vm2430_vm0, %v16524_v36 }
0x1bca   : > { %v7705_v40 = vpop.f32.mrb[49].mxu0  ;;  %v7714_v28 = vadd.f32 %v15549_v39, %v7608_v44  ;;  %v8119_v44 = vld [vmem:[%s19585_s2] sm:$0xff] }
0x1bcb   : > { %v15550_v5 = vpop.f32.mrb[50].mxu0  ;;  %v7706_v61 = vadd.f32 %v7705_v40, %v7598_v38 }
0x1bcc   : > { %v7708_v43 = vpop.f32.mrb[51].mxu0  ;;  %v7717_v62 = vadd.f32 %v15550_v5, %v7613_v47  ;;  %v7762_v4 = vsub.f32 %v7714_v28, %v7753_v63 }
0x1bcd   : > { %v7709_v1 = vadd.f32 %v7708_v43, %v7603_v41  ;;  %v7760_v7 = vsub.f32 %v7706_v61, %v7749_v58 }
0x1bce   : > { %v7763_v11 = vsub.f32 %v7717_v62, %v7755_v6 }
0x1bcf   : > { %v7761_v42 = vsub.f32 %v7709_v1, %v7751_v59 }
0x1bd0   : > { %v16791_v45 = vpop.eup %16790 }
0x1bd1   : > { %v16793_v46 = vpop.eup %16792  ;;  %v7734_v14 = vadd.f32 1.0, %v16791_v45  ;;  %v8094_v49 = vpop.f32.mrb[52].mxu0  ;;  %v8120_v45 = vld [vmem:[%s19585_s2 + $0x8] sm:$0xff]  ;;  %s19589_s2 = sld [smem:[#allocation46_spill]] }
0x1bd2   : > { %v16795_v50 = vpop.eup %16794  ;;  %v7732_v51 = vadd.f32 1.0, %v16793_v46  ;;  %v15567_v19 = vpop.f32.mrb[53].mxu0  ;;  %v8095_v23 = vadd.f32 %v8094_v49, %v8041_v22  ;;  %v16526_v49 = vld [vmem:[%s19584_s17 + $0x10] sm:$0xff]  }
0x1bd3   : > { %v16797_v53 = vpop.eup %16796  ;;  %16798 = vrcp.f32 %v7734_v14  ;;  %v7735_v54 = vadd.f32 1.0, %v16795_v50  ;;  %v8097_v55 = vpop.f32.mrb[54].mxu0  ;;  %v16525_v14 = vld [vmem:[%s19584_s17 + $0x8] sm:$0xff]   ;;  %v16528_v19 = vld [vmem:[%s19586_s12] sm:$0xff]   ;;  %s19588_s12 = sld [smem:[#allocation44_spill]] }
0x1bd4   : > { %16800 = vrcp.f32 %v7732_v51  ;;  %v7733_v24 = vadd.f32 1.0, %v16797_v53  ;;  %v15568_v56 = vpop.f32.mrb[55].mxu0  ;;  %v8098_v25 = vadd.f32 %v8097_v55, %v8046_v48  ;;  %v8101_v26 = vmax.f32 %v8095_v23, 0.0  ;;  %v16527_v51 = vld [vmem:[%s19584_s17 + $0x18] sm:$0xff]   ;;  %s19605_s17 = smov 77  }
0x1bd5   : > { %16802 = vrcp.f32 %v7735_v54 }
0x1bd6   : > { %16804 = vrcp.f32 %v7733_v24  ;;  %v8102_v27 = vmax.f32 %v8098_v25, 0.0 }
0x1bd9   : > { %v16529_v23 = vld [vmem:[%s19588_s12] sm:$0xff]   ;;  %s19418_s12 = smov 76  }
0x1bdd   : > { %v16799_v34 = vpop.eup %16798 }
0x1bde   : > { %v16801_v8 = vpop.eup %16800  ;;  %v7766_v10 = vmul.f32 %v16799_v34, %v7762_v4 }
0x1bdf   : > { %v16803_v12 = vpop.eup %16802  ;;  %v7764_v13 = vmul.f32 %v16801_v8, %v7760_v7 }
0x1be0   : > { %v16805_v15 = vpop.eup %16804  ;;  %v7767_v18 = vmul.f32 %v16803_v12, %v7763_v11  ;;  %v8201_v11 = vld [vmem:[%s19587_s6] sm:$0xff] }
0x1be1   : > { %v7765_v21 = vmul.f32 %v16805_v15, %v7761_v42  ;;  %7772 = vrot.lane.b32.xlu0 %v7764_v13, %s19558_s23 }
0x1be3   : > { %7774 = vrot.lane.b32.xlu1 %v7765_v21, %s19558_s23  ;;  %v8202_v21 = vld [vmem:[%s19587_s6 + $0x8] sm:$0xff]  ;;  %s19601_s6 = smov 75  }
0x1be5   : > { %7776 = vrot.lane.b32.xlu0 %v7766_v10, %s19558_s23 }
0x1be7   : > { %7778 = vrot.lane.b32.xlu1 %v7767_v18, %s19558_s23 }
0x1be9   : > { %8105 = vrot.lane.b32.xlu0 %v8101_v26, %s19414_s16 }
0x1beb   : > { %8107 = vrot.lane.b32.xlu1 %v8102_v27, %s19414_s16 }
0x1c53   : > { %v7773_v52 = vpop.permute.xlu0 %7772 }
0x1c54   : > { %v7784_v29 = vadd.f32 %v7773_v52, %v18423_v16 }
0x1c55   : > { %v7775_v30 = vpop.permute.xlu1 %7774 }
0x1c56   : > { %7788 = vst.msk [vmem:[#allocation2] sm:$0xff] %vm2520_vm9, %v7784_v29  ;;  %v7785_v31 = vadd.f32 %v7775_v30, %v18425_v17 }
0x1c57   : > { %v7777_v32 = vpop.permute.xlu0 %7776 }
0x1c58   : > { %7789 = vst.msk [vmem:[#allocation2 + $0x8] sm:$0xff] %vm2520_vm9, %v7785_v31  ;;  %v7786_v33 = vadd.f32 %v7777_v32, %v18431_v20 }
0x1c59   : > { %v7779_v60 = vpop.permute.xlu1 %7778 }
0x1c5a   : > { %7790 = vst.msk [vmem:[#allocation2 + $0x10] sm:$0xff] %vm2520_vm9, %v7786_v33  ;;  %v7787_v35 = vadd.f32 %v7779_v60, %v18433_v57  ;;  %v16530_v60 = vld [vmem:[%s19589_s2 + $0x10] sm:$0xff]  }
0x1c5b   : > { %v8106_v37 = vpop.permute.xlu0 %8105 }
0x1c5c   : > { %7791 = vst.msk [vmem:[#allocation2 + $0x18] sm:$0xff] %vm2520_vm9, %v7787_v35 }
0x1c5d   : > { %8112 = vst.msk [vmem:[#allocation3] sm:$0xff] %vm8111_vm14, %v8106_v37  ;;  %v8108_v16 = vpop.permute.xlu1 %8107  ;;  %v7792_v17 = vld [vmem:[#allocation2] sm:$0xff] }
0x1c5e   : > { %8113 = vst.msk [vmem:[#allocation3 + $0x8] sm:$0xff] %vm8111_vm14, %v8108_v16  ;;  %v8502_v16 = vld [vmem:[%s19590_s3] sm:$0xff] }
0x1c5f   : > { %v7793_v20 = vld [vmem:[#allocation2 + $0x8] sm:$0xff] }
0x1c60   : > { %v7796_v38 = vpack.c.bf16 %v7793_v20, %v7792_v17  ;;  %v8504_v17 = vld [vmem:[%s19590_s3 + $0x10] sm:$0xff]  ;;  %v8503_v20 = vld [vmem:[%s19590_s3 + $0x8] sm:$0xff] }
0x1c61   : > { %v7794_v39 = vld [vmem:[#allocation2 + $0x10] sm:$0xff] }
0x1c62   : > { %7876 = vrot.lane.b32.xlu0 %v7796_v38, %s19565_s8  ;;  %v8505_v38 = vld [vmem:[%s19590_s3 + $0x18] sm:$0xff]  ;;  %s19425_s3 = smov 80  }
0x1c63   : > { %v7795_v57 = vld [vmem:[#allocation2 + $0x18] sm:$0xff] }
0x1c64   : > { %v7797_v40 = vpack.c.bf16 %v7795_v57, %v7794_v39  ;;  %v8114_v41 = vld [vmem:[#allocation3] sm:$0xff]  ;;  %v16531_v57 = vld [vmem:[%s19589_s2 + $0x18] sm:$0xff]  }
0x1c65   : > { %v8115_v5 = vld [vmem:[#allocation3 + $0x8] sm:$0xff] }
0x1c66   : > { %7878 = vrot.lane.b32.xlu1 %v7797_v40, %s19565_s8  ;;  %v8116_v43 = vpack.c.bf16 %v8115_v5, %v8114_v41  ;;  %v16532_v41 = vld [vmem:[%s19589_s2] sm:$0xff]  }
0x1c68   : > { %8137 = vrot.lane.b32.xlu0 %v8116_v43, %s19574_s13  ;;  %v16533_v43 = vld [vmem:[%s19589_s2 + $0x8] sm:$0xff]  }
0x1c6a   : > { %8123 = vperm.xlu1 %16383, %v8119_v44   ;;  %v16534_v44 = vld [vmem:[%s19589_s2 + $0x20] sm:$0xff]  }
0x1c6c   : > { %8128 = vperm.xlu0 %16384, %v8120_v45   ;;  %v16535_v45 = vld [vmem:[%s19589_s2 + $0x28] sm:$0xff]   ;;  %s19593_s2 = sld [smem:[#allocation49_spill]] }
0x1cd4   : > { %v7877_v46 = vpop.permute.xlu0 %7876 }
0x1cd5   : > { %15551 = vmatprep.subr.bf16.mxu1 %v7877_v46 }
0x1cd6   : > { %15552 = vmatpush3.bf16.msra.mxu1 %v7877_v46 }
0x1cd8   : > { %v7879_v47 = vpop.permute.xlu1 %7878 }
0x1cd9   : > { %15553 = vmatprep.subr.bf16.mxu1 %v7879_v47 }
0x1cda   : > { %15554 = vmatpush3.bf16.msra.mxu1 %v7879_v47  ;;  %v8138_v50 = vpop.permute.xlu0 %8137 }
0x1cdb   : > { %15569 = vmatprep.subr.bf16.mxu1 %v17170_v9 }
0x1cdd   : > { %15556 = vmatmul.mubr.msk.bf16.vlgmr.msra.gmra.mrb[48].mxu1 %vm2430_vm0, %v16525_v14 }
0x1cde   : > { %15570 = vmatpush3.bf16.msra.mxu1 %v8138_v50  ;;  %15559 = vmatprep.mubr.msk.bf16.mxu1 %vm2430_vm0, %v16526_v49 }
0x1ce5   : > { %15560 = vmatmul.mubr.msk.bf16.gmra.mrb[52].mxu1 %vm2430_vm0, %v16527_v51 }
0x1ce6   : > { %15571 = vmatprep.mubr.msk.bf16.mxu1 %vm17181_vm12, %v17170_v9 }
0x1ce9   : > { %v8124_v61 = vpop.permute.xlu1 %8123 }
0x1ceb   : > { %v8129_v4 = vpop.permute.xlu0 %8128 }
0x1ced   : > { %15572 = vmatmul.mubr.msk.bf16.vlgmr.msra.gmra.mrb[56].mxu1 %vm2568_vm10, %v16528_v19 }
0x1cee   : > { %15583 = vmatprep.mubr.msk.bf16.mxu1 %vm2568_vm10, %v16530_v60  ;;  %v8793_v60 = vld [vmem:[%s19593_s2 + $0x8] sm:$0xff] }
0x1db0   : > { %v18510_v53 = vpop.f32.mrb[48].mxu1 }
0x1db1   : > { %v18512_v54 = vpop.f32.mrb[49].mxu1 }
0x1db2   : > { %v18514_v55 = vpop.f32.mrb[50].mxu1 }
0x1db3   : > { %v18516_v24 = vpop.f32.mrb[51].mxu1 }
0x1db8   : > { %v18518_v56 = vpop.f32.mrb[52].mxu1 }
0x1db9   : > { %v18520_v58 = vpop.f32.mrb[53].mxu1 }
0x1dba   : > { %v18522_v59 = vpop.f32.mrb[54].mxu1 }
0x1dbb   : > { %v18524_v28 = vpop.f32.mrb[55].mxu1 }
0x1dc0   : > { %v8177_v62 = vpop.f32.mrb[56].mxu1 }
0x1dc1   : > { %v8178_v63 = vadd.f32 %v8177_v62, %v8124_v61  ;;  %v15573_v1 = vpop.f32.mrb[57].mxu1 }
0x1dc2   : > { %v8180_v34 = vpop.f32.mrb[58].mxu1 }
0x1dc3   : > { %v8184_v6 = vmax.f32 %v8178_v63, 0.0  ;;  %v8181_v7 = vadd.f32 %v8180_v34, %v8129_v4  ;;  %v15574_v8 = vpop.f32.mrb[59].mxu1 }
0x1dc5   : > { %v8185_v10 = vmax.f32 %v8181_v7, 0.0  ;;  %8188 = vrot.lane.b32.xlu1 %v8184_v6, %s19414_s16 }
0x1dc7   : > { %8190 = vrot.lane.b32.xlu0 %v8185_v10, %s19414_s16 }
0x1dcb   : > { %8205 = vperm.xlu0 %16384, %v8201_v11  }
0x1e37   : > { %v8189_v12 = vpop.permute.xlu1 %8188 }
0x1e38   : > { %8194 = vst.msk [vmem:[#allocation3] sm:$0xff] %vm8111_vm14, %v8189_v12 }
0x1e39   : > { %v8191_v13 = vpop.permute.xlu0 %8190 }
0x1e3a   : > { %8195 = vst.msk [vmem:[#allocation3 + $0x8] sm:$0xff] %vm8111_vm14, %v8191_v13 }
0x1e3f   : > { %v8196_v42 = vld [vmem:[#allocation3] sm:$0xff] }
0x1e41   : > { %v8197_v15 = vld [vmem:[#allocation3 + $0x8] sm:$0xff] }
0x1e42   : > { %v8198_v18 = vpack.c.bf16 %v8197_v15, %v8196_v42 }
0x1e44   : > { %8219 = vrot.lane.b32.xlu1 %v8198_v18, %s19574_s13 }
0x1e48   : > { %8210 = vperm.xlu1 %16383, %v8202_v21  }
0x1e4a   : > { %v8206_v48 = vpop.permute.xlu0 %8205 }
0x1eb6   : > { %v8220_v22 = vpop.permute.xlu1 %8219 }
0x1eb7   : > { %15576 = vmatpush3.bf16.msra.mxu0 %v8220_v22 }
0x1eba   : > { %15578 = vmatmul.mubr.msk.bf16.vlgmr.msra.gmra.mrb[56].mxu0 %vm2568_vm10, %v16529_v23 }
0x1ec7   : > { %v8211_v52 = vpop.permute.xlu1 %8210 }
0x1f8d   : > { %v8259_v25 = vpop.f32.mrb[56].mxu0 }
0x1f8e   : > { %v8260_v26 = vadd.f32 %v8259_v25, %v8206_v48  ;;  %v15579_v27 = vpop.f32.mrb[57].mxu0 }
0x1f8f   : > { %v8262_v29 = vpop.f32.mrb[58].mxu0 }
0x1f90   : > { %v8263_v30 = vadd.f32 %v8262_v29, %v8211_v52  ;;  %8268 = vrot.lane.b32.xlu0 %v8260_v26, %s19414_s16  ;;  %v15580_v31 = vpop.f32.mrb[59].mxu0 }
0x1f92   : > { %8270 = vrot.lane.b32.xlu1 %v8263_v30, %s19414_s16  ;;  %s19416_s16 = smov 75  }
0x2002   : > { %v8269_v32 = vpop.permute.xlu0 %8268 }
0x2003   : > { %8274 = vst.msk [vmem:[#allocation3] sm:$0xff] %vm8111_vm14, %v8269_v32  ;;  %v8792_v32 = vld [vmem:[%s19593_s2] sm:$0xff] }
0x2004   : > { %v8271_v33 = vpop.permute.xlu1 %8270 }
0x2005   : > { %8275 = vst.msk [vmem:[#allocation3 + $0x8] sm:$0xff] %vm8111_vm14, %v8271_v33  ;;  %v8794_v33 = vld [vmem:[%s19593_s2 + $0x10] sm:$0xff] }
0x200a   : > { %v18541_v35 = vld [vmem:[#allocation3] sm:$0xff] }
0x200c   : > { %v18543_v36 = vld [vmem:[#allocation3 + $0x8] sm:$0xff] }
0x200d   : > { %v8278_v37 = vpack.c.bf16 %v18543_v36, %v18541_v35 }
0x200f   : > { %8367 = vrot.lane.b32.xlu1 %v8278_v37, %s19418_s12  ;;  %8299 = vrot.lane.b32.xlu0 %v8278_v37, %s19416_s16  ;;  %s19591_s16 = sld [smem:[#allocation48_spill]]  ;;  %s19592_s12 = smov 54  }
0x2013   : > { %8508 = vperm.xlu1 %16383, %v8502_v16   ;;  %8440 = vrot.lane.b32.xlu0 %v8278_v37, %s19574_s13 }
0x2015   : > { %v16536_v52 = vld [vmem:[%s19591_s16 + $0x10] sm:$0xff]   ;;  %v16537_v37 = vld [vmem:[%s19591_s16 + $0x18] sm:$0xff]  }
0x2016   : > { %15601 = vmatprep.mubr.msk.bf16.mxu0 %vm2568_vm10, %v16536_v52 }
0x2017   : > { %8518 = vperm.xlu1 %16383, %v8504_v17   ;;  %8513 = vperm.xlu0 %16384, %v8503_v20   ;;  %v16538_v17 = vld [vmem:[%s19591_s16] sm:$0xff]  }
0x201b   : > { %8544 = vrot.lane.b32.xlu1 %v18541_v35, %s19574_s13  ;;  %8523 = vperm.xlu0 %16384, %v8505_v38   ;;  %v16539_v38 = vld [vmem:[%s19591_s16 + $0x8] sm:$0xff]  }
0x201f   : > { %8546 = vrot.lane.b32.xlu0 %v18543_v36, %s19574_s13 }
0x2081   : > { %v8300_v39 = vpop.permute.xlu0 %8299  ;;  %v8368_v40 = vpop.permute.xlu1 %8367 }
0x2082   : > { %15581 = vmatprep.subr.bf16.mxu1 %v8300_v39 }
0x2083   : > { %15582 = vmatpush3.bf16.msra.mxu1 %v8300_v39  ;;  %v16540_v39 = vld [vmem:[%s19591_s16 + $0x20] sm:$0xff]  }
0x2084   : > { %15587 = vmatprep.subr.bf16.mxu1 %v8368_v40 }
0x2085   : > { %v8441_v5 = vpop.permute.xlu0 %8440 }
0x2086   : > { %15584 = vmatmul.mubr.msk.bf16.vlgmr.msra.gmra.mrb[60].mxu1 %vm2568_vm10, %v16531_v57  ;;  %v16541_v57 = vld [vmem:[%s19591_s16 + $0x28] sm:$0xff]   ;;  %s19604_s16 = smov 80  }
0x2087   : > { %15588 = vmatpush3.bf16.msra.mxu1 %v8368_v40  ;;  %15589 = vmatprep.mubr.msk.bf16.mxu1 %vm2568_vm10, %v16532_v41 }
0x2088   : > { %15593 = vmatprep.subr.bf16.mxu1 %v8441_v5 }
0x2092   : > { %15590 = vmatmul.mubr.msk.bf16.vlgmr.msra.gmra.mrb[60].mxu1 %vm2568_vm10, %v16533_v43  ;;  %v8509_v47 = vpop.permute.xlu1 %8508 }
0x2093   : > { %15594 = vmatpush3.bf16.msra.mxu1 %v8441_v5  ;;  %15595 = vmatprep.mubr.msk.bf16.mxu1 %vm2568_vm10, %v16534_v44 }
0x2096   : > { %v8514_v51 = vpop.permute.xlu0 %8513  ;;  %v8519_v7 = vpop.permute.xlu1 %8518 }
0x209a   : > { %v8524_v8 = vpop.permute.xlu0 %8523  ;;  %v8545_v12 = vpop.permute.xlu1 %8544 }
0x209e   : > { %15596 = vmatmul.mubr.msk.bf16.vlgmr.msra.gmra.mrb[60].mxu1 %vm2568_vm10, %v16535_v45  ;;  %v8547_v15 = vpop.permute.xlu0 %8546 }
0x2171   : > { %v15597_v46 = vpop.f32.mrb[60].mxu1 }
0x2172   : > { %v8483_v14 = vpop.f32.mrb[61].mxu1  ;;  %v8528_v10 = vadd.f32 %v15597_v46, %v8519_v7 }
0x2173   : > { %v8526_v49 = vadd.f32 %v8509_v47, %v8483_v14  ;;  %v15598_v50 = vpop.f32.mrb[62].mxu1 }
0x2174   : > { %v8486_v19 = vpop.f32.mrb[63].mxu1  ;;  %v8529_v11 = vadd.f32 %v15598_v50, %v8524_v8  ;;  %v8550_v13 = vsub.f32 %v8528_v10, %v8545_v12 }
0x2175   : > { %v14416_v61 = vmul.f32 -1.442695, %v8526_v49  ;;  %v8527_v62 = vadd.f32 %v8514_v51, %v8486_v19 }
0x2176   : > { %v8551_v18 = vsub.f32 %v8529_v11, %v8547_v15 }
0x2177   : > { %16806 = vpow2.f32 %v14416_v61  ;;  %v14417_v63 = vmul.f32 -1.442695, %v8527_v62 }
0x2179   : > { %16808 = vpow2.f32 %v14417_v63 }
0x2181   : > { %v16807_v1 = vpop.eup %16806 }
0x2182   : > { %v8536_v4 = vadd.f32 1.0, %v16807_v1 }
0x2183   : > { %v16809_v34 = vpop.eup %16808 }
0x2184   : > { %16810 = vrcp.f32 %v8536_v4  ;;  %v8537_v6 = vadd.f32 1.0, %v16809_v34 }
0x2186   : > { %16812 = vrcp.f32 %v8537_v6 }
0x218e   : > { %v16811_v42 = vpop.eup %16810 }
0x218f   : > { %v8552_v21 = vmul.f32 %v16811_v42, %v8550_v13 }
0x2190   : > { %v16813_v22 = vpop.eup %16812 }
0x2191   : > { %8556 = vrot.lane.b32.xlu1 %v8552_v21, %s19592_s12  ;;  %v8553_v23 = vmul.f32 %v16813_v22, %v8551_v18 }
0x2193   : > { %8558 = vrot.lane.b32.xlu0 %v8553_v23, %s19592_s12 }
0x2203   : > { %v8557_v48 = vpop.permute.xlu1 %8556 }
0x2204   : > { %v8562_v25 = vadd.f32 %v8557_v48, %v18541_v35  ;;  %v8795_v35 = vld [vmem:[%s19593_s2 + $0x18] sm:$0xff]  ;;  %s19428_s2 = smov 83  }
0x2205   : > { %v8559_v26 = vpop.permute.xlu0 %8558 }
0x2206   : > { %8564 = vst.msk [vmem:[#allocation3] sm:$0xff] %vm8111_vm14, %v8562_v25  ;;  %v8563_v27 = vadd.f32 %v8559_v26, %v18543_v36 }
0x2208   : > { %8565 = vst.msk [vmem:[#allocation3 + $0x8] sm:$0xff] %vm8111_vm14, %v8563_v27 }
0x220d   : > { %v18576_v29 = vld [vmem:[#allocation3] sm:$0xff] }
0x220f   : > { %v18578_v30 = vld [vmem:[#allocation3 + $0x8] sm:$0xff] }
0x2210   : > { %v8568_v31 = vpack.c.bf16 %v18578_v30, %v18576_v29 }
0x2212   : > { %8657 = vrot.lane.b32.xlu0 %v8568_v31, %s19425_s3  ;;  %8589 = vrot.lane.b32.xlu1 %v8568_v31, %s19423_s5  ;;  %s19594_s5 = sld [smem:[#allocation50_spill]]  ;;  %s19595_s3 = sld [smem:[#allocation51_spill]] }
0x2216   : > { %8798 = vperm.xlu0 %16384, %v8792_v32   ;;  %8730 = vrot.lane.b32.xlu1 %v8568_v31, %s19574_s13 }
0x2218   : > { %v16542_v22 = vld [vmem:[%s19594_s5 + $0x10] sm:$0xff]   ;;  %v9082_v26 = vld [vmem:[%s19595_s3] sm:$0xff]  ;;  %v9083_v52 = vld [vmem:[%s19595_s3 + $0x8] sm:$0xff] }
0x2219   : > { %15619 = vmatprep.mubr.msk.bf16.mxu1 %vm2568_vm10, %v16542_v22  ;;  %v9084_v27 = vld [vmem:[%s19595_s3 + $0x10] sm:$0xff]  ;;  %v16543_v31 = vld [vmem:[%s19594_s5 + $0x18] sm:$0xff]  }
0x221a   : > { %8808 = vperm.xlu0 %16384, %v8794_v33   ;;  %8803 = vperm.xlu1 %16383, %v8793_v60   ;;  %v16544_v33 = vld [vmem:[%s19594_s5] sm:$0xff]  }
0x221e   : > { %8834 = vrot.lane.b32.xlu0 %v18576_v29, %s19574_s13  ;;  %8813 = vperm.xlu1 %16383, %v8795_v35   ;;  %v16545_v35 = vld [vmem:[%s19594_s5 + $0x8] sm:$0xff]  }
0x2222   : > { %8836 = vrot.lane.b32.xlu1 %v18578_v30, %s19574_s13 }
0x2284   : > { %v8590_v36 = vpop.permute.xlu1 %8589  ;;  %v8658_v16 = vpop.permute.xlu0 %8657 }
0x2285   : > { %15599 = vmatprep.subr.bf16.mxu0 %v8590_v36 }
0x2286   : > { %15600 = vmatpush3.bf16.msra.mxu0 %v8590_v36  ;;  %v16546_v36 = vld [vmem:[%s19594_s5 + $0x20] sm:$0xff]  }
0x2287   : > { %15605 = vmatprep.subr.bf16.mxu0 %v8658_v16 }
0x2288   : > { %v8731_v20 = vpop.permute.xlu1 %8730 }
0x2289   : > { %15602 = vmatmul.mubr.msk.bf16.vlgmr.msra.gmra.mrb[60].mxu0 %vm2568_vm10, %v16537_v37  ;;  %v16547_v37 = vld [vmem:[%s19594_s5 + $0x28] sm:$0xff]   ;;  %s19600_s5 = smov 76  }
0x228a   : > { %15606 = vmatpush3.bf16.msra.mxu0 %v8658_v16  ;;  %15607 = vmatprep.mubr.msk.bf16.mxu0 %vm2568_vm10, %v16538_v17 }
0x228b   : > { %15611 = vmatprep.subr.bf16.mxu0 %v8731_v20 }
0x2295   : > { %15608 = vmatmul.mubr.msk.bf16.vlgmr.msra.gmra.mrb[60].mxu0 %vm2568_vm10, %v16539_v38  ;;  %v8799_v41 = vpop.permute.xlu0 %8798 }
0x2296   : > { %15612 = vmatpush3.bf16.msra.mxu0 %v8731_v20  ;;  %15613 = vmatprep.mubr.msk.bf16.mxu0 %vm2568_vm10, %v16540_v39 }
0x2299   : > { %v8804_v45 = vpop.permute.xlu1 %8803  ;;  %v8809_v62 = vpop.permute.xlu0 %8808 }
0x229d   : > { %v8814_v63 = vpop.permute.xlu1 %8813  ;;  %v8835_v34 = vpop.permute.xlu0 %8834 }
0x22a1   : > { %15614 = vmatmul.mubr.msk.bf16.vlgmr.msra.gmra.mrb[60].mxu0 %vm2568_vm10, %v16541_v57  ;;  %v8837_v8 = vpop.permute.xlu1 %8836 }
0x2374   : > { %v15615_v40 = vpop.f32.mrb[60].mxu0 }
0x2375   : > { %v8773_v5 = vpop.f32.mrb[61].mxu0  ;;  %v8818_v1 = vadd.f32 %v15615_v40, %v8809_v62 }
0x2376   : > { %v8816_v43 = vadd.f32 %v8799_v41, %v8773_v5  ;;  %v15616_v44 = vpop.f32.mrb[62].mxu0 }
0x2377   : > { %v8776_v46 = vpop.f32.mrb[63].mxu0  ;;  %v8819_v4 = vadd.f32 %v15616_v44, %v8814_v63  ;;  %v8840_v6 = vsub.f32 %v8818_v1, %v8835_v34 }
0x2378   : > { %v14438_v47 = vmul.f32 -1.442695, %v8816_v43  ;;  %v8817_v14 = vadd.f32 %v8804_v45, %v8776_v46 }
0x2379   : > { %v8841_v10 = vsub.f32 %v8819_v4, %v8837_v8 }
0x237a   : > { %16814 = vpow2.f32 %v14438_v47  ;;  %v14439_v49 = vmul.f32 -1.442695, %v8817_v14 }
0x237c   : > { %16816 = vpow2.f32 %v14439_v49 }
0x2384   : > { %v16815_v50 = vpop.eup %16814 }
0x2385   : > { %v8826_v51 = vadd.f32 1.0, %v16815_v50 }
0x2386   : > { %v16817_v19 = vpop.eup %16816 }
0x2387   : > { %16818 = vrcp.f32 %v8826_v51  ;;  %v8827_v61 = vadd.f32 1.0, %v16817_v19 }
0x2389   : > { %16820 = vrcp.f32 %v8827_v61 }
0x2391   : > { %v16819_v7 = vpop.eup %16818 }
0x2392   : > { %v8842_v11 = vmul.f32 %v16819_v7, %v8840_v6 }
0x2393   : > { %v16821_v12 = vpop.eup %16820 }
0x2394   : > { %8846 = vrot.lane.b32.xlu0 %v8842_v11, %s19592_s12  ;;  %v8843_v13 = vmul.f32 %v16821_v12, %v8841_v10 }
0x2396   : > { %8848 = vrot.lane.b32.xlu1 %v8843_v13, %s19592_s12 }
0x2406   : > { %v8847_v42 = vpop.permute.xlu0 %8846 }
0x2407   : > { %v8852_v15 = vadd.f32 %v8847_v42, %v18576_v29  ;;  %v9085_v29 = vld [vmem:[%s19595_s3 + $0x18] sm:$0xff]  ;;  %s19597_s3 = sld [smem:[#allocation53_spill]] }
0x2408   : > { %v8849_v18 = vpop.permute.xlu1 %8848 }
0x2409   : > { %8854 = vst.msk [vmem:[#allocation3] sm:$0xff] %vm8111_vm14, %v8852_v15  ;;  %v8853_v21 = vadd.f32 %v8849_v18, %v18578_v30 }
0x240b   : > { %8855 = vst.msk [vmem:[#allocation3 + $0x8] sm:$0xff] %vm8111_vm14, %v8853_v21 }
0x240d   : > { %v9370_v18 = vld [vmem:[%s19597_s3 + $0x8] sm:$0xff]  ;;  %v9369_v21 = vld [vmem:[%s19597_s3] sm:$0xff]  ;;  %v9372_v22 = vld [vmem:[%s19597_s3 + $0x18] sm:$0xff] }
0x2410   : > { %v18611_v23 = vld [vmem:[#allocation3] sm:$0xff] }
0x2412   : > { %v18613_v48 = vld [vmem:[#allocation3 + $0x8] sm:$0xff] }
0x2413   : > { %v8858_v25 = vpack.c.bf16 %v18613_v48, %v18611_v23 }
0x2415   : > { %8947 = vrot.lane.b32.xlu1 %v8858_v25, %s19571_s14  ;;  %8879 = vrot.lane.b32.xlu0 %v8858_v25, %s19428_s2  ;;  %s19596_s2 = sld [smem:[#allocation52_spill]] }
0x2419   : > { %9088 = vperm.xlu1 %16383, %v9082_v26   ;;  %9020 = vrot.lane.b32.xlu0 %v8858_v25, %s19574_s13 }
0x241b   : > { %v16548_v12 = vld [vmem:[%s19596_s2 + $0x10] sm:$0xff]   ;;  %v16549_v25 = vld [vmem:[%s19596_s2 + $0x18] sm:$0xff]   ;;  %v16550_v26 = vld [vmem:[%s19596_s2] sm:$0xff]  }
0x241c   : > { %15637 = vmatprep.mubr.msk.bf16.mxu0 %vm2568_vm10, %v16548_v12 }
0x241d   : > { %9098 = vperm.xlu1 %16383, %v9084_v27   ;;  %9093 = vperm.xlu0 %16384, %v9083_v52   ;;  %v16551_v52 = vld [vmem:[%s19596_s2 + $0x8] sm:$0xff]  }
0x2421   : > { %9124 = vrot.lane.b32.xlu1 %v18611_v23, %s19574_s13  ;;  %9103 = vperm.xlu0 %16384, %v9085_v29   ;;  %v16552_v29 = vld [vmem:[%s19596_s2 + $0x20] sm:$0xff]  }
0x2425   : > { %9126 = vrot.lane.b32.xlu0 %v18613_v48, %s19574_s13 }
0x2487   : > { %v8880_v30 = vpop.permute.xlu0 %8879  ;;  %v8948_v32 = vpop.permute.xlu1 %8947 }
0x2488   : > { %15617 = vmatprep.subr.bf16.mxu1 %v8880_v30 }
0x2489   : > { %15618 = vmatpush3.bf16.msra.mxu1 %v8880_v30  ;;  %v16553_v30 = vld [vmem:[%s19596_s2 + $0x28] sm:$0xff]   ;;  %s19598_s2 = sld [smem:[#allocation54_spill]] }
0x248a   : > { %15623 = vmatprep.subr.bf16.mxu1 %v8948_v32 }
0x248b   : > { %v9021_v60 = vpop.permute.xlu0 %9020 }
0x248c   : > { %15620 = vmatmul.mubr.msk.bf16.vlgmr.msra.gmra.mrb[64].mxu1 %vm2568_vm10, %v16543_v31 }
0x248d   : > { %15624 = vmatpush3.bf16.msra.mxu1 %v8948_v32  ;;  %15625 = vmatprep.mubr.msk.bf16.mxu1 %vm2568_vm10, %v16544_v33 }
0x248e   : > { %15629 = vmatprep.subr.bf16.mxu1 %v9021_v60 }
0x2498   : > { %15626 = vmatmul.mubr.msk.bf16.vlgmr.msra.gmra.mrb[64].mxu1 %vm2568_vm10, %v16545_v35  ;;  %v9089_v17 = vpop.permute.xlu1 %9088 }
0x2499   : > { %15630 = vmatpush3.bf16.msra.mxu1 %v9021_v60  ;;  %15631 = vmatprep.mubr.msk.bf16.mxu1 %vm2568_vm10, %v16546_v36 }
0x249c   : > { %v9094_v57 = vpop.permute.xlu0 %9093  ;;  %v9099_v14 = vpop.permute.xlu1 %9098 }
0x24a0   : > { %v9104_v49 = vpop.permute.xlu0 %9103  ;;  %v9125_v19 = vpop.permute.xlu1 %9124 }
0x24a4   : > { %15632 = vmatmul.mubr.msk.bf16.vlgmr.msra.gmra.mrb[64].mxu1 %vm2568_vm10, %v16547_v37  ;;  %v9127_v63 = vpop.permute.xlu0 %9126 }
0x2577   : > { %v15633_v16 = vpop.f32.mrb[64].mxu1 }
0x2578   : > { %v9063_v20 = vpop.f32.mrb[65].mxu1  ;;  %v9108_v50 = vadd.f32 %v15633_v16, %v9099_v14 }
0x2579   : > { %v9106_v38 = vadd.f32 %v9089_v17, %v9063_v20  ;;  %v15634_v39 = vpop.f32.mrb[66].mxu1 }
0x257a   : > { %v9066_v40 = vpop.f32.mrb[67].mxu1  ;;  %v9109_v51 = vadd.f32 %v15634_v39, %v9104_v49  ;;  %v9130_v61 = vsub.f32 %v9108_v50, %v9125_v19 }
0x257b   : > { %v14460_v41 = vmul.f32 -1.442695, %v9106_v38  ;;  %v9107_v5 = vadd.f32 %v9094_v57, %v9066_v40 }
0x257c   : > { %v9131_v1 = vsub.f32 %v9109_v51, %v9127_v63 }
0x257d   : > { %16822 = vpow2.f32 %v14460_v41  ;;  %v14461_v43 = vmul.f32 -1.442695, %v9107_v5 }
0x257f   : > { %16824 = vpow2.f32 %v14461_v43 }
0x2587   : > { %v16823_v44 = vpop.eup %16822 }
0x2588   : > { %v9116_v45 = vadd.f32 1.0, %v16823_v44 }
0x2589   : > { %v16825_v46 = vpop.eup %16824 }
0x258a   : > { %16826 = vrcp.f32 %v9116_v45  ;;  %v9117_v47 = vadd.f32 1.0, %v16825_v46 }
0x258c   : > { %16828 = vrcp.f32 %v9117_v47 }
0x2594   : > { %v16827_v62 = vpop.eup %16826 }
0x2595   : > { %v9132_v4 = vmul.f32 %v16827_v62, %v9130_v61 }
0x2596   : > { %v16829_v34 = vpop.eup %16828 }
0x2597   : > { %9136 = vrot.lane.b32.xlu1 %v9132_v4, %s19592_s12  ;;  %v9133_v6 = vmul.f32 %v16829_v34, %v9131_v1  ;;  %v16554_v4 = vld [vmem:[%s19598_s2 + $0x10] sm:$0xff]  }
0x2598   : > { %15655 = vmatprep.mubr.msk.bf16.mxu1 %vm2568_vm10, %v16554_v4 }
0x2599   : > { %9138 = vrot.lane.b32.xlu0 %v9133_v6, %s19592_s12 }
0x2609   : > { %v9137_v7 = vpop.permute.xlu1 %9136 }
0x260a   : > { %v9142_v8 = vadd.f32 %v9137_v7, %v18611_v23  ;;  %v9371_v23 = vld [vmem:[%s19597_s3 + $0x10] sm:$0xff]  ;;  %s19599_s3 = sld [smem:[#allocation55_spill]] }
0x260b   : > { %v9139_v10 = vpop.permute.xlu0 %9138 }
0x260c   : > { %9144 = vst.msk [vmem:[#allocation3] sm:$0xff] %vm8111_vm14, %v9142_v8  ;;  %v9143_v11 = vadd.f32 %v9139_v10, %v18613_v48 }
0x260e   : > { %9145 = vst.msk [vmem:[#allocation3 + $0x8] sm:$0xff] %vm8111_vm14, %v9143_v11 }
0x2610   : > { %v9659_v8 = vld [vmem:[%s19599_s3] sm:$0xff]  ;;  %v9661_v10 = vld [vmem:[%s19599_s3 + $0x10] sm:$0xff]  ;;  %v9660_v11 = vld [vmem:[%s19599_s3 + $0x8] sm:$0xff] }
0x2611   : > { %v9662_v12 = vld [vmem:[%s19599_s3 + $0x18] sm:$0xff]  ;;  %s19603_s3 = sld [smem:[#allocation57_spill]] }
0x2613   : > { %v18646_v13 = vld [vmem:[#allocation3] sm:$0xff] }
0x2615   : > { %v18648_v42 = vld [vmem:[#allocation3 + $0x8] sm:$0xff] }
0x2616   : > { %v9148_v15 = vpack.c.bf16 %v18648_v42, %v18646_v13 }
0x2617   : > { %v9950_v4 = vld [vmem:[%s19603_s3 + $0x8] sm:$0xff] }
0x2618   : > { %9307 = vrot.lane.b32.xlu0 %v9148_v15, %s19574_s13  ;;  %9169 = vrot.lane.b32.xlu1 %v9148_v15, %s19565_s8 }
0x261c   : > { %9380 = vperm.xlu0 %16384, %v9370_v18   ;;  %9375 = vperm.xlu1 %16383, %v9369_v21   ;;  %v16556_v18 = vld [vmem:[%s19598_s2] sm:$0xff]  }
0x2620   : > { %9390 = vperm.xlu0 %16384, %v9372_v22   ;;  %9385 = vperm.xlu1 %16383, %v9371_v23   ;;  %v16557_v22 = vld [vmem:[%s19598_s2 + $0x8] sm:$0xff]   ;;  %v16558_v23 = vld [vmem:[%s19598_s2 + $0x20] sm:$0xff]  }
0x2624   : > { %9413 = vrot.lane.b32.xlu0 %v18648_v42, %s19574_s13  ;;  %9411 = vrot.lane.b32.xlu1 %v18646_v13, %s19574_s13 }
0x268a   : > { %v9170_v48 = vpop.permute.xlu1 %9169  ;;  %v9308_v27 = vpop.permute.xlu0 %9307 }
0x268b   : > { %15635 = vmatprep.subr.bf16.mxu0 %v9170_v48 }
0x268c   : > { %15636 = vmatpush3.bf16.msra.mxu0 %v9170_v48  ;;  %v16559_v48 = vld [vmem:[%s19598_s2 + $0x28] sm:$0xff]  }
0x268d   : > { %15641 = vmatprep.subr.bf16.mxu0 %v9148_v15 }
0x268f   : > { %15638 = vmatmul.mubr.msk.bf16.vlgmr.msra.gmra.mrb[64].mxu0 %vm2568_vm10, %v16549_v25 }
0x2690   : > { %15642 = vmatpush3.bf16.msra.mxu0 %v9148_v15  ;;  %15643 = vmatprep.mubr.msk.bf16.mxu0 %vm2568_vm10, %v16550_v26 }
0x2691   : > { %15647 = vmatprep.subr.bf16.mxu0 %v9308_v27 }
0x269b   : > { %15644 = vmatmul.mubr.msk.bf16.vlgmr.msra.gmra.mrb[64].mxu0 %vm2568_vm10, %v16551_v52  ;;  %v9376_v32 = vpop.permute.xlu1 %9375  ;;  %v9381_v36 = vpop.permute.xlu0 %9380 }
0x269c   : > { %15648 = vmatpush3.bf16.msra.mxu0 %v9308_v27  ;;  %15649 = vmatprep.mubr.msk.bf16.mxu0 %vm2568_vm10, %v16552_v29 }
0x269f   : > { %v9386_v41 = vpop.permute.xlu1 %9385  ;;  %v9391_v5 = vpop.permute.xlu0 %9390 }
0x26a3   : > { %v9412_v45 = vpop.permute.xlu1 %9411  ;;  %v9414_v14 = vpop.permute.xlu0 %9413 }
0x26a7   : > { %15650 = vmatmul.mubr.msk.bf16.vlgmr.msra.gmra.mrb[64].mxu0 %vm2568_vm10, %v16553_v30 }
0x277a   : > { %v15651_v31 = vpop.f32.mrb[64].mxu0 }
0x277b   : > { %v9350_v33 = vpop.f32.mrb[65].mxu0  ;;  %v9395_v43 = vadd.f32 %v15651_v31, %v9386_v41 }
0x277c   : > { %v9393_v60 = vadd.f32 %v9376_v32, %v9350_v33  ;;  %v15652_v35 = vpop.f32.mrb[66].mxu0 }
0x277d   : > { %v9353_v37 = vpop.f32.mrb[67].mxu0  ;;  %v9396_v44 = vadd.f32 %v15652_v35, %v9391_v5  ;;  %v9417_v46 = vsub.f32 %v9395_v43, %v9412_v45 }
0x277e   : > { %v14482_v16 = vmul.f32 -1.442695, %v9393_v60  ;;  %v9394_v17 = vadd.f32 %v9381_v36, %v9353_v37 }
0x277f   : > { %v9418_v49 = vsub.f32 %v9396_v44, %v9414_v14 }
0x2780   : > { %16830 = vpow2.f32 %v14482_v16  ;;  %v14483_v20 = vmul.f32 -1.442695, %v9394_v17 }
0x2782   : > { %16832 = vpow2.f32 %v14483_v20 }
0x278a   : > { %v16831_v38 = vpop.eup %16830 }
0x278b   : > { %v9403_v39 = vadd.f32 1.0, %v16831_v38 }
0x278c   : > { %v16833_v57 = vpop.eup %16832 }
0x278d   : > { %16834 = vrcp.f32 %v9403_v39  ;;  %v9404_v40 = vadd.f32 1.0, %v16833_v57 }
0x278f   : > { %16836 = vrcp.f32 %v9404_v40 }
0x2797   : > { %v16835_v47 = vpop.eup %16834 }
0x2798   : > { %v9419_v50 = vmul.f32 %v16835_v47, %v9417_v46 }
0x2799   : > { %v16837_v51 = vpop.eup %16836 }
0x279a   : > { %9423 = vrot.lane.b32.xlu1 %v9419_v50, %s19592_s12  ;;  %v9420_v19 = vmul.f32 %v16837_v51, %v9418_v49 }
0x279c   : > { %9425 = vrot.lane.b32.xlu0 %v9420_v19, %s19592_s12 }
0x280c   : > { %v9424_v61 = vpop.permute.xlu1 %9423 }
0x280d   : > { %v9429_v62 = vadd.f32 %v9424_v61, %v18646_v13 }
0x280e   : > { %v9426_v63 = vpop.permute.xlu0 %9425 }
0x280f   : > { %9431 = vst.msk [vmem:[#allocation3] sm:$0xff] %vm8111_vm14, %v9429_v62  ;;  %v9430_v1 = vadd.f32 %v9426_v63, %v18648_v42  ;;  %v16555_v42 = vld [vmem:[%s19598_s2 + $0x18] sm:$0xff]   ;;  %s19602_s2 = sld [smem:[#allocation56_spill]]  ;;  %v9949_v63 = vld [vmem:[%s19603_s3] sm:$0xff] }
0x2811   : > { %9432 = vst.msk [vmem:[#allocation3 + $0x8] sm:$0xff] %vm8111_vm14, %v9430_v1  ;;  %v9951_v1 = vld [vmem:[%s19603_s3 + $0x10] sm:$0xff] }
0x2815   : > { %v16560_v51 = vld [vmem:[%s19602_s2 + $0x10] sm:$0xff]  }
0x2816   : > { %v18680_v34 = vld [vmem:[#allocation3] sm:$0xff]  ;;  %15673 = vmatprep.mubr.msk.bf16.mxu0 %vm2568_vm10, %v16560_v51 }
0x2818   : > { %v18682_v6 = vld [vmem:[#allocation3 + $0x8] sm:$0xff] }
0x2819   : > { %v9435_v7 = vpack.c.bf16 %v18682_v6, %v18680_v34 }
0x281b   : > { %9524 = vrot.lane.b32.xlu0 %v9435_v7, %s19600_s5  ;;  %9456 = vrot.lane.b32.xlu1 %v9435_v7, %s19601_s6 }
0x281f   : > { %9665 = vperm.xlu0 %16384, %v9659_v8   ;;  %9597 = vrot.lane.b32.xlu1 %v9435_v7, %s19574_s13  ;;  %v16561_v7 = vld [vmem:[%s19602_s2 + $0x18] sm:$0xff]  }
0x2823   : > { %9675 = vperm.xlu0 %16384, %v9661_v10   ;;  %9670 = vperm.xlu1 %16383, %v9660_v11   ;;  %v16562_v10 = vld [vmem:[%s19602_s2] sm:$0xff]  }
0x2827   : > { %9701 = vrot.lane.b32.xlu0 %v18680_v34, %s19574_s13  ;;  %9680 = vperm.xlu1 %16383, %v9662_v12   ;;  %v16563_v12 = vld [vmem:[%s19602_s2 + $0x8] sm:$0xff]  }
0x282b   : > { %9703 = vrot.lane.b32.xlu1 %v18682_v6, %s19574_s13 }
0x288d   : > { %v9457_v13 = vpop.permute.xlu1 %9456  ;;  %v9525_v15 = vpop.permute.xlu0 %9524 }
0x288e   : > { %15653 = vmatprep.subr.bf16.mxu1 %v9457_v13 }
0x288f   : > { %15654 = vmatpush3.bf16.msra.mxu1 %v9457_v13  ;;  %v16564_v13 = vld [vmem:[%s19602_s2 + $0x20] sm:$0xff]  }
0x2890   : > { %15659 = vmatprep.subr.bf16.mxu1 %v9525_v15 }
0x2891   : > { %v9598_v21 = vpop.permute.xlu1 %9597 }
0x2892   : > { %15656 = vmatmul.mubr.msk.bf16.vlgmr.msra.gmra.mrb[68].mxu1 %vm2568_vm10, %v16555_v42  ;;  %v16565_v42 = vld [vmem:[%s19602_s2 + $0x28] sm:$0xff]   ;;  %s19606_s2 = sld [smem:[#allocation58_spill]] }
0x2893   : > { %15660 = vmatpush3.bf16.msra.mxu1 %v9525_v15  ;;  %15661 = vmatprep.mubr.msk.bf16.mxu1 %vm2568_vm10, %v16556_v18 }
0x2894   : > { %15665 = vmatprep.subr.bf16.mxu1 %v9598_v21 }
0x289e   : > { %15662 = vmatmul.mubr.msk.bf16.vlgmr.msra.gmra.mrb[68].mxu1 %vm2568_vm10, %v16557_v22  ;;  %v9666_v26 = vpop.permute.xlu0 %9665 }
0x289f   : > { %15666 = vmatpush3.bf16.msra.mxu1 %v9598_v21  ;;  %15667 = vmatprep.mubr.msk.bf16.mxu1 %vm2568_vm10, %v16558_v23 }
0x28a2   : > { %v9671_v30 = vpop.permute.xlu1 %9670  ;;  %v9676_v17 = vpop.permute.xlu0 %9675 }
0x28a6   : > { %v9681_v20 = vpop.permute.xlu1 %9680  ;;  %v9702_v57 = vpop.permute.xlu0 %9701 }
0x28aa   : > { %15668 = vmatmul.mubr.msk.bf16.vlgmr.msra.gmra.mrb[68].mxu1 %vm2568_vm10, %v16559_v48  ;;  %v9704_v5 = vpop.permute.xlu1 %9703 }
0x297d   : > { %v15669_v25 = vpop.f32.mrb[68].mxu1 }
0x297e   : > { %v9640_v27 = vpop.f32.mrb[69].mxu1  ;;  %v9685_v38 = vadd.f32 %v15669_v25, %v9676_v17 }
0x297f   : > { %v9683_v52 = vadd.f32 %v9666_v26, %v9640_v27  ;;  %v15670_v29 = vpop.f32.mrb[70].mxu1 }
0x2980   : > { %v9643_v31 = vpop.f32.mrb[71].mxu1  ;;  %v9686_v39 = vadd.f32 %v15670_v29, %v9681_v20  ;;  %v9707_v40 = vsub.f32 %v9685_v38, %v9702_v57 }
0x2981   : > { %v14504_v32 = vmul.f32 -1.442695, %v9683_v52  ;;  %v9684_v33 = vadd.f32 %v9671_v30, %v9643_v31 }
0x2982   : > { %v9708_v43 = vsub.f32 %v9686_v39, %v9704_v5 }
0x2983   : > { %16838 = vpow2.f32 %v14504_v32  ;;  %v14505_v60 = vmul.f32 -1.442695, %v9684_v33 }
0x2985   : > { %16840 = vpow2.f32 %v14505_v60 }
0x298d   : > { %v16839_v35 = vpop.eup %16838 }
0x298e   : > { %v9693_v36 = vadd.f32 1.0, %v16839_v35 }
0x298f   : > { %v16841_v37 = vpop.eup %16840 }
0x2990   : > { %16842 = vrcp.f32 %v9693_v36  ;;  %v9694_v16 = vadd.f32 1.0, %v16841_v37 }
0x2992   : > { %16844 = vrcp.f32 %v9694_v16 }
0x299a   : > { %v16843_v41 = vpop.eup %16842 }
0x299b   : > { %v9709_v44 = vmul.f32 %v16843_v41, %v9707_v40 }
0x299c   : > { %v16845_v45 = vpop.eup %16844 }
0x299d   : > { %9713 = vrot.lane.b32.xlu0 %v9709_v44, %s19592_s12  ;;  %v9710_v46 = vmul.f32 %v16845_v45, %v9708_v43  ;;  %v16566_v45 = vld [vmem:[%s19606_s2 + $0x10] sm:$0xff]  }
0x299e   : > { %15691 = vmatprep.mubr.msk.bf16.mxu1 %vm2568_vm10, %v16566_v45 }
0x299f   : > { %9715 = vrot.lane.b32.xlu1 %v9710_v46, %s19592_s12 }
0x2a0f   : > { %v9714_v47 = vpop.permute.xlu0 %9713 }
0x2a10   : > { %v9719_v14 = vadd.f32 %v9714_v47, %v18680_v34  ;;  %v9952_v34 = vld [vmem:[%s19603_s3 + $0x18] sm:$0xff]  ;;  %s19607_s3 = sld [smem:[#allocation59_spill]] }
0x2a11   : > { %v9716_v49 = vpop.permute.xlu1 %9715 }
0x2a12   : > { %9721 = vst.msk [vmem:[#allocation3] sm:$0xff] %vm8111_vm14, %v9719_v14  ;;  %v9720_v50 = vadd.f32 %v9716_v49, %v18682_v6 }
0x2a14   : > { %9722 = vst.msk [vmem:[#allocation3 + $0x8] sm:$0xff] %vm8111_vm14, %v9720_v50 }
0x2a16   : > { %v10239_v49 = vld [vmem:[%s19607_s3] sm:$0xff]  ;;  %v10241_v50 = vld [vmem:[%s19607_s3 + $0x10] sm:$0xff]  ;;  %v10240_v51 = vld [vmem:[%s19607_s3 + $0x8] sm:$0xff] }
0x2a19   : > { %v18715_v19 = vld [vmem:[#allocation3] sm:$0xff] }
0x2a1b   : > { %v18717_v61 = vld [vmem:[#allocation3 + $0x8] sm:$0xff] }
0x2a1c   : > { %v9725_v62 = vpack.c.bf16 %v18717_v61, %v18715_v19 }
0x2a1e   : > { %9814 = vrot.lane.b32.xlu1 %v9725_v62, %s19604_s16  ;;  %9746 = vrot.lane.b32.xlu0 %v9725_v62, %s19605_s17 }
0x2a22   : > { %9955 = vperm.xlu1 %16383, %v9949_v63   ;;  %9887 = vrot.lane.b32.xlu0 %v9725_v62, %s19574_s13  ;;  %v16567_v62 = vld [vmem:[%s19606_s2 + $0x18] sm:$0xff]  }
0x2a26   : > { %9965 = vperm.xlu1 %16383, %v9951_v1   ;;  %9960 = vperm.xlu0 %16384, %v9950_v4   ;;  %v16568_v1 = vld [vmem:[%s19606_s2] sm:$0xff]  }
0x2a2a   : > { %9991 = vrot.lane.b32.xlu1 %v18715_v19, %s19574_s13  ;;  %9970 = vperm.xlu0 %16384, %v9952_v34   ;;  %v16569_v34 = vld [vmem:[%s19606_s2 + $0x8] sm:$0xff]  }
0x2a2e   : > { %9993 = vrot.lane.b32.xlu0 %v18717_v61, %s19574_s13 }
0x2a90   : > { %v9747_v6 = vpop.permute.xlu0 %9746  ;;  %v9815_v8 = vpop.permute.xlu1 %9814 }
0x2a91   : > { %15671 = vmatprep.subr.bf16.mxu0 %v9747_v6 }
0x2a92   : > { %15672 = vmatpush3.bf16.msra.mxu0 %v9747_v6  ;;  %v16570_v6 = vld [vmem:[%s19606_s2 + $0x20] sm:$0xff]  }
0x2a93   : > { %15677 = vmatprep.subr.bf16.mxu0 %v9815_v8 }
0x2a94   : > { %v9888_v11 = vpop.permute.xlu0 %9887 }
0x2a95   : > { %15674 = vmatmul.mubr.msk.bf16.vlgmr.msra.gmra.mrb[68].mxu0 %vm2568_vm10, %v16561_v7  ;;  %v16571_v7 = vld [vmem:[%s19606_s2 + $0x28] sm:$0xff]   ;;  %s19609_s2 = sld [smem:[#allocation60_spill]] }
0x2a96   : > { %15678 = vmatpush3.bf16.msra.mxu0 %v9815_v8  ;;  %15679 = vmatprep.mubr.msk.bf16.mxu0 %vm2568_vm10, %v16562_v10 }
0x2a97   : > { %15683 = vmatprep.subr.bf16.mxu0 %v9888_v11 }
0x2aa1   : > { %15680 = vmatmul.mubr.msk.bf16.vlgmr.msra.gmra.mrb[68].mxu0 %vm2568_vm10, %v16563_v12  ;;  %v9956_v18 = vpop.permute.xlu1 %9955 }
0x2aa2   : > { %15684 = vmatpush3.bf16.msra.mxu0 %v9888_v11  ;;  %15685 = vmatprep.mubr.msk.bf16.mxu0 %vm2568_vm10, %v16564_v13 }
0x2aa5   : > { %v9961_v48 = vpop.permute.xlu0 %9960  ;;  %v9966_v33 = vpop.permute.xlu1 %9965 }
0x2aa9   : > { %v9971_v60 = vpop.permute.xlu0 %9970  ;;  %v9992_v37 = vpop.permute.xlu1 %9991 }
0x2aad   : > { %15686 = vmatmul.mubr.msk.bf16.vlgmr.msra.gmra.mrb[68].mxu0 %vm2568_vm10, %v16565_v42  ;;  %v9994_v20 = vpop.permute.xlu0 %9993 }
0x2b80   : > { %v15687_v15 = vpop.f32.mrb[68].mxu0 }
0x2b81   : > { %v9930_v21 = vpop.f32.mrb[69].mxu0  ;;  %v9975_v35 = vadd.f32 %v15687_v15, %v9966_v33 }
0x2b82   : > { %v9973_v22 = vadd.f32 %v9956_v18, %v9930_v21  ;;  %v15688_v23 = vpop.f32.mrb[70].mxu0 }
0x2b83   : > { %v9933_v25 = vpop.f32.mrb[71].mxu0  ;;  %v9976_v36 = vadd.f32 %v15688_v23, %v9971_v60  ;;  %v9997_v16 = vsub.f32 %v9975_v35, %v9992_v37 }
0x2b84   : > { %v14526_v26 = vmul.f32 -1.442695, %v9973_v22  ;;  %v9974_v27 = vadd.f32 %v9961_v48, %v9933_v25 }
0x2b85   : > { %v9998_v38 = vsub.f32 %v9976_v36, %v9994_v20 }
0x2b86   : > { %16846 = vpow2.f32 %v14526_v26  ;;  %v14527_v52 = vmul.f32 -1.442695, %v9974_v27 }
0x2b88   : > { %16848 = vpow2.f32 %v14527_v52 }
0x2b90   : > { %v16847_v29 = vpop.eup %16846 }
0x2b91   : > { %v9983_v30 = vadd.f32 1.0, %v16847_v29 }
0x2b92   : > { %v16849_v31 = vpop.eup %16848 }
0x2b93   : > { %16850 = vrcp.f32 %v9983_v30  ;;  %v9984_v32 = vadd.f32 1.0, %v16849_v31 }
0x2b95   : > { %16852 = vrcp.f32 %v9984_v32 }
0x2b9d   : > { %v16851_v17 = vpop.eup %16850 }
0x2b9e   : > { %v9999_v39 = vmul.f32 %v16851_v17, %v9997_v16 }
0x2b9f   : > { %v16853_v57 = vpop.eup %16852 }
0x2ba0   : > { %10003 = vrot.lane.b32.xlu1 %v9999_v39, %s19592_s12  ;;  %v10000_v40 = vmul.f32 %v16853_v57, %v9998_v38  ;;  %v16572_v57 = vld [vmem:[%s19609_s2 + $0x10] sm:$0xff]  }
0x2ba1   : > { %15709 = vmatprep.mubr.msk.bf16.mxu0 %vm2568_vm10, %v16572_v57 }
0x2ba2   : > { %10005 = vrot.lane.b32.xlu0 %v10000_v40, %s19592_s12 }
0x2c12   : > { %v10004_v41 = vpop.permute.xlu1 %10003 }
0x2c13   : > { %v10009_v5 = vadd.f32 %v10004_v41, %v18715_v19  ;;  %v10242_v19 = vld [vmem:[%s19607_s3 + $0x18] sm:$0xff]  ;;  %s19610_s3 = sld [smem:[#allocation61_spill]] }
0x2c14   : > { %v10006_v43 = vpop.permute.xlu0 %10005 }
0x2c15   : > { %10011 = vst.msk [vmem:[#allocation3] sm:$0xff] %vm8111_vm14, %v10009_v5  ;;  %v10010_v44 = vadd.f32 %v10006_v43, %v18717_v61 }
0x2c17   : > { %10012 = vst.msk [vmem:[#allocation3 + $0x8] sm:$0xff] %vm8111_vm14, %v10010_v44 }
0x2c19   : > { %v10527_v43 = vld [vmem:[%s19610_s3 + $0x8] sm:$0xff]  ;;  %v10526_v44 = vld [vmem:[%s19610_s3] sm:$0xff]  ;;  %v10529_v45 = vld [vmem:[%s19610_s3 + $0x18] sm:$0xff] }
0x2c1c   : > { %v18750_v46 = vld [vmem:[#allocation3] sm:$0xff] }
0x2c1e   : > { %v18752_v47 = vld [vmem:[#allocation3 + $0x8] sm:$0xff] }
0x2c1f   : > { %v10015_v14 = vpack.c.bf16 %v18752_v47, %v18750_v46 }
0x2c21   : > { %10104 = vrot.lane.b32.xlu0 %v10015_v14, %s19571_s14  ;;  %10036 = vrot.lane.b32.xlu1 %v10015_v14, %s19608_s19 }
0x2c25   : > { %10245 = vperm.xlu0 %16384, %v10239_v49   ;;  %10177 = vrot.lane.b32.xlu1 %v10015_v14, %s19574_s13  ;;  %v16573_v14 = vld [vmem:[%s19609_s2 + $0x18] sm:$0xff]   ;;  %v16574_v49 = vld [vmem:[%s19609_s2] sm:$0xff]  }
0x2c29   : > { %10255 = vperm.xlu0 %16384, %v10241_v50   ;;  %10250 = vperm.xlu1 %16383, %v10240_v51   ;;  %v16575_v51 = vld [vmem:[%s19609_s2 + $0x8] sm:$0xff]  }
0x2c2d   : > { %10281 = vrot.lane.b32.xlu0 %v18750_v46, %s19574_s13  ;;  %10260 = vperm.xlu1 %16383, %v10242_v19   ;;  %v16576_v19 = vld [vmem:[%s19609_s2 + $0x20] sm:$0xff]  }
0x2c31   : > { %10283 = vrot.lane.b32.xlu1 %v18752_v47, %s19574_s13 }
0x2c93   : > { %v10037_v61 = vpop.permute.xlu1 %10036  ;;  %v10105_v63 = vpop.permute.xlu0 %10104 }
0x2c94   : > { %15689 = vmatprep.subr.bf16.mxu1 %v10037_v61 }
0x2c95   : > { %15690 = vmatpush3.bf16.msra.mxu1 %v10037_v61  ;;  %v16577_v61 = vld [vmem:[%s19609_s2 + $0x28] sm:$0xff]   ;;  %s19611_s2 = sld [smem:[#allocation62_spill]] }
0x2c96   : > { %15695 = vmatprep.subr.bf16.mxu1 %v10105_v63 }
0x2c97   : > { %v10178_v4 = vpop.permute.xlu1 %10177 }
0x2c98   : > { %15692 = vmatmul.mubr.msk.bf16.vlgmr.msra.gmra.mrb[72].mxu1 %vm2568_vm10, %v16567_v62 }
0x2c99   : > { %15696 = vmatpush3.bf16.msra.mxu1 %v10105_v63  ;;  %15697 = vmatprep.mubr.msk.bf16.mxu1 %vm2568_vm10, %v16568_v1 }
0x2c9a   : > { %15701 = vmatprep.subr.bf16.mxu1 %v10178_v4 }
0x2ca4   : > { %15698 = vmatmul.mubr.msk.bf16.vlgmr.msra.gmra.mrb[72].mxu1 %vm2568_vm10, %v16569_v34  ;;  %v10246_v10 = vpop.permute.xlu0 %10245 }
0x2ca5   : > { %15702 = vmatpush3.bf16.msra.mxu1 %v10178_v4  ;;  %15703 = vmatprep.mubr.msk.bf16.mxu1 %vm2568_vm10, %v16570_v6 }
0x2ca8   : > { %v10251_v42 = vpop.permute.xlu1 %10250  ;;  %v10256_v27 = vpop.permute.xlu0 %10255 }
0x2cac   : > { %v10261_v52 = vpop.permute.xlu1 %10260  ;;  %v10282_v31 = vpop.permute.xlu0 %10281 }
0x2cb0   : > { %15704 = vmatmul.mubr.msk.bf16.vlgmr.msra.gmra.mrb[72].mxu1 %vm2568_vm10, %v16571_v7  ;;  %v10284_v60 = vpop.permute.xlu1 %10283 }
0x2d83   : > { %v15705_v8 = vpop.f32.mrb[72].mxu1 }
0x2d84   : > { %v10220_v11 = vpop.f32.mrb[73].mxu1  ;;  %v10265_v29 = vadd.f32 %v15705_v8, %v10256_v27 }
0x2d85   : > { %v10263_v12 = vadd.f32 %v10246_v10, %v10220_v11  ;;  %v15706_v13 = vpop.f32.mrb[74].mxu1 }
0x2d86   : > { %v10223_v15 = vpop.f32.mrb[75].mxu1  ;;  %v10266_v30 = vadd.f32 %v15706_v13, %v10261_v52  ;;  %v10287_v32 = vsub.f32 %v10265_v29, %v10282_v31 }
0x2d87   : > { %v14548_v18 = vmul.f32 -1.442695, %v10263_v12  ;;  %v10264_v21 = vadd.f32 %v10251_v42, %v10223_v15 }
0x2d88   : > { %v10288_v35 = vsub.f32 %v10266_v30, %v10284_v60 }
0x2d89   : > { %16854 = vpow2.f32 %v14548_v18  ;;  %v14549_v22 = vmul.f32 -1.442695, %v10264_v21 }
0x2d8b   : > { %16856 = vpow2.f32 %v14549_v22 }
0x2d93   : > { %v16855_v23 = vpop.eup %16854 }
0x2d94   : > { %v10273_v48 = vadd.f32 1.0, %v16855_v23 }
0x2d95   : > { %v16857_v25 = vpop.eup %16856 }
0x2d96   : > { %16858 = vrcp.f32 %v10273_v48  ;;  %v10274_v26 = vadd.f32 1.0, %v16857_v25 }
0x2d98   : > { %16860 = vrcp.f32 %v10274_v26 }
0x2da0   : > { %v16859_v33 = vpop.eup %16858 }
0x2da1   : > { %v10289_v36 = vmul.f32 %v16859_v33, %v10287_v32 }
0x2da2   : > { %v16861_v37 = vpop.eup %16860 }
0x2da3   : > { %10293 = vrot.lane.b32.xlu0 %v10289_v36, %s19592_s12  ;;  %v10290_v16 = vmul.f32 %v16861_v37, %v10288_v35  ;;  %v16578_v36 = vld [vmem:[%s19611_s2 + $0x10] sm:$0xff]  }
0x2da4   : > { %15727 = vmatprep.mubr.msk.bf16.mxu1 %vm2568_vm10, %v16578_v36 }
0x2da5   : > { %10295 = vrot.lane.b32.xlu1 %v10290_v16, %s19592_s12 }
0x2e15   : > { %v10294_v17 = vpop.permute.xlu0 %10293 }
0x2e16   : > { %v10299_v20 = vadd.f32 %v10294_v17, %v18750_v46  ;;  %v10528_v46 = vld [vmem:[%s19610_s3 + $0x10] sm:$0xff]  ;;  %s19612_s3 = sld [smem:[#allocation63_spill]] }
0x2e17   : > { %v10296_v38 = vpop.permute.xlu1 %10295 }
0x2e18   : > { %10301 = vst.msk [vmem:[#allocation3] sm:$0xff] %vm8111_vm14, %v10299_v20  ;;  %v10300_v39 = vadd.f32 %v10296_v38, %v18752_v47 }
0x2e1a   : > { %10302 = vst.msk [vmem:[#allocation3 + $0x8] sm:$0xff] %vm8111_vm14, %v10300_v39 }
0x2e1c   : > { %v10816_v20 = vld [vmem:[%s19612_s3] sm:$0xff]  ;;  %v10818_v38 = vld [vmem:[%s19612_s3 + $0x10] sm:$0xff]  ;;  %v10817_v39 = vld [vmem:[%s19612_s3 + $0x8] sm:$0xff] }
0x2e1d   : > { %v10819_v57 = vld [vmem:[%s19612_s3 + $0x18] sm:$0xff]  ;;  %s19614_s3 = sld [smem:[#allocation39_spill]] }
0x2e1f   : > { %v18785_v40 = vld [vmem:[#allocation3] sm:$0xff] }
0x2e21   : > { %v18787_v41 = vld [vmem:[#allocation3 + $0x8] sm:$0xff] }
0x2e22   : > { %v10305_v5 = vpack.c.bf16 %v18787_v41, %v18785_v40 }
0x2e23   : > { %v7810_v36 = vld [vmem:[%s19614_s3 + $0x20] sm:$0xff] }
0x2e24   : > { %10464 = vrot.lane.b32.xlu1 %v10305_v5, %s19574_s13  ;;  %10326 = vrot.lane.b32.xlu0 %v10305_v5, %s19565_s8 }
0x2e28   : > { %10537 = vperm.xlu1 %16383, %v10527_v43   ;;  %10532 = vperm.xlu0 %16384, %v10526_v44   ;;  %v16580_v43 = vld [vmem:[%s19611_s2] sm:$0xff]  }
0x2e2c   : > { %10547 = vperm.xlu1 %16383, %v10529_v45   ;;  %10542 = vperm.xlu0 %16384, %v10528_v46   ;;  %v16581_v45 = vld [vmem:[%s19611_s2 + $0x8] sm:$0xff]   ;;  %v16582_v46 = vld [vmem:[%s19611_s2 + $0x20] sm:$0xff]  }
0x2e30   : > { %10570 = vrot.lane.b32.xlu1 %v18787_v41, %s19574_s13  ;;  %10568 = vrot.lane.b32.xlu0 %v18785_v40, %s19574_s13 }
0x2e96   : > { %v10327_v47 = vpop.permute.xlu0 %10326  ;;  %v10465_v50 = vpop.permute.xlu1 %10464 }
0x2e97   : > { %15707 = vmatprep.subr.bf16.mxu0 %v10327_v47 }
0x2e98   : > { %15708 = vmatpush3.bf16.msra.mxu0 %v10327_v47  ;;  %v16583_v47 = vld [vmem:[%s19611_s2 + $0x28] sm:$0xff]  }
0x2e99   : > { %15713 = vmatprep.subr.bf16.mxu0 %v10305_v5 }
0x2e9b   : > { %15710 = vmatmul.mubr.msk.bf16.vlgmr.msra.gmra.mrb[72].mxu0 %vm2568_vm10, %v16573_v14 }
0x2e9c   : > { %15714 = vmatpush3.bf16.msra.mxu0 %v10305_v5  ;;  %15715 = vmatprep.mubr.msk.bf16.mxu0 %vm2568_vm10, %v16574_v49 }
0x2e9d   : > { %15719 = vmatprep.subr.bf16.mxu0 %v10465_v50 }
0x2ea7   : > { %15716 = vmatmul.mubr.msk.bf16.vlgmr.msra.gmra.mrb[72].mxu0 %vm2568_vm10, %v16575_v51  ;;  %v10533_v63 = vpop.permute.xlu0 %10532  ;;  %v10538_v6 = vpop.permute.xlu1 %10537 }
0x2ea8   : > { %15720 = vmatpush3.bf16.msra.mxu0 %v10465_v50  ;;  %15721 = vmatprep.mubr.msk.bf16.mxu0 %vm2568_vm10, %v16576_v19 }
0x2eab   : > { %v10543_v18 = vpop.permute.xlu0 %10542  ;;  %v10548_v21 = vpop.permute.xlu1 %10547 }
0x2eaf   : > { %v10569_v48 = vpop.permute.xlu0 %10568  ;;  %v10571_v27 = vpop.permute.xlu1 %10570 }
0x2eb3   : > { %15722 = vmatmul.mubr.msk.bf16.vlgmr.msra.gmra.mrb[72].mxu0 %vm2568_vm10, %v16577_v61 }
0x2f86   : > { %v15723_v62 = vpop.f32.mrb[72].mxu0 }
0x2f87   : > { %v10507_v1 = vpop.f32.mrb[73].mxu0  ;;  %v10552_v22 = vadd.f32 %v15723_v62, %v10543_v18 }
0x2f88   : > { %v10550_v4 = vadd.f32 %v10533_v63, %v10507_v1  ;;  %v15724_v34 = vpop.f32.mrb[74].mxu0 }
0x2f89   : > { %v10510_v7 = vpop.f32.mrb[75].mxu0  ;;  %v10553_v23 = vadd.f32 %v15724_v34, %v10548_v21  ;;  %v10574_v25 = vsub.f32 %v10552_v22, %v10569_v48 }
0x2f8a   : > { %v14570_v8 = vmul.f32 -1.442695, %v10550_v4  ;;  %v10551_v10 = vadd.f32 %v10538_v6, %v10510_v7 }
0x2f8b   : > { %v10575_v52 = vsub.f32 %v10553_v23, %v10571_v27 }
0x2f8c   : > { %16862 = vpow2.f32 %v14570_v8  ;;  %v14571_v11 = vmul.f32 -1.442695, %v10551_v10 }
0x2f8e   : > { %16864 = vpow2.f32 %v14571_v11 }
0x2f96   : > { %v16863_v12 = vpop.eup %16862 }
0x2f97   : > { %v10560_v13 = vadd.f32 1.0, %v16863_v12 }
0x2f98   : > { %v16865_v42 = vpop.eup %16864 }
0x2f99   : > { %16866 = vrcp.f32 %v10560_v13  ;;  %v10561_v15 = vadd.f32 1.0, %v16865_v42 }
0x2f9b   : > { %16868 = vrcp.f32 %v10561_v15 }
0x2fa3   : > { %v16867_v26 = vpop.eup %16866 }
0x2fa4   : > { %v10576_v29 = vmul.f32 %v16867_v26, %v10574_v25 }
0x2fa5   : > { %v16869_v30 = vpop.eup %16868 }
0x2fa6   : > { %10580 = vrot.lane.b32.xlu0 %v10576_v29, %s19592_s12  ;;  %v10577_v31 = vmul.f32 %v16869_v30, %v10575_v52 }
0x2fa8   : > { %10582 = vrot.lane.b32.xlu1 %v10577_v31, %s19592_s12 }
0x3018   : > { %v10581_v32 = vpop.permute.xlu0 %10580 }
0x3019   : > { %v10586_v33 = vadd.f32 %v10581_v32, %v18785_v40 }
0x301a   : > { %v10583_v60 = vpop.permute.xlu1 %10582 }
0x301b   : > { %10588 = vst.msk [vmem:[#allocation3] sm:$0xff] %vm8111_vm14, %v10586_v33  ;;  %v10587_v35 = vadd.f32 %v10583_v60, %v18787_v41  ;;  %v16579_v41 = vld [vmem:[%s19611_s2 + $0x18] sm:$0xff]   ;;  %s19613_s2 = sld [smem:[#allocation64_spill]]  ;;  %v7807_v60 = vld [vmem:[%s19614_s3 + $0x8] sm:$0xff] }
0x301d   : > { %10589 = vst.msk [vmem:[#allocation3 + $0x8] sm:$0xff] %vm8111_vm14, %v10587_v35  ;;  %v7806_v35 = vld [vmem:[%s19614_s3] sm:$0xff] }
0x3021   : > { %v16584_v30 = vld [vmem:[%s19613_s2 + $0x10] sm:$0xff]  }
0x3022   : > { %v18819_v37 = vld [vmem:[#allocation3] sm:$0xff]  ;;  %15745 = vmatprep.mubr.msk.bf16.mxu0 %vm2568_vm10, %v16584_v30 }
0x3024   : > { %v18821_v16 = vld [vmem:[#allocation3 + $0x8] sm:$0xff] }
0x3025   : > { %v10592_v17 = vpack.c.bf16 %v18821_v16, %v18819_v37 }
0x3027   : > { %10681 = vrot.lane.b32.xlu1 %v10592_v17, %s19604_s16  ;;  %10613 = vrot.lane.b32.xlu0 %v10592_v17, %s19605_s17 }
0x302b   : > { %10822 = vperm.xlu1 %16383, %v10816_v20   ;;  %10754 = vrot.lane.b32.xlu0 %v10592_v17, %s19574_s13  ;;  %v16961_v17 = vld [vmem:[#allocation2 + $0x8] sm:$0xff] }
0x302f   : > { %10832 = vperm.xlu1 %16383, %v10818_v38   ;;  %10827 = vperm.xlu0 %16384, %v10817_v39   ;;  %v16585_v38 = vld [vmem:[%s19613_s2 + $0x18] sm:$0xff]  }
0x3033   : > { %10858 = vrot.lane.b32.xlu1 %v18819_v37, %s19574_s13  ;;  %10837 = vperm.xlu0 %16384, %v10819_v57   ;;  %v16586_v57 = vld [vmem:[%s19613_s2] sm:$0xff]  }
0x3037   : > { %10860 = vrot.lane.b32.xlu0 %v18821_v16, %s19574_s13 }
0x3099   : > { %v10614_v40 = vpop.permute.xlu0 %10613  ;;  %v10682_v5 = vpop.permute.xlu1 %10681 }
0x309a   : > { %15725 = vmatprep.subr.bf16.mxu1 %v10614_v40 }
0x309b   : > { %15726 = vmatpush3.bf16.msra.mxu1 %v10614_v40  ;;  %v16587_v40 = vld [vmem:[%s19613_s2 + $0x8] sm:$0xff]  }
0x309c   : > { %15731 = vmatprep.subr.bf16.mxu1 %v10682_v5 }
0x309d   : > { %v10755_v44 = vpop.permute.xlu0 %10754 }
0x309e   : > { %15728 = vmatmul.mubr.msk.bf16.vlgmr.msra.gmra.mrb[76].mxu1 %vm2568_vm10, %v16579_v41  ;;  %v16588_v41 = vld [vmem:[%s19613_s2 + $0x20] sm:$0xff]  }
0x309f   : > { %15732 = vmatpush3.bf16.msra.mxu1 %v10682_v5  ;;  %15733 = vmatprep.mubr.msk.bf16.mxu1 %vm2568_vm10, %v16580_v43 }
0x30a0   : > { %15737 = vmatprep.subr.bf16.mxu1 %v10755_v44 }
0x30aa   : > { %15734 = vmatmul.mubr.msk.bf16.vlgmr.msra.gmra.mrb[76].mxu1 %vm2568_vm10, %v16581_v45  ;;  %v10823_v49 = vpop.permute.xlu1 %10822 }
0x30ab   : > { %15738 = vmatpush3.bf16.msra.mxu1 %v10755_v44  ;;  %15739 = vmatprep.mubr.msk.bf16.mxu1 %vm2568_vm10, %v16582_v46 }
0x30ae   : > { %v10828_v61 = vpop.permute.xlu0 %10827  ;;  %v10833_v10 = vpop.permute.xlu1 %10832 }
0x30b2   : > { %v10838_v11 = vpop.permute.xlu0 %10837  ;;  %v10859_v42 = vpop.permute.xlu1 %10858 }
0x30b6   : > { %15740 = vmatmul.mubr.msk.bf16.vlgmr.msra.gmra.mrb[76].mxu1 %vm2568_vm10, %v16583_v47  ;;  %v10861_v21 = vpop.permute.xlu0 %10860 }
0x3189   : > { %v15741_v14 = vpop.f32.mrb[76].mxu1 }
0x318a   : > { %v10797_v50 = vpop.f32.mrb[77].mxu1  ;;  %v10842_v12 = vadd.f32 %v15741_v14, %v10833_v10 }
0x318b   : > { %v10840_v51 = vadd.f32 %v10823_v49, %v10797_v50  ;;  %v15742_v19 = vpop.f32.mrb[78].mxu1  ;;  %v16589_v49 = vld [vmem:[%s19613_s2 + $0x28] sm:$0xff]  }
0x318c   : > { %v10800_v62 = vpop.f32.mrb[79].mxu1  ;;  %v10843_v13 = vadd.f32 %v15742_v19, %v10838_v11  ;;  %v10864_v15 = vsub.f32 %v10842_v12, %v10859_v42  ;;  %v11106_v12 = vld [vmem:[%s19615_s21] sm:$0xff] }
0x318d   : > { %v14592_v63 = vmul.f32 -1.442695, %v10840_v51  ;;  %v10841_v1 = vadd.f32 %v10828_v61, %v10800_v62 }
0x318e   : > { %v10865_v22 = vsub.f32 %v10843_v13, %v10861_v21  ;;  %v11108_v13 = vld [vmem:[%s19615_s21 + $0x10] sm:$0xff] }
0x318f   : > { %16870 = vpow2.f32 %v14592_v63  ;;  %v14593_v4 = vmul.f32 -1.442695, %v10841_v1 }
0x3191   : > { %16872 = vpow2.f32 %v14593_v4 }
0x3199   : > { %v16871_v34 = vpop.eup %16870 }
0x319a   : > { %v10850_v6 = vadd.f32 1.0, %v16871_v34 }
0x319b   : > { %v16873_v7 = vpop.eup %16872 }
0x319c   : > { %16874 = vrcp.f32 %v10850_v6  ;;  %v10851_v8 = vadd.f32 1.0, %v16873_v7 }
0x319e   : > { %16876 = vrcp.f32 %v10851_v8 }
0x31a6   : > { %v16875_v18 = vpop.eup %16874 }
0x31a7   : > { %v10866_v23 = vmul.f32 %v16875_v18, %v10864_v15 }
0x31a8   : > { %v16877_v48 = vpop.eup %16876 }
0x31a9   : > { %10870 = vrot.lane.b32.xlu1 %v10866_v23, %s19592_s12  ;;  %v10867_v25 = vmul.f32 %v16877_v48, %v10865_v22  ;;  %v11107_v23 = vld [vmem:[%s19615_s21 + $0x8] sm:$0xff]  ;;  %v11109_v48 = vld [vmem:[%s19615_s21 + $0x18] sm:$0xff] }
0x31ab   : > { %10872 = vrot.lane.b32.xlu0 %v10867_v25, %s19592_s12  ;;  %v11177_v25 = vand.u32 127, %v2407_v0 }
0x31ad   : > { %vm11178_vm15 = vcmp.eq.s32.totalorder %v17665_v2, %v11177_v25  ;;  %vm11179_vm2 = vcmp.eq.s32.totalorder %v17670_v3, %v11177_v25 }
0x321b   : > { %v10871_v26 = vpop.permute.xlu1 %10870 }
0x321c   : > { %v10876_v27 = vadd.f32 %v10871_v26, %v18819_v37  ;;  %v7811_v37 = vld [vmem:[%s19614_s3 + $0x28] sm:$0xff]  ;;  %v11180_v26 = vsel %vm11178_vm15, 0.25, %v17170_v9 }
0x321d   : > { %v10873_v52 = vpop.permute.xlu0 %10872  ;;  %15765 = vmatprep.mubr.msk.f32.mxu1 %vm2568_vm10, %v11180_v26 }
0x321e   : > { %10878 = vst.msk [vmem:[#allocation3] sm:$0xff] %vm8111_vm14, %v10876_v27  ;;  %v10877_v29 = vadd.f32 %v10873_v52, %v18821_v16  ;;  %v16960_v16 = vld [vmem:[#allocation2] sm:$0xff] }
0x3220   : > { %10879 = vst.msk [vmem:[#allocation3 + $0x8] sm:$0xff] %vm8111_vm14, %v10877_v29 }
0x3225   : > { %v18854_v31 = vld [vmem:[#allocation3] sm:$0xff] }
0x3227   : > { %v18856_v32 = vld [vmem:[#allocation3 + $0x8] sm:$0xff] }
0x3228   : > { %v10882_v33 = vpack.c.bf16 %v18856_v32, %v18854_v31 }
0x322a   : > { %10971 = vrot.lane.b32.xlu0 %v10882_v33, %s19604_s16  ;;  %10903 = vrot.lane.b32.xlu1 %v10882_v33, %s19605_s17 }
0x322e   : > { %7821 = vperm.xlu0 %16384, %v7807_v60   ;;  %7816 = vperm.xlu1 %16383, %v7806_v35  }
0x3232   : > { %7836 = vperm.xlu0 %16384, %v7810_v36   ;;  %11044 = vrot.lane.b32.xlu1 %v10882_v33, %s19574_s13 }
0x3236   : > { %7987 = vrot.lane.b32.xlu0 %v16960_v16, %s19565_s8  ;;  %7841 = vperm.xlu1 %16383, %v7811_v37  }
0x323a   : > { %7989 = vrot.lane.b32.xlu1 %v16961_v17, %s19565_s8 }
0x329c   : > { %v10904_v20 = vpop.permute.xlu1 %10903  ;;  %v10972_v39 = vpop.permute.xlu0 %10971 }
0x329d   : > { %15743 = vmatprep.subr.bf16.mxu0 %v10904_v20 }
0x329e   : > { %15744 = vmatpush3.bf16.msra.mxu0 %v10904_v20 }
0x329f   : > { %15749 = vmatprep.subr.bf16.mxu0 %v10972_v39 }
0x32a1   : > { %15746 = vmatmul.mubr.msk.bf16.vlgmr.msra.gmra.mrb[76].mxu0 %vm2568_vm10, %v16585_v38 }
0x32a2   : > { %15750 = vmatpush3.bf16.msra.mxu0 %v10972_v39  ;;  %15751 = vmatprep.mubr.msk.bf16.mxu0 %vm2568_vm10, %v16586_v57 }
0x32ad   : > { %v7822_v5 = vpop.permute.xlu0 %7821  ;;  %15752 = vmatmul.mubr.msk.bf16.vlgmr.msra.gmra.mrb[76].mxu0 %vm2568_vm10, %v16587_v40  ;;  %v7817_v43 = vpop.permute.xlu1 %7816 }
0x32ae   : > { %v7932_v44 = vadd.f32 %v18516_v24, %v7822_v5  ;;  %v7929_v45 = vadd.f32 %v18512_v54, %v7817_v43  ;;  %15757 = vmatprep.mubr.msk.bf16.mxu0 %vm2568_vm10, %v16588_v41  ;;  %v11181_v43 = vsel %vm11179_vm2, 0.25, %v17170_v9 }
0x32b0   : > { %v14387_v46 = vmul.f32 -1.442695, %v7932_v44  ;;  %v14386_v47 = vmul.f32 -1.442695, %v7929_v45 }
0x32b1   : > { %v11045_v14 = vpop.permute.xlu1 %11044  ;;  %v7837_v54 = vpop.permute.xlu0 %7836 }
0x32b2   : > { %16878 = vpow2.f32 %v14387_v46  ;;  %15755 = vmatprep.subr.bf16.mxu0 %v11045_v14  ;;  %v7945_v4 = vadd.f32 %v18520_v58, %v7837_v54  ;;  %v7808_v54 = vld [vmem:[%s19614_s3 + $0x10] sm:$0xff] }
0x32b3   : > { %16880 = vpow2.f32 %v14386_v47  ;;  %15756 = vmatpush3.bf16.msra.mxu0 %v11045_v14 }
0x32b5   : > { %v7842_v24 = vpop.permute.xlu1 %7841  ;;  %v7988_v63 = vpop.permute.xlu0 %7987 }
0x32b6   : > { %v7948_v1 = vadd.f32 %v18524_v28, %v7842_v24  ;;  %v7999_v7 = vsub.f32 %v7945_v4, %v7988_v63  ;;  %v16962_v63 = vld [vmem:[#allocation2 + $0x10] sm:$0xff] }
0x32b9   : > { %15758 = vmatmul.mubr.msk.bf16.vlgmr.msra.gmra.mrb[76].mxu0 %vm2568_vm10, %v16589_v49  ;;  %v7990_v62 = vpop.permute.xlu1 %7989 }
0x32ba   : > { %v8000_v34 = vsub.f32 %v7948_v1, %v7990_v62  ;;  %v7812_v62 = vld [vmem:[%s19614_s3 + $0x30] sm:$0xff] }
0x32bc   : > { %v16879_v50 = vpop.eup %16878 }
0x32bd   : > { %v16881_v51 = vpop.eup %16880  ;;  %v7972_v19 = vadd.f32 1.0, %v16879_v50 }
0x32be   : > { %v7971_v61 = vadd.f32 1.0, %v16881_v51 }
0x32bf   : > { %16882 = vrcp.f32 %v7972_v19 }
0x32c0   : > { %16884 = vrcp.f32 %v7971_v61 }
0x32c9   : > { %v16883_v6 = vpop.eup %16882 }
0x32ca   : > { %v16885_v8 = vpop.eup %16884  ;;  %v8004_v10 = vmul.f32 %v16883_v6, %v8000_v34 }
0x32cb   : > { %v8003_v11 = vmul.f32 %v16885_v8, %v7999_v7 }
0x32cc   : > { %8013 = vrot.lane.b32.xlu1 %v8004_v10, %s19558_s23 }
0x32cd   : > { %8011 = vrot.lane.b32.xlu0 %v8003_v11, %s19558_s23  ;;  %v7809_v11 = vld [vmem:[%s19614_s3 + $0x18] sm:$0xff] }
0x32d0   : > { %11112 = vperm.xlu1 %16383, %v11106_v12  }
0x32d4   : > { %11122 = vperm.xlu1 %16383, %v11108_v13   ;;  %v7813_v13 = vld [vmem:[%s19614_s3 + $0x38] sm:$0xff] }
0x32d8   : > { %11148 = vrot.lane.b32.xlu1 %v18854_v31, %s19574_s13 }
0x333e   : > { %v8014_v58 = vpop.permute.xlu1 %8013 }
0x333f   : > { %v8012_v28 = vpop.permute.xlu0 %8011  ;;  %v8024_v42 = vadd.f32 %v16961_v17, %v8014_v58 }
0x3340   : > { %v8023_v15 = vadd.f32 %v16960_v16, %v8012_v28  ;;  %v16963_v28 = vld [vmem:[#allocation2 + $0x18] sm:$0xff] }
0x3341   : > { %8028 = vst.msk [vmem:[#allocation2 + $0x8] sm:$0xff] %vm2520_vm9, %v8024_v42 }
0x3342   : > { %8027 = vst.msk [vmem:[#allocation2] sm:$0xff] %vm2520_vm9, %v8023_v15 }
0x3348   : > { %v11171_v18 = vld [vmem:[#allocation2 + $0x8] sm:$0xff] }
0x3349   : > { %v11170_v21 = vld [vmem:[#allocation2] sm:$0xff] }
0x334a   : > { %v16385_v22 = vpack.i.bf16 %v11171_v18, %v11170_v21 }
0x334c   : > { %16386 = vrot.lane.b32.xlu0 %v16385_v22, %s19565_s8 }
0x334f   : > { %v11113_v52 = vpop.permute.xlu1 %11112 }
0x3350   : > { %11117 = vperm.xlu0 %16384, %v11107_v23  }
0x3353   : > { %v11123_v16 = vpop.permute.xlu1 %11122 }
0x3354   : > { %11127 = vperm.xlu0 %16384, %v11109_v48  }
0x3357   : > { %v11149_v0 = vpop.permute.xlu1 %11148 }
0x3358   : > { %11150 = vrot.lane.b32.xlu0 %v18856_v32, %s19574_s13 }
0x338c   : > { %v15759_v27 = vpop.f32.mrb[76].mxu0 }
0x338d   : > { %v11087_v29 = vpop.f32.mrb[77].mxu0  ;;  %v11132_v17 = vadd.f32 %v15759_v27, %v11123_v16 }
0x338e   : > { %v11130_v30 = vadd.f32 %v11113_v52, %v11087_v29  ;;  %v15760_v33 = vpop.f32.mrb[78].mxu0 }
0x338f   : > { %v11090_v60 = vpop.f32.mrb[79].mxu0  ;;  %v11154_v20 = vsub.f32 %v11132_v17, %v11149_v0 }
0x3390   : > { %v14614_v35 = vmul.f32 -1.442695, %v11130_v30 }
0x3392   : > { %16886 = vpow2.f32 %v14614_v35 }
0x339c   : > { %v16887_v36 = vpop.eup %16886 }
0x339d   : > { %v11140_v37 = vadd.f32 1.0, %v16887_v36 }
0x339f   : > { %16888 = vrcp.f32 %v11140_v37 }
0x33a9   : > { %v16889_v38 = vpop.eup %16888 }
0x33aa   : > { %v11156_v39 = vmul.f32 %v16889_v38, %v11154_v20 }
0x33ac   : > { %11160 = vrot.lane.b32.xlu1 %v11156_v39, %s19592_s12 }
0x33be   : > { %v16387_v57 = vpop.permute.xlu0 %16386 }
0x33bf   : > { %v16389_v40 = vunpack.i.h.bf16 %v16387_v57  ;;  %v16388_v41 = vunpack.i.l.bf16 %v16387_v57 }
0x33c1   : > { %v15930_v5 = vpack.c.bf16 %v16389_v40, %v16388_v41 }
0x33c3   : > { %15932 = vmatprep.subr.msk.bf16.mxu1 %vm15931_vm1, %v15930_v5 }
0x33c4   : > { %15935 = vmatpush3.bf16.xpose.msk.msra.mxu1 %vm15931_vm1, %v15930_v5 }
0x33cb   : > { %15766 = vmatmul.mubr.msk.f32.vlgmr.msra.gmra.mrb[80].mxu1 %vm2568_vm10, %v11181_v43 }
0x33cf   : > { %v11118_v44 = vpop.permute.xlu0 %11117 }
0x33d0   : > { %v11131_v45 = vadd.f32 %v11118_v44, %v11090_v60 }
0x33d2   : > { %v14615_v46 = vmul.f32 -1.442695, %v11131_v45 }
0x33d3   : > { %v11128_v49 = vpop.permute.xlu0 %11127 }
0x33d4   : > { %16890 = vpow2.f32 %v14615_v46  ;;  %v11133_v51 = vadd.f32 %v15760_v33, %v11128_v49 }
0x33d7   : > { %v11151_v50 = vpop.permute.xlu0 %11150 }
0x33d8   : > { %v11155_v19 = vsub.f32 %v11133_v51, %v11151_v50 }
0x33de   : > { %v16891_v47 = vpop.eup %16890 }
0x33df   : > { %v11141_v14 = vadd.f32 1.0, %v16891_v47 }
0x33e1   : > { %16892 = vrcp.f32 %v11141_v14 }
0x33eb   : > { %v16893_v61 = vpop.eup %16892 }
0x33ec   : > { %v11157_v24 = vmul.f32 %v16893_v61, %v11155_v19 }
0x33ee   : > { %11162 = vrot.lane.b32.xlu0 %v11157_v24, %s19592_s12 }
0x33f2   : > { %7826 = vperm.xlu0 %16384, %v7808_v54  }
0x33f6   : > { %7846 = vperm.xlu0 %16384, %v7812_v62  }
0x33fa   : > { %7991 = vrot.lane.b32.xlu0 %v16962_v63, %s19565_s8 }
0x341e   : > { %v11161_v1 = vpop.permute.xlu1 %11160 }
0x341f   : > { %v11166_v4 = vadd.f32 %v11161_v1, %v18854_v31 }
0x3421   : > { %11168 = vst.msk [vmem:[#allocation3] sm:$0xff] %vm8111_vm14, %v11166_v4 }
0x3428   : > { %v11174_v34 = vld [vmem:[#allocation3] sm:$0xff] }
0x3429   : > { %11505 = vst.msk [vmem:[#allocation4 + $0x10] sm:$0xff] %vm8111_vm14, %v11174_v34 }
0x3460   : > { %v11163_v6 = vpop.permute.xlu0 %11162 }
0x3461   : > { %v11167_v7 = vadd.f32 %v11163_v6, %v18856_v32 }
0x3463   : > { %11169 = vst.msk [vmem:[#allocation3 + $0x8] sm:$0xff] %vm8111_vm14, %v11167_v7 }
0x346a   : > { %v11175_v8 = vld [vmem:[#allocation3 + $0x8] sm:$0xff] }
0x346b   : > { %11506 = vst.msk [vmem:[#allocation4 + $0x18] sm:$0xff] %vm8111_vm14, %v11175_v8  ;;  %v16390_v10 = vpack.i.bf16 %v11175_v8, %v11174_v34 }
0x346d   : > { %16391 = vrot.lane.b32.xlu1 %v16390_v10, %s19574_s13 }
0x3471   : > { %v7827_v12 = vpop.permute.xlu0 %7826  ;;  %7831 = vperm.xlu1 %16383, %v7809_v11  }
0x3472   : > { %v7937_v31 = vadd.f32 %v18510_v53, %v7827_v12 }
0x3474   : > { %v14388_v58 = vmul.f32 -1.442695, %v7937_v31 }
0x3475   : > { %7851 = vperm.xlu1 %16383, %v7813_v13   ;;  %v7847_v15 = vpop.permute.xlu0 %7846 }
0x3476   : > { %16894 = vpow2.f32 %v14388_v58  ;;  %v7953_v21 = vadd.f32 %v18518_v56, %v7847_v15 }
0x3479   : > { %7993 = vrot.lane.b32.xlu1 %v16963_v28, %s19565_s8  ;;  %v7992_v18 = vpop.permute.xlu0 %7991 }
0x347a   : > { %v8001_v22 = vsub.f32 %v7953_v21, %v7992_v18 }
0x3480   : > { %v16895_v32 = vpop.eup %16894 }
0x3481   : > { %v7973_v42 = vadd.f32 1.0, %v16895_v32 }
0x3483   : > { %16896 = vrcp.f32 %v7973_v42 }
0x348d   : > { %v16897_v23 = vpop.eup %16896 }
0x348e   : > { %v8005_v48 = vmul.f32 %v16897_v23, %v8001_v22 }
0x3490   : > { %8015 = vrot.lane.b32.xlu0 %v8005_v48, %s19558_s23 }
0x349e   : > { %v15767_v53 = vpop.f32.mrb[80].mxu1 }
0x349f   : > { %v11264_v25 = vpop.f32.mrb[81].mxu1 }
0x34a0   : > { %15772 = vmatprep.mubr.msk.f32.mxu0 %vm2568_vm10, %v11264_v25 }
0x34df   : > { %v16392_v26 = vpop.permute.xlu1 %16391 }
0x34e0   : > { %v16394_v27 = vunpack.i.h.bf16 %v16392_v26  ;;  %v16393_v52 = vunpack.i.l.bf16 %v16392_v26 }
0x34e2   : > { %v15936_v29 = vpack.c.bf16 %v16394_v27, %v16393_v52  ;;  %v11510_v52 = vld [vmem:[#allocation4 + $0x18] sm:$0xff] }
0x34e4   : > { %15937 = vmatprep.subr.bf16.mxu0 %v15936_v29 }
0x34e5   : > { %15939 = vmatpush3.bf16.msra.mxu0 %v15936_v29 }
0x34e6   : > { %15782 = vmatprep.subr.bf16.mxu0 %v17170_v9 }
0x34e8   : > { %15773 = vmatmul.mubr.msk.f32.vlgmr.msra.gmra.mrb[2].mxu0 %vm2568_vm10, %v15767_v53 }
0x34e9   : > { %15786 = vmatprep.mubr.msk.bf16.mxu0 %vm17181_vm12, %v17170_v9 }
0x34f0   : > { %v7832_v56 = vpop.permute.xlu1 %7831 }
0x34f1   : > { %v7940_v30 = vadd.f32 %v18514_v55, %v7832_v56  ;;  %v11509_v56 = vld [vmem:[#allocation4 + $0x10] sm:$0xff] }
0x34f3   : > { %v14389_v33 = vmul.f32 -1.442695, %v7940_v30  ;;  %v11512_v30 = vpack.c.bf16 %v11510_v52, %v11509_v56 }
0x34f4   : > { %v7852_v36 = vpop.permute.xlu1 %7851 }
0x34f5   : > { %16898 = vpow2.f32 %v14389_v33  ;;  %v7956_v0 = vadd.f32 %v18522_v59, %v7852_v36  ;;  %v11516_v33 = vld [vmem:[%s19616_s22 + $0x8] sm:$0xff] }
0x34f8   : > { %v7994_v17 = vpop.permute.xlu1 %7993 }
0x34f9   : > { %v8002_v20 = vsub.f32 %v7956_v0, %v7994_v17  ;;  %v11515_v17 = vld [vmem:[%s19616_s22] sm:$0xff] }
0x34ff   : > { %v16899_v60 = vpop.eup %16898 }
0x3500   : > { %v7974_v35 = vadd.f32 1.0, %v16899_v60 }
0x3502   : > { %16900 = vrcp.f32 %v7974_v35  ;;  %v8016_v37 = vpop.permute.xlu0 %8015 }
0x3503   : > { %v8025_v16 = vadd.f32 %v16962_v63, %v8016_v37 }
0x3505   : > { %8029 = vst.msk [vmem:[#allocation2 + $0x10] sm:$0xff] %vm2520_vm9, %v8025_v16 }
0x350c   : > { %v16901_v38 = vpop.eup %16900  ;;  %v11172_v39 = vld [vmem:[#allocation2 + $0x10] sm:$0xff] }
0x350d   : > { %v8006_v57 = vmul.f32 %v16901_v38, %v8002_v20  ;;  %11412 = vrot.lane.b32.xlu0 %v11172_v39, %s19565_s8 }
0x350f   : > { %8017 = vrot.lane.b32.xlu1 %v8006_v57, %s19558_s23  ;;  %s18943_s23 = sand.u32 1, %s17078_s10  }
0x3510   : > { %s19453_s2 = scalar_lea.vmem [#allocation9], %s18943_s23  ;;  %s13904_s3 = sshll.u32 %s18943_s23, 4 }
0x3511   : > { %s18951_s21 = scalar_lea.vmem [#allocation7], %s13904_s3  ;;  %s19617_s3 = sld [smem:[#allocation66_spill]] }
0x3517   : > { %v16590_v38 = vld [vmem:[%s19617_s3] sm:$0xff]   ;;  %s19620_s3 = sld [smem:[#allocation70_spill]] }
0x357f   : > { %v11413_v55 = vpop.permute.xlu0 %11412 }
0x3580   : > { %15779 = vmatprep.mubr.msk.f32.mxu1 %vm2568_vm10, %v11413_v55 }
0x3581   : > { %v8018_v40 = vpop.permute.xlu1 %8017 }
0x3582   : > { %v8026_v41 = vadd.f32 %v16963_v28, %v8018_v40 }
0x3584   : > { %8030 = vst.msk [vmem:[#allocation2 + $0x18] sm:$0xff] %vm2520_vm9, %v8026_v41 }
0x358b   : > { %v11173_v5 = vld [vmem:[#allocation2 + $0x18] sm:$0xff] }
0x358c   : > { %11414 = vrot.lane.b32.xlu1 %v11173_v5, %s19565_s8 }
0x35bb   : > { %v15774_v43 = vpop.f32.mrb[2].mxu0 }
0x35bc   : > { %v11363_v59 = vsel %vm2568_vm10, %v15774_v43, -inf  ;;  %v11353_v44 = vpop.f32.mrb[3].mxu0 }
0x35bd   : > { %v11362_v45 = vsel %vm2568_vm10, %v11353_v44, -inf }
0x35be   : > { %v11364_v46 = vmax.f32 %v11362_v45, %v11363_v59 }
0x35c0   : > { %v11365_v47 = vrot.slane %v11364_v46, 4 }
0x35c2   : > { %v11366_v14 = vmax.f32 %v11364_v46, %v11365_v47 }
0x35c4   : > { %v11367_v49 = vrot.slane %v11366_v14, 2 }
0x35c6   : > { %v11368_v50 = vmax.f32 %v11366_v14, %v11367_v49 }
0x35c8   : > { %v11369_v51 = vrot.slane %v11368_v50, 1 }
0x35ca   : > { %v11370_v19 = vmax.f32 %v11368_v50, %v11369_v51  ;;  %v11820_v50 = vld [vmem:[%s19619_s24] sm:$0xff]  ;;  %v11822_v51 = vld [vmem:[%s19619_s24 + $0x10] sm:$0xff] }
0x35cc   : > { %v11371_v61 = vsub.f32 %v11353_v44, %v11370_v19  ;;  %v11372_v24 = vsub.f32 %v15774_v43, %v11370_v19  ;;  %vm11391_vm3 = vcmp.ge.f32.partialorder %v11353_v44, %v11370_v19  ;;  %vm11392_vm4 = vcmp.ge.f32.partialorder %v15774_v43, %v11370_v19  ;;  %v11821_v19 = vld [vmem:[%s19619_s24 + $0x8] sm:$0xff] }
0x35cd   : > { %v11393_v54 = vsel %vm11391_vm3, %v17665_v2, 16  ;;  %v11394_v62 = vsel %vm11392_vm4, %v17670_v3, 16 }
0x35ce   : > { %v11373_v63 = vmul.f32 1.442695, %v11371_v61  ;;  %v11375_v1 = vmul.f32 1.442695, %v11372_v24  ;;  %v11395_v4 = vsel %vm2568_vm10, %v11393_v54, 2147483647 }
0x35cf   : > { %v11396_v34 = vsel %vm2568_vm10, %v11394_v62, 2147483647  ;;  %v11823_v61 = vld [vmem:[%s19619_s24 + $0x18] sm:$0xff] }
0x35d0   : > { %16902 = vpow2.f32 %v11373_v63  ;;  %vm11397_vm5 = vcmp.lt.s32.totalorder %v11395_v4, %v11396_v34 }
0x35d1   : > { %16904 = vpow2.f32 %v11375_v1  ;;  %v11398_v6 = vsel %vm11397_vm5, %v11395_v4, %v11396_v34 }
0x35d2   : > { %v11399_v7 = vrot.slane %v11398_v6, 4 }
0x35d4   : > { %vm11400_vm6 = vcmp.lt.s32.totalorder %v11398_v6, %v11399_v7 }
0x35d5   : > { %v11401_v8 = vsel %vm11400_vm6, %v11398_v6, %v11399_v7 }
0x35d6   : > { %v11402_v10 = vrot.slane %v11401_v8, 2 }
0x35d8   : > { %vm11403_vm7 = vcmp.lt.s32.totalorder %v11401_v8, %v11402_v10 }
0x35d9   : > { %v11404_v2 = vsel %vm11403_vm7, %v11401_v8, %v11402_v10 }
0x35da   : > { %v16903_v3 = vpop.eup %16902  ;;  %v11405_v11 = vrot.slane %v11404_v2, 1 }
0x35db   : > { %v16905_v12 = vpop.eup %16904  ;;  %v11377_v31 = vsel %vm2568_vm10, %v16903_v3, 0.0 }
0x35dc   : > { %v11378_v13 = vsel %vm2568_vm10, %v16905_v12, 0.0  ;;  %vm11406_vm9 = vcmp.lt.s32.totalorder %v11404_v2, %v11405_v11 }
0x35dd   : > { %v11379_v58 = vadd.f32 %v11378_v13, %v11377_v31  ;;  %v11407_v28 = vsel %vm11406_vm9, %v11404_v2, %v11405_v11 }
0x35de   : > { %11409 = vst.msk [vmem:[%s19453_s2] sm:$0x1] %vm11408_vm8, %v11407_v28  ;;  %s19618_s2 = sld [smem:[#allocation68_spill]] }
0x35df   : > { %v11380_v32 = vrot.slane %v11379_v58, 4 }
0x35e1   : > { %v11381_v42 = vadd.f32 %v11380_v32, %v11379_v58 }
0x35e3   : > { %v11382_v15 = vrot.slane %v11381_v42, 2 }
0x35e4   : > { %v16591_v46 = vld [vmem:[%s19618_s2 + $0x10] sm:$0xff]   ;;  %v16592_v54 = vld [vmem:[%s19618_s2 + $0x18] sm:$0xff]   ;;  %v16593_v63 = vld [vmem:[%s19618_s2] sm:$0xff]  }
0x35e5   : > { %v11383_v18 = vadd.f32 %v11382_v15, %v11381_v42  ;;  %v16594_v4 = vld [vmem:[%s19618_s2 + $0x8] sm:$0xff]   ;;  %v16595_v34 = vld [vmem:[%s19618_s2 + $0x20] sm:$0xff]  }
0x35e6   : > { %v16596_v6 = vld [vmem:[%s19618_s2 + $0x28] sm:$0xff]   ;;  %s19621_s2 = sld [smem:[#allocation71_spill]] }
0x35e7   : > { %v11384_v21 = vrot.slane %v11383_v18, 1 }
0x35e9   : > { %v11385_v22 = vadd.f32 %v11384_v21, %v11383_v18 }
0x35eb   : > { %16906 = vrcp.f32 %v11385_v22 }
0x35f5   : > { %v16907_v23 = vpop.eup %16906 }
0x35f6   : > { %v11387_v48 = vmul.f32 %v16907_v23, %v16903_v3  ;;  %v11388_v53 = vmul.f32 %v16907_v23, %v16905_v12 }
0x35f8   : > { %11389 = vst.msk [vmem:[%s18951_s21] sm:$0xff] %vm2568_vm10, %v11387_v48  ;;  %11390 = vst.msk [vmem:[%s18951_s21 + $0x8] sm:$0xff] %vm2568_vm10, %v11388_v53  ;;  %v15940_v25 = vpack.c.bf16 %v11388_v53, %v11387_v48 }
0x35fa   : > { %15941 = vmatprep.subr.bf16.mxu1 %v15940_v25 }
0x35fb   : > { %15943 = vmatpush3.bf16.msra.mxu1 %v15940_v25 }
0x35fe   : > { %v11415_v26 = vpop.permute.xlu1 %11414 }
0x35ff   : > { %15780 = vmatmul.mubr.msk.f32.vlgmr.msra.gmra.mrb[82].mxu1 %vm2568_vm10, %v11415_v26 }
0x3600   : > { %15792 = vmatprep.mubr.msk.bf16.mxu1 %vm2568_vm10, %v16591_v46 }
0x36d2   : > { %v15781_v27 = vpop.f32.mrb[82].mxu1 }
0x36d3   : > { %11499 = vrot.lane.b32.xlu1 %v15781_v27, %s19592_s12  ;;  %v11486_v29 = vpop.f32.mrb[83].mxu1 }
0x36d4   : > { %11497 = vrot.lane.b32.xlu0 %v11486_v29, %s19592_s12 }
0x36d7   : > { %11536 = vrot.lane.b32.xlu1 %v11512_v30, %s19574_s13 }
0x36db   : > { %11524 = vperm.xlu1 %16383, %v11516_v33  }
0x3745   : > { %v11500_v60 = vpop.permute.xlu1 %11499 }
0x3746   : > { %11504 = vst.msk [vmem:[#allocation4 + $0x8] sm:$0xff] %vm8111_vm14, %v11500_v60  ;;  %v11498_v35 = vpop.permute.xlu0 %11497 }
0x3747   : > { %11503 = vst.msk [vmem:[#allocation4] sm:$0xff] %vm8111_vm14, %v11498_v35 }
0x3749   : > { %v11537_v20 = vpop.permute.xlu1 %11536 }
0x374d   : > { %v11508_v36 = vld [vmem:[#allocation4 + $0x8] sm:$0xff] }
0x374e   : > { %v11507_v37 = vld [vmem:[#allocation4] sm:$0xff] }
0x374f   : > { %v11511_v16 = vpack.c.bf16 %v11508_v36, %v11507_v37  ;;  %v16597_v36 = vld [vmem:[%s19620_s3 + $0x10] sm:$0xff]  }
0x3751   : > { %11534 = vrot.lane.b32.xlu0 %v11511_v16, %s19574_s13 }
0x3755   : > { %11519 = vperm.xlu0 %16384, %v11515_v17  }
0x375a   : > { %v11525_v41 = vpop.permute.xlu1 %11524 }
0x37c3   : > { %v11535_v0 = vpop.permute.xlu0 %11534 }
0x37c4   : > { %15783 = vmatpush3.bf16.msra.mxu0 %v11535_v0  ;;  %v12110_v0 = vld [vmem:[%s19621_s2] sm:$0xff] }
0x37c5   : > { %15784 = vmatprep.subr.bf16.mxu0 %v17170_v9 }
0x37c8   : > { %15785 = vmatpush3.bf16.msra.mxu0 %v11537_v20  ;;  %v12112_v20 = vld [vmem:[%s19621_s2 + $0x10] sm:$0xff] }
0x37cb   : > { %15787 = vmatmul.mubr.msk.bf16.vlgmr.msra.gmra.mrb[80].mxu0 %vm2430_vm0, %v16590_v38  ;;  %v12111_v38 = vld [vmem:[%s19621_s2 + $0x8] sm:$0xff] }
0x37cc   : > { %15810 = vmatprep.mubr.msk.bf16.mxu0 %vm2568_vm10, %v16597_v36 }
0x37d4   : > { %v11520_v39 = vpop.permute.xlu0 %11519 }
0x389e   : > { %v11577_v57 = vpop.f32.mrb[80].mxu0 }
0x389f   : > { %v11578_v55 = vadd.f32 %v11577_v57, %v11520_v39  ;;  %v15788_v40 = vpop.f32.mrb[81].mxu0  ;;  %v12113_v39 = vld [vmem:[%s19621_s2 + $0x18] sm:$0xff]  ;;  %s19627_s2 = sld [smem:[#allocation77_spill]] }
0x38a0   : > { %v11580_v5 = vpop.f32.mrb[82].mxu0 }
0x38a1   : > { %v11581_v43 = vadd.f32 %v11580_v5, %v11525_v41  ;;  %11586 = vrot.lane.b32.xlu0 %v11578_v55, %s19592_s12  ;;  %v15789_v59 = vpop.f32.mrb[83].mxu0  ;;  %v16598_v55 = vld [vmem:[%s19620_s3 + $0x18] sm:$0xff]   ;;  %v16599_v41 = vld [vmem:[%s19620_s3] sm:$0xff]  }
0x38a2   : > { %v16601_v59 = vld [vmem:[%s19620_s3 + $0x20] sm:$0xff]  }
0x38a3   : > { %11588 = vrot.lane.b32.xlu1 %v11581_v43, %s19592_s12  ;;  %v16600_v43 = vld [vmem:[%s19620_s3 + $0x8] sm:$0xff]  }
0x3913   : > { %v11587_v44 = vpop.permute.xlu0 %11586 }
0x3914   : > { %11592 = vst.msk [vmem:[#allocation4] sm:$0xff] %vm8111_vm14, %v11587_v44  ;;  %v16602_v44 = vld [vmem:[%s19620_s3 + $0x28] sm:$0xff]   ;;  %s19629_s3 = sld [smem:[#allocation79_spill]] }
0x3915   : > { %v11589_v45 = vpop.permute.xlu1 %11588 }
0x3916   : > { %11593 = vst.msk [vmem:[#allocation4 + $0x8] sm:$0xff] %vm8111_vm14, %v11589_v45 }
0x391b   : > { %v18975_v47 = vld [vmem:[#allocation4] sm:$0xff] }
0x391d   : > { %v18977_v14 = vld [vmem:[#allocation4 + $0x8] sm:$0xff] }
0x391e   : > { %v11596_v49 = vpack.c.bf16 %v18977_v14, %v18975_v47 }
0x3920   : > { %11685 = vrot.lane.b32.xlu1 %v11596_v49, %s19600_s5  ;;  %11617 = vrot.lane.b32.xlu0 %v11596_v49, %s19601_s6 }
0x3924   : > { %11826 = vperm.xlu1 %16383, %v11820_v50   ;;  %11758 = vrot.lane.b32.xlu0 %v11596_v49, %s19574_s13 }
0x3928   : > { %11836 = vperm.xlu1 %16383, %v11822_v51   ;;  %11831 = vperm.xlu0 %16384, %v11821_v19  }
0x392c   : > { %11862 = vrot.lane.b32.xlu1 %v18975_v47, %s19574_s13  ;;  %11841 = vperm.xlu0 %16384, %v11823_v61  }
0x3930   : > { %11864 = vrot.lane.b32.xlu0 %v18977_v14, %s19574_s13 }
0x3992   : > { %v11618_v24 = vpop.permute.xlu0 %11617  ;;  %v11686_v62 = vpop.permute.xlu1 %11685 }
0x3993   : > { %15790 = vmatprep.subr.bf16.mxu1 %v11618_v24 }
0x3994   : > { %15791 = vmatpush3.bf16.msra.mxu1 %v11618_v24 }
0x3995   : > { %15796 = vmatprep.subr.bf16.mxu1 %v11686_v62 }
0x3996   : > { %v11759_v1 = vpop.permute.xlu0 %11758 }
0x3997   : > { %15793 = vmatmul.mubr.msk.bf16.vlgmr.msra.gmra.mrb[84].mxu1 %vm2568_vm10, %v16592_v54 }
0x3998   : > { %15797 = vmatpush3.bf16.msra.mxu1 %v11686_v62  ;;  %15798 = vmatprep.mubr.msk.bf16.mxu1 %vm2568_vm10, %v16593_v63 }
0x3999   : > { %15802 = vmatprep.subr.bf16.mxu1 %v11759_v1 }
0x39a3   : > { %15799 = vmatmul.mubr.msk.bf16.vlgmr.msra.gmra.mrb[84].mxu1 %vm2568_vm10, %v16594_v4  ;;  %v11827_v8 = vpop.permute.xlu1 %11826 }
0x39a4   : > { %15803 = vmatpush3.bf16.msra.mxu1 %v11759_v1  ;;  %15804 = vmatprep.mubr.msk.bf16.mxu1 %vm2568_vm10, %v16595_v34 }
0x39a7   : > { %v11832_v11 = vpop.permute.xlu0 %11831  ;;  %v11837_v18 = vpop.permute.xlu1 %11836 }
0x39ab   : > { %v11842_v21 = vpop.permute.xlu0 %11841  ;;  %v11863_v48 = vpop.permute.xlu1 %11862 }
0x39af   : > { %15805 = vmatmul.mubr.msk.bf16.vlgmr.msra.gmra.mrb[84].mxu1 %vm2568_vm10, %v16596_v6  ;;  %v11865_v26 = vpop.permute.xlu0 %11864 }
0x3a82   : > { %v15806_v7 = vpop.f32.mrb[84].mxu1 }
0x3a83   : > { %v11801_v10 = vpop.f32.mrb[85].mxu1  ;;  %v11846_v22 = vadd.f32 %v15806_v7, %v11837_v18 }
0x3a84   : > { %v11844_v2 = vadd.f32 %v11827_v8, %v11801_v10  ;;  %v15807_v3 = vpop.f32.mrb[86].mxu1 }
0x3a85   : > { %v11804_v12 = vpop.f32.mrb[87].mxu1  ;;  %v11847_v23 = vadd.f32 %v15807_v3, %v11842_v21  ;;  %v11868_v53 = vsub.f32 %v11846_v22, %v11863_v48 }
0x3a86   : > { %v14646_v31 = vmul.f32 -1.442695, %v11844_v2  ;;  %v11845_v13 = vadd.f32 %v11832_v11, %v11804_v12 }
0x3a87   : > { %v11869_v27 = vsub.f32 %v11847_v23, %v11865_v26 }
0x3a88   : > { %16908 = vpow2.f32 %v14646_v31  ;;  %v14647_v58 = vmul.f32 -1.442695, %v11845_v13 }
0x3a8a   : > { %16910 = vpow2.f32 %v14647_v58 }
0x3a92   : > { %v16909_v28 = vpop.eup %16908 }
0x3a93   : > { %v11854_v32 = vadd.f32 1.0, %v16909_v28 }
0x3a94   : > { %v16911_v42 = vpop.eup %16910 }
0x3a95   : > { %16912 = vrcp.f32 %v11854_v32  ;;  %v11855_v15 = vadd.f32 1.0, %v16911_v42 }
0x3a97   : > { %16914 = vrcp.f32 %v11855_v15 }
0x3a9f   : > { %v16913_v25 = vpop.eup %16912 }
0x3aa0   : > { %v11870_v52 = vmul.f32 %v16913_v25, %v11868_v53 }
0x3aa1   : > { %v16915_v29 = vpop.eup %16914 }
0x3aa2   : > { %11874 = vrot.lane.b32.xlu1 %v11870_v52, %s19592_s12  ;;  %v11871_v56 = vmul.f32 %v16915_v29, %v11869_v27 }
0x3aa4   : > { %11876 = vrot.lane.b32.xlu0 %v11871_v56, %s19592_s12 }
0x3b14   : > { %v11875_v30 = vpop.permute.xlu1 %11874 }
0x3b15   : > { %v11880_v33 = vadd.f32 %v11875_v30, %v18975_v47 }
0x3b16   : > { %v11877_v60 = vpop.permute.xlu0 %11876 }
0x3b17   : > { %11882 = vst.msk [vmem:[#allocation4] sm:$0xff] %vm8111_vm14, %v11880_v33  ;;  %v11881_v35 = vadd.f32 %v11877_v60, %v18977_v14 }
0x3b19   : > { %11883 = vst.msk [vmem:[#allocation4 + $0x8] sm:$0xff] %vm8111_vm14, %v11881_v35 }
0x3b1e   : > { %v19010_v37 = vld [vmem:[#allocation4] sm:$0xff] }
0x3b20   : > { %v19012_v16 = vld [vmem:[#allocation4 + $0x8] sm:$0xff] }
0x3b21   : > { %v11886_v17 = vpack.c.bf16 %v19012_v16, %v19010_v37 }
0x3b23   : > { %11975 = vrot.lane.b32.xlu0 %v11886_v17, %s19604_s16  ;;  %11907 = vrot.lane.b32.xlu1 %v11886_v17, %s19605_s17  ;;  %s19622_s17 = sld [smem:[#allocation72_spill]]  ;;  %s19623_s16 = sld [smem:[#allocation73_spill]] }
0x3b27   : > { %12116 = vperm.xlu0 %16384, %v12110_v0   ;;  %12048 = vrot.lane.b32.xlu1 %v11886_v17, %s19574_s13 }
0x3b29   : > { %v16603_v15 = vld [vmem:[%s19622_s17 + $0x10] sm:$0xff]   ;;  %v12400_v23 = vld [vmem:[%s19623_s16] sm:$0xff]  ;;  %v12401_v53 = vld [vmem:[%s19623_s16 + $0x8] sm:$0xff] }
0x3b2a   : > { %15828 = vmatprep.mubr.msk.bf16.mxu1 %vm2568_vm10, %v16603_v15  ;;  %v12402_v48 = vld [vmem:[%s19623_s16 + $0x10] sm:$0xff]  ;;  %v12403_v25 = vld [vmem:[%s19623_s16 + $0x18] sm:$0xff]  ;;  %v16605_v29 = vld [vmem:[%s19622_s17] sm:$0xff]  }
0x3b2b   : > { %12126 = vperm.xlu0 %16384, %v12112_v20   ;;  %12121 = vperm.xlu1 %16383, %v12111_v38   ;;  %v16604_v27 = vld [vmem:[%s19622_s17 + $0x18] sm:$0xff]   ;;  %v16606_v30 = vld [vmem:[%s19622_s17 + $0x8] sm:$0xff]   ;;  %v16607_v33 = vld [vmem:[%s19622_s17 + $0x20] sm:$0xff]  }
0x3b2c   : > { %v16608_v60 = vld [vmem:[%s19622_s17 + $0x28] sm:$0xff]  }
0x3b2f   : > { %12152 = vrot.lane.b32.xlu0 %v19010_v37, %s19574_s13  ;;  %12131 = vperm.xlu1 %16383, %v12113_v39  }
0x3b33   : > { %12154 = vrot.lane.b32.xlu1 %v19012_v16, %s19574_s13 }
0x3b95   : > { %v11908_v57 = vpop.permute.xlu1 %11907  ;;  %v11976_v40 = vpop.permute.xlu0 %11975 }
0x3b96   : > { %15808 = vmatprep.subr.bf16.mxu0 %v11908_v57 }
0x3b97   : > { %15809 = vmatpush3.bf16.msra.mxu0 %v11908_v57 }
0x3b98   : > { %15814 = vmatprep.subr.bf16.mxu0 %v11976_v40 }
0x3b99   : > { %v12049_v5 = vpop.permute.xlu1 %12048 }
0x3b9a   : > { %15811 = vmatmul.mubr.msk.bf16.vlgmr.msra.gmra.mrb[84].mxu0 %vm2568_vm10, %v16598_v55 }
0x3b9b   : > { %15815 = vmatpush3.bf16.msra.mxu0 %v11976_v40  ;;  %15816 = vmatprep.mubr.msk.bf16.mxu0 %vm2568_vm10, %v16599_v41 }
0x3b9c   : > { %15820 = vmatprep.subr.bf16.mxu0 %v12049_v5 }
0x3ba6   : > { %15817 = vmatmul.mubr.msk.bf16.vlgmr.msra.gmra.mrb[84].mxu0 %vm2568_vm10, %v16600_v43  ;;  %v12117_v46 = vpop.permute.xlu0 %12116 }
0x3ba7   : > { %15821 = vmatpush3.bf16.msra.mxu0 %v12049_v5  ;;  %15822 = vmatprep.mubr.msk.bf16.mxu0 %vm2568_vm10, %v16601_v59 }
0x3baa   : > { %v12122_v50 = vpop.permute.xlu1 %12121  ;;  %v12127_v4 = vpop.permute.xlu0 %12126 }
0x3bae   : > { %v12132_v34 = vpop.permute.xlu1 %12131  ;;  %v12153_v8 = vpop.permute.xlu0 %12152 }
0x3bb2   : > { %15823 = vmatmul.mubr.msk.bf16.vlgmr.msra.gmra.mrb[84].mxu0 %vm2568_vm10, %v16602_v44  ;;  %v12155_v3 = vpop.permute.xlu1 %12154 }
0x3c85   : > { %v15824_v45 = vpop.f32.mrb[84].mxu0 }
0x3c86   : > { %v12091_v47 = vpop.f32.mrb[85].mxu0  ;;  %v12136_v6 = vadd.f32 %v15824_v45, %v12127_v4 }
0x3c87   : > { %v12134_v14 = vadd.f32 %v12117_v46, %v12091_v47  ;;  %v15825_v49 = vpop.f32.mrb[86].mxu0 }
0x3c88   : > { %v12094_v51 = vpop.f32.mrb[87].mxu0  ;;  %v12137_v7 = vadd.f32 %v15825_v49, %v12132_v34  ;;  %v12158_v10 = vsub.f32 %v12136_v6, %v12153_v8 }
0x3c89   : > { %v14668_v19 = vmul.f32 -1.442695, %v12134_v14  ;;  %v12135_v61 = vadd.f32 %v12122_v50, %v12094_v51 }
0x3c8a   : > { %v12159_v11 = vsub.f32 %v12137_v7, %v12155_v3 }
0x3c8b   : > { %16916 = vpow2.f32 %v14668_v19  ;;  %v14669_v24 = vmul.f32 -1.442695, %v12135_v61 }
0x3c8d   : > { %16918 = vpow2.f32 %v14669_v24 }
0x3c95   : > { %v16917_v54 = vpop.eup %16916 }
0x3c96   : > { %v12144_v62 = vadd.f32 1.0, %v16917_v54 }
0x3c97   : > { %v16919_v63 = vpop.eup %16918 }
0x3c98   : > { %16920 = vrcp.f32 %v12144_v62  ;;  %v12145_v1 = vadd.f32 1.0, %v16919_v63 }
0x3c9a   : > { %16922 = vrcp.f32 %v12145_v1 }
0x3ca2   : > { %v16921_v2 = vpop.eup %16920 }
0x3ca3   : > { %v12160_v12 = vmul.f32 %v16921_v2, %v12158_v10 }
0x3ca4   : > { %v16923_v31 = vpop.eup %16922 }
0x3ca5   : > { %12164 = vrot.lane.b32.xlu0 %v12160_v12, %s19592_s12  ;;  %v12161_v13 = vmul.f32 %v16923_v31, %v12159_v11 }
0x3ca7   : > { %12166 = vrot.lane.b32.xlu1 %v12161_v13, %s19592_s12 }
0x3d17   : > { %v12165_v58 = vpop.permute.xlu0 %12164 }
0x3d18   : > { %v12170_v28 = vadd.f32 %v12165_v58, %v19010_v37 }
0x3d19   : > { %v12167_v32 = vpop.permute.xlu1 %12166 }
0x3d1a   : > { %12172 = vst.msk [vmem:[#allocation4] sm:$0xff] %vm8111_vm14, %v12170_v28  ;;  %v12171_v42 = vadd.f32 %v12167_v32, %v19012_v16 }
0x3d1c   : > { %12173 = vst.msk [vmem:[#allocation4 + $0x8] sm:$0xff] %vm8111_vm14, %v12171_v42 }
0x3d21   : > { %v19045_v18 = vld [vmem:[#allocation4] sm:$0xff] }
0x3d23   : > { %v19047_v21 = vld [vmem:[#allocation4 + $0x8] sm:$0xff] }
0x3d24   : > { %v12176_v22 = vpack.c.bf16 %v19047_v21, %v19045_v18 }
0x3d26   : > { %12265 = vrot.lane.b32.xlu1 %v12176_v22, %s19571_s14  ;;  %12197 = vrot.lane.b32.xlu0 %v12176_v22, %s19608_s19  ;;  %s19624_s14 = sld [smem:[#allocation74_spill]]  ;;  %s19625_s19 = sld [smem:[#allocation75_spill]] }
0x3d2a   : > { %12406 = vperm.xlu1 %16383, %v12400_v23   ;;  %12338 = vrot.lane.b32.xlu0 %v12176_v22, %s19574_s13 }
0x3d2c   : > { %v16609_v1 = vld [vmem:[%s19624_s14 + $0x10] sm:$0xff]   ;;  %v12688_v7 = vld [vmem:[%s19625_s19 + $0x8] sm:$0xff]  ;;  %v12687_v8 = vld [vmem:[%s19625_s19] sm:$0xff] }
0x3d2d   : > { %15846 = vmatprep.mubr.msk.bf16.mxu0 %vm2568_vm10, %v16609_v1  ;;  %v12690_v10 = vld [vmem:[%s19625_s19 + $0x18] sm:$0xff]  ;;  %v12689_v2 = vld [vmem:[%s19625_s19 + $0x10] sm:$0xff]  ;;  %v16611_v12 = vld [vmem:[%s19624_s14] sm:$0xff]  }
0x3d2e   : > { %12416 = vperm.xlu1 %16383, %v12402_v48   ;;  %12411 = vperm.xlu0 %16384, %v12401_v53   ;;  %v16610_v11 = vld [vmem:[%s19624_s14 + $0x18] sm:$0xff]   ;;  %v16612_v13 = vld [vmem:[%s19624_s14 + $0x8] sm:$0xff]   ;;  %v16613_v58 = vld [vmem:[%s19624_s14 + $0x20] sm:$0xff]  }
0x3d2f   : > { %v16614_v28 = vld [vmem:[%s19624_s14 + $0x28] sm:$0xff]  }
0x3d32   : > { %12442 = vrot.lane.b32.xlu1 %v19045_v18, %s19574_s13  ;;  %12421 = vperm.xlu0 %16384, %v12403_v25  }
0x3d36   : > { %12444 = vrot.lane.b32.xlu0 %v19047_v21, %s19574_s13 }
0x3d98   : > { %v12198_v26 = vpop.permute.xlu0 %12197  ;;  %v12266_v52 = vpop.permute.xlu1 %12265 }
0x3d99   : > { %15826 = vmatprep.subr.bf16.mxu1 %v12198_v26 }
0x3d9a   : > { %15827 = vmatpush3.bf16.msra.mxu1 %v12198_v26 }
0x3d9b   : > { %15832 = vmatprep.subr.bf16.mxu1 %v12266_v52 }
0x3d9c   : > { %v12339_v56 = vpop.permute.xlu0 %12338 }
0x3d9d   : > { %15829 = vmatmul.mubr.msk.bf16.vlgmr.msra.gmra.mrb[88].mxu1 %vm2568_vm10, %v16604_v27 }
0x3d9e   : > { %15833 = vmatpush3.bf16.msra.mxu1 %v12266_v52  ;;  %15834 = vmatprep.mubr.msk.bf16.mxu1 %vm2568_vm10, %v16605_v29 }
0x3d9f   : > { %15838 = vmatprep.subr.bf16.mxu1 %v12339_v56 }
0x3da9   : > { %15835 = vmatmul.mubr.msk.bf16.vlgmr.msra.gmra.mrb[88].mxu1 %vm2568_vm10, %v16606_v30  ;;  %v12407_v36 = vpop.permute.xlu1 %12406 }
0x3daa   : > { %15839 = vmatpush3.bf16.msra.mxu1 %v12339_v56  ;;  %15840 = vmatprep.mubr.msk.bf16.mxu1 %vm2568_vm10, %v16607_v33 }
0x3dad   : > { %v12412_v0 = vpop.permute.xlu0 %12411  ;;  %v12417_v43 = vpop.permute.xlu1 %12416 }
0x3db1   : > { %v12422_v59 = vpop.permute.xlu0 %12421  ;;  %v12443_v46 = vpop.permute.xlu1 %12442 }
0x3db5   : > { %15841 = vmatmul.mubr.msk.bf16.vlgmr.msra.gmra.mrb[88].mxu1 %vm2568_vm10, %v16608_v60  ;;  %v12445_v49 = vpop.permute.xlu0 %12444 }
0x3e88   : > { %v15842_v35 = vpop.f32.mrb[88].mxu1 }
0x3e89   : > { %v12381_v37 = vpop.f32.mrb[89].mxu1  ;;  %v12426_v44 = vadd.f32 %v15842_v35, %v12417_v43 }
0x3e8a   : > { %v12424_v16 = vadd.f32 %v12407_v36, %v12381_v37  ;;  %v15843_v17 = vpop.f32.mrb[90].mxu1 }
0x3e8b   : > { %v12384_v20 = vpop.f32.mrb[91].mxu1  ;;  %v12427_v45 = vadd.f32 %v15843_v17, %v12422_v59  ;;  %v12448_v47 = vsub.f32 %v12426_v44, %v12443_v46  ;;  %v12977_v44 = vld [vmem:[%s19627_s2] sm:$0xff]  ;;  %v12978_v46 = vld [vmem:[%s19627_s2 + $0x8] sm:$0xff] }
0x3e8c   : > { %v14690_v38 = vmul.f32 -1.442695, %v12424_v16  ;;  %v12425_v39 = vadd.f32 %v12412_v0, %v12384_v20 }
0x3e8d   : > { %v12449_v50 = vsub.f32 %v12427_v45, %v12445_v49  ;;  %v12979_v45 = vld [vmem:[%s19627_s2 + $0x10] sm:$0xff] }
0x3e8e   : > { %16924 = vpow2.f32 %v14690_v38  ;;  %v14691_v57 = vmul.f32 -1.442695, %v12425_v39 }
0x3e90   : > { %16926 = vpow2.f32 %v14691_v57 }
0x3e98   : > { %v16925_v55 = vpop.eup %16924 }
0x3e99   : > { %v12434_v40 = vadd.f32 1.0, %v16925_v55 }
0x3e9a   : > { %v16927_v41 = vpop.eup %16926 }
0x3e9b   : > { %16928 = vrcp.f32 %v12434_v40  ;;  %v12435_v5 = vadd.f32 1.0, %v16927_v41 }
0x3e9d   : > { %16930 = vrcp.f32 %v12435_v5 }
0x3ea5   : > { %v16929_v14 = vpop.eup %16928 }
0x3ea6   : > { %v12450_v51 = vmul.f32 %v16929_v14, %v12448_v47  ;;  %v12980_v47 = vld [vmem:[%s19627_s2 + $0x18] sm:$0xff]  ;;  %s19628_s2 = sld [smem:[#allocation78_spill]] }
0x3ea7   : > { %v16931_v19 = vpop.eup %16930 }
0x3ea8   : > { %12454 = vrot.lane.b32.xlu1 %v12450_v51, %s19592_s12  ;;  %v12451_v61 = vmul.f32 %v16931_v19, %v12449_v50 }
0x3eaa   : > { %12456 = vrot.lane.b32.xlu0 %v12451_v61, %s19592_s12 }
0x3f1a   : > { %v12455_v24 = vpop.permute.xlu1 %12454 }
0x3f1b   : > { %v12460_v54 = vadd.f32 %v12455_v24, %v19045_v18 }
0x3f1c   : > { %v12457_v62 = vpop.permute.xlu0 %12456 }
0x3f1d   : > { %12462 = vst.msk [vmem:[#allocation4] sm:$0xff] %vm8111_vm14, %v12460_v54  ;;  %v12461_v63 = vadd.f32 %v12457_v62, %v19047_v21 }
0x3f1f   : > { %12463 = vst.msk [vmem:[#allocation4 + $0x8] sm:$0xff] %vm8111_vm14, %v12461_v63 }
0x3f24   : > { %v19080_v4 = vld [vmem:[#allocation4] sm:$0xff] }
0x3f26   : > { %v19082_v34 = vld [vmem:[#allocation4 + $0x8] sm:$0xff] }
0x3f27   : > { %v12466_v6 = vpack.c.bf16 %v19082_v34, %v19080_v4 }
0x3f29   : > { %12625 = vrot.lane.b32.xlu0 %v12466_v6, %s19574_s13  ;;  %12487 = vrot.lane.b32.xlu1 %v12466_v6, %s19565_s8  ;;  %s19626_s8 = sld [smem:[#allocation76_spill]] }
0x3f2d   : > { %12698 = vperm.xlu0 %16384, %v12688_v7   ;;  %12693 = vperm.xlu1 %16383, %v12687_v8  }
0x3f2f   : > { %v16615_v41 = vld [vmem:[%s19626_s8 + $0x10] sm:$0xff]   ;;  %v16616_v49 = vld [vmem:[%s19626_s8 + $0x18] sm:$0xff]   ;;  %v16617_v51 = vld [vmem:[%s19626_s8] sm:$0xff]  }
0x3f30   : > { %15864 = vmatprep.mubr.msk.bf16.mxu1 %vm2568_vm10, %v16615_v41  ;;  %v16618_v61 = vld [vmem:[%s19626_s8 + $0x8] sm:$0xff]   ;;  %v16619_v24 = vld [vmem:[%s19626_s8 + $0x20] sm:$0xff]  }
0x3f31   : > { %12708 = vperm.xlu0 %16384, %v12690_v10   ;;  %12703 = vperm.xlu1 %16383, %v12689_v2   ;;  %v16620_v54 = vld [vmem:[%s19626_s8 + $0x28] sm:$0xff]  }
0x3f35   : > { %12731 = vrot.lane.b32.xlu0 %v19082_v34, %s19574_s13  ;;  %12729 = vrot.lane.b32.xlu1 %v19080_v4, %s19574_s13 }
0x3f9b   : > { %v12488_v3 = vpop.permute.xlu1 %12487  ;;  %v12626_v31 = vpop.permute.xlu0 %12625 }
0x3f9c   : > { %15844 = vmatprep.subr.bf16.mxu0 %v12488_v3 }
0x3f9d   : > { %15845 = vmatpush3.bf16.msra.mxu0 %v12488_v3 }
0x3f9e   : > { %15850 = vmatprep.subr.bf16.mxu0 %v12466_v6 }
0x3fa0   : > { %15847 = vmatmul.mubr.msk.bf16.vlgmr.msra.gmra.mrb[88].mxu0 %vm2568_vm10, %v16610_v11 }
0x3fa1   : > { %15851 = vmatpush3.bf16.msra.mxu0 %v12466_v6  ;;  %15852 = vmatprep.mubr.msk.bf16.mxu0 %vm2568_vm10, %v16611_v12 }
0x3fa2   : > { %15856 = vmatprep.subr.bf16.mxu0 %v12626_v31 }
0x3fac   : > { %15853 = vmatmul.mubr.msk.bf16.vlgmr.msra.gmra.mrb[88].mxu0 %vm2568_vm10, %v16612_v13  ;;  %v12694_v42 = vpop.permute.xlu1 %12693  ;;  %v12699_v22 = vpop.permute.xlu0 %12698 }
0x3fad   : > { %15857 = vmatpush3.bf16.msra.mxu0 %v12626_v31  ;;  %15858 = vmatprep.mubr.msk.bf16.mxu0 %vm2568_vm10, %v16613_v58 }
0x3fb0   : > { %v12704_v56 = vpop.permute.xlu1 %12703  ;;  %v12709_v30 = vpop.permute.xlu0 %12708 }
0x3fb4   : > { %v12730_v35 = vpop.permute.xlu1 %12729  ;;  %v12732_v16 = vpop.permute.xlu0 %12731 }
0x3fb8   : > { %15859 = vmatmul.mubr.msk.bf16.vlgmr.msra.gmra.mrb[88].mxu0 %vm2568_vm10, %v16614_v28 }
0x408b   : > { %v15860_v32 = vpop.f32.mrb[88].mxu0 }
0x408c   : > { %v12668_v15 = vpop.f32.mrb[89].mxu0  ;;  %v12713_v33 = vadd.f32 %v15860_v32, %v12704_v56 }
0x408d   : > { %v12711_v18 = vadd.f32 %v12694_v42, %v12668_v15  ;;  %v15861_v21 = vpop.f32.mrb[90].mxu0 }
0x408e   : > { %v12671_v23 = vpop.f32.mrb[91].mxu0  ;;  %v12714_v60 = vadd.f32 %v15861_v21, %v12709_v30  ;;  %v12735_v36 = vsub.f32 %v12713_v33, %v12730_v35  ;;  %v13269_v35 = vld [vmem:[%s19629_s3 + $0x10] sm:$0xff] }
0x408f   : > { %v14712_v48 = vmul.f32 -1.442695, %v12711_v18  ;;  %v12712_v53 = vadd.f32 %v12699_v22, %v12671_v23 }
0x4090   : > { %v12736_v17 = vsub.f32 %v12714_v60, %v12732_v16  ;;  %v13267_v60 = vld [vmem:[%s19629_s3] sm:$0xff] }
0x4091   : > { %16932 = vpow2.f32 %v14712_v48  ;;  %v14713_v25 = vmul.f32 -1.442695, %v12712_v53 }
0x4093   : > { %16934 = vpow2.f32 %v14713_v25 }
0x409b   : > { %v16933_v26 = vpop.eup %16932 }
0x409c   : > { %v12721_v27 = vadd.f32 1.0, %v16933_v26 }
0x409d   : > { %v16935_v52 = vpop.eup %16934 }
0x409e   : > { %16936 = vrcp.f32 %v12721_v27  ;;  %v12722_v29 = vadd.f32 1.0, %v16935_v52 }
0x40a0   : > { %16938 = vrcp.f32 %v12722_v29  ;;  %v16621_v29 = vld [vmem:[%s19628_s2 + $0x10] sm:$0xff]  }
0x40a1   : > { %15882 = vmatprep.mubr.msk.bf16.mxu0 %vm2568_vm10, %v16621_v29 }
0x40a8   : > { %v16937_v37 = vpop.eup %16936 }
0x40a9   : > { %v12737_v0 = vmul.f32 %v16937_v37, %v12735_v36  ;;  %v13268_v36 = vld [vmem:[%s19629_s3 + $0x8] sm:$0xff]  ;;  %v13270_v37 = vld [vmem:[%s19629_s3 + $0x18] sm:$0xff]  ;;  %s19634_s3 = sld [smem:[#allocation85_spill]] }
0x40aa   : > { %v16939_v20 = vpop.eup %16938 }
0x40ab   : > { %12741 = vrot.lane.b32.xlu1 %v12737_v0, %s19592_s12  ;;  %v12738_v38 = vmul.f32 %v16939_v20, %v12736_v17  ;;  %v16622_v17 = vld [vmem:[%s19628_s2 + $0x18] sm:$0xff]   ;;  %v16623_v20 = vld [vmem:[%s19628_s2] sm:$0xff]  }
0x40ad   : > { %12743 = vrot.lane.b32.xlu0 %v12738_v38, %s19592_s12 }
0x411d   : > { %v12742_v39 = vpop.permute.xlu1 %12741 }
0x411e   : > { %v12747_v57 = vadd.f32 %v12742_v39, %v19080_v4  ;;  %v16624_v39 = vld [vmem:[%s19628_s2 + $0x8] sm:$0xff]  }
0x411f   : > { %v12744_v55 = vpop.permute.xlu0 %12743 }
0x4120   : > { %12749 = vst.msk [vmem:[#allocation4] sm:$0xff] %vm8111_vm14, %v12747_v57  ;;  %v12748_v40 = vadd.f32 %v12744_v55, %v19082_v34  ;;  %v16625_v57 = vld [vmem:[%s19628_s2 + $0x20] sm:$0xff]   ;;  %v16626_v55 = vld [vmem:[%s19628_s2 + $0x28] sm:$0xff]   ;;  %s19632_s2 = sld [smem:[#allocation83_spill]] }
0x4122   : > { %12750 = vst.msk [vmem:[#allocation4 + $0x8] sm:$0xff] %vm8111_vm14, %v12748_v40 }
0x4126   : > { %v13418_v29 = vld [vmem:[%s19632_s2] sm:$0xff] }
0x4127   : > { %v19114_v5 = vld [vmem:[#allocation4] sm:$0xff] }
0x4129   : > { %v19116_v43 = vld [vmem:[#allocation4 + $0x8] sm:$0xff] }
0x412a   : > { %v12753_v59 = vpack.c.bf16 %v19116_v43, %v19114_v5 }
0x412c   : > { %12842 = vrot.lane.b32.xlu0 %v12753_v59, %s19600_s5  ;;  %12774 = vrot.lane.b32.xlu1 %v12753_v59, %s19601_s6 }
0x4130   : > { %12983 = vperm.xlu0 %16384, %v12977_v44   ;;  %12915 = vrot.lane.b32.xlu1 %v12753_v59, %s19574_s13 }
0x4134   : > { %12993 = vperm.xlu0 %16384, %v12979_v45   ;;  %12988 = vperm.xlu1 %16383, %v12978_v46  }
0x4138   : > { %13019 = vrot.lane.b32.xlu0 %v19114_v5, %s19574_s13  ;;  %12998 = vperm.xlu1 %16383, %v12980_v47  }
0x413c   : > { %13021 = vrot.lane.b32.xlu1 %v19116_v43, %s19574_s13 }
0x419e   : > { %v12775_v14 = vpop.permute.xlu1 %12774  ;;  %v12843_v50 = vpop.permute.xlu0 %12842 }
0x419f   : > { %15862 = vmatprep.subr.bf16.mxu1 %v12775_v14 }
0x41a0   : > { %15863 = vmatpush3.bf16.msra.mxu1 %v12775_v14 }
0x41a1   : > { %15868 = vmatprep.subr.bf16.mxu1 %v12843_v50 }
0x41a2   : > { %v12916_v19 = vpop.permute.xlu1 %12915 }
0x41a3   : > { %15865 = vmatmul.mubr.msk.bf16.vlgmr.msra.gmra.mrb[92].mxu1 %vm2568_vm10, %v16616_v49 }
0x41a4   : > { %15869 = vmatpush3.bf16.msra.mxu1 %v12843_v50  ;;  %15870 = vmatprep.mubr.msk.bf16.mxu1 %vm2568_vm10, %v16617_v51 }
0x41a5   : > { %15874 = vmatprep.subr.bf16.mxu1 %v12916_v19 }
0x41af   : > { %15871 = vmatmul.mubr.msk.bf16.vlgmr.msra.gmra.mrb[92].mxu1 %vm2568_vm10, %v16618_v61  ;;  %v12984_v63 = vpop.permute.xlu0 %12983 }
0x41b0   : > { %15875 = vmatpush3.bf16.msra.mxu1 %v12916_v19  ;;  %15876 = vmatprep.mubr.msk.bf16.mxu1 %vm2568_vm10, %v16619_v24 }
0x41b1   : > { %15898 = vmatprep.subr.bf16.mxu1 %v17170_v9 }
0x41b3   : > { %v12989_v6 = vpop.permute.xlu1 %12988  ;;  %v12994_v13 = vpop.permute.xlu0 %12993 }
0x41b7   : > { %v12999_v58 = vpop.permute.xlu1 %12998  ;;  %v13020_v42 = vpop.permute.xlu0 %13019 }
0x41bb   : > { %15877 = vmatmul.mubr.msk.bf16.vlgmr.msra.gmra.mrb[92].mxu1 %vm2568_vm10, %v16620_v54  ;;  %v13022_v21 = vpop.permute.xlu1 %13021 }
0x41bc   : > { %15900 = vmatprep.mubr.msk.bf16.mxu1 %vm17181_vm12, %v17170_v9 }
0x428e   : > { %v15878_v62 = vpop.f32.mrb[92].mxu1 }
0x428f   : > { %v12958_v1 = vpop.f32.mrb[93].mxu1  ;;  %v13003_v28 = vadd.f32 %v15878_v62, %v12994_v13 }
0x4290   : > { %v13001_v4 = vadd.f32 %v12984_v63, %v12958_v1  ;;  %v15879_v34 = vpop.f32.mrb[94].mxu1 }
0x4291   : > { %v12961_v7 = vpop.f32.mrb[95].mxu1  ;;  %v13004_v32 = vadd.f32 %v15879_v34, %v12999_v58  ;;  %v13025_v15 = vsub.f32 %v13003_v28, %v13020_v42 }
0x4292   : > { %v14734_v8 = vmul.f32 -1.442695, %v13001_v4  ;;  %v13002_v10 = vadd.f32 %v12989_v6, %v12961_v7 }
0x4293   : > { %v13026_v22 = vsub.f32 %v13004_v32, %v13022_v21 }
0x4294   : > { %16940 = vpow2.f32 %v14734_v8  ;;  %v14735_v2 = vmul.f32 -1.442695, %v13002_v10 }
0x4296   : > { %16942 = vpow2.f32 %v14735_v2 }
0x429e   : > { %v16941_v3 = vpop.eup %16940 }
0x429f   : > { %v13011_v11 = vadd.f32 1.0, %v16941_v3 }
0x42a0   : > { %v16943_v12 = vpop.eup %16942 }
0x42a1   : > { %16944 = vrcp.f32 %v13011_v11  ;;  %v13012_v31 = vadd.f32 1.0, %v16943_v12 }
0x42a3   : > { %16946 = vrcp.f32 %v13012_v31 }
0x42ab   : > { %v16945_v18 = vpop.eup %16944 }
0x42ac   : > { %v13027_v23 = vmul.f32 %v16945_v18, %v13025_v15 }
0x42ad   : > { %v16947_v48 = vpop.eup %16946 }
0x42ae   : > { %13031 = vrot.lane.b32.xlu0 %v13027_v23, %s19592_s12  ;;  %v13028_v53 = vmul.f32 %v16947_v48, %v13026_v22 }
0x42b0   : > { %13033 = vrot.lane.b32.xlu1 %v13028_v53, %s19592_s12 }
0x4320   : > { %v13032_v25 = vpop.permute.xlu0 %13031 }
0x4321   : > { %v13037_v26 = vadd.f32 %v13032_v25, %v19114_v5 }
0x4322   : > { %v13034_v27 = vpop.permute.xlu1 %13033 }
0x4323   : > { %13039 = vst.msk [vmem:[#allocation4] sm:$0xff] %vm8111_vm14, %v13037_v26  ;;  %v13038_v52 = vadd.f32 %v13034_v27, %v19116_v43 }
0x4325   : > { %13040 = vst.msk [vmem:[#allocation4 + $0x8] sm:$0xff] %vm8111_vm14, %v13038_v52 }
0x432a   : > { %v19152_v56 = vld [vmem:[#allocation4] sm:$0xff] }
0x432c   : > { %v19154_v30 = vld [vmem:[#allocation4 + $0x8] sm:$0xff] }
0x432d   : > { %v13043_v33 = vpack.c.bf16 %v19154_v30, %v19152_v56 }
0x432f   : > { %13132 = vrot.lane.b32.xlu1 %v13043_v33, %s19600_s5  ;;  %13064 = vrot.lane.b32.xlu0 %v13043_v33, %s19601_s6  ;;  %s19630_s5 = sld [smem:[#allocation81_spill]]  ;;  %s19631_s6 = sld [smem:[#allocation80_spill]] }
0x4333   : > { %13273 = vperm.xlu1 %16383, %v13267_v60   ;;  %13205 = vrot.lane.b32.xlu0 %v13043_v33, %s19574_s13 }
0x4335   : > { %v13336_v2 = vld [vmem:[%s19630_s5] sm:$0xff]  ;;  %v13337_v32 = vld [vmem:[%s19630_s5 + $0x8] sm:$0xff]  ;;  %s13677_s5 = sshll.u32 %s18951_s21, 4  ;;  %s19231_s5 = int_to_ptr.vmem [resolvable:$true] %s13677_s5 }
0x4336   : > { %v16627_v15 = vld [vmem:[%s19631_s6] sm:$0xff]   ;;  %s19633_s6 = sld [smem:[#allocation82_spill]] }
0x4337   : > { %13283 = vperm.xlu1 %16383, %v13269_v35   ;;  %13278 = vperm.xlu0 %16384, %v13268_v36   ;;  %v13419_v36 = vld [vmem:[%s19632_s2 + $0x8] sm:$0xff]  ;;  %s19637_s2 = sld [smem:[#allocation86_spill]] }
0x433b   : > { %13309 = vrot.lane.b32.xlu1 %v19152_v56, %s19574_s13  ;;  %13288 = vperm.xlu0 %16384, %v13270_v37  }
0x433f   : > { %13311 = vrot.lane.b32.xlu0 %v19154_v30, %s19574_s13 }
0x43a1   : > { %v13065_v16 = vpop.permute.xlu0 %13064  ;;  %v13133_v0 = vpop.permute.xlu1 %13132 }
0x43a2   : > { %15880 = vmatprep.subr.bf16.mxu0 %v13065_v16 }
0x43a3   : > { %15881 = vmatpush3.bf16.msra.mxu0 %v13065_v16  ;;  %v16628_v16 = vld [vmem:[%s19633_s6] sm:$0xff]   ;;  %s19635_s6 = sld [smem:[#allocation84_spill]] }
0x43a4   : > { %15886 = vmatprep.subr.bf16.mxu0 %v13133_v0 }
0x43a5   : > { %v13206_v38 = vpop.permute.xlu0 %13205 }
0x43a6   : > { %15883 = vmatmul.mubr.msk.bf16.vlgmr.msra.gmra.mrb[92].mxu0 %vm2568_vm10, %v16622_v17 }
0x43a7   : > { %15887 = vmatpush3.bf16.msra.mxu0 %v13133_v0  ;;  %15888 = vmatprep.mubr.msk.bf16.mxu0 %vm2568_vm10, %v16623_v20 }
0x43a8   : > { %15892 = vmatprep.subr.bf16.mxu0 %v13206_v38 }
0x43b2   : > { %15889 = vmatmul.mubr.msk.bf16.vlgmr.msra.gmra.mrb[92].mxu0 %vm2568_vm10, %v16624_v39  ;;  %v13274_v41 = vpop.permute.xlu1 %13273 }
0x43b3   : > { %15893 = vmatpush3.bf16.msra.mxu0 %v13206_v38  ;;  %15894 = vmatprep.mubr.msk.bf16.mxu0 %vm2568_vm10, %v16625_v57 }
0x43b4   : > { %15910 = vmatprep.subr.bf16.mxu0 %v17170_v9 }
0x43b6   : > { %v13279_v44 = vpop.permute.xlu0 %13278  ;;  %v13284_v61 = vpop.permute.xlu1 %13283 }
0x43ba   : > { %v13289_v24 = vpop.permute.xlu0 %13288  ;;  %v13310_v63 = vpop.permute.xlu1 %13309 }
0x43be   : > { %15895 = vmatmul.mubr.msk.bf16.vlgmr.msra.gmra.mrb[92].mxu0 %vm2568_vm10, %v16626_v55  ;;  %v13312_v34 = vpop.permute.xlu0 %13311 }
0x43bf   : > { %15912 = vmatprep.mubr.msk.bf16.mxu0 %vm17181_vm12, %v17170_v9 }
0x4491   : > { %v15896_v40 = vpop.f32.mrb[92].mxu0 }
0x4492   : > { %v13248_v5 = vpop.f32.mrb[93].mxu0  ;;  %v13293_v54 = vadd.f32 %v15896_v40, %v13284_v61 }
0x4493   : > { %v13291_v43 = vadd.f32 %v13274_v41, %v13248_v5  ;;  %v15897_v59 = vpop.f32.mrb[94].mxu0 }
0x4494   : > { %v13251_v45 = vpop.f32.mrb[95].mxu0  ;;  %v13294_v62 = vadd.f32 %v15897_v59, %v13289_v24  ;;  %v13315_v1 = vsub.f32 %v13293_v54, %v13310_v63 }
0x4495   : > { %v14756_v46 = vmul.f32 -1.442695, %v13291_v43  ;;  %v13292_v47 = vadd.f32 %v13279_v44, %v13251_v45  ;;  %v13500_v43 = vld [vmem:[%s19634_s3] sm:$0xff] }
0x4496   : > { %v13316_v6 = vsub.f32 %v13294_v62, %v13312_v34  ;;  %v13581_v34 = vld [vmem:[%s19636_s9] sm:$0xff]  ;;  %s16964_s9 = scalar_lea.vmem %s19231_s5, 256 }
0x4497   : > { %16948 = vpow2.f32 %v14756_v46  ;;  %v14757_v14 = vmul.f32 -1.442695, %v13292_v47  ;;  %v13501_v47 = vld [vmem:[%s19634_s3 + $0x8] sm:$0xff]  ;;  %p16965_p11 = scmp.ne.s32.totalorder %s19231_s5, %s16964_s9 }
0x4499   : > { %16950 = vpow2.f32 %v14757_v14  ;;  %p16966_p12 = pnand %p16965_p11, %p17648_p5 }
0x449b   : > { %p16967_p13 = pneg %p16966_p12 }
0x44a1   : > { %v16949_v49 = vpop.eup %16948 }
0x44a2   : > { %v13301_v50 = vadd.f32 1.0, %v16949_v49  ;;  %v16629_v49 = vld [vmem:[%s19635_s6] sm:$0xff]   ;;  %s14775_s6 = sshll.u32 %s17629_s0, 8 }
0x44a3   : > { %v16951_v51 = vpop.eup %16950  ;;  %s19228_s3 = scalar_lea.hbm %s17601_s27, %s14775_s6 }
0x44a4   : > { %16952 = vrcp.f32 %v13301_v50  ;;  %v13302_v19 = vadd.f32 1.0, %v16951_v51 }
0x44a6   : > { %16954 = vrcp.f32 %v13302_v19 }
0x44ae   : > { %v16953_v4 = vpop.eup %16952 }
0x44af   : > { %v13317_v7 = vmul.f32 %v16953_v4, %v13315_v1 }
0x44b0   : > { %v16955_v8 = vpop.eup %16954 }
0x44b1   : > { %13321 = vrot.lane.b32.xlu1 %v13317_v7, %s19592_s12  ;;  %v13318_v10 = vmul.f32 %v16955_v8, %v13316_v6 }
0x44b3   : > { %13323 = vrot.lane.b32.xlu0 %v13318_v10, %s19592_s12 }
0x44b7   : > { %13340 = vperm.xlu0 %16384, %v13336_v2  }
0x4523   : > { %v13322_v3 = vpop.permute.xlu1 %13321 }
0x4524   : > { %v13327_v11 = vadd.f32 %v13322_v3, %v19152_v56 }
0x4525   : > { %v13324_v12 = vpop.permute.xlu0 %13323 }
0x4526   : > { %13329 = vst.msk [vmem:[#allocation4] sm:$0xff] %vm8111_vm14, %v13327_v11  ;;  %v13328_v31 = vadd.f32 %v13324_v12, %v19154_v30  ;;  %v13580_v11 = vld [vmem:[%s19637_s2] sm:$0xf] }
0x4528   : > { %13330 = vst.msk [vmem:[#allocation4 + $0x8] sm:$0xff] %vm8111_vm14, %v13328_v31 }
0x452d   : > { %v13331_v13 = vld [vmem:[#allocation4] sm:$0xff] }
0x452f   : > { %v13332_v58 = vld [vmem:[#allocation4 + $0x8] sm:$0xff] }
0x4530   : > { %v13333_v28 = vpack.c.bf16 %v13332_v58, %v13331_v13 }
0x4532   : > { %13354 = vrot.lane.b32.xlu1 %v13333_v28, %s19574_s13 }
0x4536   : > { %13345 = vperm.xlu1 %16383, %v13337_v32   ;;  %v13341_v18 = vpop.permute.xlu0 %13340 }
0x45a4   : > { %v13355_v42 = vpop.permute.xlu1 %13354 }
0x45a5   : > { %15899 = vmatpush3.bf16.msra.mxu1 %v13355_v42 }
0x45a6   : > { %15904 = vmatprep.subr.bf16.mxu1 %v17170_v9 }
0x45a8   : > { %15901 = vmatmul.mubr.msk.bf16.vlgmr.msra.gmra.mrb[96].mxu1 %vm2568_vm10, %v16627_v15 }
0x45a9   : > { %15906 = vmatprep.mubr.msk.bf16.mxu1 %vm17181_vm12, %v17170_v9 }
0x45b5   : > { %v13346_v48 = vpop.permute.xlu1 %13345 }
0x467b   : > { %v13394_v21 = vpop.f32.mrb[96].mxu1 }
0x467c   : > { %v13395_v22 = vadd.f32 %v13394_v21, %v13341_v18  ;;  %v15902_v23 = vpop.f32.mrb[97].mxu1 }
0x467d   : > { %v13397_v53 = vpop.f32.mrb[98].mxu1 }
0x467e   : > { %v13401_v25 = vmax.f32 %v13395_v22, 0.0  ;;  %v13398_v26 = vadd.f32 %v13397_v53, %v13346_v48  ;;  %v15903_v27 = vpop.f32.mrb[99].mxu1 }
0x4680   : > { %v13402_v52 = vmax.f32 %v13398_v26, 0.0  ;;  %13405 = vrot.lane.b32.xlu0 %v13401_v25, %s19592_s12 }
0x4682   : > { %13407 = vrot.lane.b32.xlu1 %v13402_v52, %s19592_s12 }
0x4686   : > { %13422 = vperm.xlu1 %16383, %v13418_v29  }
0x46f2   : > { %v13406_v56 = vpop.permute.xlu0 %13405 }
0x46f3   : > { %13411 = vst.msk [vmem:[#allocation4] sm:$0xff] %vm8111_vm14, %v13406_v56 }
0x46f4   : > { %v13408_v30 = vpop.permute.xlu1 %13407 }
0x46f5   : > { %13412 = vst.msk [vmem:[#allocation4 + $0x8] sm:$0xff] %vm8111_vm14, %v13408_v30 }
0x46fa   : > { %v13413_v33 = vld [vmem:[#allocation4] sm:$0xff] }
0x46fc   : > { %v13414_v60 = vld [vmem:[#allocation4 + $0x8] sm:$0xff] }
0x46fd   : > { %v13415_v35 = vpack.c.bf16 %v13414_v60, %v13413_v33 }
0x46ff   : > { %13436 = vrot.lane.b32.xlu0 %v13415_v35, %s19574_s13 }
0x4703   : > { %13427 = vperm.xlu0 %16384, %v13419_v36  }
0x4705   : > { %v13423_v17 = vpop.permute.xlu1 %13422 }
0x4771   : > { %v13437_v37 = vpop.permute.xlu0 %13436 }
0x4772   : > { %15905 = vmatpush3.bf16.msra.mxu1 %v13437_v37 }
0x4773   : > { %15916 = vmatprep.subr.bf16.mxu1 %v17170_v9 }
0x4775   : > { %15907 = vmatmul.mubr.msk.bf16.vlgmr.msra.gmra.mrb[100].mxu1 %vm2568_vm10, %v16628_v16 }
0x4776   : > { %15918 = vmatprep.mubr.msk.bf16.mxu1 %vm17181_vm12, %v17170_v9 }
0x4782   : > { %v13428_v39 = vpop.permute.xlu0 %13427 }
0x4848   : > { %v13476_v0 = vpop.f32.mrb[100].mxu1 }
0x4849   : > { %v13477_v20 = vadd.f32 %v13476_v0, %v13423_v17  ;;  %v15908_v38 = vpop.f32.mrb[101].mxu1 }
0x484a   : > { %v13479_v57 = vpop.f32.mrb[102].mxu1 }
0x484b   : > { %v13483_v55 = vmax.f32 %v13477_v20, 0.0  ;;  %v13480_v40 = vadd.f32 %v13479_v57, %v13428_v39  ;;  %v15909_v41 = vpop.f32.mrb[103].mxu1 }
0x484d   : > { %v13484_v5 = vmax.f32 %v13480_v40, 0.0  ;;  %13487 = vrot.lane.b32.xlu1 %v13483_v55, %s19592_s12 }
0x484f   : > { %13489 = vrot.lane.b32.xlu0 %v13484_v5, %s19592_s12 }
0x4853   : > { %13504 = vperm.xlu0 %16384, %v13500_v43  }
0x48bf   : > { %v13488_v59 = vpop.permute.xlu1 %13487 }
0x48c0   : > { %13493 = vst.msk [vmem:[#allocation4] sm:$0xff] %vm8111_vm14, %v13488_v59 }
0x48c1   : > { %v13490_v9 = vpop.permute.xlu0 %13489 }
0x48c2   : > { %13494 = vst.msk [vmem:[#allocation4 + $0x8] sm:$0xff] %vm8111_vm14, %v13490_v9 }
0x48c7   : > { %v13495_v44 = vld [vmem:[#allocation4] sm:$0xff] }
0x48c9   : > { %v13496_v45 = vld [vmem:[#allocation4 + $0x8] sm:$0xff] }
0x48ca   : > { %v13497_v46 = vpack.c.bf16 %v13496_v45, %v13495_v44 }
0x48cc   : > { %13518 = vrot.lane.b32.xlu1 %v13497_v46, %s19574_s13 }
0x48d0   : > { %13509 = vperm.xlu1 %16383, %v13501_v47  }
0x48d2   : > { %v13505_v50 = vpop.permute.xlu0 %13504 }
0x493e   : > { %v13519_v14 = vpop.permute.xlu1 %13518 }
0x493f   : > { %15911 = vmatpush3.bf16.msra.mxu0 %v13519_v14 }
0x4942   : > { %15913 = vmatmul.mubr.msk.bf16.vlgmr.msra.gmra.mrb[96].mxu0 %vm2568_vm10, %v16629_v49 }
0x494f   : > { %v13510_v24 = vpop.permute.xlu1 %13509 }
0x4a15   : > { %v13558_v51 = vpop.f32.mrb[96].mxu0 }
0x4a16   : > { %v13559_v19 = vadd.f32 %v13558_v51, %v13505_v50  ;;  %v15914_v61 = vpop.f32.mrb[97].mxu0 }
0x4a17   : > { %v13561_v54 = vpop.f32.mrb[98].mxu0 }
0x4a18   : > { %v13565_v62 = vmax.f32 %v13559_v19, 0.0  ;;  %v13562_v63 = vadd.f32 %v13561_v54, %v13510_v24  ;;  %v15915_v1 = vpop.f32.mrb[99].mxu0 }
0x4a1a   : > { %v13566_v4 = vmax.f32 %v13562_v63, 0.0  ;;  %13569 = vrot.lane.b32.xlu0 %v13565_v62, %s19592_s12 }
0x4a1c   : > { %13571 = vrot.lane.b32.xlu1 %v13566_v4, %s19592_s12  ;;  %s13646_s12 = sand.u32 1, %s17629_s0  }
0x4a1d   : > { %s19233_s8 = scalar_lea.sflag [#allocation8], %s13646_s12 }
0x4a20   : > { %13584 = vperm.xlu1 %16383, %v13581_v34  }
0x4a8c   : > { %v13570_v6 = vpop.permute.xlu0 %13569 }
0x4a8d   : > { %13575 = vst.msk [vmem:[#allocation4] sm:$0xff] %vm8111_vm14, %v13570_v6 }
0x4a8e   : > { %v13572_v7 = vpop.permute.xlu1 %13571 }
0x4a8f   : > { %13576 = vst.msk [vmem:[#allocation4 + $0x8] sm:$0xff] %vm8111_vm14, %v13572_v7 }
0x4a94   : > { %v13577_v8 = vld [vmem:[#allocation4] sm:$0xff] }
0x4a96   : > { %v13578_v10 = vld [vmem:[#allocation4 + $0x8] sm:$0xff] }
0x4a97   : > { %v13579_v2 = vpack.c.bf16 %v13578_v10, %v13577_v8 }
0x4a99   : > { %13588 = vrot.lane.b32.xlu0 %v13579_v2, %s19574_s13  ;;  %s17188_s13 = smov [#allocation7]  }
0x4a9a   : > { %s16968_s2 = sshll.u32 %s17188_s13, 4  ;;  %s16969_s2 = int_to_ptr.vmem [resolvable:$false] %s16968_s2 }
0x4a9b   : > { %s16970_s14 = scalar_lea.vmem %s16969_s2, 512  ;;  %p16971_p0 = scmp.lt.s32.totalorder %s19231_s5, %s16969_s2 }
0x4a9c   : > { %p16972_p1 = scmp.lt.s32.totalorder %s16970_s14, %s16964_s9 }
0x4a9e   : > { %p16973_p2 = por %p16972_p1, %p16971_p0 }
0x4aa0   : > { %p16974_p3 = pnand %p16973_p2, %p16967_p13 }
0x4b0b   : > { %v13589_v3 = vpop.permute.xlu0 %13588 }
0x4b0c   : > { %15917 = vmatpush3.bf16.msra.mxu1 %v13589_v3 }
0x4b0f   : > { %15919 = vmatmul.mubr.msk.bf16.vlgmr.msra.gmra.mrb[104].mxu1 %vm2568_vm10, %v13580_v11 }
0x4b10   : > { %16977 = shalt.err (!%p16974_p3)
}
0x4b11   : > { %s16978_s21 = scalar_lea.hbm %s19228_s3, 256  ;;  %s16982_s12 = scalar_lea.hbm %s17601_s27, 512 }
0x4b12   : > { %p16979_p4 = scmp.ne.s32.totalorder %s19228_s3, %s16978_s21  ;;  %p16983_p9 = scmp.lt.u32.totalorder %s19228_s3, %s17601_s27 }
0x4b13   : > { %p16984_p10 = scmp.lt.u32.totalorder %s16982_s12, %s16978_s21  ;;  %p16986_p12 = scmp.lt.u32.totalorder %s16978_s21, %s19228_s3 }
0x4b14   : > { %p16980_p7 = pnand %p16979_p4, %p17648_p5 }
0x4b15   : > { %p16985_p11 = por %p16984_p10, %p16983_p9 }
0x4b16   : > { %p16981_p8 = pneg %p16980_p7 }
0x4b17   : > { %p16987_p0 = por %p16986_p12, %p16985_p11 }
0x4b19   : > { %p16988_p13 = pnand %p16987_p0, %p16981_p8 }
0x4b1b   : > { %16991 = shalt.err (!%p16988_p13)
}
0x4b1c   : > { %s17189_s9 = smov 128   ;;  %s17190_s14 = smov 8  }
0x4b1d   : > { %16233 = dma.vmem_to_hbm [thread:$0]  (%p17648_p5), %s19231_s5, 256, %s19228_s3, %s19233_s8, %s17189_s9, %s17189_s9, %s17190_s14  }
0x4b1e   : > { %s14771_s6 = sshll.u32 %s17629_s0, 4  ;;  %s19638_s2 = scalar_lea.vmem [#allocation9], %s18943_s23 }
0x4b1f   : > { %s19255_s13 = scalar_lea.hbm %s17606_s4, %s14771_s6  ;;  %s13693_s21 = sshll.u32 %s19638_s2, 4  ;;  %s13694_s21 = int_to_ptr.vmem [resolvable:$true] %s13693_s21 }
0x4b20   : > { %s16992_s12 = scalar_lea.vmem %s13694_s21, 16  ;;  %s17191_s16 = smov [#allocation9]  }
0x4b21   : > { %p16993_p1 = scmp.ne.s32.totalorder %s13694_s21, %s16992_s12  ;;  %s16996_s17 = sshll.u32 %s17191_s16, 4  ;;  %s16997_s17 = int_to_ptr.vmem [resolvable:$false] %s16996_s17 }
0x4b22   : > { %s16998_s19 = scalar_lea.vmem %s16997_s17, 32  ;;  %p16999_p4 = scmp.lt.s32.totalorder %s13694_s21, %s16997_s17 }
0x4b23   : > { %p16994_p2 = pnand %p16993_p1, %p17648_p5  ;;  %p17000_p7 = scmp.lt.s32.totalorder %s16998_s19, %s16992_s12 }
0x4b25   : > { %p16995_p3 = pneg %p16994_p2  ;;  %p17001_p8 = por %p17000_p7, %p16999_p4 }
0x4b27   : > { %p17002_p9 = pnand %p17001_p8, %p16995_p3 }
0x4b29   : > { %17005 = shalt.err (!%p17002_p9)
}
0x4b2a   : > { %s17006_s3 = scalar_lea.hbm %s19255_s13, 16  ;;  %s17010_s16 = scalar_lea.hbm %s17606_s4, 32 }
0x4b2b   : > { %p17007_p10 = scmp.ne.s32.totalorder %s19255_s13, %s17006_s3  ;;  %p17011_p0 = scmp.lt.u32.totalorder %s19255_s13, %s17606_s4 }
0x4b2c   : > { %p17012_p13 = scmp.lt.u32.totalorder %s17010_s16, %s17006_s3  ;;  %p17014_p2 = scmp.lt.u32.totalorder %s17006_s3, %s19255_s13 }
0x4b2d   : > { %p17008_p11 = pnand %p17007_p10, %p17648_p5 }
0x4b2e   : > { %p17013_p1 = por %p17012_p13, %p17011_p0 }
0x4b2f   : > { %p17009_p12 = pneg %p17008_p11 }
0x4b30   : > { %p17015_p4 = por %p17014_p2, %p17013_p1 }
0x4b32   : > { %p17016_p3 = pnand %p17015_p4, %p17009_p12 }
0x4b34   : > { %17019 = shalt.err (!%p17016_p3)
}
0x4b35   : > { %16234 = dma.vmem_to_hbm [thread:$0]  (%p17648_p5), %s13694_s21, 16, %s19255_s13, %s19233_s8   ;;  %v13585_v12 = vpop.permute.xlu1 %13584 }
0x4b36   : > { %s13903_s17 = sshll.u32 %s18943_s23, 3  ;;  %s14768_s19 = sshll.u32 %s17629_s0, 7 }
0x4b37   : > { %s2366_s5 = scalar_lea.vmem [#allocation5], %s13903_s17  ;;  %s19276_s14 = scalar_lea.hbm %s17596_s20, %s14768_s19 }
0x4b38   : > { %s13664_s9 = sshll.u32 %s2366_s5, 4  ;;  %s13642_s8 = scalar_lea.sflag [#allocation6], %s18943_s23  ;;  %s19278_s9 = int_to_ptr.vmem [resolvable:$true] %s13664_s9 }
0x4b39   : > { %s17020_s6 = scalar_lea.vmem %s19278_s9, 128  ;;  %s17192_s13 = smov [#allocation5]  }
0x4b3a   : > { %p17021_p7 = scmp.ne.s32.totalorder %s19278_s9, %s17020_s6  ;;  %s17024_s0 = sshll.u32 %s17192_s13, 4  ;;  %s17025_s0 = int_to_ptr.vmem [resolvable:$false] %s17024_s0 }
0x4b3b   : > { %s17026_s2 = scalar_lea.vmem %s17025_s0, 256  ;;  %p17027_p10 = scmp.lt.s32.totalorder %s19278_s9, %s17025_s0 }
0x4b3c   : > { %p17022_p8 = pnand %p17021_p7, %p17648_p5  ;;  %p17028_p11 = scmp.lt.s32.totalorder %s17026_s2, %s17020_s6 }
0x4b3e   : > { %p17023_p9 = pneg %p17022_p8  ;;  %p17029_p12 = por %p17028_p11, %p17027_p10 }
0x4b40   : > { %p17030_p0 = pnand %p17029_p12, %p17023_p9 }
0x4be2   : > { %v13628_v31 = vpop.f32.mrb[104].mxu1 }
0x4be3   : > { %v13629_v13 = vadd.f32 %v13628_v31, %v13585_v12  ;;  %v15920_v58 = vpop.f32.mrb[105].mxu1 }
0x4be4   : > { %v13631_v28 = vpop.f32.mrb[106].mxu1 }
0x4be5   : > { %v14765_v32 = vmul.f32 -1.442695, %v13629_v13  ;;  %v15921_v42 = vpop.f32.mrb[107].mxu1 }
0x4be7   : > { %16956 = vpow2.f32 %v14765_v32 }
0x4bf1   : > { %v16957_v15 = vpop.eup %16956 }
0x4bf2   : > { %v13637_v18 = vadd.f32 1.0, %v16957_v15 }
0x4bf4   : > { %16958 = vrcp.f32 %v13637_v18 }
0x4bfe   : > { %v16959_v21 = vpop.eup %16958 }
0x4bff   : > { %13640 = vst.msk [vmem:[%s2366_s5] sm:$0xff] %vm2568_vm10, %v16959_v21 }
0x4c00   : > { %17033 = shalt.err (!%p17030_p0)
}
0x4c01   : > { %s17034_s23 = scalar_lea.hbm %s19276_s14, 128  ;;  %s17038_s21 = scalar_lea.hbm %s17596_s20, 256 }
0x4c02   : > { %p17035_p13 = scmp.ne.s32.totalorder %s19276_s14, %s17034_s23  ;;  %p17039_p4 = scmp.lt.u32.totalorder %s19276_s14, %s17596_s20 }
0x4c03   : > { %p17040_p3 = scmp.lt.u32.totalorder %s17038_s21, %s17034_s23  ;;  %p17042_p8 = scmp.lt.u32.totalorder %s17034_s23, %s19276_s14 }
0x4c04   : > { %p17036_p1 = pnand %p17035_p13, %p17648_p5 }
0x4c05   : > { %p17041_p7 = por %p17040_p3, %p17039_p4 }
0x4c06   : > { %p17037_p2 = pneg %p17036_p1 }
0x4c07   : > { %p17043_p10 = por %p17042_p8, %p17041_p7 }
0x4c09   : > { %p17044_p9 = pnand %p17043_p10, %p17037_p2 }
0x4c0b   : > { %17047 = shalt.err (!%p17044_p9)
}
0x4c0c   : > { %16232 = dma.vmem_to_hbm [thread:$0]  (%p17648_p5), %s19278_s9, 128, %s19276_s14, %s13642_s8  }
0x4c0d PF: > { %p16248_p11 = scmp.ge.s32.totalorder %s17086_s15, 2  ;;  %s13705_s12 = sand.u32 1, %s17074_s7  }
0x4c0e   : > { %s13706_s3 = scalar_lea.sflag [#allocation6], %s13705_s12 }
0x4c0f   : > { %p16239_p12 = pnand %p16248_p11, %p17652_p6 }
0x4c11   : > { %17065 = dma.done.wait (!%p16239_p12), %s13706_s3, 128  }
0x4c12   : > { %17067 = vsyncadd (!%p16239_p12), %s13706_s3, 4294967168  ;;  %s19639_s16 = sadd.s32 4294967294, %s17086_s15  }
0x4c13   : > { %s13714_s17 = sand.u32 1, %s19639_s16  }
0x4c14   : > { %s13715_s19 = scalar_lea.sflag [#allocation8], %s13714_s17 }
0x4c15   : > { %17069 = dma.done.wait (!%p16239_p12), %s13715_s19, 272  }
0x4c16   : > { %17071 = vsyncadd (!%p16239_p12), %s13715_s19, 4294967024  ;;  %p177_p5 = scmp.ge.s32.totalorder %s17633_s18, 4   ;;  %s19640_s7 = smov %s17078_s10 }
0x4c17   : > { %s19641_s10 = smov %s17082_s11  ;;  %s19642_s11 = smov %s17646_s26 }
0x4c18   : > { %s19643_s15 = smov %s17633_s18  ;;  %179 = sbr.rel (!%p177_p5) target bundleno = 194 (0xc2), region = 539 }
0x4c1f   :  { %13728 = vsyncpa [#allocation6], 1 }
0x4c20   :  { %13730 = vsyncpa [#allocation6 + $0x1], 1 }
0x4c21   :  { %13731 = vsyncpa [#allocation8], 1 }
0x4c22   :  { %13733 = vsyncpa [#allocation8 + $0x1], 1 }

</bundles_post_ra>
